<compile_context>
chip_gen: v7x
topology: tpu7x:2x2x1
jax: 0.10.0
libtpu: 0.0.40
codegen_flags: <defaults>
</compile_context>

<pallas_src>
import functools
import math

import jax
import jax.numpy as jnp
from jax.experimental import pallas as pl
from jax.experimental.pallas import tpu as pltpu

VMEM = pltpu.MemorySpace.VMEM
_INV_SQRT2 = 0.7071067811865476
_LN_EPS = 1e-5


# ----------------------------------------------------------------------------
# In-kernel math helpers (operate on values, not refs)
# ----------------------------------------------------------------------------
def _ln_rows(x, g, b, eps=_LN_EPS):
    mu = jnp.mean(x, axis=-1, keepdims=True)
    xc = x - mu
    var = jnp.mean(xc * xc, axis=-1, keepdims=True)
    return xc * jax.lax.rsqrt(var + eps) * g + b


def _gelu(x):  # exact erf-based GELU (matches nn.GELU default)
    return 0.5 * x * (1.0 + jax.lax.erf(x * _INV_SQRT2))


def _softmax_lastdim(s):
    s = s - jnp.max(s, axis=-1, keepdims=True)
    p = jnp.exp(s)
    return p / jnp.sum(p, axis=-1, keepdims=True)


def _mha_hb(xq, xkv, wq_h, bq_h, wkv_h, bkv_h, wo_h, bo, nhead):
    """Head-batched multi-head attention.

    xq : (N, L,  Dq)  query input          xkv: (N, Lk, Dk) key/value input
    wq_h : (H, Dq, Dh)  bf16 (1/sqrt(Dh) already folded in)   bq_h : (H,1,Dh)  f32
    wkv_h: (H, Dk, 2Dh) bf16                                  bkv_h: (H,1,2Dh) f32
    wo_h : (H, Dh, E)   bf16                                  bo   : (1,E)     f32
    Returns (N, L, E) f32 after output projection + bias.

    Heads are carried on the batch axis (z = N*H) of rank-3 batched matmuls, so
    every dot_general is the canonical single-batch-dim form and there is ONE
    softmax pass; no per-head slices or in-kernel transposes are needed.
    """
    N, L, Dq = xq.shape
    Lk, Dk = xkv.shape[1], xkv.shape[2]
    H = nhead
    Dh = wq_h.shape[-1]
    E = wo_h.shape[-1]
    Z = N * H

    xq = xq.astype(jnp.bfloat16)
    xkv = xkv.astype(jnp.bfloat16)

    xq_b = jnp.broadcast_to(xq[:, None], (N, H, L, Dq)).reshape(Z, L, Dq)
    xkv_b = jnp.broadcast_to(xkv[:, None], (N, H, Lk, Dk)).reshape(Z, Lk, Dk)
    wq_b = jnp.broadcast_to(wq_h[None], (N, H, Dq, Dh)).reshape(Z, Dq, Dh)
    bq_b = jnp.broadcast_to(bq_h[None], (N, H, 1, Dh)).reshape(Z, 1, Dh)
    wkv_b = jnp.broadcast_to(wkv_h[None], (N, H, Dk, 2 * Dh)).reshape(Z, Dk, 2 * Dh)
    bkv_b = jnp.broadcast_to(bkv_h[None], (N, H, 1, 2 * Dh)).reshape(Z, 1, 2 * Dh)
    wo_b = jnp.broadcast_to(wo_h[None], (N, H, Dh, E)).reshape(Z, Dh, E)

    q = jnp.einsum("zld,zdk->zlk", xq_b, wq_b,
                   preferred_element_type=jnp.float32) + bq_b
    kv = jnp.einsum("zld,zdk->zlk", xkv_b, wkv_b,
                    preferred_element_type=jnp.float32) + bkv_b
    k = kv[:, :, :Dh]
    v = kv[:, :, Dh:]

    s = jnp.einsum("zqd,zkd->zqk", q.astype(jnp.bfloat16), k.astype(jnp.bfloat16),
                   preferred_element_type=jnp.float32)
    p = _softmax_lastdim(s)
    ctx = jnp.einsum("zqk,zkd->zqd", p.astype(jnp.bfloat16), v.astype(jnp.bfloat16),
                     preferred_element_type=jnp.float32)
    out = jnp.einsum("zqd,zde->zqe", ctx.astype(jnp.bfloat16), wo_b,
                     preferred_element_type=jnp.float32)
    out = out.reshape(N, H, L, E).sum(axis=1)                     # combine heads
    return out + bo


# ----------------------------------------------------------------------------
# Pallas kernels
# ----------------------------------------------------------------------------
def _embed_kernel(x_ref, w_ref, b_ref, g_ref, be_ref, pos_ref, o_ref):
    """input_embedding (Linear + LayerNorm) + learned positional-encoding add."""
    x = x_ref[0].astype(jnp.bfloat16)                             # (S, In)
    y = jnp.dot(x, w_ref[...], preferred_element_type=jnp.float32) + b_ref[...]
    y = _ln_rows(y, g_ref[...], be_ref[...]) + pos_ref[...]
    o_ref[0] = y.astype(o_ref.dtype)


def _enc_stack_kernel(h_ref, wq_ref, bq_ref, wkv_ref, bkv_ref, wo_ref, bo_ref,
                      ln1g_ref, ln1b_ref, ff1w_ref, ff1b_ref, ff2w_ref, ff2b_ref,
                      ln2g_ref, ln2b_ref, flng_ref, flnb_ref,
                      o_ref, x_scr, *, nhead):
    """Whole post-LN TransformerEncoder stack (batch_first=True, relu FFN).

    grid = (batch b : parallel, layer l : arbitrary); the activation stays in a
    VMEM f32 scratch across the layer axis.  A trailing LayerNorm (stack-final /
    pre-pooling) is applied as the last-layer epilogue."""
    l = pl.program_id(1)

    @pl.when(l == 0)
    def _():
        x_scr[...] = h_ref[0].astype(jnp.float32)                 # (S, D)

    x = x_scr[...]                                                # (S, D) f32
    xb = x.astype(jnp.bfloat16)[None]                             # (1, S, D)

    # --- self attention (head-batched) ---
    attn = _mha_hb(xb, xb, wq_ref[0], bq_ref[0], wkv_ref[0], bkv_ref[0],
                   wo_ref[0], bo_ref[0], nhead)[0]                # (S, D) f32
    h1 = _ln_rows(x + attn, ln1g_ref[0], ln1b_ref[0])

    # --- FFN (2048 hidden kept in VMEM, bf16 GEMM inputs, f32 accumulate) ---
    ff = jnp.dot(h1.astype(jnp.bfloat16), ff1w_ref[0],
                 preferred_element_type=jnp.float32) + ff1b_ref[0]
    ff = jnp.maximum(ff, 0.0)
    ff = jnp.dot(ff.astype(jnp.bfloat16), ff2w_ref[0],
                 preferred_element_type=jnp.float32) + ff2b_ref[0]
    h2 = _ln_rows(h1 + ff, ln2g_ref[0], ln2b_ref[0])
    x_scr[...] = h2

    @pl.when(l == pl.num_programs(1) - 1)
    def _():
        o_ref[0] = _ln_rows(h2, flng_ref[...], flnb_ref[...]).astype(o_ref.dtype)


def _cross_kernel(ht_ref, kvt_ref, wq_ref, bq_ref, wkv_ref, bkv_ref, wo_ref, bo_ref,
                  o_ref, *, nhead):
    """Cross attention in (N=S, L=B, E) layout (batch_first=False quirk).
    kv_projection is folded into the K/V weights; the residual_cross_attention
    Linear is folded into the output projection; the residual add is fused."""
    ht = ht_ref[...]                                              # (S, B, D) bf16
    attn = _mha_hb(ht, kvt_ref[...], wq_ref[...], bq_ref[...], wkv_ref[...],
                   bkv_ref[...], wo_ref[...], bo_ref[...], nhead)  # (S, B, D) f32
    o_ref[...] = (ht.astype(jnp.float32) + attn).astype(o_ref.dtype)


def _pool_cls_kernel(ht_ref, wq_ref, bq_ref, wkv_ref, bkv_ref, wo_ref, bo_ref,
                     c1w_ref, c1b_ref, rb1w_ref, rb1b_ref,
                     c2w_ref, c2b_ref, rb2w_ref, rb2b_ref,
                     c3w_ref, c3b_ref, c4w_ref, c4b_ref, o_ref, *, nhead):
    """attention_pooling (q=k=v, batch_first=False quirk) + max over seq +
    the whole classifier head (BatchNorm folded into the Linears)."""
    ht = ht_ref[...]                                              # (S, B, D) bf16
    pooled = _mha_hb(ht, ht, wq_ref[...], bq_ref[...], wkv_ref[...], bkv_ref[...],
                     wo_ref[...], bo_ref[...], nhead)             # (S, B, D) f32
    x = jnp.max(pooled, axis=0)                                   # (B, D) == torch.max(dim=1)

    def lin(h, w_ref, b_ref):
        return jnp.dot(h.astype(jnp.bfloat16), w_ref[...],
                       preferred_element_type=jnp.float32) + b_ref[...]

    # TODO(synk): ResidualBlock definition not given in the source file; assuming
    # ResidualBlock(d): x + GELU(BatchNorm1d(Linear(d, d)(x))) (BN folded).
    h = _gelu(lin(x, c1w_ref, c1b_ref))
    h = h + _gelu(lin(h, rb1w_ref, rb1b_ref))
    h = _gelu(lin(h, c2w_ref, c2b_ref))
    h = h + _gelu(lin(h, rb2w_ref, rb2b_ref))
    h = _gelu(lin(h, c3w_ref, c3b_ref))
    h = lin(h, c4w_ref, c4b_ref)
    o_ref[...] = h.astype(o_ref.dtype)


# ----------------------------------------------------------------------------
# pallas_call wrappers
# ----------------------------------------------------------------------------
def embed(x, pos_s, p):
    B, S, In = x.shape
    D = p["emb_w"].shape[1]
    return pl.pallas_call(
        _embed_kernel,
        out_shape=jax.ShapeDtypeStruct((B, S, D), jnp.bfloat16),
        grid=(B,),
        in_specs=[pl.BlockSpec((1, S, In), lambda b: (b, 0, 0)),
                  pl.BlockSpec((In, D), lambda b: (0, 0)),
                  pl.BlockSpec((1, D), lambda b: (0, 0)),
                  pl.BlockSpec((1, D), lambda b: (0, 0)),
                  pl.BlockSpec((1, D), lambda b: (0, 0)),
                  pl.BlockSpec((S, D), lambda b: (0, 0))],
        out_specs=pl.BlockSpec((1, S, D), lambda b: (b, 0, 0)),
        compiler_params=pltpu.CompilerParams(dimension_semantics=("parallel",)),
    )(x, p["emb_w"], p["emb_b"], p["emb_ln_g"], p["emb_ln_b"], pos_s)


def encoder_stack(h, sp, final_g, final_b, nhead):
    """One pallas_call for an entire TransformerEncoder stack + trailing LN."""
    B, S, D = h.shape
    n_layers = sp["wq_h"].shape[0]

    def lspec(arr):   # per-layer stacked weight: block covers one layer
        nd = arr.ndim
        return pl.BlockSpec((1,) + tuple(arr.shape[1:]),
                            lambda b, l, _n=nd: (l,) + (0,) * (_n - 1))

    order = ["wq_h", "bq_h", "wkv_h", "bkv_h", "wo_h", "bo",
             "ln1_g", "ln1_b", "ff1_w", "ff1_b", "ff2_w", "ff2_b",
             "ln2_g", "ln2_b"]
    weights = [sp[k] for k in order]
    in_specs = ([pl.BlockSpec((1, S, D), lambda b, l: (b, 0, 0))]
                + [lspec(a) for a in weights]
                + [pl.BlockSpec((1, D), lambda b, l: (0, 0)),
                   pl.BlockSpec((1, D), lambda b, l: (0, 0))])

    return pl.pallas_call(
        functools.partial(_enc_stack_kernel, nhead=nhead),
        out_shape=jax.ShapeDtypeStruct((B, S, D), jnp.bfloat16),
        grid=(B, n_layers),
        in_specs=in_specs,
        out_specs=pl.BlockSpec((1, S, D), lambda b, l: (b, 0, 0)),
        scratch_shapes=[pltpu.VMEM((S, D), jnp.float32)],
        compiler_params=pltpu.CompilerParams(
            dimension_semantics=("parallel", "arbitrary"),
            vmem_limit_bytes=32 * 1024 * 1024),
    )(h, *weights, final_g, final_b)


def cross_attention_residual(h, kv_raw, cp, nhead):
    # nn.MultiheadAttention default batch_first=False: (B,S,D) is read as
    # (seq=B, batch=S, embed).  The tiny relayout to (S,B,*) is done as XLA
    # transposes; attention + residual add are fused in one kernel.
    B, S, D = h.shape
    ht = jnp.transpose(h, (1, 0, 2))                      # (S, B, D) bf16
    kvt = jnp.transpose(kv_raw, (1, 0, 2))                # (S, B, input_dim)
    out_t = pl.pallas_call(
        functools.partial(_cross_kernel, nhead=nhead),
        out_shape=jax.ShapeDtypeStruct((S, B, D), jnp.bfloat16),
        in_specs=[pl.BlockSpec(memory_space=VMEM)] * 8,
        out_specs=pl.BlockSpec(memory_space=VMEM),
    )(ht, kvt, cp["wq_h"], cp["bq_h"], cp["wkv_h"], cp["bkv_h"],
      cp["wo_h"], cp["bo"])
    return jnp.transpose(out_t, (1, 0, 2))                # (B, S, D)


def pool_and_classify(h, pp, cl, nhead):
    B, S, D = h.shape
    ht = jnp.transpose(h, (1, 0, 2))                      # (S, B, D)
    inputs = [ht, pp["wq_h"], pp["bq_h"], pp["wkv_h"], pp["bkv_h"],
              pp["wo_h"], pp["bo"],
              cl["c1_w"], cl["c1_b"], cl["rb1_w"], cl["rb1_b"],
              cl["c2_w"], cl["c2_b"], cl["rb2_w"], cl["rb2_b"],
              cl["c3_w"], cl["c3_b"], cl["c4_w"], cl["c4_b"]]
    return pl.pallas_call(
        functools.partial(_pool_cls_kernel, nhead=nhead),
        out_shape=jax.ShapeDtypeStruct((B, 1), jnp.float32),
        in_specs=[pl.BlockSpec(memory_space=VMEM)] * len(inputs),
        out_specs=pl.BlockSpec(memory_space=VMEM),
    )(*inputs)


# ----------------------------------------------------------------------------
# Forward pass (5 pallas_calls total)
# ----------------------------------------------------------------------------
def forward(prep, x, key_value_pairs, *, nhead):
    S = x.shape[1]
    # input_embedding + LearnedPositionalEncoding (dropout = identity)
    # TODO(synk): LearnedPositionalEncoding definition not given; assuming a
    # learned (max_len, d_model) table added to the embeddings.
    h = embed(x, prep["pos"][:S], prep)
    # transformer_encoder (num_layers) + final LayerNorm (fused, one call)
    h = encoder_stack(h, prep["enc"], prep["enc_ln_g"], prep["enc_ln_b"], nhead)
    # cross attention (kv_projection + residual Linear folded) + residual add
    h = cross_attention_residual(h, key_value_pairs, prep["cross"], nhead)
    # post-cross encoder (2 layers) + pre_pooling LayerNorm (fused, one call)
    h = encoder_stack(h, prep["post"], prep["pre_pool_ln_g"],
                      prep["pre_pool_ln_b"], nhead)
    # attention_pooling + max over seq + classifier head (one call)
    return pool_and_classify(h, prep["pool"], prep["cls"], nhead)


# ----------------------------------------------------------------------------
# Parameter init (PyTorch-like raw params) and preprocessing (run once, eager)
# ----------------------------------------------------------------------------
def _dense(key, fan_in, fan_out, scale=0.02):
    w = jax.random.normal(key, (fan_in, fan_out), jnp.float32) * scale
    b = jnp.zeros((fan_out,), jnp.float32)
    return w, b


def _bn(dim):
    return {"gamma": jnp.ones((dim,), jnp.float32),
            "beta": jnp.zeros((dim,), jnp.float32),
            "mean": jnp.zeros((dim,), jnp.float32),
            "var": jnp.ones((dim,), jnp.float32)}


def _init_mha(key, d):
    ks = jax.random.split(key, 4)
    wq, bq = _dense(ks[0], d, d)
    wk, bk = _dense(ks[1], d, d)
    wv, bv = _dense(ks[2], d, d)
    wo, bo = _dense(ks[3], d, d)
    return {"wq": wq, "bq": bq, "wk": wk, "bk": bk,
            "wv": wv, "bv": bv, "wo": wo, "bo": bo}


def _init_encoder_layer(key, d, ffn=2048):
    ks = jax.random.split(key, 3)
    ff1_w, ff1_b = _dense(ks[1], d, ffn)
    ff2_w, ff2_b = _dense(ks[2], ffn, d)
    ones, zeros = jnp.ones((d,), jnp.float32), jnp.zeros((d,), jnp.float32)
    return {"attn": _init_mha(ks[0], d),
            "ff1_w": ff1_w, "ff1_b": ff1_b, "ff2_w": ff2_w, "ff2_b": ff2_b,
            "ln1_g": ones, "ln1_b": zeros, "ln2_g": ones, "ln2_b": zeros}


def init_raw_params(key, input_dim, d_model, num_layers, max_len=1000):
    keys = iter(jax.random.split(key, 32))
    ones, zeros = jnp.ones((d_model,), jnp.float32), jnp.zeros((d_model,), jnp.float32)
    p = {}
    p["emb_w"], p["emb_b"] = _dense(next(keys), input_dim, d_model)
    p["emb_ln_g"], p["emb_ln_b"] = ones, zeros
    p["pos"] = jax.random.normal(next(keys), (max_len, d_model), jnp.float32) * 0.02
    p["enc_layers"] = [_init_encoder_layer(next(keys), d_model) for _ in range(num_layers)]
    p["enc_ln_g"], p["enc_ln_b"] = ones, zeros
    p["kv_w"], p["kv_b"] = _dense(next(keys), input_dim, d_model)
    p["cross_attn"] = _init_mha(next(keys), d_model)
    p["res_cross_w"], p["res_cross_b"] = _dense(next(keys), d_model, d_model)
    p["post_layers"] = [_init_encoder_layer(next(keys), d_model) for _ in range(2)]
    p["pre_pool_ln_g"], p["pre_pool_ln_b"] = ones, zeros
    p["pool_attn"] = _init_mha(next(keys), d_model)
    p["c1_w"], p["c1_b"] = _dense(next(keys), d_model, 256)
    p["c1_bn"] = _bn(256)
    p["rb1_w"], p["rb1_b"] = _dense(next(keys), 256, 256)
    p["rb1_bn"] = _bn(256)
    p["c2_w"], p["c2_b"] = _dense(next(keys), 256, 128)
    p["c2_bn"] = _bn(128)
    p["rb2_w"], p["rb2_b"] = _dense(next(keys), 128, 128)
    p["rb2_bn"] = _bn(128)
    p["c3_w"], p["c3_b"] = _dense(next(keys), 128, 64)
    p["c3_bn"] = _bn(64)
    p["c4_w"], p["c4_b"] = _dense(next(keys), 64, 1)
    return p


def _row(v):
    return v.reshape(1, -1).astype(jnp.float32)


def _fold_bn(w, b, bn, eps=1e-5):
    scale = bn["gamma"] / jnp.sqrt(bn["var"] + eps)
    shift = bn["beta"] - bn["mean"] * scale
    return w * scale[None, :], b * scale + shift


def _heads_cols(w, H):          # (Din, H*Dh) -> (H, Din, Dh)
    Din, Dtot = w.shape
    Dh = Dtot // H
    return jnp.stack([w[:, i * Dh:(i + 1) * Dh] for i in range(H)], axis=0)


def _heads_bias(b, H):          # (H*Dh,) -> (H, 1, Dh)
    Dh = b.shape[0] // H
    return b.reshape(H, Dh)[:, None, :].astype(jnp.float32)


def _prep_mha(wq, bq, wk, bk, wv, bv, wo, bo, H):
    """Head-stacked weights; 1/sqrt(Dh) folded into the Q projection."""
    Dh = wq.shape[1] // H
    scale = 1.0 / math.sqrt(Dh)
    wq_h = _heads_cols(wq * scale, H)
    bq_h = _heads_bias(bq * scale, H)
    wkv_h = jnp.concatenate([_heads_cols(wk, H), _heads_cols(wv, H)], axis=-1)
    bkv_h = jnp.concatenate([_heads_bias(bk, H), _heads_bias(bv, H)], axis=-1)
    wo_h = wo.reshape(H, Dh, wo.shape[1])
    return {"wq_h": wq_h.astype(jnp.bfloat16), "bq_h": bq_h,
            "wkv_h": wkv_h.astype(jnp.bfloat16), "bkv_h": bkv_h,
            "wo_h": wo_h.astype(jnp.bfloat16), "bo": _row(bo)}


def _prep_layer(lp, H):
    a = lp["attn"]
    out = _prep_mha(a["wq"], a["bq"], a["wk"], a["bk"], a["wv"], a["bv"],
                    a["wo"], a["bo"], H)
    out.update({"ln1_g": _row(lp["ln1_g"]), "ln1_b": _row(lp["ln1_b"]),
                "ff1_w": lp["ff1_w"].astype(jnp.bfloat16), "ff1_b": _row(lp["ff1_b"]),
                "ff2_w": lp["ff2_w"].astype(jnp.bfloat16), "ff2_b": _row(lp["ff2_b"]),
                "ln2_g": _row(lp["ln2_g"]), "ln2_b": _row(lp["ln2_b"])})
    return out


def _stack_layers(layers):
    return {k: jnp.stack([l[k] for l in layers], axis=0) for k in layers[0]}


def prepare_params(raw, nhead):
    """One-time preprocessing (outside jit): head-stacking, bf16 casts,
    scale/BN/kv-projection/residual-Linear folding, per-layer weight stacking."""
    H = nhead
    p = {"emb_w": raw["emb_w"].astype(jnp.bfloat16), "emb_b": _row(raw["emb_b"]),
         "emb_ln_g": _row(raw["emb_ln_g"]), "emb_ln_b": _row(raw["emb_ln_b"]),
         "pos": raw["pos"].astype(jnp.float32),
         "enc": _stack_layers([_prep_layer(l, H) for l in raw["enc_layers"]]),
         "enc_ln_g": _row(raw["enc_ln_g"]), "enc_ln_b": _row(raw["enc_ln_b"]),
         "post": _stack_layers([_prep_layer(l, H) for l in raw["post_layers"]]),
         "pre_pool_ln_g": _row(raw["pre_pool_ln_g"]),
         "pre_pool_ln_b": _row(raw["pre_pool_ln_b"]),
         "pool": _prep_mha(raw["pool_attn"]["wq"], raw["pool_attn"]["bq"],
                           raw["pool_attn"]["wk"], raw["pool_attn"]["bk"],
                           raw["pool_attn"]["wv"], raw["pool_attn"]["bv"],
                           raw["pool_attn"]["wo"], raw["pool_attn"]["bo"], H)}

    # cross attention: fold kv_projection into K/V, residual Linear into out-proj
    ca = raw["cross_attn"]
    wk_f = raw["kv_w"] @ ca["wk"]
    bk_f = raw["kv_b"] @ ca["wk"] + ca["bk"]
    wv_f = raw["kv_w"] @ ca["wv"]
    bv_f = raw["kv_b"] @ ca["wv"] + ca["bv"]
    wor = ca["wo"] @ raw["res_cross_w"]
    bor = ca["bo"] @ raw["res_cross_w"] + raw["res_cross_b"]
    p["cross"] = _prep_mha(ca["wq"], ca["bq"], wk_f, bk_f, wv_f, bv_f, wor, bor, H)

    # classifier head: fold eval-mode BatchNorm1d into the preceding Linear.
    c1w, c1b = _fold_bn(raw["c1_w"], raw["c1_b"], raw["c1_bn"])
    rb1w, rb1b = _fold_bn(raw["rb1_w"], raw["rb1_b"], raw["rb1_bn"])
    c2w, c2b = _fold_bn(raw["c2_w"], raw["c2_b"], raw["c2_bn"])
    rb2w, rb2b = _fold_bn(raw["rb2_w"], raw["rb2_b"], raw["rb2_bn"])
    c3w, c3b = _fold_bn(raw["c3_w"], raw["c3_b"], raw["c3_bn"])
    p["cls"] = {"c1_w": c1w.astype(jnp.bfloat16), "c1_b": _row(c1b),
                "rb1_w": rb1w.astype(jnp.bfloat16), "rb1_b": _row(rb1b),
                "c2_w": c2w.astype(jnp.bfloat16), "c2_b": _row(c2b),
                "rb2_w": rb2w.astype(jnp.bfloat16), "rb2_b": _row(rb2b),
                "c3_w": c3w.astype(jnp.bfloat16), "c3_b": _row(c3b),
                "c4_w": raw["c4_w"].astype(jnp.bfloat16), "c4_b": _row(raw["c4_b"])}
    return p


# ----------------------------------------------------------------------------
if __name__ == "__main__":
    input_dim, d_model, nhead, num_layers, dropout = 4, 32, 4, 2, 0.1
    B, S = 2, 8

    key = jax.random.PRNGKey(0)
    kx, kp = jax.random.split(key)
    x = jax.random.normal(kx, (B, S, input_dim), jnp.float32)
    key_value_pairs = x  # per the module NOTE: kv pairs are the same input x

    raw = init_raw_params(kp, input_dim, d_model, num_layers)
    prep = jax.device_put(prepare_params(raw, nhead))  # folding hoisted out of jit

    fwd = jax.jit(functools.partial(forward, nhead=nhead))
    out = jax.block_until_ready(fwd(prep, x, key_value_pairs))

    assert out.shape == (B, 1), out.shape
    assert bool(jnp.all(jnp.isfinite(out)))
    print("KERNEL_OK")
</pallas_src>

<mosaic_0001>
module attributes {stable_mosaic.version = 11 : i64} {
  func.func @_embed_kernel(%arg0: i32, %arg1: memref<1x8x4xf32, #tpu.memory_space<vmem>>, %arg2: memref<4x32xbf16, #tpu.memory_space<vmem>>, %arg3: memref<1x32xf32, #tpu.memory_space<vmem>>, %arg4: memref<1x32xf32, #tpu.memory_space<vmem>>, %arg5: memref<1x32xf32, #tpu.memory_space<vmem>>, %arg6: memref<8x32xf32, #tpu.memory_space<vmem>>, %arg7: memref<1x8x32xbf16, #tpu.memory_space<vmem>>) attributes {dimension_semantics = [#tpu.dimension_semantics<parallel>], iteration_bounds = array<i64: 2>, scalar_prefetch = 0 : i64, scratch_operands = 0 : i64, tpu.core_type = #tpu.core_type<tc>, window_params = [{transform_indices = @transform_0, window_bounds = array<i64: 1, 8, 4>}, {pipeline_mode = #tpu.pipeline_mode<synchronous>, transform_indices = @transform_1, window_bounds = array<i64: 4, 32>}, {pipeline_mode = #tpu.pipeline_mode<synchronous>, transform_indices = @transform_2, window_bounds = array<i64: 1, 32>}, {pipeline_mode = #tpu.pipeline_mode<synchronous>, transform_indices = @transform_3, window_bounds = array<i64: 1, 32>}, {pipeline_mode = #tpu.pipeline_mode<synchronous>, transform_indices = @transform_4, window_bounds = array<i64: 1, 32>}, {pipeline_mode = #tpu.pipeline_mode<synchronous>, transform_indices = @transform_5, window_bounds = array<i64: 8, 32>}, {transform_indices = @transform_6, window_bounds = array<i64: 1, 8, 32>}]} {
    %c0 = arith.constant 0 : index
    %c0_0 = arith.constant 0 : index
    %c0_1 = arith.constant 0 : index
    %0 = vector.load %arg1[%c0, %c0_0, %c0_1] : memref<1x8x4xf32, #tpu.memory_space<vmem>>, vector<1x8x4xf32>
    %1 = vector.shape_cast %0 : vector<1x8x4xf32> to vector<8x4xf32>
    %2 = arith.truncf %1 : vector<8x4xf32> to vector<8x4xbf16>
    %c0_2 = arith.constant 0 : index
    %c0_3 = arith.constant 0 : index
    %3 = vector.load %arg2[%c0_2, %c0_3] : memref<4x32xbf16, #tpu.memory_space<vmem>>, vector<4x32xbf16>
    %cst = arith.constant dense<0.000000e+00> : vector<8x32xf32>
    %4 = tpu.matmul %2, %3, %cst {dimension_numbers = #tpu.dot_dimension_numbers<[1], [0], [0], [1], [0, 0, 1, 1], [], []>} : vector<8x4xbf16>, vector<4x32xbf16>, vector<8x32xf32> -> vector<8x32xf32>
    %c0_4 = arith.constant 0 : index
    %c0_5 = arith.constant 0 : index
    %5 = vector.load %arg3[%c0_4, %c0_5] : memref<1x32xf32, #tpu.memory_space<vmem>>, vector<1x32xf32>
    %6 = vector.broadcast %5 : vector<1x32xf32> to vector<8x32xf32>
    %7 = arith.addf %4, %6 : vector<8x32xf32>
    %c0_6 = arith.constant 0 : index
    %c0_7 = arith.constant 0 : index
    %8 = vector.load %arg4[%c0_6, %c0_7] : memref<1x32xf32, #tpu.memory_space<vmem>>, vector<1x32xf32>
    %c0_8 = arith.constant 0 : index
    %c0_9 = arith.constant 0 : index
    %9 = vector.load %arg5[%c0_8, %c0_9] : memref<1x32xf32, #tpu.memory_space<vmem>>, vector<1x32xf32>
    %cst_10 = arith.constant dense<0.000000e+00> : vector<8xf32>
    %10 = vector.multi_reduction <add>, %7, %cst_10 [1] : vector<8x32xf32> to vector<8xf32>
    %11 = vector.shape_cast %10 : vector<8xf32> to vector<8x1xf32>
    %cst_11 = arith.constant 3.200000e+01 : f32
    %12 = vector.broadcast %cst_11 : f32 to vector<8x1xf32>
    %13 = arith.divf %11, %12 : vector<8x1xf32>
    %14 = vector.broadcast %13 : vector<8x1xf32> to vector<8x32xf32>
    %15 = arith.subf %7, %14 : vector<8x32xf32>
    %16 = arith.mulf %15, %15 : vector<8x32xf32>
    %cst_12 = arith.constant dense<0.000000e+00> : vector<8xf32>
    %17 = vector.multi_reduction <add>, %16, %cst_12 [1] : vector<8x32xf32> to vector<8xf32>
    %18 = vector.shape_cast %17 : vector<8xf32> to vector<8x1xf32>
    %cst_13 = arith.constant 3.200000e+01 : f32
    %19 = vector.broadcast %cst_13 : f32 to vector<8x1xf32>
    %20 = arith.divf %18, %19 : vector<8x1xf32>
    %cst_14 = arith.constant 9.99999974E-6 : f32
    %21 = vector.broadcast %cst_14 : f32 to vector<8x1xf32>
    %22 = arith.addf %20, %21 : vector<8x1xf32>
    %23 = math.rsqrt %22 : vector<8x1xf32>
    %24 = vector.broadcast %23 : vector<8x1xf32> to vector<8x32xf32>
    %25 = arith.mulf %15, %24 : vector<8x32xf32>
    %26 = vector.broadcast %8 : vector<1x32xf32> to vector<8x32xf32>
    %27 = arith.mulf %25, %26 : vector<8x32xf32>
    %28 = vector.broadcast %9 : vector<1x32xf32> to vector<8x32xf32>
    %29 = arith.addf %27, %28 : vector<8x32xf32>
    %c0_15 = arith.constant 0 : index
    %c0_16 = arith.constant 0 : index
    %30 = vector.load %arg6[%c0_15, %c0_16] : memref<8x32xf32, #tpu.memory_space<vmem>>, vector<8x32xf32>
    %31 = arith.addf %29, %30 : vector<8x32xf32>
    %32 = arith.truncf %31 : vector<8x32xf32> to vector<8x32xbf16>
    %c0_17 = arith.constant 0 : index
    %c0_18 = arith.constant 0 : index
    %c0_19 = arith.constant 0 : index
    %33 = vector.load %arg7[%c0_17, %c0_18, %c0_19] : memref<1x8x32xbf16, #tpu.memory_space<vmem>>, vector<1x8x32xbf16>
    %34 = vector.shape_cast %33 : vector<1x8x32xbf16> to vector<8x32xbf16>
    %35 = vector.shape_cast %32 : vector<8x32xbf16> to vector<1x8x32xbf16>
    tpu.vector_store %arg7[%c0_17, %c0_18, %c0_19], %35 {strides = array<i32>} : memref<1x8x32xbf16, #tpu.memory_space<vmem>>, vector<1x8x32xbf16>,
    return
  }
  func.func @transform_0(%arg0: i32) -> (i32, i32, i32) {
    %c0_i32 = arith.constant 0 : i32
    %c0_i32_0 = arith.constant 0 : i32
    %c0_i32_1 = arith.constant 0 : i32
    return %arg0, %c0_i32, %c0_i32_0 : i32, i32, i32
  }
  func.func @transform_1(%arg0: i32) -> (i32, i32) {
    %c0_i32 = arith.constant 0 : i32
    %c0_i32_0 = arith.constant 0 : i32
    %c0_i32_1 = arith.constant 0 : i32
    return %c0_i32, %c0_i32_0 : i32, i32
  }
  func.func @transform_2(%arg0: i32) -> (i32, i32) {
    %c0_i32 = arith.constant 0 : i32
    %c0_i32_0 = arith.constant 0 : i32
    %c0_i32_1 = arith.constant 0 : i32
    return %c0_i32, %c0_i32_0 : i32, i32
  }
  func.func @transform_3(%arg0: i32) -> (i32, i32) {
    %c0_i32 = arith.constant 0 : i32
    %c0_i32_0 = arith.constant 0 : i32
    %c0_i32_1 = arith.constant 0 : i32
    return %c0_i32, %c0_i32_0 : i32, i32
  }
  func.func @transform_4(%arg0: i32) -> (i32, i32) {
    %c0_i32 = arith.constant 0 : i32
    %c0_i32_0 = arith.constant 0 : i32
    %c0_i32_1 = arith.constant 0 : i32
    return %c0_i32, %c0_i32_0 : i32, i32
  }
  func.func @transform_5(%arg0: i32) -> (i32, i32) {
    %c0_i32 = arith.constant 0 : i32
    %c0_i32_0 = arith.constant 0 : i32
    %c0_i32_1 = arith.constant 0 : i32
    return %c0_i32, %c0_i32_0 : i32, i32
  }
  func.func @transform_6(%arg0: i32) -> (i32, i32, i32) {
    %c0_i32 = arith.constant 0 : i32
    %c0_i32_0 = arith.constant 0 : i32
    %c0_i32_1 = arith.constant 0 : i32
    return %arg0, %c0_i32, %c0_i32_0 : i32, i32, i32
  }
}

module attributes {stable_mosaic.version = 11 : i64} {
  func.func @_cross_kernel(%arg0: memref<8x2x32xbf16, #tpu.memory_space<vmem>>, %arg1: memref<8x2x4xf32, #tpu.memory_space<vmem>>, %arg2: memref<4x32x8xbf16, #tpu.memory_space<vmem>>, %arg3: memref<4x1x8xf32, #tpu.memory_space<vmem>>, %arg4: memref<4x4x16xbf16, #tpu.memory_space<vmem>>, %arg5: memref<4x1x16xf32, #tpu.memory_space<vmem>>, %arg6: memref<4x8x32xbf16, #tpu.memory_space<vmem>>, %arg7: memref<1x32xf32, #tpu.memory_space<vmem>>, %arg8: memref<8x2x32xbf16, #tpu.memory_space<vmem>>) attributes {dimension_semantics = [], scalar_prefetch = 0 : i64, scratch_operands = 0 : i64, tpu.core_type = #tpu.core_type<tc>} {
    %c0 = arith.constant 0 : index
    %c0_0 = arith.constant 0 : index
    %c0_1 = arith.constant 0 : index
    %0 = vector.load %arg0[%c0, %c0_0, %c0_1] : memref<8x2x32xbf16, #tpu.memory_space<vmem>>, vector<8x2x32xbf16>
    %c0_2 = arith.constant 0 : index
    %c0_3 = arith.constant 0 : index
    %c0_4 = arith.constant 0 : index
    %1 = vector.load %arg1[%c0_2, %c0_3, %c0_4] : memref<8x2x4xf32, #tpu.memory_space<vmem>>, vector<8x2x4xf32>
    %c0_5 = arith.constant 0 : index
    %c0_6 = arith.constant 0 : index
    %c0_7 = arith.constant 0 : index
    %2 = vector.load %arg2[%c0_5, %c0_6, %c0_7] : memref<4x32x8xbf16, #tpu.memory_space<vmem>>, vector<4x32x8xbf16>
    %c0_8 = arith.constant 0 : index
    %c0_9 = arith.constant 0 : index
    %c0_10 = arith.constant 0 : index
    %3 = vector.load %arg3[%c0_8, %c0_9, %c0_10] : memref<4x1x8xf32, #tpu.memory_space<vmem>>, vector<4x1x8xf32>
    %c0_11 = arith.constant 0 : index
    %c0_12 = arith.constant 0 : index
    %c0_13 = arith.constant 0 : index
    %4 = vector.load %arg4[%c0_11, %c0_12, %c0_13] : memref<4x4x16xbf16, #tpu.memory_space<vmem>>, vector<4x4x16xbf16>
    %c0_14 = arith.constant 0 : index
    %c0_15 = arith.constant 0 : index
    %c0_16 = arith.constant 0 : index
    %5 = vector.load %arg5[%c0_14, %c0_15, %c0_16] : memref<4x1x16xf32, #tpu.memory_space<vmem>>, vector<4x1x16xf32>
    %c0_17 = arith.constant 0 : index
    %c0_18 = arith.constant 0 : index
    %c0_19 = arith.constant 0 : index
    %6 = vector.load %arg6[%c0_17, %c0_18, %c0_19] : memref<4x8x32xbf16, #tpu.memory_space<vmem>>, vector<4x8x32xbf16>
    %c0_20 = arith.constant 0 : index
    %c0_21 = arith.constant 0 : index
    %7 = vector.load %arg7[%c0_20, %c0_21] : memref<1x32xf32, #tpu.memory_space<vmem>>, vector<1x32xf32>
    %8 = arith.truncf %1 : vector<8x2x4xf32> to vector<8x2x4xbf16>
    %9 = vector.shape_cast %0 : vector<8x2x32xbf16> to vector<8x1x2x32xbf16>
    %10 = vector.shape_cast %9 : vector<8x1x2x32xbf16> to vector<8x1x2x32xbf16>
    %11 = vector.broadcast %10 : vector<8x1x2x32xbf16> to vector<8x4x2x32xbf16>
    %12 = vector.shape_cast %11 : vector<8x4x2x32xbf16> to vector<32x2x32xbf16>
    %13 = vector.shape_cast %8 : vector<8x2x4xbf16> to vector<8x1x2x4xbf16>
    %14 = vector.shape_cast %13 : vector<8x1x2x4xbf16> to vector<8x1x2x4xbf16>
    %15 = vector.broadcast %14 : vector<8x1x2x4xbf16> to vector<8x4x2x4xbf16>
    %16 = vector.shape_cast %15 : vector<8x4x2x4xbf16> to vector<32x2x4xbf16>
    %17 = vector.shape_cast %2 : vector<4x32x8xbf16> to vector<1x4x32x8xbf16>
    %18 = vector.shape_cast %17 : vector<1x4x32x8xbf16> to vector<1x4x32x8xbf16>
    %19 = vector.broadcast %18 : vector<1x4x32x8xbf16> to vector<8x4x32x8xbf16>
    %20 = vector.shape_cast %19 : vector<8x4x32x8xbf16> to vector<32x32x8xbf16>
    %21 = vector.shape_cast %3 : vector<4x1x8xf32> to vector<1x4x1x8xf32>
    %22 = vector.shape_cast %21 : vector<1x4x1x8xf32> to vector<1x4x1x8xf32>
    %23 = vector.broadcast %22 : vector<1x4x1x8xf32> to vector<8x4x1x8xf32>
    %24 = vector.shape_cast %23 : vector<8x4x1x8xf32> to vector<32x1x8xf32>
    %25 = vector.shape_cast %4 : vector<4x4x16xbf16> to vector<1x4x4x16xbf16>
    %26 = vector.shape_cast %25 : vector<1x4x4x16xbf16> to vector<1x4x4x16xbf16>
    %27 = vector.broadcast %26 : vector<1x4x4x16xbf16> to vector<8x4x4x16xbf16>
    %28 = vector.shape_cast %27 : vector<8x4x4x16xbf16> to vector<32x4x16xbf16>
    %29 = vector.shape_cast %5 : vector<4x1x16xf32> to vector<1x4x1x16xf32>
    %30 = vector.shape_cast %29 : vector<1x4x1x16xf32> to vector<1x4x1x16xf32>
    %31 = vector.broadcast %30 : vector<1x4x1x16xf32> to vector<8x4x1x16xf32>
    %32 = vector.shape_cast %31 : vector<8x4x1x16xf32> to vector<32x1x16xf32>
    %33 = vector.shape_cast %6 : vector<4x8x32xbf16> to vector<1x4x8x32xbf16>
    %34 = vector.shape_cast %33 : vector<1x4x8x32xbf16> to vector<1x4x8x32xbf16>
    %35 = vector.broadcast %34 : vector<1x4x8x32xbf16> to vector<8x4x8x32xbf16>
    %36 = vector.shape_cast %35 : vector<8x4x8x32xbf16> to vector<32x8x32xbf16>
    "tpu.trace_start"() <{level = 10 : i32, message = "zld,zdk->zlk"}> : () -> ()
    %cst = arith.constant dense<0.000000e+00> : vector<32x2x8xf32>
    %37 = tpu.matmul %12, %20, %cst {dimension_numbers = #tpu.dot_dimension_numbers<[2], [1], [1], [2], [0, 0, 0, 1, 1, 2], [0], [0]>} : vector<32x2x32xbf16>, vector<32x32x8xbf16>, vector<32x2x8xf32> -> vector<32x2x8xf32>
    "tpu.trace_stop"() : () -> ()
    %38 = vector.broadcast %24 : vector<32x1x8xf32> to vector<32x2x8xf32>
    %39 = arith.addf %37, %38 : vector<32x2x8xf32>
    "tpu.trace_start"() <{level = 10 : i32, message = "zld,zdk->zlk"}> : () -> ()
    %cst_22 = arith.constant dense<0.000000e+00> : vector<32x2x16xf32>
    %40 = tpu.matmul %16, %28, %cst_22 {dimension_numbers = #tpu.dot_dimension_numbers<[2], [1], [1], [2], [0, 0, 0, 1, 1, 2], [0], [0]>} : vector<32x2x4xbf16>, vector<32x4x16xbf16>, vector<32x2x16xf32> -> vector<32x2x16xf32>
    "tpu.trace_stop"() : () -> ()
    %41 = vector.broadcast %32 : vector<32x1x16xf32> to vector<32x2x16xf32>
    %42 = arith.addf %40, %41 : vector<32x2x16xf32>
    %43 = vector.extract_strided_slice %42 {offsets = [0, 0, 0], sizes = [32, 2, 8], strides = [1, 1, 1]} : vector<32x2x16xf32> to vector<32x2x8xf32>
    %44 = vector.extract_strided_slice %42 {offsets = [0, 0, 8], sizes = [32, 2, 8], strides = [1, 1, 1]} : vector<32x2x16xf32> to vector<32x2x8xf32>
    %45 = arith.truncf %39 : vector<32x2x8xf32> to vector<32x2x8xbf16>
    %46 = arith.truncf %43 : vector<32x2x8xf32> to vector<32x2x8xbf16>
    "tpu.trace_start"() <{level = 10 : i32, message = "zqd,zkd->zqk"}> : () -> ()
    %cst_23 = arith.constant dense<0.000000e+00> : vector<32x2x2xf32>
    %47 = tpu.matmul %45, %46, %cst_23 {dimension_numbers = #tpu.dot_dimension_numbers<[2], [2], [1], [1], [0, 0, 0, 1, 1, 1], [0], [0]>} : vector<32x2x8xbf16>, vector<32x2x8xbf16>, vector<32x2x2xf32> -> vector<32x2x2xf32>
    "tpu.trace_stop"() : () -> ()
    %cst_24 = arith.constant dense<0xFF800000> : vector<32x2xf32>
    %48 = vector.multi_reduction <maximumf>, %47, %cst_24 [2] : vector<32x2x2xf32> to vector<32x2xf32>
    %49 = vector.shape_cast %48 : vector<32x2xf32> to vector<32x2x1xf32>
    %50 = vector.broadcast %49 : vector<32x2x1xf32> to vector<32x2x2xf32>
    %51 = arith.subf %47, %50 : vector<32x2x2xf32>
    %52 = math.exp %51 : vector<32x2x2xf32>
    %cst_25 = arith.constant dense<0.000000e+00> : vector<32x2xf32>
    %53 = vector.multi_reduction <add>, %52, %cst_25 [2] : vector<32x2x2xf32> to vector<32x2xf32>
    %54 = vector.shape_cast %53 : vector<32x2xf32> to vector<32x2x1xf32>
    %55 = vector.broadcast %54 : vector<32x2x1xf32> to vector<32x2x2xf32>
    %56 = arith.divf %52, %55 : vector<32x2x2xf32>
    %57 = arith.truncf %56 : vector<32x2x2xf32> to vector<32x2x2xbf16>
    %58 = arith.truncf %44 : vector<32x2x8xf32> to vector<32x2x8xbf16>
    "tpu.trace_start"() <{level = 10 : i32, message = "zqk,zkd->zqd"}> : () -> ()
    %cst_26 = arith.constant dense<0.000000e+00> : vector<32x2x8xf32>
    %59 = tpu.matmul %57, %58, %cst_26 {dimension_numbers = #tpu.dot_dimension_numbers<[2], [1], [1], [2], [0, 0, 0, 1, 1, 2], [0], [0]>} : vector<32x2x2xbf16>, vector<32x2x8xbf16>, vector<32x2x8xf32> -> vector<32x2x8xf32>
    "tpu.trace_stop"() : () -> ()
    %60 = arith.truncf %59 : vector<32x2x8xf32> to vector<32x2x8xbf16>
    "tpu.trace_start"() <{level = 10 : i32, message = "zqd,zde->zqe"}> : () -> ()
    %cst_27 = arith.constant dense<0.000000e+00> : vector<32x2x32xf32>
    %61 = tpu.matmul %60, %36, %cst_27 {dimension_numbers = #tpu.dot_dimension_numbers<[2], [1], [1], [2], [0, 0, 0, 1, 1, 2], [0], [0]>} : vector<32x2x8xbf16>, vector<32x8x32xbf16>, vector<32x2x32xf32> -> vector<32x2x32xf32>
    "tpu.trace_stop"() : () -> ()
    %62 = vector.shape_cast %61 : vector<32x2x32xf32> to vector<8x4x2x32xf32>
    %cst_28 = arith.constant dense<0.000000e+00> : vector<8x2x32xf32>
    %63 = vector.multi_reduction <add>, %62, %cst_28 [1] : vector<8x4x2x32xf32> to vector<8x2x32xf32>
    %64 = vector.shape_cast %7 : vector<1x32xf32> to vector<1x1x32xf32>
    %65 = vector.broadcast %64 : vector<1x1x32xf32> to vector<8x2x32xf32>
    %66 = arith.addf %63, %65 : vector<8x2x32xf32>
    %67 = arith.extf %0 : vector<8x2x32xbf16> to vector<8x2x32xf32>
    %68 = arith.addf %67, %66 : vector<8x2x32xf32>
    %69 = arith.truncf %68 : vector<8x2x32xf32> to vector<8x2x32xbf16>
    %c0_29 = arith.constant 0 : index
    %c0_30 = arith.constant 0 : index
    %c0_31 = arith.constant 0 : index
    %70 = vector.load %arg8[%c0_29, %c0_30, %c0_31] : memref<8x2x32xbf16, #tpu.memory_space<vmem>>, vector<8x2x32xbf16>
    tpu.vector_store %arg8[%c0_29, %c0_30, %c0_31], %69 {strides = array<i32>} : memref<8x2x32xbf16, #tpu.memory_space<vmem>>, vector<8x2x32xbf16>,
    return
  }
}

module attributes {stable_mosaic.version = 11 : i64} {
  func.func @_enc_stack_kernel(%arg0: i32, %arg1: i32, %arg2: memref<1x8x32xbf16, #tpu.memory_space<vmem>>, %arg3: memref<1x4x32x8xbf16, #tpu.memory_space<vmem>>, %arg4: memref<1x4x1x8xf32, #tpu.memory_space<vmem>>, %arg5: memref<1x4x32x16xbf16, #tpu.memory_space<vmem>>, %arg6: memref<1x4x1x16xf32, #tpu.memory_space<vmem>>, %arg7: memref<1x4x8x32xbf16, #tpu.memory_space<vmem>>, %arg8: memref<1x1x32xf32, #tpu.memory_space<vmem>>, %arg9: memref<1x1x32xf32, #tpu.memory_space<vmem>>, %arg10: memref<1x1x32xf32, #tpu.memory_space<vmem>>, %arg11: memref<1x32x2048xbf16, #tpu.memory_space<vmem>>, %arg12: memref<1x1x2048xf32, #tpu.memory_space<vmem>>, %arg13: memref<1x2048x32xbf16, #tpu.memory_space<vmem>>, %arg14: memref<1x1x32xf32, #tpu.memory_space<vmem>>, %arg15: memref<1x1x32xf32, #tpu.memory_space<vmem>>, %arg16: memref<1x1x32xf32, #tpu.memory_space<vmem>>, %arg17: memref<1x32xf32, #tpu.memory_space<vmem>>, %arg18: memref<1x32xf32, #tpu.memory_space<vmem>>, %arg19: memref<1x8x32xbf16, #tpu.memory_space<vmem>>, %arg20: memref<8x32xf32, #tpu.memory_space<vmem>>) attributes {dimension_semantics = [#tpu.dimension_semantics<parallel>, #tpu.dimension_semantics<arbitrary>], iteration_bounds = array<i64: 2, 2>, scalar_prefetch = 0 : i64, scratch_operands = 1 : i64, tpu.core_type = #tpu.core_type<tc>, window_params = [{transform_indices = @transform_0, window_bounds = array<i64: 1, 8, 32>}, {transform_indices = @transform_1, window_bounds = array<i64: 1, 4, 32, 8>}, {transform_indices = @transform_2, window_bounds = array<i64: 1, 4, 1, 8>}, {transform_indices = @transform_3, window_bounds = array<i64: 1, 4, 32, 16>}, {transform_indices = @transform_4, window_bounds = array<i64: 1, 4, 1, 16>}, {transform_indices = @transform_5, window_bounds = array<i64: 1, 4, 8, 32>}, {transform_indices = @transform_6, window_bounds = array<i64: 1, 1, 32>}, {transform_indices = @transform_7, window_bounds = array<i64: 1, 1, 32>}, {transform_indices = @transform_8, window_bounds = array<i64: 1, 1, 32>}, {transform_indices = @transform_9, window_bounds = array<i64: 1, 32, 2048>}, {transform_indices = @transform_10, window_bounds = array<i64: 1, 1, 2048>}, {transform_indices = @transform_11, window_bounds = array<i64: 1, 2048, 32>}, {transform_indices = @transform_12, window_bounds = array<i64: 1, 1, 32>}, {transform_indices = @transform_13, window_bounds = array<i64: 1, 1, 32>}, {transform_indices = @transform_14, window_bounds = array<i64: 1, 1, 32>}, {pipeline_mode = #tpu.pipeline_mode<synchronous>, transform_indices = @transform_15, window_bounds = array<i64: 1, 32>}, {pipeline_mode = #tpu.pipeline_mode<synchronous>, transform_indices = @transform_16, window_bounds = array<i64: 1, 32>}, {transform_indices = @transform_17, window_bounds = array<i64: 1, 8, 32>}]} {
    %c0_i32 = arith.constant 0 : i32
    %0 = arith.cmpi eq, %arg1, %c0_i32 : i32
    %1 = arith.extui %0 : i1 to i32
    %c0_i32_0 = arith.constant 0 : i32
    %2 = arith.cmpi ne, %1, %c0_i32_0 : i32
    scf.if %2 {
      %c0_72 = arith.constant 0 : index
      %c0_73 = arith.constant 0 : index
      %c0_74 = arith.constant 0 : index
      %139 = vector.load %arg2[%c0_72, %c0_73, %c0_74] : memref<1x8x32xbf16, #tpu.memory_space<vmem>>, vector<1x8x32xbf16>
      %140 = vector.shape_cast %139 : vector<1x8x32xbf16> to vector<8x32xbf16>
      %141 = arith.extf %140 : vector<8x32xbf16> to vector<8x32xf32>
      %c0_75 = arith.constant 0 : index
      %c0_76 = arith.constant 0 : index
      %142 = vector.load %arg20[%c0_75, %c0_76] : memref<8x32xf32, #tpu.memory_space<vmem>>, vector<8x32xf32>
      tpu.vector_store %arg20[%c0_75, %c0_76], %141 {strides = array<i32>} : memref<8x32xf32, #tpu.memory_space<vmem>>, vector<8x32xf32>,
    } else {
    }
    %c0 = arith.constant 0 : index
    %c0_1 = arith.constant 0 : index
    %3 = vector.load %arg20[%c0, %c0_1] : memref<8x32xf32, #tpu.memory_space<vmem>>, vector<8x32xf32>
    %4 = arith.truncf %3 : vector<8x32xf32> to vector<8x32xbf16>
    %5 = vector.shape_cast %4 : vector<8x32xbf16> to vector<1x8x32xbf16>
    %c0_2 = arith.constant 0 : index
    %c0_3 = arith.constant 0 : index
    %c0_4 = arith.constant 0 : index
    %c0_5 = arith.constant 0 : index
    %6 = vector.load %arg3[%c0_2, %c0_3, %c0_4, %c0_5] : memref<1x4x32x8xbf16, #tpu.memory_space<vmem>>, vector<1x4x32x8xbf16>
    %7 = vector.shape_cast %6 : vector<1x4x32x8xbf16> to vector<4x32x8xbf16>
    %c0_6 = arith.constant 0 : index
    %c0_7 = arith.constant 0 : index
    %c0_8 = arith.constant 0 : index
    %c0_9 = arith.constant 0 : index
    %8 = vector.load %arg4[%c0_6, %c0_7, %c0_8, %c0_9] : memref<1x4x1x8xf32, #tpu.memory_space<vmem>>, vector<1x4x1x8xf32>
    %9 = vector.shape_cast %8 : vector<1x4x1x8xf32> to vector<4x1x8xf32>
    %c0_10 = arith.constant 0 : index
    %c0_11 = arith.constant 0 : index
    %c0_12 = arith.constant 0 : index
    %c0_13 = arith.constant 0 : index
    %10 = vector.load %arg5[%c0_10, %c0_11, %c0_12, %c0_13] : memref<1x4x32x16xbf16, #tpu.memory_space<vmem>>, vector<1x4x32x16xbf16>
    %11 = vector.shape_cast %10 : vector<1x4x32x16xbf16> to vector<4x32x16xbf16>
    %c0_14 = arith.constant 0 : index
    %c0_15 = arith.constant 0 : index
    %c0_16 = arith.constant 0 : index
    %c0_17 = arith.constant 0 : index
    %12 = vector.load %arg6[%c0_14, %c0_15, %c0_16, %c0_17] : memref<1x4x1x16xf32, #tpu.memory_space<vmem>>, vector<1x4x1x16xf32>
    %13 = vector.shape_cast %12 : vector<1x4x1x16xf32> to vector<4x1x16xf32>
    %c0_18 = arith.constant 0 : index
    %c0_19 = arith.constant 0 : index
    %c0_20 = arith.constant 0 : index
    %c0_21 = arith.constant 0 : index
    %14 = vector.load %arg7[%c0_18, %c0_19, %c0_20, %c0_21] : memref<1x4x8x32xbf16, #tpu.memory_space<vmem>>, vector<1x4x8x32xbf16>
    %15 = vector.shape_cast %14 : vector<1x4x8x32xbf16> to vector<4x8x32xbf16>
    %c0_22 = arith.constant 0 : index
    %c0_23 = arith.constant 0 : index
    %c0_24 = arith.constant 0 : index
    %16 = vector.load %arg8[%c0_22, %c0_23, %c0_24] : memref<1x1x32xf32, #tpu.memory_space<vmem>>, vector<1x1x32xf32>
    %17 = vector.shape_cast %16 : vector<1x1x32xf32> to vector<1x32xf32>
    %18 = vector.shape_cast %5 : vector<1x8x32xbf16> to vector<1x1x8x32xbf16>
    %19 = vector.shape_cast %18 : vector<1x1x8x32xbf16> to vector<1x1x8x32xbf16>
    %20 = vector.broadcast %19 : vector<1x1x8x32xbf16> to vector<1x4x8x32xbf16>
    %21 = vector.shape_cast %20 : vector<1x4x8x32xbf16> to vector<4x8x32xbf16>
    %22 = vector.shape_cast %5 : vector<1x8x32xbf16> to vector<1x1x8x32xbf16>
    %23 = vector.shape_cast %22 : vector<1x1x8x32xbf16> to vector<1x1x8x32xbf16>
    %24 = vector.broadcast %23 : vector<1x1x8x32xbf16> to vector<1x4x8x32xbf16>
    %25 = vector.shape_cast %24 : vector<1x4x8x32xbf16> to vector<4x8x32xbf16>
    %26 = vector.shape_cast %7 : vector<4x32x8xbf16> to vector<1x4x32x8xbf16>
    %27 = vector.shape_cast %26 : vector<1x4x32x8xbf16> to vector<4x32x8xbf16>
    %28 = vector.shape_cast %9 : vector<4x1x8xf32> to vector<1x4x1x8xf32>
    %29 = vector.shape_cast %28 : vector<1x4x1x8xf32> to vector<4x1x8xf32>
    %30 = vector.shape_cast %11 : vector<4x32x16xbf16> to vector<1x4x32x16xbf16>
    %31 = vector.shape_cast %30 : vector<1x4x32x16xbf16> to vector<4x32x16xbf16>
    %32 = vector.shape_cast %13 : vector<4x1x16xf32> to vector<1x4x1x16xf32>
    %33 = vector.shape_cast %32 : vector<1x4x1x16xf32> to vector<4x1x16xf32>
    %34 = vector.shape_cast %15 : vector<4x8x32xbf16> to vector<1x4x8x32xbf16>
    %35 = vector.shape_cast %34 : vector<1x4x8x32xbf16> to vector<4x8x32xbf16>
    "tpu.trace_start"() <{level = 10 : i32, message = "zld,zdk->zlk"}> : () -> ()
    %cst = arith.constant dense<0.000000e+00> : vector<4x8x8xf32>
    %36 = tpu.matmul %21, %27, %cst {dimension_numbers = #tpu.dot_dimension_numbers<[2], [1], [1], [2], [0, 0, 0, 1, 1, 2], [0], [0]>} : vector<4x8x32xbf16>, vector<4x32x8xbf16>, vector<4x8x8xf32> -> vector<4x8x8xf32>
    "tpu.trace_stop"() : () -> ()
    %37 = vector.broadcast %29 : vector<4x1x8xf32> to vector<4x8x8xf32>
    %38 = arith.addf %36, %37 : vector<4x8x8xf32>
    "tpu.trace_start"() <{level = 10 : i32, message = "zld,zdk->zlk"}> : () -> ()
    %cst_25 = arith.constant dense<0.000000e+00> : vector<4x8x16xf32>
    %39 = tpu.matmul %25, %31, %cst_25 {dimension_numbers = #tpu.dot_dimension_numbers<[2], [1], [1], [2], [0, 0, 0, 1, 1, 2], [0], [0]>} : vector<4x8x32xbf16>, vector<4x32x16xbf16>, vector<4x8x16xf32> -> vector<4x8x16xf32>
    "tpu.trace_stop"() : () -> ()
    %40 = vector.broadcast %33 : vector<4x1x16xf32> to vector<4x8x16xf32>
    %41 = arith.addf %39, %40 : vector<4x8x16xf32>
    %42 = vector.extract_strided_slice %41 {offsets = [0, 0, 0], sizes = [4, 8, 8], strides = [1, 1, 1]} : vector<4x8x16xf32> to vector<4x8x8xf32>
    %43 = vector.extract_strided_slice %41 {offsets = [0, 0, 8], sizes = [4, 8, 8], strides = [1, 1, 1]} : vector<4x8x16xf32> to vector<4x8x8xf32>
    %44 = arith.truncf %38 : vector<4x8x8xf32> to vector<4x8x8xbf16>
    %45 = arith.truncf %42 : vector<4x8x8xf32> to vector<4x8x8xbf16>
    "tpu.trace_start"() <{level = 10 : i32, message = "zqd,zkd->zqk"}> : () -> ()
    %cst_26 = arith.constant dense<0.000000e+00> : vector<4x8x8xf32>
    %46 = tpu.matmul %44, %45, %cst_26 {dimension_numbers = #tpu.dot_dimension_numbers<[2], [2], [1], [1], [0, 0, 0, 1, 1, 1], [0], [0]>} : vector<4x8x8xbf16>, vector<4x8x8xbf16>, vector<4x8x8xf32> -> vector<4x8x8xf32>
    "tpu.trace_stop"() : () -> ()
    %cst_27 = arith.constant dense<0xFF800000> : vector<4x8xf32>
    %47 = vector.multi_reduction <maximumf>, %46, %cst_27 [2] : vector<4x8x8xf32> to vector<4x8xf32>
    %48 = vector.shape_cast %47 : vector<4x8xf32> to vector<4x8x1xf32>
    %49 = vector.broadcast %48 : vector<4x8x1xf32> to vector<4x8x8xf32>
    %50 = arith.subf %46, %49 : vector<4x8x8xf32>
    %51 = math.exp %50 : vector<4x8x8xf32>
    %cst_28 = arith.constant dense<0.000000e+00> : vector<4x8xf32>
    %52 = vector.multi_reduction <add>, %51, %cst_28 [2] : vector<4x8x8xf32> to vector<4x8xf32>
    %53 = vector.shape_cast %52 : vector<4x8xf32> to vector<4x8x1xf32>
    %54 = vector.broadcast %53 : vector<4x8x1xf32> to vector<4x8x8xf32>
    %55 = arith.divf %51, %54 : vector<4x8x8xf32>
    %56 = arith.truncf %55 : vector<4x8x8xf32> to vector<4x8x8xbf16>
    %57 = arith.truncf %43 : vector<4x8x8xf32> to vector<4x8x8xbf16>
    "tpu.trace_start"() <{level = 10 : i32, message = "zqk,zkd->zqd"}> : () -> ()
    %cst_29 = arith.constant dense<0.000000e+00> : vector<4x8x8xf32>
    %58 = tpu.matmul %56, %57, %cst_29 {dimension_numbers = #tpu.dot_dimension_numbers<[2], [1], [1], [2], [0, 0, 0, 1, 1, 2], [0], [0]>} : vector<4x8x8xbf16>, vector<4x8x8xbf16>, vector<4x8x8xf32> -> vector<4x8x8xf32>
    "tpu.trace_stop"() : () -> ()
    %59 = arith.truncf %58 : vector<4x8x8xf32> to vector<4x8x8xbf16>
    "tpu.trace_start"() <{level = 10 : i32, message = "zqd,zde->zqe"}> : () -> ()
    %cst_30 = arith.constant dense<0.000000e+00> : vector<4x8x32xf32>
    %60 = tpu.matmul %59, %35, %cst_30 {dimension_numbers = #tpu.dot_dimension_numbers<[2], [1], [1], [2], [0, 0, 0, 1, 1, 2], [0], [0]>} : vector<4x8x8xbf16>, vector<4x8x32xbf16>, vector<4x8x32xf32> -> vector<4x8x32xf32>
    "tpu.trace_stop"() : () -> ()
    %61 = vector.shape_cast %60 : vector<4x8x32xf32> to vector<1x4x8x32xf32>
    %cst_31 = arith.constant dense<0.000000e+00> : vector<1x8x32xf32>
    %62 = vector.multi_reduction <add>, %61, %cst_31 [1] : vector<1x4x8x32xf32> to vector<1x8x32xf32>
    %63 = vector.shape_cast %17 : vector<1x32xf32> to vector<1x1x32xf32>
    %64 = vector.broadcast %63 : vector<1x1x32xf32> to vector<1x8x32xf32>
    %65 = arith.addf %62, %64 : vector<1x8x32xf32>
    %66 = vector.shape_cast %65 : vector<1x8x32xf32> to vector<8x32xf32>
    %67 = arith.addf %3, %66 : vector<8x32xf32>
    %c0_32 = arith.constant 0 : index
    %c0_33 = arith.constant 0 : index
    %c0_34 = arith.constant 0 : index
    %68 = vector.load %arg9[%c0_32, %c0_33, %c0_34] : memref<1x1x32xf32, #tpu.memory_space<vmem>>, vector<1x1x32xf32>
    %69 = vector.shape_cast %68 : vector<1x1x32xf32> to vector<1x32xf32>
    %c0_35 = arith.constant 0 : index
    %c0_36 = arith.constant 0 : index
    %c0_37 = arith.constant 0 : index
    %70 = vector.load %arg10[%c0_35, %c0_36, %c0_37] : memref<1x1x32xf32, #tpu.memory_space<vmem>>, vector<1x1x32xf32>
    %71 = vector.shape_cast %70 : vector<1x1x32xf32> to vector<1x32xf32>
    %cst_38 = arith.constant dense<0.000000e+00> : vector<8xf32>
    %72 = vector.multi_reduction <add>, %67, %cst_38 [1] : vector<8x32xf32> to vector<8xf32>
    %73 = vector.shape_cast %72 : vector<8xf32> to vector<8x1xf32>
    %cst_39 = arith.constant 3.200000e+01 : f32
    %74 = vector.broadcast %cst_39 : f32 to vector<8x1xf32>
    %75 = arith.divf %73, %74 : vector<8x1xf32>
    %76 = vector.broadcast %75 : vector<8x1xf32> to vector<8x32xf32>
    %77 = arith.subf %67, %76 : vector<8x32xf32>
    %78 = arith.mulf %77, %77 : vector<8x32xf32>
    %cst_40 = arith.constant dense<0.000000e+00> : vector<8xf32>
    %79 = vector.multi_reduction <add>, %78, %cst_40 [1] : vector<8x32xf32> to vector<8xf32>
    %80 = vector.shape_cast %79 : vector<8xf32> to vector<8x1xf32>
    %cst_41 = arith.constant 3.200000e+01 : f32
    %81 = vector.broadcast %cst_41 : f32 to vector<8x1xf32>
    %82 = arith.divf %80, %81 : vector<8x1xf32>
    %cst_42 = arith.constant 9.99999974E-6 : f32
    %83 = vector.broadcast %cst_42 : f32 to vector<8x1xf32>
    %84 = arith.addf %82, %83 : vector<8x1xf32>
    %85 = math.rsqrt %84 : vector<8x1xf32>
    %86 = vector.broadcast %85 : vector<8x1xf32> to vector<8x32xf32>
    %87 = arith.mulf %77, %86 : vector<8x32xf32>
    %88 = vector.broadcast %69 : vector<1x32xf32> to vector<8x32xf32>
    %89 = arith.mulf %87, %88 : vector<8x32xf32>
    %90 = vector.broadcast %71 : vector<1x32xf32> to vector<8x32xf32>
    %91 = arith.addf %89, %90 : vector<8x32xf32>
    %92 = arith.truncf %91 : vector<8x32xf32> to vector<8x32xbf16>
    %c0_43 = arith.constant 0 : index
    %c0_44 = arith.constant 0 : index
    %c0_45 = arith.constant 0 : index
    %93 = vector.load %arg11[%c0_43, %c0_44, %c0_45] : memref<1x32x2048xbf16, #tpu.memory_space<vmem>>, vector<1x32x2048xbf16>
    %94 = vector.shape_cast %93 : vector<1x32x2048xbf16> to vector<32x2048xbf16>
    %cst_46 = arith.constant dense<0.000000e+00> : vector<8x2048xf32>
    %95 = tpu.matmul %92, %94, %cst_46 {dimension_numbers = #tpu.dot_dimension_numbers<[1], [0], [0], [1], [0, 0, 1, 1], [], []>} : vector<8x32xbf16>, vector<32x2048xbf16>, vector<8x2048xf32> -> vector<8x2048xf32>
    %c0_47 = arith.constant 0 : index
    %c0_48 = arith.constant 0 : index
    %c0_49 = arith.constant 0 : index
    %96 = vector.load %arg12[%c0_47, %c0_48, %c0_49] : memref<1x1x2048xf32, #tpu.memory_space<vmem>>, vector<1x1x2048xf32>
    %97 = vector.shape_cast %96 : vector<1x1x2048xf32> to vector<1x2048xf32>
    %98 = vector.broadcast %97 : vector<1x2048xf32> to vector<8x2048xf32>
    %99 = arith.addf %95, %98 : vector<8x2048xf32>
    %cst_50 = arith.constant 0.000000e+00 : f32
    %100 = vector.broadcast %cst_50 : f32 to vector<8x2048xf32>
    %101 = arith.maximumf %99, %100 : vector<8x2048xf32>
    %102 = arith.truncf %101 : vector<8x2048xf32> to vector<8x2048xbf16>
    %c0_51 = arith.constant 0 : index
    %c0_52 = arith.constant 0 : index
    %c0_53 = arith.constant 0 : index
    %103 = vector.load %arg13[%c0_51, %c0_52, %c0_53] : memref<1x2048x32xbf16, #tpu.memory_space<vmem>>, vector<1x2048x32xbf16>
    %104 = vector.shape_cast %103 : vector<1x2048x32xbf16> to vector<2048x32xbf16>
    %cst_54 = arith.constant dense<0.000000e+00> : vector<8x32xf32>
    %105 = tpu.matmul %102, %104, %cst_54 {dimension_numbers = #tpu.dot_dimension_numbers<[1], [0], [0], [1], [0, 0, 1, 1], [], []>} : vector<8x2048xbf16>, vector<2048x32xbf16>, vector<8x32xf32> -> vector<8x32xf32>
    %c0_55 = arith.constant 0 : index
    %c0_56 = arith.constant 0 : index
    %c0_57 = arith.constant 0 : index
    %106 = vector.load %arg14[%c0_55, %c0_56, %c0_57] : memref<1x1x32xf32, #tpu.memory_space<vmem>>, vector<1x1x32xf32>
    %107 = vector.shape_cast %106 : vector<1x1x32xf32> to vector<1x32xf32>
    %108 = vector.broadcast %107 : vector<1x32xf32> to vector<8x32xf32>
    %109 = arith.addf %105, %108 : vector<8x32xf32>
    %110 = arith.addf %91, %109 : vector<8x32xf32>
    %c0_58 = arith.constant 0 : index
    %c0_59 = arith.constant 0 : index
    %c0_60 = arith.constant 0 : index
    %111 = vector.load %arg15[%c0_58, %c0_59, %c0_60] : memref<1x1x32xf32, #tpu.memory_space<vmem>>, vector<1x1x32xf32>
    %112 = vector.shape_cast %111 : vector<1x1x32xf32> to vector<1x32xf32>
    %c0_61 = arith.constant 0 : index
    %c0_62 = arith.constant 0 : index
    %c0_63 = arith.constant 0 : index
    %113 = vector.load %arg16[%c0_61, %c0_62, %c0_63] : memref<1x1x32xf32, #tpu.memory_space<vmem>>, vector<1x1x32xf32>
    %114 = vector.shape_cast %113 : vector<1x1x32xf32> to vector<1x32xf32>
    %cst_64 = arith.constant dense<0.000000e+00> : vector<8xf32>
    %115 = vector.multi_reduction <add>, %110, %cst_64 [1] : vector<8x32xf32> to vector<8xf32>
    %116 = vector.shape_cast %115 : vector<8xf32> to vector<8x1xf32>
    %cst_65 = arith.constant 3.200000e+01 : f32
    %117 = vector.broadcast %cst_65 : f32 to vector<8x1xf32>
    %118 = arith.divf %116, %117 : vector<8x1xf32>
    %119 = vector.broadcast %118 : vector<8x1xf32> to vector<8x32xf32>
    %120 = arith.subf %110, %119 : vector<8x32xf32>
    %121 = arith.mulf %120, %120 : vector<8x32xf32>
    %cst_66 = arith.constant dense<0.000000e+00> : vector<8xf32>
    %122 = vector.multi_reduction <add>, %121, %cst_66 [1] : vector<8x32xf32> to vector<8xf32>
    %123 = vector.shape_cast %122 : vector<8xf32> to vector<8x1xf32>
    %cst_67 = arith.constant 3.200000e+01 : f32
    %124 = vector.broadcast %cst_67 : f32 to vector<8x1xf32>
    %125 = arith.divf %123, %124 : vector<8x1xf32>
    %cst_68 = arith.constant 9.99999974E-6 : f32
    %126 = vector.broadcast %cst_68 : f32 to vector<8x1xf32>
    %127 = arith.addf %125, %126 : vector<8x1xf32>
    %128 = math.rsqrt %127 : vector<8x1xf32>
    %129 = vector.broadcast %128 : vector<8x1xf32> to vector<8x32xf32>
    %130 = arith.mulf %120, %129 : vector<8x32xf32>
    %131 = vector.broadcast %112 : vector<1x32xf32> to vector<8x32xf32>
    %132 = arith.mulf %130, %131 : vector<8x32xf32>
    %133 = vector.broadcast %114 : vector<1x32xf32> to vector<8x32xf32>
    %134 = arith.addf %132, %133 : vector<8x32xf32>
    %c0_69 = arith.constant 0 : index
    %c0_70 = arith.constant 0 : index
    %135 = vector.load %arg20[%c0_69, %c0_70] : memref<8x32xf32, #tpu.memory_space<vmem>>, vector<8x32xf32>
    tpu.vector_store %arg20[%c0_69, %c0_70], %134 {strides = array<i32>} : memref<8x32xf32, #tpu.memory_space<vmem>>, vector<8x32xf32>,
    %c1_i32 = arith.constant 1 : i32
    %136 = arith.cmpi eq, %arg1, %c1_i32 : i32
    %137 = arith.extui %136 : i1 to i32
    %c0_i32_71 = arith.constant 0 : i32
    %138 = arith.cmpi ne, %137, %c0_i32_71 : i32
    scf.if %138 {
      %c0_72 = arith.constant 0 : index
      %c0_73 = arith.constant 0 : index
      %139 = vector.load %arg17[%c0_72, %c0_73] : memref<1x32xf32, #tpu.memory_space<vmem>>, vector<1x32xf32>
      %c0_74 = arith.constant 0 : index
      %c0_75 = arith.constant 0 : index
      %140 = vector.load %arg18[%c0_74, %c0_75] : memref<1x32xf32, #tpu.memory_space<vmem>>, vector<1x32xf32>
      %cst_76 = arith.constant dense<0.000000e+00> : vector<8xf32>
      %141 = vector.multi_reduction <add>, %134, %cst_76 [1] : vector<8x32xf32> to vector<8xf32>
      %142 = vector.shape_cast %141 : vector<8xf32> to vector<8x1xf32>
      %cst_77 = arith.constant 3.200000e+01 : f32
      %143 = vector.broadcast %cst_77 : f32 to vector<8x1xf32>
      %144 = arith.divf %142, %143 : vector<8x1xf32>
      %145 = vector.broadcast %144 : vector<8x1xf32> to vector<8x32xf32>
      %146 = arith.subf %134, %145 : vector<8x32xf32>
      %147 = arith.mulf %146, %146 : vector<8x32xf32>
      %cst_78 = arith.constant dense<0.000000e+00> : vector<8xf32>
      %148 = vector.multi_reduction <add>, %147, %cst_78 [1] : vector<8x32xf32> to vector<8xf32>
      %149 = vector.shape_cast %148 : vector<8xf32> to vector<8x1xf32>
      %cst_79 = arith.constant 3.200000e+01 : f32
      %150 = vector.broadcast %cst_79 : f32 to vector<8x1xf32>
      %151 = arith.divf %149, %150 : vector<8x1xf32>
      %cst_80 = arith.constant 9.99999974E-6 : f32
      %152 = vector.broadcast %cst_80 : f32 to vector<8x1xf32>
      %153 = arith.addf %151, %152 : vector<8x1xf32>
      %154 = math.rsqrt %153 : vector<8x1xf32>
      %155 = vector.broadcast %154 : vector<8x1xf32> to vector<8x32xf32>
      %156 = arith.mulf %146, %155 : vector<8x32xf32>
      %157 = vector.broadcast %139 : vector<1x32xf32> to vector<8x32xf32>
      %158 = arith.mulf %156, %157 : vector<8x32xf32>
      %159 = vector.broadcast %140 : vector<1x32xf32> to vector<8x32xf32>
      %160 = arith.addf %158, %159 : vector<8x32xf32>
      %161 = arith.truncf %160 : vector<8x32xf32> to vector<8x32xbf16>
      %c0_81 = arith.constant 0 : index
      %c0_82 = arith.constant 0 : index
      %c0_83 = arith.constant 0 : index
      %162 = vector.load %arg19[%c0_81, %c0_82, %c0_83] : memref<1x8x32xbf16, #tpu.memory_space<vmem>>, vector<1x8x32xbf16>
      %163 = vector.shape_cast %162 : vector<1x8x32xbf16> to vector<8x32xbf16>
      %164 = vector.shape_cast %161 : vector<8x32xbf16> to vector<1x8x32xbf16>
      tpu.vector_store %arg19[%c0_81, %c0_82, %c0_83], %164 {strides = array<i32>} : memref<1x8x32xbf16, #tpu.memory_space<vmem>>, vector<1x8x32xbf16>,
    } else {
    }
    return
  }
  func.func @transform_0(%arg0: i32, %arg1: i32) -> (i32, i32, i32) {
    %c0_i32 = arith.constant 0 : i32
    %c0_i32_0 = arith.constant 0 : i32
    %c0_i32_1 = arith.constant 0 : i32
    return %arg0, %c0_i32, %c0_i32_0 : i32, i32, i32
  }
  func.func @transform_1(%arg0: i32, %arg1: i32) -> (i32, i32, i32, i32) {
    %c0_i32 = arith.constant 0 : i32
    %c0_i32_0 = arith.constant 0 : i32
    %c0_i32_1 = arith.constant 0 : i32
    %c0_i32_2 = arith.constant 0 : i32
    return %arg1, %c0_i32, %c0_i32_0, %c0_i32_1 : i32, i32, i32, i32
  }
  func.func @transform_2(%arg0: i32, %arg1: i32) -> (i32, i32, i32, i32) {
    %c0_i32 = arith.constant 0 : i32
    %c0_i32_0 = arith.constant 0 : i32
    %c0_i32_1 = arith.constant 0 : i32
    %c0_i32_2 = arith.constant 0 : i32
    return %arg1, %c0_i32, %c0_i32_0, %c0_i32_1 : i32, i32, i32, i32
  }
  func.func @transform_3(%arg0: i32, %arg1: i32) -> (i32, i32, i32, i32) {
    %c0_i32 = arith.constant 0 : i32
    %c0_i32_0 = arith.constant 0 : i32
    %c0_i32_1 = arith.constant 0 : i32
    %c0_i32_2 = arith.constant 0 : i32
    return %arg1, %c0_i32, %c0_i32_0, %c0_i32_1 : i32, i32, i32, i32
  }
  func.func @transform_4(%arg0: i32, %arg1: i32) -> (i32, i32, i32, i32) {
    %c0_i32 = arith.constant 0 : i32
    %c0_i32_0 = arith.constant 0 : i32
    %c0_i32_1 = arith.constant 0 : i32
    %c0_i32_2 = arith.constant 0 : i32
    return %arg1, %c0_i32, %c0_i32_0, %c0_i32_1 : i32, i32, i32, i32
  }
  func.func @transform_5(%arg0: i32, %arg1: i32) -> (i32, i32, i32, i32) {
    %c0_i32 = arith.constant 0 : i32
    %c0_i32_0 = arith.constant 0 : i32
    %c0_i32_1 = arith.constant 0 : i32
    %c0_i32_2 = arith.constant 0 : i32
    return %arg1, %c0_i32, %c0_i32_0, %c0_i32_1 : i32, i32, i32, i32
  }
  func.func @transform_6(%arg0: i32, %arg1: i32) -> (i32, i32, i32) {
    %c0_i32 = arith.constant 0 : i32
    %c0_i32_0 = arith.constant 0 : i32
    %c0_i32_1 = arith.constant 0 : i32
    return %arg1, %c0_i32, %c0_i32_0 : i32, i32, i32
  }
  func.func @transform_7(%arg0: i32, %arg1: i32) -> (i32, i32, i32) {
    %c0_i32 = arith.constant 0 : i32
    %c0_i32_0 = arith.constant 0 : i32
    %c0_i32_1 = arith.constant 0 : i32
    return %arg1, %c0_i32, %c0_i32_0 : i32, i32, i32
  }
  func.func @transform_8(%arg0: i32, %arg1: i32) -> (i32, i32, i32) {
    %c0_i32 = arith.constant 0 : i32
    %c0_i32_0 = arith.constant 0 : i32
    %c0_i32_1 = arith.constant 0 : i32
    return %arg1, %c0_i32, %c0_i32_0 : i32, i32, i32
  }
  func.func @transform_9(%arg0: i32, %arg1: i32) -> (i32, i32, i32) {
    %c0_i32 = arith.constant 0 : i32
    %c0_i32_0 = arith.constant 0 : i32
    %c0_i32_1 = arith.constant 0 : i32
    return %arg1, %c0_i32, %c0_i32_0 : i32, i32, i32
  }
  func.func @transform_10(%arg0: i32, %arg1: i32) -> (i32, i32, i32) {
    %c0_i32 = arith.constant 0 : i32
    %c0_i32_0 = arith.constant 0 : i32
    %c0_i32_1 = arith.constant 0 : i32
    return %arg1, %c0_i32, %c0_i32_0 : i32, i32, i32
  }
  func.func @transform_11(%arg0: i32, %arg1: i32) -> (i32, i32, i32) {
    %c0_i32 = arith.constant 0 : i32
    %c0_i32_0 = arith.constant 0 : i32
    %c0_i32_1 = arith.constant 0 : i32
    return %arg1, %c0_i32, %c0_i32_0 : i32, i32, i32
  }
  func.func @transform_12(%arg0: i32, %arg1: i32) -> (i32, i32, i32) {
    %c0_i32 = arith.constant 0 : i32
    %c0_i32_0 = arith.constant 0 : i32
    %c0_i32_1 = arith.constant 0 : i32
    return %arg1, %c0_i32, %c0_i32_0 : i32, i32, i32
  }
  func.func @transform_13(%arg0: i32, %arg1: i32) -> (i32, i32, i32) {
    %c0_i32 = arith.constant 0 : i32
    %c0_i32_0 = arith.constant 0 : i32
    %c0_i32_1 = arith.constant 0 : i32
    return %arg1, %c0_i32, %c0_i32_0 : i32, i32, i32
  }
  func.func @transform_14(%arg0: i32, %arg1: i32) -> (i32, i32, i32) {
    %c0_i32 = arith.constant 0 : i32
    %c0_i32_0 = arith.constant 0 : i32
    %c0_i32_1 = arith.constant 0 : i32
    return %arg1, %c0_i32, %c0_i32_0 : i32, i32, i32
  }
  func.func @transform_15(%arg0: i32, %arg1: i32) -> (i32, i32) {
    %c0_i32 = arith.constant 0 : i32
    %c0_i32_0 = arith.constant 0 : i32
    %c0_i32_1 = arith.constant 0 : i32
    return %c0_i32, %c0_i32_0 : i32, i32
  }
  func.func @transform_16(%arg0: i32, %arg1: i32) -> (i32, i32) {
    %c0_i32 = arith.constant 0 : i32
    %c0_i32_0 = arith.constant 0 : i32
    %c0_i32_1 = arith.constant 0 : i32
    return %c0_i32, %c0_i32_0 : i32, i32
  }
  func.func @transform_17(%arg0: i32, %arg1: i32) -> (i32, i32, i32) {
    %c0_i32 = arith.constant 0 : i32
    %c0_i32_0 = arith.constant 0 : i32
    %c0_i32_1 = arith.constant 0 : i32
    return %arg0, %c0_i32, %c0_i32_0 : i32, i32, i32
  }
}

module attributes {stable_mosaic.version = 11 : i64} {
  func.func @_pool_cls_kernel(%arg0: memref<8x2x32xbf16, #tpu.memory_space<vmem>>, %arg1: memref<4x32x8xbf16, #tpu.memory_space<vmem>>, %arg2: memref<4x1x8xf32, #tpu.memory_space<vmem>>, %arg3: memref<4x32x16xbf16, #tpu.memory_space<vmem>>, %arg4: memref<4x1x16xf32, #tpu.memory_space<vmem>>, %arg5: memref<4x8x32xbf16, #tpu.memory_space<vmem>>, %arg6: memref<1x32xf32, #tpu.memory_space<vmem>>, %arg7: memref<32x256xbf16, #tpu.memory_space<vmem>>, %arg8: memref<1x256xf32, #tpu.memory_space<vmem>>, %arg9: memref<256x256xbf16, #tpu.memory_space<vmem>>, %arg10: memref<1x256xf32, #tpu.memory_space<vmem>>, %arg11: memref<256x128xbf16, #tpu.memory_space<vmem>>, %arg12: memref<1x128xf32, #tpu.memory_space<vmem>>, %arg13: memref<128x128xbf16, #tpu.memory_space<vmem>>, %arg14: memref<1x128xf32, #tpu.memory_space<vmem>>, %arg15: memref<128x64xbf16, #tpu.memory_space<vmem>>, %arg16: memref<1x64xf32, #tpu.memory_space<vmem>>, %arg17: memref<64x1xbf16, #tpu.memory_space<vmem>>, %arg18: memref<1x1xf32, #tpu.memory_space<vmem>>, %arg19: memref<2x1xf32, #tpu.memory_space<vmem>>) attributes {dimension_semantics = [], scalar_prefetch = 0 : i64, scratch_operands = 0 : i64, tpu.core_type = #tpu.core_type<tc>} {
    %c0 = arith.constant 0 : index
    %c0_0 = arith.constant 0 : index
    %c0_1 = arith.constant 0 : index
    %0 = vector.load %arg0[%c0, %c0_0, %c0_1] : memref<8x2x32xbf16, #tpu.memory_space<vmem>>, vector<8x2x32xbf16>
    %c0_2 = arith.constant 0 : index
    %c0_3 = arith.constant 0 : index
    %c0_4 = arith.constant 0 : index
    %1 = vector.load %arg1[%c0_2, %c0_3, %c0_4] : memref<4x32x8xbf16, #tpu.memory_space<vmem>>, vector<4x32x8xbf16>
    %c0_5 = arith.constant 0 : index
    %c0_6 = arith.constant 0 : index
    %c0_7 = arith.constant 0 : index
    %2 = vector.load %arg2[%c0_5, %c0_6, %c0_7] : memref<4x1x8xf32, #tpu.memory_space<vmem>>, vector<4x1x8xf32>
    %c0_8 = arith.constant 0 : index
    %c0_9 = arith.constant 0 : index
    %c0_10 = arith.constant 0 : index
    %3 = vector.load %arg3[%c0_8, %c0_9, %c0_10] : memref<4x32x16xbf16, #tpu.memory_space<vmem>>, vector<4x32x16xbf16>
    %c0_11 = arith.constant 0 : index
    %c0_12 = arith.constant 0 : index
    %c0_13 = arith.constant 0 : index
    %4 = vector.load %arg4[%c0_11, %c0_12, %c0_13] : memref<4x1x16xf32, #tpu.memory_space<vmem>>, vector<4x1x16xf32>
    %c0_14 = arith.constant 0 : index
    %c0_15 = arith.constant 0 : index
    %c0_16 = arith.constant 0 : index
    %5 = vector.load %arg5[%c0_14, %c0_15, %c0_16] : memref<4x8x32xbf16, #tpu.memory_space<vmem>>, vector<4x8x32xbf16>
    %c0_17 = arith.constant 0 : index
    %c0_18 = arith.constant 0 : index
    %6 = vector.load %arg6[%c0_17, %c0_18] : memref<1x32xf32, #tpu.memory_space<vmem>>, vector<1x32xf32>
    %7 = vector.shape_cast %0 : vector<8x2x32xbf16> to vector<8x1x2x32xbf16>
    %8 = vector.shape_cast %7 : vector<8x1x2x32xbf16> to vector<8x1x2x32xbf16>
    %9 = vector.broadcast %8 : vector<8x1x2x32xbf16> to vector<8x4x2x32xbf16>
    %10 = vector.shape_cast %9 : vector<8x4x2x32xbf16> to vector<32x2x32xbf16>
    %11 = vector.shape_cast %0 : vector<8x2x32xbf16> to vector<8x1x2x32xbf16>
    %12 = vector.shape_cast %11 : vector<8x1x2x32xbf16> to vector<8x1x2x32xbf16>
    %13 = vector.broadcast %12 : vector<8x1x2x32xbf16> to vector<8x4x2x32xbf16>
    %14 = vector.shape_cast %13 : vector<8x4x2x32xbf16> to vector<32x2x32xbf16>
    %15 = vector.shape_cast %1 : vector<4x32x8xbf16> to vector<1x4x32x8xbf16>
    %16 = vector.shape_cast %15 : vector<1x4x32x8xbf16> to vector<1x4x32x8xbf16>
    %17 = vector.broadcast %16 : vector<1x4x32x8xbf16> to vector<8x4x32x8xbf16>
    %18 = vector.shape_cast %17 : vector<8x4x32x8xbf16> to vector<32x32x8xbf16>
    %19 = vector.shape_cast %2 : vector<4x1x8xf32> to vector<1x4x1x8xf32>
    %20 = vector.shape_cast %19 : vector<1x4x1x8xf32> to vector<1x4x1x8xf32>
    %21 = vector.broadcast %20 : vector<1x4x1x8xf32> to vector<8x4x1x8xf32>
    %22 = vector.shape_cast %21 : vector<8x4x1x8xf32> to vector<32x1x8xf32>
    %23 = vector.shape_cast %3 : vector<4x32x16xbf16> to vector<1x4x32x16xbf16>
    %24 = vector.shape_cast %23 : vector<1x4x32x16xbf16> to vector<1x4x32x16xbf16>
    %25 = vector.broadcast %24 : vector<1x4x32x16xbf16> to vector<8x4x32x16xbf16>
    %26 = vector.shape_cast %25 : vector<8x4x32x16xbf16> to vector<32x32x16xbf16>
    %27 = vector.shape_cast %4 : vector<4x1x16xf32> to vector<1x4x1x16xf32>
    %28 = vector.shape_cast %27 : vector<1x4x1x16xf32> to vector<1x4x1x16xf32>
    %29 = vector.broadcast %28 : vector<1x4x1x16xf32> to vector<8x4x1x16xf32>
    %30 = vector.shape_cast %29 : vector<8x4x1x16xf32> to vector<32x1x16xf32>
    %31 = vector.shape_cast %5 : vector<4x8x32xbf16> to vector<1x4x8x32xbf16>
    %32 = vector.shape_cast %31 : vector<1x4x8x32xbf16> to vector<1x4x8x32xbf16>
    %33 = vector.broadcast %32 : vector<1x4x8x32xbf16> to vector<8x4x8x32xbf16>
    %34 = vector.shape_cast %33 : vector<8x4x8x32xbf16> to vector<32x8x32xbf16>
    "tpu.trace_start"() <{level = 10 : i32, message = "zld,zdk->zlk"}> : () -> ()
    %cst = arith.constant dense<0.000000e+00> : vector<32x2x8xf32>
    %35 = tpu.matmul %10, %18, %cst {dimension_numbers = #tpu.dot_dimension_numbers<[2], [1], [1], [2], [0, 0, 0, 1, 1, 2], [0], [0]>} : vector<32x2x32xbf16>, vector<32x32x8xbf16>, vector<32x2x8xf32> -> vector<32x2x8xf32>
    "tpu.trace_stop"() : () -> ()
    %36 = vector.broadcast %22 : vector<32x1x8xf32> to vector<32x2x8xf32>
    %37 = arith.addf %35, %36 : vector<32x2x8xf32>
    "tpu.trace_start"() <{level = 10 : i32, message = "zld,zdk->zlk"}> : () -> ()
    %cst_19 = arith.constant dense<0.000000e+00> : vector<32x2x16xf32>
    %38 = tpu.matmul %14, %26, %cst_19 {dimension_numbers = #tpu.dot_dimension_numbers<[2], [1], [1], [2], [0, 0, 0, 1, 1, 2], [0], [0]>} : vector<32x2x32xbf16>, vector<32x32x16xbf16>, vector<32x2x16xf32> -> vector<32x2x16xf32>
    "tpu.trace_stop"() : () -> ()
    %39 = vector.broadcast %30 : vector<32x1x16xf32> to vector<32x2x16xf32>
    %40 = arith.addf %38, %39 : vector<32x2x16xf32>
    %41 = vector.extract_strided_slice %40 {offsets = [0, 0, 0], sizes = [32, 2, 8], strides = [1, 1, 1]} : vector<32x2x16xf32> to vector<32x2x8xf32>
    %42 = vector.extract_strided_slice %40 {offsets = [0, 0, 8], sizes = [32, 2, 8], strides = [1, 1, 1]} : vector<32x2x16xf32> to vector<32x2x8xf32>
    %43 = arith.truncf %37 : vector<32x2x8xf32> to vector<32x2x8xbf16>
    %44 = arith.truncf %41 : vector<32x2x8xf32> to vector<32x2x8xbf16>
    "tpu.trace_start"() <{level = 10 : i32, message = "zqd,zkd->zqk"}> : () -> ()
    %cst_20 = arith.constant dense<0.000000e+00> : vector<32x2x2xf32>
    %45 = tpu.matmul %43, %44, %cst_20 {dimension_numbers = #tpu.dot_dimension_numbers<[2], [2], [1], [1], [0, 0, 0, 1, 1, 1], [0], [0]>} : vector<32x2x8xbf16>, vector<32x2x8xbf16>, vector<32x2x2xf32> -> vector<32x2x2xf32>
    "tpu.trace_stop"() : () -> ()
    %cst_21 = arith.constant dense<0xFF800000> : vector<32x2xf32>
    %46 = vector.multi_reduction <maximumf>, %45, %cst_21 [2] : vector<32x2x2xf32> to vector<32x2xf32>
    %47 = vector.shape_cast %46 : vector<32x2xf32> to vector<32x2x1xf32>
    %48 = vector.broadcast %47 : vector<32x2x1xf32> to vector<32x2x2xf32>
    %49 = arith.subf %45, %48 : vector<32x2x2xf32>
    %50 = math.exp %49 : vector<32x2x2xf32>
    %cst_22 = arith.constant dense<0.000000e+00> : vector<32x2xf32>
    %51 = vector.multi_reduction <add>, %50, %cst_22 [2] : vector<32x2x2xf32> to vector<32x2xf32>
    %52 = vector.shape_cast %51 : vector<32x2xf32> to vector<32x2x1xf32>
    %53 = vector.broadcast %52 : vector<32x2x1xf32> to vector<32x2x2xf32>
    %54 = arith.divf %50, %53 : vector<32x2x2xf32>
    %55 = arith.truncf %54 : vector<32x2x2xf32> to vector<32x2x2xbf16>
    %56 = arith.truncf %42 : vector<32x2x8xf32> to vector<32x2x8xbf16>
    "tpu.trace_start"() <{level = 10 : i32, message = "zqk,zkd->zqd"}> : () -> ()
    %cst_23 = arith.constant dense<0.000000e+00> : vector<32x2x8xf32>
    %57 = tpu.matmul %55, %56, %cst_23 {dimension_numbers = #tpu.dot_dimension_numbers<[2], [1], [1], [2], [0, 0, 0, 1, 1, 2], [0], [0]>} : vector<32x2x2xbf16>, vector<32x2x8xbf16>, vector<32x2x8xf32> -> vector<32x2x8xf32>
    "tpu.trace_stop"() : () -> ()
    %58 = arith.truncf %57 : vector<32x2x8xf32> to vector<32x2x8xbf16>
    "tpu.trace_start"() <{level = 10 : i32, message = "zqd,zde->zqe"}> : () -> ()
    %cst_24 = arith.constant dense<0.000000e+00> : vector<32x2x32xf32>
    %59 = tpu.matmul %58, %34, %cst_24 {dimension_numbers = #tpu.dot_dimension_numbers<[2], [1], [1], [2], [0, 0, 0, 1, 1, 2], [0], [0]>} : vector<32x2x8xbf16>, vector<32x8x32xbf16>, vector<32x2x32xf32> -> vector<32x2x32xf32>
    "tpu.trace_stop"() : () -> ()
    %60 = vector.shape_cast %59 : vector<32x2x32xf32> to vector<8x4x2x32xf32>
    %cst_25 = arith.constant dense<0.000000e+00> : vector<8x2x32xf32>
    %61 = vector.multi_reduction <add>, %60, %cst_25 [1] : vector<8x4x2x32xf32> to vector<8x2x32xf32>
    %62 = vector.shape_cast %6 : vector<1x32xf32> to vector<1x1x32xf32>
    %63 = vector.broadcast %62 : vector<1x1x32xf32> to vector<8x2x32xf32>
    %64 = arith.addf %61, %63 : vector<8x2x32xf32>
    %cst_26 = arith.constant dense<0xFF800000> : vector<2x32xf32>
    %65 = vector.multi_reduction <maximumf>, %64, %cst_26 [0] : vector<8x2x32xf32> to vector<2x32xf32>
    %66 = arith.truncf %65 : vector<2x32xf32> to vector<2x32xbf16>
    %c0_27 = arith.constant 0 : index
    %c0_28 = arith.constant 0 : index
    %67 = vector.load %arg7[%c0_27, %c0_28] : memref<32x256xbf16, #tpu.memory_space<vmem>>, vector<32x256xbf16>
    %cst_29 = arith.constant dense<0.000000e+00> : vector<2x256xf32>
    %68 = tpu.matmul %66, %67, %cst_29 {dimension_numbers = #tpu.dot_dimension_numbers<[1], [0], [0], [1], [0, 0, 1, 1], [], []>} : vector<2x32xbf16>, vector<32x256xbf16>, vector<2x256xf32> -> vector<2x256xf32>
    %c0_30 = arith.constant 0 : index
    %c0_31 = arith.constant 0 : index
    %69 = vector.load %arg8[%c0_30, %c0_31] : memref<1x256xf32, #tpu.memory_space<vmem>>, vector<1x256xf32>
    %70 = vector.broadcast %69 : vector<1x256xf32> to vector<2x256xf32>
    %71 = arith.addf %68, %70 : vector<2x256xf32>
    %cst_32 = arith.constant 5.000000e-01 : f32
    %72 = vector.broadcast %cst_32 : f32 to vector<2x256xf32>
    %73 = arith.mulf %72, %71 : vector<2x256xf32>
    %cst_33 = arith.constant 0.707106769 : f32
    %74 = vector.broadcast %cst_33 : f32 to vector<2x256xf32>
    %75 = arith.mulf %71, %74 : vector<2x256xf32>
    %76 = math.erf %75 : vector<2x256xf32>
    %cst_34 = arith.constant 1.000000e+00 : f32
    %77 = vector.broadcast %cst_34 : f32 to vector<2x256xf32>
    %78 = arith.addf %77, %76 : vector<2x256xf32>
    %79 = arith.mulf %73, %78 : vector<2x256xf32>
    %80 = arith.truncf %79 : vector<2x256xf32> to vector<2x256xbf16>
    %c0_35 = arith.constant 0 : index
    %c0_36 = arith.constant 0 : index
    %81 = vector.load %arg9[%c0_35, %c0_36] : memref<256x256xbf16, #tpu.memory_space<vmem>>, vector<256x256xbf16>
    %cst_37 = arith.constant dense<0.000000e+00> : vector<2x256xf32>
    %82 = tpu.matmul %80, %81, %cst_37 {dimension_numbers = #tpu.dot_dimension_numbers<[1], [0], [0], [1], [0, 0, 1, 1], [], []>} : vector<2x256xbf16>, vector<256x256xbf16>, vector<2x256xf32> -> vector<2x256xf32>
    %c0_38 = arith.constant 0 : index
    %c0_39 = arith.constant 0 : index
    %83 = vector.load %arg10[%c0_38, %c0_39] : memref<1x256xf32, #tpu.memory_space<vmem>>, vector<1x256xf32>
    %84 = vector.broadcast %83 : vector<1x256xf32> to vector<2x256xf32>
    %85 = arith.addf %82, %84 : vector<2x256xf32>
    %cst_40 = arith.constant 5.000000e-01 : f32
    %86 = vector.broadcast %cst_40 : f32 to vector<2x256xf32>
    %87 = arith.mulf %86, %85 : vector<2x256xf32>
    %cst_41 = arith.constant 0.707106769 : f32
    %88 = vector.broadcast %cst_41 : f32 to vector<2x256xf32>
    %89 = arith.mulf %85, %88 : vector<2x256xf32>
    %90 = math.erf %89 : vector<2x256xf32>
    %cst_42 = arith.constant 1.000000e+00 : f32
    %91 = vector.broadcast %cst_42 : f32 to vector<2x256xf32>
    %92 = arith.addf %91, %90 : vector<2x256xf32>
    %93 = arith.mulf %87, %92 : vector<2x256xf32>
    %94 = arith.addf %79, %93 : vector<2x256xf32>
    %95 = arith.truncf %94 : vector<2x256xf32> to vector<2x256xbf16>
    %c0_43 = arith.constant 0 : index
    %c0_44 = arith.constant 0 : index
    %96 = vector.load %arg11[%c0_43, %c0_44] : memref<256x128xbf16, #tpu.memory_space<vmem>>, vector<256x128xbf16>
    %cst_45 = arith.constant dense<0.000000e+00> : vector<2x128xf32>
    %97 = tpu.matmul %95, %96, %cst_45 {dimension_numbers = #tpu.dot_dimension_numbers<[1], [0], [0], [1], [0, 0, 1, 1], [], []>} : vector<2x256xbf16>, vector<256x128xbf16>, vector<2x128xf32> -> vector<2x128xf32>
    %c0_46 = arith.constant 0 : index
    %c0_47 = arith.constant 0 : index
    %98 = vector.load %arg12[%c0_46, %c0_47] : memref<1x128xf32, #tpu.memory_space<vmem>>, vector<1x128xf32>
    %99 = vector.broadcast %98 : vector<1x128xf32> to vector<2x128xf32>
    %100 = arith.addf %97, %99 : vector<2x128xf32>
    %cst_48 = arith.constant 5.000000e-01 : f32
    %101 = vector.broadcast %cst_48 : f32 to vector<2x128xf32>
    %102 = arith.mulf %101, %100 : vector<2x128xf32>
    %cst_49 = arith.constant 0.707106769 : f32
    %103 = vector.broadcast %cst_49 : f32 to vector<2x128xf32>
    %104 = arith.mulf %100, %103 : vector<2x128xf32>
    %105 = math.erf %104 : vector<2x128xf32>
    %cst_50 = arith.constant 1.000000e+00 : f32
    %106 = vector.broadcast %cst_50 : f32 to vector<2x128xf32>
    %107 = arith.addf %106, %105 : vector<2x128xf32>
    %108 = arith.mulf %102, %107 : vector<2x128xf32>
    %109 = arith.truncf %108 : vector<2x128xf32> to vector<2x128xbf16>
    %c0_51 = arith.constant 0 : index
    %c0_52 = arith.constant 0 : index
    %110 = vector.load %arg13[%c0_51, %c0_52] : memref<128x128xbf16, #tpu.memory_space<vmem>>, vector<128x128xbf16>
    %cst_53 = arith.constant dense<0.000000e+00> : vector<2x128xf32>
    %111 = tpu.matmul %109, %110, %cst_53 {dimension_numbers = #tpu.dot_dimension_numbers<[1], [0], [0], [1], [0, 0, 1, 1], [], []>} : vector<2x128xbf16>, vector<128x128xbf16>, vector<2x128xf32> -> vector<2x128xf32>
    %c0_54 = arith.constant 0 : index
    %c0_55 = arith.constant 0 : index
    %112 = vector.load %arg14[%c0_54, %c0_55] : memref<1x128xf32, #tpu.memory_space<vmem>>, vector<1x128xf32>
    %113 = vector.broadcast %112 : vector<1x128xf32> to vector<2x128xf32>
    %114 = arith.addf %111, %113 : vector<2x128xf32>
    %cst_56 = arith.constant 5.000000e-01 : f32
    %115 = vector.broadcast %cst_56 : f32 to vector<2x128xf32>
    %116 = arith.mulf %115, %114 : vector<2x128xf32>
    %cst_57 = arith.constant 0.707106769 : f32
    %117 = vector.broadcast %cst_57 : f32 to vector<2x128xf32>
    %118 = arith.mulf %114, %117 : vector<2x128xf32>
    %119 = math.erf %118 : vector<2x128xf32>
    %cst_58 = arith.constant 1.000000e+00 : f32
    %120 = vector.broadcast %cst_58 : f32 to vector<2x128xf32>
    %121 = arith.addf %120, %119 : vector<2x128xf32>
    %122 = arith.mulf %116, %121 : vector<2x128xf32>
    %123 = arith.addf %108, %122 : vector<2x128xf32>
    %124 = arith.truncf %123 : vector<2x128xf32> to vector<2x128xbf16>
    %c0_59 = arith.constant 0 : index
    %c0_60 = arith.constant 0 : index
    %125 = vector.load %arg15[%c0_59, %c0_60] : memref<128x64xbf16, #tpu.memory_space<vmem>>, vector<128x64xbf16>
    %cst_61 = arith.constant dense<0.000000e+00> : vector<2x64xf32>
    %126 = tpu.matmul %124, %125, %cst_61 {dimension_numbers = #tpu.dot_dimension_numbers<[1], [0], [0], [1], [0, 0, 1, 1], [], []>} : vector<2x128xbf16>, vector<128x64xbf16>, vector<2x64xf32> -> vector<2x64xf32>
    %c0_62 = arith.constant 0 : index
    %c0_63 = arith.constant 0 : index
    %127 = vector.load %arg16[%c0_62, %c0_63] : memref<1x64xf32, #tpu.memory_space<vmem>>, vector<1x64xf32>
    %128 = vector.broadcast %127 : vector<1x64xf32> to vector<2x64xf32>
    %129 = arith.addf %126, %128 : vector<2x64xf32>
    %cst_64 = arith.constant 5.000000e-01 : f32
    %130 = vector.broadcast %cst_64 : f32 to vector<2x64xf32>
    %131 = arith.mulf %130, %129 : vector<2x64xf32>
    %cst_65 = arith.constant 0.707106769 : f32
    %132 = vector.broadcast %cst_65 : f32 to vector<2x64xf32>
    %133 = arith.mulf %129, %132 : vector<2x64xf32>
    %134 = math.erf %133 : vector<2x64xf32>
    %cst_66 = arith.constant 1.000000e+00 : f32
    %135 = vector.broadcast %cst_66 : f32 to vector<2x64xf32>
    %136 = arith.addf %135, %134 : vector<2x64xf32>
    %137 = arith.mulf %131, %136 : vector<2x64xf32>
    %138 = arith.truncf %137 : vector<2x64xf32> to vector<2x64xbf16>
    %c0_67 = arith.constant 0 : index
    %c0_68 = arith.constant 0 : index
    %139 = vector.load %arg17[%c0_67, %c0_68] : memref<64x1xbf16, #tpu.memory_space<vmem>>, vector<64x1xbf16>
    %cst_69 = arith.constant dense<0.000000e+00> : vector<2x1xf32>
    %140 = tpu.matmul %138, %139, %cst_69 {dimension_numbers = #tpu.dot_dimension_numbers<[1], [0], [0], [1], [0, 0, 1, 1], [], []>} : vector<2x64xbf16>, vector<64x1xbf16>, vector<2x1xf32> -> vector<2x1xf32>
    %c0_70 = arith.constant 0 : index
    %c0_71 = arith.constant 0 : index
    %141 = vector.load %arg18[%c0_70, %c0_71] : memref<1x1xf32, #tpu.memory_space<vmem>>, vector<1x1xf32>
    %142 = vector.broadcast %141 : vector<1x1xf32> to vector<2x1xf32>
    %143 = arith.addf %140, %142 : vector<2x1xf32>
    %c0_72 = arith.constant 0 : index
    %c0_73 = arith.constant 0 : index
    %144 = vector.load %arg19[%c0_72, %c0_73] : memref<2x1xf32, #tpu.memory_space<vmem>>, vector<2x1xf32>
    tpu.vector_store %arg19[%c0_72, %c0_73], %143 {strides = array<i32>} : memref<2x1xf32, #tpu.memory_space<vmem>>, vector<2x1xf32>,
    return
  }
}

</mosaic_0001>

<bundles_post_ra>
// kernel: forward.5
= control target key start
LH: loop header
LB: loop body
LE: loop exit
PB: predicated region body
PF: predicated region fallthrough
CT: control target
= control target key end

     0   :  { %s473_s21 = smov 0   ;;  %s509_s0 = inlined_call_operand.vmem [shape: f32[2,8,4], index: 0, kind: input, shape index: {}]   ;;  %s510_s1 = inlined_call_operand.vmem [shape: bf16[4,32], index: 1, kind: input, shape index: {}]   ;;  %s511_s2 = inlined_call_operand.vmem [shape: f32[1,32], index: 2, kind: input, shape index: {}]   ;;  %s512_s3 = inlined_call_operand.vmem [shape: f32[1,32], index: 3, kind: input, shape index: {}]   ;;  %s513_s4 = inlined_call_operand.vmem [shape: f32[1,32], index: 4, kind: input, shape index: {}]   ;;  %s514_s5 = inlined_call_operand.vmem [shape: f32[8,32], index: 5, kind: input, shape index: {}]   ;;  %s515_s6 = inlined_call_operand.vmem [shape: bf16[2,8,32], index: 6, kind: output, shape index: {}]  }
   0x1 LB: > { %s395_s22 = sadd.s32 4294967295, %s434_s21   ;;  %p399_p0 = scmp.ge.s32.totalorder %s434_s21, 1  ;;  %s434_s21 = sphi %s473_s21, %s16_s21  }
   0x2   : > { %p211_p1 = scmp.lt.s32.totalorder %s434_s21, 3 }
   0x4   : > { %p212_p2 = pnand %p399_p0, %p211_p1 }
   0x5   : > { %v250_v0 = vld [vmem:[%s510_s1] sm:$0x3] (!%p212_p2)  ;;  %vm262_vm0 = vcmask (!%p212_p2), 1041408   ;;  %p239_p3 = scmp.lt.s32.totalorder (!%p212_p2), %s395_s22, 1  ;;  %v436_v1 = vmov (!%p212_p2), 0.0   ;;  %vm437_vm1 = vmmov (!%p212_p2), 0  }
   0x6   : > { %215 = sbr.rel (%p212_p2) target bundleno = 551 (0x227), region = 44  ;;  %410 = vmatprep.subr.bf16.mxu0 (!%p212_p2), %v436_v1  ;;  %v264_v2 = vsel (!%p212_p2), %vm262_vm0, %v250_v0, 0  ;;  %412 = vmatprep.mubr.msk.bf16.mxu0 (!%p212_p2), %vm437_vm1, %v436_v1  ;;  %vm258_vm2 = vcmask (!%p212_p2), 31744   ;;  %v402_v5 = vld [vmem:[%s511_s2] ss:$0 sm:$0xff] (!%p212_p2)  ;;  %vm308_vm3 = vcmask (!%p212_p2), 261120  }
   0x7   : > { %411 = vmatpush3.bf16.msra.mxu0 (!%p212_p2), %v264_v2  ;;  %v404_v21 = vld [vmem:[%s512_s3] ss:$0 sm:$0xff] (!%p212_p2)  ;;  %vm340_vm4 = vcmask (!%p212_p2), 257024  }
   0x8   : > { %v405_v23 = vld [vmem:[%s513_s4] ss:$0 sm:$0xff] (!%p212_p2) }
   0x9   : > { %v337_v25 = vld [vmem:[%s514_s5] sm:$0xff] (!%p212_p2) }
   0xd   : > { %s517_s22 = smov (!%p239_p3, %s395_s22), 1 }
   0xe   : > { %s400_s25 = sshll.u32 %s517_s22, 3  ;;  %s401_s13 = sshll.u32 %s517_s22, 2 }
   0xf   : > { %s242_s28 = scalar_lea.vmem %s509_s0, %s400_s25  ;;  %s246_s16 = scalar_lea.vmem %s515_s6, %s401_s13 }
  0x10   : > { %v248_v3 = vld [vmem:[%s242_s28] sm:$0xff] }
  0x11   : > { %v249_v4 = vpack.c.bf16 %v248_v3, %v248_v3 }
  0x13   : > { %413 = vmatmul.mubr.msk.bf16.vlgmr.msra.gmra.mrb[0].mxu0 %vm258_vm2, %v249_v4 }
  0xe6   : > { %v300_v6 = vpop.f32.mrb[0].mxu0 }
  0xe7   : > { %v301_v7 = vadd.f32 %v402_v5, %v300_v6  ;;  %v414_v8 = vpop.f32.mrb[1].mxu0 }
  0xe8   : > { %v303_v9 = vpop.f32.mrb[2].mxu0 }
  0xe9   : > { %v415_v10 = vpop.f32.mrb[3].mxu0  ;;  %v309_v11 = vsel %vm308_vm3, %v301_v7, 0.0 }
  0xea   : > { %310 = vadd.xlane.f32.xlu0 %v309_v11 }
 0x177   : > { %v311_v12 = vpop.xlane.xlu0 %310 }
 0x178   : > { %v313_v13 = vmul.f32 0.03125, %v311_v12 }
 0x17a   : > { %v314_v14 = vsub.f32 %v301_v7, %v313_v13 }
 0x17c   : > { %v315_v15 = vmul.f32 %v314_v14, %v314_v14 }
 0x17e   : > { %v316_v16 = vsel %vm308_vm3, %v315_v15, 0.0 }
 0x17f   : > { %317 = vadd.xlane.f32.xlu0 %v316_v16 }
 0x20c   : > { %v318_v17 = vpop.xlane.xlu0 %317 }
 0x20d   : > { %v319_v18 = vmul.f32 0.03125, %v318_v17 }
 0x20f   : > { %v320_v19 = vadd.f32 1e-05, %v319_v18 }
 0x211   : > { %426 = vrsqrt.f32 %v320_v19 }
 0x21b   : > { %v427_v20 = vpop.eup %426 }
 0x21c   : > { %v322_v22 = vmul.f32 %v427_v20, %v314_v14 }
 0x21e   : > { %v329_v24 = vmul.f32 %v404_v21, %v322_v22 }
 0x220   : > { %v336_v26 = vadd.f32 %v405_v23, %v329_v24 }
 0x222   : > { %v338_v27 = vadd.f32 %v337_v25, %v336_v26 }
 0x224   : > { %v339_v28 = vpack.c.bf16 %v338_v27, %v338_v27 }
 0x226   : > { %341 = vst.msk [vmem:[%s246_s16] sm:$0xf] %vm340_vm4, %v339_v28 }
 0x227 PF: > { %s16_s21 = sadd.s32 1, %s434_s21  }
 0x228   : > { %p13_p4 = scmp.ge.s32.totalorder %s16_s21, 4  }
 0x22a   :  { %15 = sbr.rel (!%p13_p4) target bundleno = 1 (0x1), region = 74 }

// kernel: forward.6
= control target key start
LH: loop header
LB: loop body
LE: loop exit
PB: predicated region body
PF: predicated region fallthrough
CT: control target
= control target key end

     0   :  { %s5212_s24 = smov 0   ;;  %s5214_s25 = smov 0   ;;  %s5812_s0 = inlined_call_operand.vmem [shape: bf16[2,8,32], index: 0, kind: input, shape index: {}]   ;;  %s5813_s1 = inlined_call_operand.vmem [shape: bf16[2,4,32,8], index: 1, kind: input, shape index: {}]   ;;  %s5814_s2 = inlined_call_operand.vmem [shape: f32[2,4,1,8], index: 2, kind: input, shape index: {}]   ;;  %s5815_s3 = inlined_call_operand.vmem [shape: bf16[2,4,32,16], index: 3, kind: input, shape index: {}]   ;;  %s5816_s4 = inlined_call_operand.vmem [shape: f32[2,4,1,16], index: 4, kind: input, shape index: {}]   ;;  %s5817_s5 = inlined_call_operand.vmem [shape: bf16[2,4,8,32], index: 5, kind: input, shape index: {}]   ;;  %s5818_s6 = inlined_call_operand.vmem [shape: f32[2,1,32], index: 6, kind: input, shape index: {}]   ;;  %s5819_s7 = inlined_call_operand.vmem [shape: f32[2,1,32], index: 7, kind: input, shape index: {}]   ;;  %s5820_s8 = inlined_call_operand.vmem [shape: f32[2,1,32], index: 8, kind: input, shape index: {}]   ;;  %s5821_s9 = inlined_call_operand.vmem [shape: bf16[2,32,2048], index: 9, kind: input, shape index: {}]   ;;  %s5822_s10 = inlined_call_operand.vmem [shape: f32[2,1,2048], index: 10, kind: input, shape index: {}]   ;;  %s5823_s11 = inlined_call_operand.vmem [shape: bf16[2,2048,32], index: 11, kind: input, shape index: {}]   ;;  %s5824_s12 = inlined_call_operand.vmem [shape: f32[2,1,32], index: 12, kind: input, shape index: {}]   ;;  %s5825_s13 = inlined_call_operand.vmem [shape: f32[2,1,32], index: 13, kind: input, shape index: {}]   ;;  %s5826_s14 = inlined_call_operand.vmem [shape: f32[2,1,32], index: 14, kind: input, shape index: {}]   ;;  %s5827_s15 = inlined_call_operand.vmem [shape: f32[1,32], index: 15, kind: input, shape index: {}]   ;;  %s5828_s16 = inlined_call_operand.vmem [shape: f32[1,32], index: 16, kind: input, shape index: {}]   ;;  %s5829_s17 = inlined_call_operand.vmem [shape: bf16[2,8,32], index: 17, kind: output, shape index: {}]  }
   0x1   :  { %5837 = sst [smem:[#allocation12_spill]] %s5812_s0  ;;  %s5216_s26 = smov 0  }
   0x2   :  { %5838 = sst [smem:[#allocation13_spill]] %s5813_s1  ;;  %s5218_s27 = smov 0  }
   0x3   :  { %5839 = sst [smem:[#allocation14_spill]] %s5814_s2  ;;  %s5220_s28 = smov 0  }
   0x4   :  { %5840 = sst [smem:[#allocation15_spill]] %s5815_s3 }
   0x5   :  { %5841 = sst [smem:[#allocation16_spill]] %s5816_s4 }
   0x6   :  { %5842 = sst [smem:[#allocation17_spill]] %s5817_s5 }
   0x7   :  { %5843 = sst [smem:[#allocation18_spill]] %s5821_s9 }
   0x8   :  { %5844 = sst [smem:[#allocation19_spill]] %s5822_s10 }
   0x9   :  { %5845 = sst [smem:[#allocation20_spill]] %s5826_s14 }
   0xa   :  { %5846 = sst [smem:[#allocation21_spill]] %s5827_s15 }
   0xb   :  { %5847 = sst [smem:[#allocation22_spill]] %s5828_s16 }
   0xc   :  { %5848 = sst [smem:[#allocation23_spill]] %s5829_s17 }
   0xd LB: > { %5849 = sst [smem:[#allocation3_spill]] %s5100_s24  ;;  %s36_s29 = sadd.s32 1, %s5108_s26  ;;  %s5116_s28 = sphi %s5220_s28, %s27_s28   ;;  %s5112_s27 = sphi %s5218_s27, %s5883_s27   ;;  %s5108_s26 = sphi %s5216_s26, %s5882_s26   ;;  %s5104_s25 = sphi %s5214_s25, %s5881_s25   ;;  %s5100_s24 = sphi %s5212_s24, %s5880_s24  }
   0xe   : > { %5850 = sst [smem:[#allocation4_spill]] %s5108_s26  ;;  %s39_s0 = sadd.s32 1, %s5112_s27 }
   0xf   : > { %5851 = sst [smem:[#allocation5_spill]] %s5112_s27  ;;  %p37_p0 = scmp.ge.s32.totalorder %s36_s29, 2 }
  0x10   : > { %5852 = sst [smem:[#allocation6_spill]] %s5116_s28  ;;  %p4262_p1 = scmp.ge.s32.totalorder %s5116_s28, 1 }
  0x11   : > { %p623_p2 = scmp.lt.s32.totalorder %s5116_s28, 5  ;;  %s5885_s29 = smov (%p37_p0, %s36_s29), 0 }
  0x12   : > { %5853 = sst [smem:[#allocation7_spill]] %s5885_s29  ;;  %s5887_s0 = smov (!%p37_p0, %s39_s0), %s5112_s27 }
  0x13   : > { %p624_p3 = pnand %p4262_p1, %p623_p2  ;;  %p41_p4 = scmp.ge.s32.totalorder %s5887_s0, 2 }
  0x15   : > { %s5889_s0 = smov (%p41_p4, %s5887_s0), 0  ;;  %627 = sbr.rel (%p624_p3) target bundleno = 2815 (0xaff), region = 88 }
  0x16   : > { %5854 = sst [smem:[#allocation8_spill]] %s5889_s0 }
  0x1c   : > { %p728_p5 = scmp.lt.s32.totalorder %s5104_s25, 1  ;;  %p732_p6 = scmp.lt.s32.totalorder %s5100_s24, 1 }
  0x1d   : > { %s5855_s20 = sld [smem:[#allocation12_spill]]  ;;  %s5856_s29 = sld [smem:[#allocation13_spill]] }
  0x1e   : > { %s5891_s25 = smov (!%p728_p5, %s5104_s25), 1  ;;  %s5858_s2 = sld [smem:[#allocation14_spill]] }
  0x1f   : > { %s5246_s30 = scalar_select %p732_p6, %s5100_s24, 1 }
  0x20   : > { %s4263_s18 = sshll.u32 %s5891_s25, 2  ;;  %s5860_s3 = sld [smem:[#allocation15_spill]] }
  0x21   : > { %s4502_s22 = sshll.u32 %s5246_s30, 6  ;;  %s4266_s26 = sshll.u32 %s5246_s30, 2 }
  0x22   : > { %s5861_s4 = sld [smem:[#allocation16_spill]]  ;;  %s5862_s5 = sld [smem:[#allocation17_spill]] }
  0x23   : > { %s731_s21 = scalar_lea.vmem %s5855_s20, %s4263_s18  ;;  %s5255_s27 = scalar_lea.vmem %s5856_s29, %s4502_s22 }
  0x24   : > { %5857 = sst [smem:[#allocation9_spill]] %s5255_s27  ;;  %s5261_s15 = scalar_lea.vmem %s5858_s2, %s4266_s26 }
  0x25   : > { %5859 = sst [smem:[#allocation10_spill]] %s5261_s15  ;;  %s4504_s29 = sshll.u32 %s5246_s30, 4 }
  0x26   : > { %s5266_s19 = scalar_lea.vmem %s5860_s3, %s4502_s22  ;;  %s5863_s10 = sld [smem:[#allocation19_spill]] }
  0x27   : > { %s5865_s9 = sld [smem:[#allocation18_spill]]  ;;  %s4506_s16 = sshll.u32 %s5246_s30, 10 }
  0x28   : > { %s5271_s0 = scalar_lea.vmem %s5861_s4, %s4266_s26  ;;  %s5277_s17 = scalar_lea.vmem %s5862_s5, %s4504_s29 }
  0x29   : > { %s4505_s26 = sshll.u32 %s5246_s30, 8  ;;  %s5306_s14 = scalar_lea.vmem %s5823_s11, %s4506_s16 }
  0x2a   : > { %s780_s25 = scalar_lea.vmem %s5824_s12, %s5246_s30  ;;  %s783_s3 = scalar_lea.vmem %s5825_s13, %s5246_s30 }
  0x2b   : > { %s5868_s2 = sld [smem:[#allocation3_spill]] }
  0x2c   : > { %s5295_s4 = scalar_lea.vmem %s5863_s10, %s4504_s29  ;;  %s5866_s10 = sld [smem:[#allocation20_spill]] }
  0x2d   : > { %5864 = sst [smem:[#allocation11_spill]] %s5295_s4  ;;  %s5300_s5 = scalar_lea.vmem %s5865_s9, %s4505_s26 }
  0x2e   : > { %s5867_s9 = sld [smem:[#allocation23_spill]] }
  0x31   : > { %p4278_p7 = scmp.ne.s32.totalorder %s5868_s2, 0 }
  0x32   : > { %s786_s27 = scalar_lea.vmem %s5866_s10, %s5246_s30  ;;  %v796_v0 = vld [vmem:[%s731_s21] sm:$0xf] (!%p4278_p7)  ;;  %vm798_vm0 = vcmask (!%p4278_p7), 261120  }
  0x33   : > { %795 = sbr.rel (%p4278_p7) target bundleno = 58 (0x3a), region = 92  ;;  %v797_v1 = vunpack.c.l.bf16 (!%p4278_p7), %v796_v0 }
  0x34   : > { %s5323_s4 = scalar_lea.vmem %s5867_s9, %s4263_s18 }
  0x35   : > { %799 = vst.msk [vmem:[#allocation2] sm:$0xff] (!%p4278_p7), %vm798_vm0, %v797_v1 }
  0x3a PF: > { %s5869_s16 = sld [smem:[#allocation9_spill]]  ;;  %v5118_v3 = vmov 0.0   ;;  %vm5119_vm1 = vmmov 0   ;;  %vm883_vm2 = vcmask 261120   ;;  %v4919_v13 = vld [vmem:[%s5266_s19] sm:$0xff]   ;;  %v4920_v14 = vld [vmem:[%s5266_s19 + $0x10] sm:$0xff]   ;;  %s5871_s21 = scalar_lea.vmem %s5818_s6, %s5246_s30 }
  0x3b   : > { %4731 = vmatprep.subr.bf16.mxu0 %v5118_v3  ;;  %4739 = vmatprep.subr.bf16.mxu1 %v5118_v3  ;;  %v4921_v15 = vld [vmem:[%s5266_s19 + $0x8] sm:$0xff]   ;;  %v4922_v16 = vld [vmem:[%s5266_s19 + $0x18] sm:$0xff]   ;;  %v4923_v17 = vld [vmem:[%s5266_s19 + $0x20] sm:$0xff]   ;;  %s5870_s9 = sld [smem:[#allocation10_spill]]  ;;  %vm1323_vm3 = vcmask 64512   ;;  %s5120_s10 = smov 120  }
  0x3c   : > { %4735 = vmatprep.mubr.msk.bf16.mxu0 %vm5119_vm1, %v5118_v3  ;;  %4743 = vmatprep.mubr.msk.bf16.mxu1 %vm5119_vm1, %v5118_v3  ;;  %v800_v7 = vld [vmem:[#allocation2] sm:$0xff]  ;;  %v4924_v18 = vld [vmem:[%s5266_s19 + $0x30] sm:$0xff]   ;;  %v4925_v19 = vld [vmem:[%s5266_s19 + $0x28] sm:$0xff]   ;;  %vm1562_vm4 = vcmask 1043456   ;;  %s5872_s24 = scalar_lea.vmem %s5819_s7, %s5246_s30  ;;  %s5873_s15 = scalar_lea.vmem %s5820_s8, %s5246_s30 }
  0x3d   : > { %v801_v8 = vpack.c.bf16 %v800_v7, %v800_v7  ;;  %v4926_v20 = vld [vmem:[%s5266_s19 + $0x38] sm:$0xff]   ;;  %v4295_v37 = vld [vmem:[%s5271_s0] ss:$0 sm:$0xff]  ;;  %v4296_v38 = vld [vmem:[%s5271_s0 + $0x1] ss:$0 sm:$0xff]  ;;  %s5876_s2 = sld [smem:[#allocation3_spill]] }
  0x3e   : > { %v4297_v55 = vld [vmem:[%s5271_s0 + $0x2] ss:$0 sm:$0xff]  ;;  %v4298_v57 = vld [vmem:[%s5271_s0 + $0x3] ss:$0 sm:$0xff] }
  0x40   : > { %v4911_v2 = vld [vmem:[%s5869_s16] sm:$0xff]   ;;  %v4912_v4 = vld [vmem:[%s5869_s16 + $0x10] sm:$0xff]   ;;  %v4913_v5 = vld [vmem:[%s5869_s16 + $0x8] sm:$0xff]  }
  0x41   : > { %4732 = vmatpush3.bf16.msra.mxu0 %v4911_v2  ;;  %4740 = vmatpush3.bf16.msra.mxu1 %v4912_v4  ;;  %v4914_v6 = vld [vmem:[%s5869_s16 + $0x18] sm:$0xff]   ;;  %v4915_v9 = vld [vmem:[%s5869_s16 + $0x20] sm:$0xff]   ;;  %v4916_v10 = vld [vmem:[%s5869_s16 + $0x30] sm:$0xff]  }
  0x42   : > { %4733 = vmatprep.subr.bf16.mxu0 %v5118_v3  ;;  %4741 = vmatprep.subr.bf16.mxu1 %v5118_v3  ;;  %v4917_v11 = vld [vmem:[%s5869_s16 + $0x28] sm:$0xff]   ;;  %v4918_v12 = vld [vmem:[%s5869_s16 + $0x38] sm:$0xff]   ;;  %v4279_v49 = vld [vmem:[%s5870_s9] ss:$0 sm:$0xff] }
  0x43   : > { %v4280_v52 = vld [vmem:[%s5870_s9 + $0x1] ss:$0 sm:$0xff]  ;;  %p4497_p8 = scmp.ne.s32.totalorder %s5876_s2, 1 }
  0x44   : > { %vm4042_vm5 = vcmask (!%p4497_p8), 257024  }
  0x45   : > { %4734 = vmatpush3.bf16.msra.mxu0 %v4913_v5  ;;  %4742 = vmatpush3.bf16.msra.mxu1 %v4914_v6 }
  0x46   : > { %4747 = vmatprep.subr.bf16.mxu0 %v5118_v3  ;;  %4755 = vmatprep.subr.bf16.mxu1 %v5118_v3 }
  0x48   : > { %4736 = vmatmul.mubr.msk.bf16.vlgmr.msra.gmra.mrb[0].mxu0 %vm883_vm2, %v801_v8  ;;  %4744 = vmatmul.mubr.msk.bf16.vlgmr.msra.gmra.mrb[0].mxu1 %vm883_vm2, %v801_v8 }
  0x49   : > { %4748 = vmatpush3.bf16.msra.mxu0 %v4915_v9  ;;  %4756 = vmatpush3.bf16.msra.mxu1 %v4916_v10 }
  0x4a   : > { %4749 = vmatprep.subr.bf16.mxu0 %v5118_v3  ;;  %4757 = vmatprep.subr.bf16.mxu1 %v5118_v3 }
  0x4b   : > { %4751 = vmatprep.mubr.msk.bf16.mxu0 %vm5119_vm1, %v5118_v3  ;;  %4759 = vmatprep.mubr.msk.bf16.mxu1 %vm5119_vm1, %v5118_v3 }
  0x4d   : > { %4750 = vmatpush3.bf16.msra.mxu0 %v4917_v11  ;;  %4758 = vmatpush3.bf16.msra.mxu1 %v4918_v12  ;;  %v4282_v11 = vld [vmem:[%s5870_s9 + $0x3] ss:$0 sm:$0xff] }
  0x4e   : > { %4763 = vmatprep.subr.bf16.mxu0 %v5118_v3  ;;  %4771 = vmatprep.subr.bf16.mxu1 %v5118_v3 }
  0x50   : > { %4752 = vmatmul.mubr.msk.bf16.vlgmr.msra.gmra.mrb[4].mxu0 %vm883_vm2, %v801_v8  ;;  %4760 = vmatmul.mubr.msk.bf16.vlgmr.msra.gmra.mrb[4].mxu1 %vm883_vm2, %v801_v8 }
  0x51   : > { %4764 = vmatpush3.bf16.msra.mxu0 %v4919_v13  ;;  %4772 = vmatpush3.bf16.msra.mxu1 %v4920_v14 }
  0x52   : > { %4765 = vmatprep.subr.bf16.mxu0 %v5118_v3  ;;  %4773 = vmatprep.subr.bf16.mxu1 %v5118_v3 }
  0x53   : > { %4767 = vmatprep.mubr.msk.bf16.mxu0 %vm5119_vm1, %v5118_v3  ;;  %4775 = vmatprep.mubr.msk.bf16.mxu1 %vm5119_vm1, %v5118_v3 }
  0x55   : > { %4766 = vmatpush3.bf16.msra.mxu0 %v4921_v15  ;;  %4774 = vmatpush3.bf16.msra.mxu1 %v4922_v16 }
  0x56   : > { %4779 = vmatprep.subr.bf16.mxu0 %v5118_v3  ;;  %4787 = vmatprep.subr.bf16.mxu1 %v5118_v3 }
  0x58   : > { %4768 = vmatmul.mubr.msk.bf16.vlgmr.msra.gmra.mrb[8].mxu0 %vm883_vm2, %v801_v8  ;;  %4776 = vmatmul.mubr.msk.bf16.vlgmr.msra.gmra.mrb[8].mxu1 %vm883_vm2, %v801_v8 }
  0x59   : > { %4780 = vmatpush3.bf16.msra.mxu0 %v4923_v17  ;;  %4788 = vmatpush3.bf16.msra.mxu1 %v4924_v18 }
  0x5a   : > { %4781 = vmatprep.subr.bf16.mxu0 %v5118_v3  ;;  %4789 = vmatprep.subr.bf16.mxu1 %v5118_v3 }
  0x5b   : > { %4783 = vmatprep.mubr.msk.bf16.mxu0 %vm5119_vm1, %v5118_v3  ;;  %4791 = vmatprep.mubr.msk.bf16.mxu1 %vm5119_vm1, %v5118_v3 }
  0x5d   : > { %4782 = vmatpush3.bf16.msra.mxu0 %v4925_v19  ;;  %4790 = vmatpush3.bf16.msra.mxu1 %v4926_v20 }
  0x5e   : > { %4795 = vmatprep.subr.bf16.mxu0 %v5118_v3  ;;  %4801 = vmatprep.subr.bf16.mxu1 %v5118_v3 }
  0x60   : > { %4784 = vmatmul.mubr.msk.bf16.vlgmr.msra.gmra.mrb[12].mxu0 %vm883_vm2, %v801_v8  ;;  %4792 = vmatmul.mubr.msk.bf16.vlgmr.msra.gmra.mrb[12].mxu1 %vm883_vm2, %v801_v8  ;;  %v4281_v8 = vld [vmem:[%s5870_s9 + $0x2] ss:$0 sm:$0xff] }
  0x61   : > { %4797 = vmatprep.mubr.msk.bf16.mxu0 %vm5119_vm1, %v5118_v3  ;;  %4803 = vmatprep.mubr.msk.bf16.mxu1 %vm5119_vm1, %v5118_v3 }
 0x11b   : > { %v921_v21 = vpop.f32.mrb[0].mxu0  ;;  %v973_v23 = vpop.f32.mrb[0].mxu1 }
 0x11c   : > { %v4737_v22 = vpop.f32.mrb[1].mxu0  ;;  %v4745_v25 = vpop.f32.mrb[1].mxu1  ;;  %v922_v56 = vadd.f32 %v4279_v49, %v921_v21  ;;  %v974_v58 = vadd.f32 %v4280_v52, %v973_v23 }
 0x11d   : > { %v924_v24 = vpop.f32.mrb[2].mxu0  ;;  %v976_v27 = vpop.f32.mrb[2].mxu1 }
 0x11e   : > { %v4738_v26 = vpop.f32.mrb[3].mxu0  ;;  %v4746_v28 = vpop.f32.mrb[3].mxu1  ;;  %v1315_v2 = vpack.c.bf16 %v922_v56, %v922_v56  ;;  %v1316_v7 = vpack.c.bf16 %v974_v58, %v974_v58 }
 0x123   : > { %v1025_v29 = vpop.f32.mrb[4].mxu0  ;;  %v1077_v31 = vpop.f32.mrb[4].mxu1 }
 0x124   : > { %v4753_v30 = vpop.f32.mrb[5].mxu0  ;;  %v4761_v33 = vpop.f32.mrb[5].mxu1  ;;  %v1026_v14 = vadd.f32 %v4281_v8, %v1025_v29  ;;  %v1078_v15 = vadd.f32 %v4282_v11, %v1077_v31 }
 0x125   : > { %v1028_v32 = vpop.f32.mrb[6].mxu0  ;;  %v1080_v35 = vpop.f32.mrb[6].mxu1 }
 0x126   : > { %v4754_v34 = vpop.f32.mrb[7].mxu0  ;;  %v4762_v36 = vpop.f32.mrb[7].mxu1  ;;  %v1317_v16 = vpack.c.bf16 %v1026_v14, %v1026_v14  ;;  %v1318_v17 = vpack.c.bf16 %v1078_v15, %v1078_v15 }
 0x12b   : > { %v1153_v39 = vpop.f32.mrb[8].mxu0  ;;  %v1205_v41 = vpop.f32.mrb[8].mxu1 }
 0x12c   : > { %v1154_v40 = vadd.f32 %v4295_v37, %v1153_v39  ;;  %v4769_v42 = vpop.f32.mrb[9].mxu0  ;;  %v1206_v43 = vadd.f32 %v4296_v38, %v1205_v41  ;;  %v4777_v45 = vpop.f32.mrb[9].mxu1 }
 0x12d   : > { %v1156_v44 = vpop.f32.mrb[10].mxu0  ;;  %v1208_v48 = vpop.f32.mrb[10].mxu1 }
 0x12e   : > { %v5390_v46 = vpack.c.bf16 %v1154_v40, %v1154_v40  ;;  %v4770_v47 = vpop.f32.mrb[11].mxu0  ;;  %v5393_v50 = vpack.c.bf16 %v1206_v43, %v1206_v43  ;;  %v4778_v51 = vpop.f32.mrb[11].mxu1 }
 0x130   : > { %v1328_v53 = vsel %vm1323_vm3, %v5390_v46, 0  ;;  %v1374_v54 = vsel %vm1323_vm3, %v5393_v50, 0 }
 0x131   : > { %4796 = vmatpush3.bf16.xpose.msra.mxu0 %v1328_v53  ;;  %4802 = vmatpush3.bf16.xpose.msra.mxu1 %v1374_v54 }
 0x132   : > { %4807 = vmatprep.subr.bf16.mxu0 %v5118_v3  ;;  %4813 = vmatprep.subr.bf16.mxu1 %v5118_v3 }
 0x133   : > { %v1257_v59 = vpop.f32.mrb[12].mxu0  ;;  %v1309_v61 = vpop.f32.mrb[12].mxu1 }
 0x134   : > { %v1258_v60 = vadd.f32 %v4297_v55, %v1257_v59  ;;  %v4785_v62 = vpop.f32.mrb[13].mxu0  ;;  %v1310_v63 = vadd.f32 %v4298_v57, %v1309_v61  ;;  %v4793_v1 = vpop.f32.mrb[13].mxu1 }
 0x135   : > { %v1260_v0 = vpop.f32.mrb[14].mxu0  ;;  %v1312_v6 = vpop.f32.mrb[14].mxu1 }
 0x136   : > { %v5404_v4 = vpack.c.bf16 %v1258_v60, %v1258_v60  ;;  %v4786_v5 = vpop.f32.mrb[15].mxu0  ;;  %v5407_v9 = vpack.c.bf16 %v1310_v63, %v1310_v63  ;;  %v4794_v10 = vpop.f32.mrb[15].mxu1 }
 0x138   : > { %v1420_v12 = vsel %vm1323_vm3, %v5404_v4, 0  ;;  %4798 = vmatmul.mubr.msk.bf16.vlgmr.msra.gmra.mrb[16].mxu0 %vm1323_vm3, %v1315_v2  ;;  %v1466_v13 = vsel %vm1323_vm3, %v5407_v9, 0  ;;  %4804 = vmatmul.mubr.msk.bf16.vlgmr.msra.gmra.mrb[16].mxu1 %vm1323_vm3, %v1316_v7 }
 0x139   : > { %4808 = vmatpush3.bf16.xpose.msra.mxu0 %v1420_v12  ;;  %4814 = vmatpush3.bf16.xpose.msra.mxu1 %v1466_v13 }
 0x13a   : > { %4809 = vmatprep.mubr.msk.bf16.mxu0 %vm5119_vm1, %v5118_v3  ;;  %4815 = vmatprep.mubr.msk.bf16.mxu1 %vm5119_vm1, %v5118_v3 }
 0x13b   : > { %4825 = vmatprep.subr.bf16.mxu1 %v5118_v3  ;;  %4819 = vmatprep.subr.bf16.mxu0 %v5118_v3 }
 0x140   : > { %4810 = vmatmul.mubr.msk.bf16.vlgmr.msra.gmra.mrb[20].mxu0 %vm1323_vm3, %v1317_v16  ;;  %4816 = vmatmul.mubr.msk.bf16.vlgmr.msra.gmra.mrb[20].mxu1 %vm1323_vm3, %v1318_v17 }
 0x141   : > { %4821 = vmatprep.mubr.msk.bf16.mxu0 %vm5119_vm1, %v5118_v3  ;;  %4827 = vmatprep.mubr.msk.bf16.mxu1 %vm5119_vm1, %v5118_v3 }
 0x20b   : > { %v1364_v18 = vpop.f32.mrb[16].mxu0  ;;  %v1410_v19 = vpop.f32.mrb[16].mxu1 }
 0x20c   : > { %v4799_v20 = vpop.f32.mrb[17].mxu0  ;;  %v1508_v21 = vsel %vm1323_vm3, %v1364_v18, -inf  ;;  %v4805_v22 = vpop.f32.mrb[17].mxu1  ;;  %v1511_v27 = vsel %vm1323_vm3, %v1410_v19, -inf }
 0x20d   : > { %1509 = vmax.xlane.f32.xlu0 %v1508_v21  ;;  %v1367_v23 = vpop.f32.mrb[18].mxu0  ;;  %v1413_v24 = vpop.f32.mrb[18].mxu1  ;;  %v843_v21 = vld [vmem:[%s5277_s17 + $0x4] sm:$0xf] }
 0x20e   : > { %v4800_v25 = vpop.f32.mrb[19].mxu0  ;;  %v4806_v26 = vpop.f32.mrb[19].mxu1  ;;  %v1807_v22 = vsel %vm1562_vm4, %v843_v21, 0  ;;  %v844_v23 = vld [vmem:[%s5277_s17 + $0x8] sm:$0xf] }
 0x211   : > { %1512 = vmax.xlane.f32.xlu0 %v1511_v27  ;;  %v1853_v27 = vsel %vm1562_vm4, %v844_v23, 0 }
 0x213   : > { %v1456_v28 = vpop.f32.mrb[20].mxu0  ;;  %v1502_v29 = vpop.f32.mrb[20].mxu1 }
 0x214   : > { %v4811_v30 = vpop.f32.mrb[21].mxu0  ;;  %v1514_v31 = vsel %vm1323_vm3, %v1456_v28, -inf  ;;  %v4817_v32 = vpop.f32.mrb[21].mxu1  ;;  %v1517_v37 = vsel %vm1323_vm3, %v1502_v29, -inf }
 0x215   : > { %1515 = vmax.xlane.f32.xlu1 %v1514_v31  ;;  %v1459_v33 = vpop.f32.mrb[22].mxu0  ;;  %v1505_v34 = vpop.f32.mrb[22].mxu1 }
 0x216   : > { %v4812_v35 = vpop.f32.mrb[23].mxu0  ;;  %v4818_v36 = vpop.f32.mrb[23].mxu1 }
 0x219   : > { %1518 = vmax.xlane.f32.xlu1 %v1517_v37 }
 0x29a   : > { %v1510_v38 = vpop.xlane.xlu0 %1509 }
 0x29b   : > { %v1520_v39 = vsub.f32 %v1364_v18, %v1510_v38 }
 0x29d   : > { %v1524_v40 = vmul.f32 1.442695, %v1520_v39 }
 0x29e   : > { %v1513_v41 = vpop.xlane.xlu0 %1512 }
 0x29f   : > { %5055 = vpow2.f32 %v1524_v40  ;;  %v1521_v42 = vsub.f32 %v1410_v19, %v1513_v41  ;;  %v842_v19 = vld [vmem:[%s5277_s17] sm:$0xf] }
 0x2a0   : > { %v1761_v20 = vsel %vm1562_vm4, %v842_v19, 0 }
 0x2a1   : > { %v1526_v43 = vmul.f32 1.442695, %v1521_v42 }
 0x2a2   : > { %v1516_v44 = vpop.xlane.xlu1 %1515 }
 0x2a3   : > { %5057 = vpow2.f32 %v1526_v43  ;;  %v1522_v45 = vsub.f32 %v1456_v28, %v1516_v44  ;;  %v845_v28 = vld [vmem:[%s5277_s17 + $0xc] sm:$0xf] }
 0x2a4   : > { %v1899_v34 = vsel %vm1562_vm4, %v845_v28, 0  ;;  %v2012_v28 = vld [vmem:[%s5300_s5 + $0xc8] sm:$0xff] }
 0x2a5   : > { %v1528_v47 = vmul.f32 1.442695, %v1522_v45 }
 0x2a6   : > { %v1519_v55 = vpop.xlane.xlu1 %1518 }
 0x2a7   : > { %5059 = vpow2.f32 %v1528_v47  ;;  %v1523_v56 = vsub.f32 %v1502_v29, %v1519_v55 }
 0x2a9   : > { %v5056_v48 = vpop.eup %5055  ;;  %v1530_v57 = vmul.f32 1.442695, %v1523_v56 }
 0x2aa   : > { %v1532_v49 = vsel %vm1323_vm3, %v5056_v48, 0.0 }
 0x2ab   : > { %1533 = vadd.xlane.f32.xlu0 %v1532_v49  ;;  %5061 = vpow2.f32 %v1530_v57 }
 0x2ad   : > { %v5058_v51 = vpop.eup %5057 }
 0x2ae   : > { %v1535_v52 = vsel %vm1323_vm3, %v5058_v51, 0.0 }
 0x2af   : > { %1536 = vadd.xlane.f32.xlu1 %v1535_v52 }
 0x2b1   : > { %v5060_v53 = vpop.eup %5059 }
 0x2b2   : > { %v1538_v54 = vsel %vm1323_vm3, %v5060_v53, 0.0 }
 0x2b3   : > { %1539 = vadd.xlane.f32.xlu0 %v1538_v54 }
 0x2b5   : > { %v5062_v58 = vpop.eup %5061 }
 0x2b6   : > { %v1541_v59 = vsel %vm1323_vm3, %v5062_v58, 0.0 }
 0x2c0   : > { %1607 = vrot.lane.b32.xlu1 %v5393_v50, %s5120_s10 }
 0x2c4   : > { %1656 = vrot.lane.b32.xlu1 %v5404_v4, %s5120_s10 }
 0x2c9   : > { %1557 = vrot.lane.b32.xlu0 %v5390_v46, %s5120_s10 }
 0x2e8   : > { %1542 = vadd.xlane.f32.xlu1 %v1541_v59 }
 0x2f9   : > { %1705 = vrot.lane.b32.xlu1 %v5407_v9, %s5120_s10  ;;  %s5878_s10 = sld [smem:[#allocation22_spill]] (!%p4497_p8) }
 0x338   : > { %v1534_v60 = vpop.xlane.xlu0 %1533 }
 0x339   : > { %5063 = vrcp.f32 %v1534_v60 }
 0x33c   : > { %v1537_v61 = vpop.xlane.xlu1 %1536 }
 0x33d   : > { %5065 = vrcp.f32 %v1537_v61 }
 0x340   : > { %v1540_v50 = vpop.xlane.xlu0 %1539  ;;  %v1608_v62 = vpop.permute.xlu1 %1607 }
 0x341   : > { %5067 = vrcp.f32 %v1540_v50  ;;  %v1613_v46 = vsel %vm1562_vm4, %v1608_v62, 0 }
 0x342   : > { %4826 = vmatpush3.bf16.msra.mxu1 %v1613_v46 }
 0x343   : > { %v5064_v63 = vpop.eup %5063  ;;  %4837 = vmatprep.subr.bf16.mxu1 %v5118_v3 }
 0x344   : > { %v1545_v0 = vmul.f32 %v5064_v63, %v5056_v48  ;;  %v1558_v1 = vpop.permute.xlu0 %1557  ;;  %v1657_v4 = vpop.permute.xlu1 %1656 }
 0x345   : > { %v1564_v2 = vsel %vm1562_vm4, %v1558_v1, 0  ;;  %v1662_v8 = vsel %vm1562_vm4, %v1657_v4, 0 }
 0x346   : > { %4820 = vmatpush3.bf16.msra.mxu0 %v1564_v2  ;;  %v1552_v5 = vpack.c.bf16 %v1545_v0, %v1545_v0  ;;  %v4323_v0 = vld [vmem:[%s5871_s21] ss:$0 sm:$0xff] }
 0x347   : > { %v5066_v6 = vpop.eup %5065  ;;  %4831 = vmatprep.subr.bf16.mxu0 %v5118_v3 }
 0x348   : > { %v1547_v7 = vmul.f32 %v5066_v6, %v5058_v51 }
 0x349   : > { %4822 = vmatmul.mubr.msk.bf16.vlgmr.msra.gmra.mrb[24].mxu0 %vm1323_vm3, %v1552_v5 }
 0x34a   : > { %4832 = vmatpush3.bf16.msra.mxu0 %v1662_v8  ;;  %v1553_v9 = vpack.c.bf16 %v1547_v7, %v1547_v7  ;;  %4833 = vmatprep.mubr.msk.bf16.mxu0 %vm5119_vm1, %v5118_v3  ;;  %v5075_v8 = vld [vmem:[#allocation2] sm:$0xff] }
 0x34b   : > { %v5068_v10 = vpop.eup %5067  ;;  %4843 = vmatprep.subr.bf16.mxu0 %v5118_v3 }
 0x34c   : > { %v1549_v11 = vmul.f32 %v5068_v10, %v5060_v53  ;;  %4828 = vmatmul.mubr.msk.bf16.vlgmr.msra.gmra.mrb[24].mxu1 %vm1323_vm3, %v1553_v9 }
 0x34d   : > { %4839 = vmatprep.mubr.msk.bf16.mxu1 %vm5119_vm1, %v5118_v3 }
 0x34e   : > { %v1554_v12 = vpack.c.bf16 %v1549_v11, %v1549_v11 }
 0x351   : > { %4834 = vmatmul.mubr.msk.bf16.vlgmr.msra.gmra.mrb[28].mxu0 %vm1323_vm3, %v1554_v12 }
 0x352   : > { %4845 = vmatprep.mubr.msk.bf16.mxu0 %vm5119_vm1, %v5118_v3  ;;  %4844 = vmatpush3.bf16.msra.mxu0 %v1761_v20  ;;  %v1996_v20 = vld [vmem:[%s5300_s5 + $0x48] sm:$0xff] }
 0x353   : > { %4855 = vmatprep.subr.bf16.mxu0 %v5118_v3 }
 0x375   : > { %v1543_v13 = vpop.xlane.xlu1 %1542 }
 0x376   : > { %5069 = vrcp.f32 %v1543_v13 }
 0x379   : > { %v1706_v14 = vpop.permute.xlu1 %1705 }
 0x37a   : > { %v1711_v15 = vsel %vm1562_vm4, %v1706_v14, 0 }
 0x37b   : > { %4838 = vmatpush3.bf16.msra.mxu1 %v1711_v15 }
 0x37c   : > { %4849 = vmatprep.subr.bf16.mxu1 %v5118_v3 }
 0x380   : > { %v5070_v16 = vpop.eup %5069 }
 0x381   : > { %v1551_v17 = vmul.f32 %v5070_v16, %v5062_v58  ;;  %v1987_v16 = vld [vmem:[%s5300_s5] sm:$0xff] }
 0x383   : > { %v1555_v18 = vpack.c.bf16 %v1551_v17, %v1551_v17  ;;  %v1995_v17 = vld [vmem:[%s5300_s5 + $0x40] sm:$0xff] }
 0x384   : > { %v4327_v19 = vcombine.high %v1987_v16, %v1995_v17  ;;  %v4326_v21 = vcombine.low %v1987_v16, %v1995_v17  ;;  %v2009_v17 = vld [vmem:[%s5300_s5 + $0xb0] sm:$0xff] }
 0x385   : > { %4840 = vmatmul.mubr.msk.bf16.vlgmr.msra.gmra.mrb[28].mxu1 %vm1323_vm3, %v1555_v18  ;;  %v1988_v18 = vld [vmem:[%s5300_s5 + $0x8] sm:$0xff] }
 0x386   : > { %4851 = vmatprep.mubr.msk.bf16.mxu1 %vm5119_vm1, %v5118_v3  ;;  %4850 = vmatpush3.bf16.msra.mxu1 %v1807_v22  ;;  %v4328_v22 = vcombine.low %v1988_v18, %v1996_v20  ;;  %v4329_v23 = vcombine.high %v1988_v18, %v1996_v20  ;;  %v2017_v18 = vld [vmem:[%s5300_s5 + $0xf0] sm:$0xff]  ;;  %v2018_v20 = vld [vmem:[%s5300_s5 + $0xf8] sm:$0xff] }
 0x387   : > { %4861 = vmatprep.subr.bf16.mxu1 %v5118_v3 }
 0x41c   : > { %v1600_v24 = vpop.f32.mrb[24].mxu0 }
 0x41d   : > { %v1753_v25 = vpack.c.bf16 %v1600_v24, %v1600_v24  ;;  %v4823_v26 = vpop.f32.mrb[25].mxu0  ;;  %v2003_v24 = vld [vmem:[%s5300_s5 + $0x80] sm:$0xff] }
 0x41e   : > { %v1603_v29 = vpop.f32.mrb[26].mxu0  ;;  %v2004_v26 = vld [vmem:[%s5300_s5 + $0x88] sm:$0xff] }
 0x41f   : > { %v4824_v30 = vpop.f32.mrb[27].mxu0  ;;  %v1649_v31 = vpop.f32.mrb[24].mxu1  ;;  %4846 = vmatmul.mubr.msk.bf16.vlgmr.msra.gmra.mrb[32].mxu0 %vm1323_vm3, %v1753_v25  ;;  %v2011_v25 = vld [vmem:[%s5300_s5 + $0xc0] sm:$0xff] }
 0x420   : > { %v1754_v32 = vpack.c.bf16 %v1649_v31, %v1649_v31  ;;  %v4829_v33 = vpop.f32.mrb[25].mxu1  ;;  %4856 = vmatpush3.bf16.msra.mxu0 %v1853_v27  ;;  %4857 = vmatprep.mubr.msk.bf16.mxu0 %vm5119_vm1, %v5118_v3  ;;  %v4343_v27 = vcombine.high %v2003_v24, %v2011_v25  ;;  %v4342_v29 = vcombine.low %v2003_v24, %v2011_v25 }
 0x421   : > { %v1652_v35 = vpop.f32.mrb[26].mxu1  ;;  %2266 = vmatprep.subr.bf16.mxu0 %v4327_v19  ;;  %v4344_v30 = vcombine.low %v2004_v26, %v2012_v28  ;;  %v4345_v31 = vcombine.high %v2004_v26, %v2012_v28  ;;  %v1997_v33 = vld [vmem:[%s5300_s5 + $0x50] sm:$0xff]  ;;  %v2010_v19 = vld [vmem:[%s5300_s5 + $0xb8] sm:$0xff]  ;;  %v4354_v25 = vcombine.low %v2009_v17, %v2017_v18  ;;  %v4928_v28 = vld [vmem:[%s5306_s14 + $0xc0] sm:$0xff]  }
 0x422   : > { %v4830_v36 = vpop.f32.mrb[27].mxu1  ;;  %4852 = vmatmul.mubr.msk.bf16.vlgmr.msra.gmra.mrb[32].mxu1 %vm1323_vm3, %v1754_v32  ;;  %v1989_v32 = vld [vmem:[%s5300_s5 + $0x10] sm:$0xff]  ;;  %v5121_v35 = vmov 0   ;;  %v4357_v24 = vcombine.high %v2010_v19, %v2018_v20  ;;  %v4356_v26 = vcombine.low %v2010_v19, %v2018_v20 }
 0x423   : > { %4862 = vmatpush3.bf16.msra.mxu1 %v1899_v34  ;;  %4863 = vmatprep.mubr.msk.bf16.mxu1 %vm5119_vm1, %v5118_v3  ;;  %v1990_v34 = vld [vmem:[%s5300_s5 + $0x18] sm:$0xff]  ;;  %v4331_v36 = vcombine.high %v1989_v32, %v1997_v33 }
 0x424   : > { %v1698_v37 = vpop.f32.mrb[28].mxu0  ;;  %2307 = vmatprep.subr.bf16.mxu1 %v4329_v23  ;;  %v4355_v23 = vcombine.high %v2009_v17, %v2017_v18 }
 0x425   : > { %v1755_v38 = vpack.c.bf16 %v1698_v37, %v1698_v37  ;;  %v4835_v39 = vpop.f32.mrb[29].mxu0  ;;  %v1998_v37 = vld [vmem:[%s5300_s5 + $0x58] sm:$0xff] }
 0x426   : > { %v1701_v40 = vpop.f32.mrb[30].mxu0  ;;  %v4332_v39 = vcombine.low %v1990_v34, %v1998_v37 }
 0x427   : > { %v4836_v41 = vpop.f32.mrb[31].mxu0  ;;  %4858 = vmatmul.mubr.msk.bf16.vlgmr.msra.gmra.mrb[36].mxu0 %vm1323_vm3, %v1755_v38  ;;  %v4330_v38 = vcombine.low %v1989_v32, %v1997_v33  ;;  %v4333_v40 = vcombine.high %v1990_v34, %v1998_v37  ;;  %v4932_v32 = vld [vmem:[%s5306_s14 + $0xc8] sm:$0xff]   ;;  %v4937_v37 = vld [vmem:[%s5306_s14 + $0x10] sm:$0xff]  }
 0x428   : > { %2267 = vmatpush1.bf16.msra.mxu0 %v4326_v21  ;;  %2298 = vmatprep.mubr.bf16.mxu0 %v5121_v35  ;;  %v4933_v33 = vld [vmem:[%s5306_s14 + $0x8] sm:$0xff]  }
 0x429   : > { %2268 = vmatprep.subr.bf16.mxu0 %v4343_v27  ;;  %v4927_v27 = vld [vmem:[%s5306_s14 + $0x40] sm:$0xff]   ;;  %v4934_v34 = vld [vmem:[%s5306_s14 + $0x88] sm:$0xff]  }
 0x42c   : > { %2269 = vmatpush1.bf16.msra.mxu0 %v4342_v29  ;;  %v4929_v29 = vld [vmem:[%s5306_s14] sm:$0xff]  }
 0x42d   : > { %2348 = vmatprep.subr.bf16.mxu0 %v4331_v36  ;;  %v4936_v36 = vld [vmem:[%s5306_s14 + $0xd0] sm:$0xff]  }
 0x458   : > { %v1747_v42 = vpop.f32.mrb[28].mxu1 }
 0x459   : > { %v1756_v43 = vpack.c.bf16 %v1747_v42, %v1747_v42  ;;  %v4841_v44 = vpop.f32.mrb[29].mxu1 }
 0x45a   : > { %v1750_v45 = vpop.f32.mrb[30].mxu1 }
 0x45b   : > { %v4842_v47 = vpop.f32.mrb[31].mxu1  ;;  %4864 = vmatmul.mubr.msk.bf16.vlgmr.msra.gmra.mrb[36].mxu1 %vm1323_vm3, %v1756_v43  ;;  %v4324_v45 = vld [vmem:[%s5872_s24] ss:$0 sm:$0xff] }
 0x45c   : > { %2308 = vmatpush1.bf16.msra.mxu1 %v4328_v22  ;;  %2339 = vmatprep.mubr.bf16.mxu1 %v5121_v35 }
 0x45d   : > { %2309 = vmatprep.subr.bf16.mxu1 %v4345_v31  ;;  %v4931_v31 = vld [vmem:[%s5306_s14 + $0x48] sm:$0xff]  }
 0x460   : > { %2310 = vmatpush1.bf16.msra.mxu1 %v4344_v30  ;;  %v4930_v30 = vld [vmem:[%s5306_s14 + $0x80] sm:$0xff]  }
 0x461   : > { %2389 = vmatprep.subr.bf16.mxu1 %v4333_v40  ;;  %v4940_v40 = vld [vmem:[%s5306_s14 + $0xd8] sm:$0xff]  }
 0x4f2   : > { %v1797_v48 = vpop.f32.mrb[32].mxu0 }
 0x4f3   : > { %v4847_v49 = vpop.f32.mrb[33].mxu0  ;;  %v1941_v53 = vsel %vm883_vm2, %v1797_v48, 0.0  ;;  %v4325_v48 = vld [vmem:[%s5873_s15] ss:$0 sm:$0xff] }
 0x4f4   : > { %v1800_v51 = vpop.f32.mrb[34].mxu0 }
 0x4f5   : > { %v4848_v52 = vpop.f32.mrb[35].mxu0  ;;  %v1843_v3 = vpop.f32.mrb[32].mxu1  ;;  %v2005_v51 = vld [vmem:[%s5300_s5 + $0x90] sm:$0xff] }
 0x4f6   : > { %v1942_v54 = vsel %vm883_vm2, %v1843_v3, 0.0  ;;  %v4853_v55 = vpop.f32.mrb[33].mxu1  ;;  %v2013_v52 = vld [vmem:[%s5300_s5 + $0xd0] sm:$0xff]  ;;  %v2006_v3 = vld [vmem:[%s5300_s5 + $0x98] sm:$0xff] }
 0x4f7   : > { %v1943_v56 = vadd.f32 %v1942_v54, %v1941_v53  ;;  %v1846_v57 = vpop.f32.mrb[34].mxu1  ;;  %v2014_v53 = vld [vmem:[%s5300_s5 + $0xd8] sm:$0xff] }
 0x4f8   : > { %v4854_v58 = vpop.f32.mrb[35].mxu1  ;;  %v4349_v57 = vcombine.high %v2006_v3, %v2014_v53 }
 0x4f9   : > { %v1991_v58 = vld [vmem:[%s5300_s5 + $0x20] sm:$0xff] }
 0x4fa   : > { %v1889_v59 = vpop.f32.mrb[36].mxu0 }
 0x4fb   : > { %v1944_v60 = vsel %vm883_vm2, %v1889_v59, 0.0  ;;  %v4859_v61 = vpop.f32.mrb[37].mxu0  ;;  %v1999_v59 = vld [vmem:[%s5300_s5 + $0x60] sm:$0xff] }
 0x4fc   : > { %v1945_v50 = vadd.f32 %v1944_v60, %v1943_v56  ;;  %v1892_v62 = vpop.f32.mrb[38].mxu0  ;;  %v4347_v56 = vcombine.high %v2005_v51, %v2013_v52  ;;  %v1992_v60 = vld [vmem:[%s5300_s5 + $0x28] sm:$0xff] }
 0x4fd   : > { %v4860_v46 = vpop.f32.mrb[39].mxu0  ;;  %v2000_v61 = vld [vmem:[%s5300_s5 + $0x68] sm:$0xff]  ;;  %v4348_v62 = vcombine.low %v2006_v3, %v2014_v53  ;;  %v4951_v3 = vld [vmem:[%s5306_s14 + $0x70] sm:$0xff]  }
 0x4fe   : > { %v4335_v46 = vcombine.high %v1991_v58, %v1999_v59  ;;  %v4952_v53 = vld [vmem:[%s5306_s14 + $0xf0] sm:$0xff]  }
 0x52e   : > { %v1935_v63 = vpop.f32.mrb[36].mxu1 }
 0x52f   : > { %v1946_v1 = vsel %vm883_vm2, %v1935_v63, 0.0  ;;  %v4865_v2 = vpop.f32.mrb[37].mxu1  ;;  %v4337_v63 = vcombine.high %v1992_v60, %v2000_v61 }
 0x530   : > { %v1947_v4 = vadd.f32 %v1946_v1, %v1945_v50  ;;  %v1938_v5 = vpop.f32.mrb[38].mxu1  ;;  %v4346_v50 = vcombine.low %v2005_v51, %v2013_v52  ;;  %v2015_v1 = vld [vmem:[%s5300_s5 + $0xe0] sm:$0xff]  ;;  %v2008_v2 = vld [vmem:[%s5300_s5 + $0xa8] sm:$0xff] }
 0x531   : > { %v4866_v6 = vpop.f32.mrb[39].mxu1  ;;  %v4334_v5 = vcombine.low %v1991_v58, %v1999_v59  ;;  %v4949_v51 = vld [vmem:[%s5306_s14 + $0x28] sm:$0xff]   ;;  %v4956_v58 = vld [vmem:[%s5306_s14 + $0xf8] sm:$0xff]  }
 0x532   : > { %v1954_v7 = vadd.f32 %v4323_v0, %v1947_v4  ;;  %v2007_v0 = vld [vmem:[%s5300_s5 + $0xa0] sm:$0xff]  ;;  %v2016_v4 = vld [vmem:[%s5300_s5 + $0xe8] sm:$0xff]  ;;  %v4336_v6 = vcombine.low %v1992_v60, %v2000_v61  ;;  %v4957_v59 = vld [vmem:[%s5306_s14 + $0x38] sm:$0xff]  }
 0x533   : > { %v4950_v52 = vld [vmem:[%s5306_s14 + $0xa8] sm:$0xff]   ;;  %v4958_v60 = vld [vmem:[%s5306_s14 + $0xb8] sm:$0xff]   ;;  %v4959_v61 = vld [vmem:[%s5306_s14 + $0x140] sm:$0xff]  }
 0x534   : > { %v1955_v9 = vadd.f32 %v5075_v8, %v1954_v7  ;;  %v4351_v7 = vcombine.high %v2007_v0, %v2015_v1  ;;  %v4353_v8 = vcombine.high %v2008_v2, %v2016_v4 }
 0x536   : > { %v1958_v10 = vsel %vm883_vm2, %v1955_v9, 0.0 }
 0x537   : > { %1959 = vadd.xlane.f32.xlu0 %v1958_v10  ;;  %v2001_v10 = vld [vmem:[%s5300_s5 + $0x70] sm:$0xff] }
 0x5c4   : > { %v1960_v11 = vpop.xlane.xlu0 %1959 }
 0x5c5   : > { %v1962_v12 = vmul.f32 0.03125, %v1960_v11  ;;  %v1994_v11 = vld [vmem:[%s5300_s5 + $0x38] sm:$0xff] }
 0x5c7   : > { %v1963_v13 = vsub.f32 %v1955_v9, %v1962_v12  ;;  %v1993_v9 = vld [vmem:[%s5300_s5 + $0x30] sm:$0xff]  ;;  %v2002_v12 = vld [vmem:[%s5300_s5 + $0x78] sm:$0xff]  ;;  %s5874_s5 = sld [smem:[#allocation11_spill]] }
 0x5c8   : > { %v4341_v16 = vcombine.high %v1994_v11, %v2002_v12  ;;  %v4338_v21 = vcombine.low %v1993_v9, %v2001_v10  ;;  %v4340_v22 = vcombine.low %v1994_v11, %v2002_v12 }
 0x5c9   : > { %v1964_v14 = vmul.f32 %v1963_v13, %v1963_v13 }
 0x5cb   : > { %v1965_v15 = vsel %vm883_vm2, %v1964_v14, 0.0  ;;  %v4352_v14 = vcombine.low %v2008_v2, %v2016_v4 }
 0x5cc   : > { %1966 = vadd.xlane.f32.xlu1 %v1965_v15  ;;  %v4339_v15 = vcombine.high %v1993_v9, %v2001_v10 }
 0x659   : > { %v1967_v41 = vpop.xlane.xlu1 %1966 }
 0x65a   : > { %v1968_v42 = vmul.f32 0.03125, %v1967_v41  ;;  %v4941_v41 = vld [vmem:[%s5306_s14 + $0x18] sm:$0xff]  }
 0x65c   : > { %v1969_v43 = vadd.f32 1e-05, %v1968_v42  ;;  %v4942_v42 = vld [vmem:[%s5306_s14 + $0x98] sm:$0xff]  }
 0x65e   : > { %5071 = vrsqrt.f32 %v1969_v43  ;;  %v4943_v43 = vld [vmem:[%s5306_s14 + $0x60] sm:$0xff]  }
 0x668   : > { %v5072_v44 = vpop.eup %5071 }
 0x669   : > { %v1971_v47 = vmul.f32 %v5072_v44, %v1963_v13  ;;  %v4350_v13 = vcombine.low %v2007_v0, %v2015_v1  ;;  %v4944_v44 = vld [vmem:[%s5306_s14 + $0xe0] sm:$0xff]   ;;  %v5599_v0 = vld [vmem:[%s5874_s5 + $0x8] sm:$0xff] }
 0x66b   : > { %v1978_v49 = vmul.f32 %v4324_v45, %v1971_v47  ;;  %v4945_v45 = vld [vmem:[%s5306_s14 + $0x20] sm:$0xff]  }
 0x66c   : > { %v4946_v47 = vld [vmem:[%s5306_s14 + $0xa0] sm:$0xff]  }
 0x66d   : > { %v5517_v54 = vadd.f32 %v4325_v48, %v1978_v49  ;;  %v4947_v48 = vld [vmem:[%s5306_s14 + $0x68] sm:$0xff]  }
 0x66e   : > { %v4948_v49 = vld [vmem:[%s5306_s14 + $0xe8] sm:$0xff]  }
 0x66f   : > { %v5521_v55 = vpack.c.bf16 %v5517_v54, %v5517_v54 }
 0x671   : > { %4358 = vmatmul.mubr.msk.bf16.vlgmr.msra.gmra.mrb[40].mxu0 %vm883_vm2, %v5521_v55  ;;  %4359 = vmatmul.mubr.msk.bf16.vlgmr.msra.gmra.mrb[40].mxu1 %vm883_vm2, %v5521_v55 }
 0x672   : > { %2349 = vmatpush1.bf16.msra.mxu0 %v4330_v38  ;;  %2390 = vmatpush1.bf16.msra.mxu1 %v4332_v39  ;;  %v4938_v38 = vld [vmem:[%s5306_s14 + $0x90] sm:$0xff]   ;;  %v4939_v39 = vld [vmem:[%s5306_s14 + $0x58] sm:$0xff]  }
 0x673   : > { %2350 = vmatprep.subr.bf16.mxu0 %v4347_v56  ;;  %2391 = vmatprep.subr.bf16.mxu1 %v4349_v57  ;;  %v4954_v56 = vld [vmem:[%s5306_s14 + $0xb0] sm:$0xff]   ;;  %v4955_v57 = vld [vmem:[%s5306_s14 + $0x78] sm:$0xff]  }
 0x674   : > { %2380 = vmatprep.mubr.bf16.mxu0 %v5121_v35  ;;  %2421 = vmatprep.mubr.bf16.mxu1 %v5121_v35 }
 0x676   : > { %2351 = vmatpush1.bf16.msra.mxu0 %v4346_v50  ;;  %2392 = vmatpush1.bf16.msra.mxu1 %v4348_v62  ;;  %v4960_v50 = vld [vmem:[%s5306_s14 + $0x1c0] sm:$0xff]   ;;  %v2023_v62 = vlaneseq }
 0x677   : > { %2430 = vmatprep.subr.bf16.mxu0 %v4335_v46  ;;  %2471 = vmatprep.subr.bf16.mxu1 %v4337_v63 }
 0x678   : > { %v5595_v46 = vshrl.u32 %v2023_v62, 7  ;;  %v4970_v62 = vld [vmem:[%s5306_s14 + $0x190] sm:$0xff]  }
 0x679   : > { %4360 = vmatmul.mubr.msk.bf16.vlgmr.msra.gmra.mrb[44].mxu0 %vm883_vm2, %v5521_v55  ;;  %4361 = vmatmul.mubr.msk.bf16.vlgmr.msra.gmra.mrb[44].mxu1 %vm883_vm2, %v5521_v55 }
 0x67a   : > { %2431 = vmatpush1.bf16.msra.mxu0 %v4334_v5  ;;  %2472 = vmatpush1.bf16.msra.mxu1 %v4336_v6  ;;  %v2049_v63 = vsub.s32 6, %v5595_v46  ;;  %v2025_v2 = vsub.s32 0, %v5595_v46  ;;  %v2033_v4 = vsub.s32 2, %v5595_v46  ;;  %v5609_v5 = vld [vmem:[%s5874_s5] sm:$0xff]  ;;  %v2029_v6 = vsub.s32 1, %v5595_v46 }
 0x67b   : > { %2432 = vmatprep.subr.bf16.mxu0 %v4351_v7  ;;  %2473 = vmatprep.subr.bf16.mxu1 %v4353_v8  ;;  %v2037_v7 = vsub.s32 3, %v5595_v46 }
 0x67c   : > { %2462 = vmatprep.mubr.bf16.mxu0 %v5121_v35  ;;  %2503 = vmatprep.mubr.bf16.mxu1 %v5121_v35  ;;  %v5604_v1 = vrot.slane %v5599_v0, %v2049_v63  ;;  %v2026_v8 = vrot.slane %v5609_v5, %v2025_v2  ;;  %v2034_v9 = vrot.slane %v5609_v5, %v2033_v4 }
 0x67d   : > { %v2030_v10 = vrot.slane %v5609_v5, %v2029_v6  ;;  %v2038_v11 = vrot.slane %v5609_v5, %v2037_v7 }
 0x67e   : > { %2433 = vmatpush1.bf16.msra.mxu0 %v4350_v13  ;;  %2474 = vmatpush1.bf16.msra.mxu1 %v4352_v14 }
 0x67f   : > { %2512 = vmatprep.subr.bf16.mxu0 %v4339_v15  ;;  %2553 = vmatprep.subr.bf16.mxu1 %v4341_v16 }
 0x681   : > { %4362 = vmatmul.mubr.msk.bf16.vlgmr.msra.gmra.mrb[48].mxu0 %vm883_vm2, %v5521_v55  ;;  %4363 = vmatmul.mubr.msk.bf16.vlgmr.msra.gmra.mrb[48].mxu1 %vm883_vm2, %v5521_v55 }
 0x682   : > { %2513 = vmatpush1.bf16.msra.mxu0 %v4338_v21  ;;  %2554 = vmatpush1.bf16.msra.mxu1 %v4340_v22  ;;  %v2045_v22 = vsub.s32 5, %v5595_v46 }
 0x683   : > { %2514 = vmatprep.subr.bf16.mxu0 %v4355_v23  ;;  %2555 = vmatprep.subr.bf16.mxu1 %v4357_v24  ;;  %v2053_v23 = vsub.s32 7, %v5595_v46 }
 0x684   : > { %2544 = vmatprep.mubr.bf16.mxu0 %v5121_v35  ;;  %2585 = vmatprep.mubr.bf16.mxu1 %v5121_v35  ;;  %v4935_v35 = vld [vmem:[%s5306_s14 + $0x50] sm:$0xff]  }
 0x686   : > { %2515 = vmatpush1.bf16.msra.mxu0 %v4354_v25  ;;  %2556 = vmatpush1.bf16.msra.mxu1 %v4356_v26 }
 0x687   : > { %4555 = vmatprep.subr.bf16.mxu0 %v4927_v27  ;;  %4577 = vmatprep.subr.bf16.mxu1 %v4928_v28 }
 0x689   : > { %4364 = vmatmul.mubr.msk.bf16.vlgmr.msra.gmra.mrb[52].mxu0 %vm883_vm2, %v5521_v55  ;;  %4365 = vmatmul.mubr.msk.bf16.vlgmr.msra.gmra.mrb[52].mxu1 %vm883_vm2, %v5521_v55  ;;  %v4953_v55 = vld [vmem:[%s5306_s14 + $0x30] sm:$0xff]  }
 0x68a   : > { %4556 = vmatpush3.bf16.msra.mxu0 %v4929_v29  ;;  %4578 = vmatpush3.bf16.msra.mxu1 %v4930_v30 }
 0x68b   : > { %4557 = vmatprep.subr.bf16.mxu0 %v4931_v31  ;;  %4579 = vmatprep.subr.bf16.mxu1 %v4932_v32  ;;  %v2046_v32 = vrot.slane %v5609_v5, %v2045_v22 }
 0x68e   : > { %4558 = vmatpush3.bf16.msra.mxu0 %v4933_v33  ;;  %4580 = vmatpush3.bf16.msra.mxu1 %v4934_v34  ;;  %v2054_v33 = vrot.slane %v5609_v5, %v2053_v23  ;;  %v4961_v34 = vld [vmem:[%s5306_s14 + $0x100] sm:$0xff]  }
 0x68f   : > { %4559 = vmatprep.subr.bf16.mxu0 %v4935_v35  ;;  %4581 = vmatprep.subr.bf16.mxu1 %v4936_v36  ;;  %v4962_v35 = vld [vmem:[%s5306_s14 + $0x180] sm:$0xff]  }
 0x692   : > { %4560 = vmatpush3.bf16.msra.mxu0 %v4937_v37  ;;  %4582 = vmatpush3.bf16.msra.mxu1 %v4938_v38  ;;  %v4963_v38 = vld [vmem:[%s5306_s14 + $0x148] sm:$0xff]  }
 0x693   : > { %4561 = vmatprep.subr.bf16.mxu0 %v4939_v39  ;;  %4583 = vmatprep.subr.bf16.mxu1 %v4940_v40  ;;  %v4964_v39 = vld [vmem:[%s5306_s14 + $0x1c8] sm:$0xff]  }
 0x696   : > { %4562 = vmatpush3.bf16.msra.mxu0 %v4941_v41  ;;  %4584 = vmatpush3.bf16.msra.mxu1 %v4942_v42 }
 0x697   : > { %4563 = vmatprep.subr.bf16.mxu0 %v4943_v43  ;;  %4585 = vmatprep.subr.bf16.mxu1 %v4944_v44 }
 0x69a   : > { %4564 = vmatpush3.bf16.msra.mxu0 %v4945_v45  ;;  %4586 = vmatpush3.bf16.msra.mxu1 %v4946_v47 }
 0x69b   : > { %4565 = vmatprep.subr.bf16.mxu0 %v4947_v48  ;;  %4587 = vmatprep.subr.bf16.mxu1 %v4948_v49  ;;  %v4965_v49 = vld [vmem:[%s5306_s14 + $0x108] sm:$0xff]  }
 0x69e   : > { %4566 = vmatpush3.bf16.msra.mxu0 %v4949_v51  ;;  %4588 = vmatpush3.bf16.msra.mxu1 %v4950_v52  ;;  %v4966_v51 = vld [vmem:[%s5306_s14 + $0x188] sm:$0xff]  }
 0x69f   : > { %4567 = vmatprep.subr.bf16.mxu0 %v4951_v3  ;;  %4589 = vmatprep.subr.bf16.mxu1 %v4952_v53  ;;  %v4967_v53 = vld [vmem:[%s5306_s14 + $0x150] sm:$0xff]  }
 0x6a2   : > { %4568 = vmatpush3.bf16.msra.mxu0 %v4953_v55  ;;  %4590 = vmatpush3.bf16.msra.mxu1 %v4954_v56  ;;  %v4968_v55 = vld [vmem:[%s5306_s14 + $0x1d0] sm:$0xff]  }
 0x6a3   : > { %4569 = vmatprep.subr.bf16.mxu0 %v4955_v57  ;;  %4591 = vmatprep.subr.bf16.mxu1 %v4956_v58  ;;  %v2058_v58 = vrot.slane %v5599_v0, %v2025_v2 }
 0x6a6   : > { %4570 = vmatpush3.bf16.msra.mxu0 %v4957_v59  ;;  %4592 = vmatpush3.bf16.msra.mxu1 %v4958_v60  ;;  %v2066_v59 = vrot.slane %v5599_v0, %v2033_v4 }
 0x6a7   : > { %4599 = vmatprep.subr.bf16.mxu0 %v4959_v61  ;;  %4621 = vmatprep.subr.bf16.mxu1 %v4960_v50  ;;  %v4969_v50 = vld [vmem:[%s5306_s14 + $0x110] sm:$0xff]  }
 0x744   : > { %v2300_v12 = vpop.f32.mrb[40].mxu0  ;;  %v2341_v13 = vpop.f32.mrb[40].mxu1 }
 0x745   : > { %v2301_v14 = vadd.f32 %v2300_v12, %v2026_v8  ;;  %v2342_v15 = vadd.f32 %v2341_v13, %v2034_v9  ;;  %v2302_v16 = vpop.f32.mrb[41].mxu0  ;;  %v2343_v17 = vpop.f32.mrb[41].mxu1  ;;  %v4971_v8 = vld [vmem:[%s5306_s14 + $0x158] sm:$0xff]  }
 0x746   : > { %v2303_v18 = vadd.f32 %v2302_v16, %v2030_v10  ;;  %v2344_v19 = vadd.f32 %v2343_v17, %v2038_v11  ;;  %v2304_v20 = vpop.f32.mrb[42].mxu0  ;;  %v2345_v21 = vpop.f32.mrb[42].mxu1  ;;  %v4972_v9 = vld [vmem:[%s5306_s14 + $0x1d8] sm:$0xff]  }
 0x747   : > { %v2594_v24 = vmax.f32 %v2301_v14, 0.0  ;;  %v2596_v25 = vmax.f32 %v2342_v15, 0.0  ;;  %v2305_v26 = vpop.f32.mrb[43].mxu0  ;;  %v2346_v27 = vpop.f32.mrb[43].mxu1  ;;  %v4973_v16 = vld [vmem:[%s5306_s14 + $0x118] sm:$0xff]   ;;  %v4975_v21 = vld [vmem:[%s5306_s14 + $0x160] sm:$0xff]  }
 0x748   : > { %v2595_v28 = vmax.f32 %v2303_v18, 0.0  ;;  %v2597_v29 = vmax.f32 %v2344_v19, 0.0  ;;  %v4974_v17 = vld [vmem:[%s5306_s14 + $0x198] sm:$0xff]   ;;  %v2041_v18 = vsub.s32 4, %v5595_v46  ;;  %v4977_v26 = vld [vmem:[%s5306_s14 + $0x120] sm:$0xff]  }
 0x749   : > { %v2610_v36 = vpack.c.bf16 %v2594_v24, %v2594_v24  ;;  %v2612_v37 = vpack.c.bf16 %v2596_v25, %v2596_v25  ;;  %v4976_v24 = vld [vmem:[%s5306_s14 + $0x1e0] sm:$0xff]   ;;  %v5021_v46 = vld [vmem:[%s5306_s14 + $0x238] sm:$0xff]  }
 0x74a   : > { %v2611_v30 = vpack.c.bf16 %v2595_v28, %v2595_v28  ;;  %v2613_v31 = vpack.c.bf16 %v2597_v29, %v2597_v29  ;;  %v2074_v25 = vrot.slane %v5599_v0, %v2041_v18  ;;  %v4978_v27 = vld [vmem:[%s5306_s14 + $0x1a0] sm:$0xff]   ;;  %v4979_v28 = vld [vmem:[%s5306_s14 + $0x168] sm:$0xff]  }
 0x74b   : > { %v4980_v29 = vld [vmem:[%s5306_s14 + $0x1e8] sm:$0xff]  }
 0x74c   : > { %v5633_v40 = vpop.f32.mrb[44].mxu0  ;;  %v5635_v41 = vpop.f32.mrb[44].mxu1  ;;  %3689 = vmatprep.mubr.bf16.mxu0 %v2611_v30  ;;  %3729 = vmatprep.mubr.bf16.mxu1 %v2613_v31 }
 0x74d   : > { %v2384_v42 = vpop.f32.mrb[45].mxu0  ;;  %v2425_v43 = vpop.f32.mrb[45].mxu1  ;;  %3690 = vmatmul.mubr.bf16.vlgmr.msra.gmra.mrb[56].mxu0 %v2610_v36  ;;  %3730 = vmatmul.mubr.bf16.vlgmr.msra.gmra.mrb[56].mxu1 %v2612_v37 }
 0x74e   : > { %v2385_v44 = vadd.f32 %v2384_v42, %v2046_v32  ;;  %v2426_v45 = vadd.f32 %v2425_v43, %v2054_v33  ;;  %4600 = vmatpush3.bf16.msra.mxu0 %v4961_v34  ;;  %4622 = vmatpush3.bf16.msra.mxu1 %v4962_v35  ;;  %v2386_v47 = vpop.f32.mrb[46].mxu0  ;;  %v2427_v48 = vpop.f32.mrb[46].mxu1  ;;  %v2042_v42 = vrot.slane %v5609_v5, %v2041_v18  ;;  %v5002_v18 = vld [vmem:[%s5306_s14 + $0x290] sm:$0xff]  }
 0x74f   : > { %v2387_v52 = vpop.f32.mrb[47].mxu0  ;;  %v2428_v3 = vpop.f32.mrb[47].mxu1  ;;  %4601 = vmatprep.subr.bf16.mxu0 %v4963_v38  ;;  %4623 = vmatprep.subr.bf16.mxu1 %v4964_v39  ;;  %v4981_v38 = vld [vmem:[%s5306_s14 + $0x128] sm:$0xff]   ;;  %v4984_v47 = vld [vmem:[%s5306_s14 + $0x1f0] sm:$0xff]   ;;  %v2062_v48 = vrot.slane %v5599_v0, %v2029_v6  ;;  %v4988_v6 = vld [vmem:[%s5306_s14 + $0x1f8] sm:$0xff]  }
 0x750   : > { %v2599_v56 = vmax.f32 %v2385_v44, 0.0  ;;  %v2601_v57 = vmax.f32 %v2426_v45, 0.0  ;;  %v4982_v39 = vld [vmem:[%s5306_s14 + $0x1a8] sm:$0xff]   ;;  %v4983_v45 = vld [vmem:[%s5306_s14 + $0x170] sm:$0xff]   ;;  %v4987_v3 = vld [vmem:[%s5306_s14 + $0x178] sm:$0xff]  }
 0x752   : > { %v2615_v60 = vpack.c.bf16 %v2599_v56, %v2599_v56  ;;  %v2617_v61 = vpack.c.bf16 %v2601_v57, %v2601_v57  ;;  %4602 = vmatpush3.bf16.msra.mxu0 %v4965_v49  ;;  %4624 = vmatpush3.bf16.msra.mxu1 %v4966_v51  ;;  %v2070_v49 = vrot.slane %v5599_v0, %v2037_v7  ;;  %v4989_v7 = vld [vmem:[%s5306_s14 + $0x138] sm:$0xff]  }
 0x753   : > { %4603 = vmatprep.subr.bf16.mxu0 %v4967_v53  ;;  %4625 = vmatprep.subr.bf16.mxu1 %v4968_v55  ;;  %v2383_v51 = vadd.f32 %v5633_v40, %v2042_v42  ;;  %v4990_v56 = vld [vmem:[%s5306_s14 + $0x1b8] sm:$0xff]   ;;  %v4991_v40 = vld [vmem:[%s5306_s14 + $0x240] sm:$0xff]   ;;  %v2086_v42 = vrot.slane %v5599_v0, %v2053_v23 }
 0x754   : > { %v2464_v10 = vpop.f32.mrb[48].mxu0  ;;  %v2505_v11 = vpop.f32.mrb[48].mxu1  ;;  %3769 = vmatprep.mubr.bf16.mxu0 %v2615_v60  ;;  %3809 = vmatprep.mubr.bf16.mxu1 %v2617_v61  ;;  %v4993_v61 = vld [vmem:[%s5306_s14 + $0x200] sm:$0xff]   ;;  %v5022_v23 = vld [vmem:[%s5306_s14 + $0x2b8] sm:$0xff]  }
 0x755   : > { %v5647_v2 = vadd.f32 %v2464_v10, %v2058_v58  ;;  %v5649_v4 = vadd.f32 %v2505_v11, %v2066_v59  ;;  %v2466_v12 = vpop.f32.mrb[49].mxu0  ;;  %v2507_v13 = vpop.f32.mrb[49].mxu1  ;;  %v2598_v57 = vmax.f32 %v2383_v51, 0.0  ;;  %v4995_v10 = vld [vmem:[%s5306_s14 + $0x248] sm:$0xff]  }
 0x756   : > { %4604 = vmatpush3.bf16.msra.mxu0 %v4969_v50  ;;  %4626 = vmatpush3.bf16.msra.mxu1 %v4970_v62  ;;  %v2468_v14 = vpop.f32.mrb[50].mxu0  ;;  %v2509_v15 = vpop.f32.mrb[50].mxu1  ;;  %v2467_v53 = vadd.f32 %v2466_v12, %v2062_v48  ;;  %v2508_v55 = vadd.f32 %v2507_v13, %v2070_v49  ;;  %v4996_v11 = vld [vmem:[%s5306_s14 + $0x2c8] sm:$0xff]   ;;  %v5023_v48 = vld [vmem:[%s5306_s14 + $0x340] sm:$0xff]  }
 0x757   : > { %v2469_v19 = vpop.f32.mrb[51].mxu0  ;;  %v2510_v20 = vpop.f32.mrb[51].mxu1  ;;  %4605 = vmatprep.subr.bf16.mxu0 %v4971_v8  ;;  %4627 = vmatprep.subr.bf16.mxu1 %v4972_v9  ;;  %v2614_v50 = vpack.c.bf16 %v2598_v57, %v2598_v57  ;;  %v4994_v8 = vld [vmem:[%s5306_s14 + $0x280] sm:$0xff]   ;;  %v4997_v13 = vld [vmem:[%s5306_s14 + $0x208] sm:$0xff]   ;;  %v4999_v15 = vld [vmem:[%s5306_s14 + $0x250] sm:$0xff]   ;;  %v2604_v49 = vmax.f32 %v5649_v4, 0.0 }
 0x758   : > { %v2603_v59 = vmax.f32 %v2467_v53, 0.0  ;;  %v2605_v60 = vmax.f32 %v2508_v55, 0.0  ;;  %v4998_v14 = vld [vmem:[%s5306_s14 + $0x288] sm:$0xff]   ;;  %v5003_v19 = vld [vmem:[%s5306_s14 + $0x258] sm:$0xff]   ;;  %v5032_v57 = vld [vmem:[%s5306_s14 + $0x3d0] sm:$0xff]  }
 0x759   : > { %v5004_v20 = vld [vmem:[%s5306_s14 + $0x2d8] sm:$0xff]   ;;  %v5028_v4 = vld [vmem:[%s5306_s14 + $0x3c8] sm:$0xff]  }
 0x75a   : > { %4606 = vmatpush3.bf16.msra.mxu0 %v4973_v16  ;;  %4628 = vmatpush3.bf16.msra.mxu1 %v4974_v17  ;;  %v2619_v9 = vpack.c.bf16 %v2603_v59, %v2603_v59  ;;  %v2621_v12 = vpack.c.bf16 %v2605_v60, %v2605_v60  ;;  %v5000_v16 = vld [vmem:[%s5306_s14 + $0x2d0] sm:$0xff]   ;;  %v5029_v55 = vld [vmem:[%s5306_s14 + $0x308] sm:$0xff]   ;;  %v5036_v59 = vld [vmem:[%s5306_s14 + $0x3d8] sm:$0xff]  }
 0x75b   : > { %4607 = vmatprep.subr.bf16.mxu0 %v4975_v21  ;;  %4629 = vmatprep.subr.bf16.mxu1 %v4976_v24  ;;  %v5001_v17 = vld [vmem:[%s5306_s14 + $0x210] sm:$0xff]   ;;  %v5005_v21 = vld [vmem:[%s5306_s14 + $0x218] sm:$0xff]  }
 0x75c   : > { %v2546_v30 = vpop.f32.mrb[52].mxu0  ;;  %v2587_v31 = vpop.f32.mrb[52].mxu1  ;;  %v5006_v24 = vld [vmem:[%s5306_s14 + $0x298] sm:$0xff]  }
 0x75d   : > { %v5661_v32 = vadd.f32 %v2546_v30, %v2074_v25  ;;  %v5664_v33 = vadd.f32 %v2587_v31, %v5604_v1  ;;  %v5666_v34 = vpop.f32.mrb[53].mxu0  ;;  %v5668_v35 = vpop.f32.mrb[53].mxu1  ;;  %v2050_v1 = vrot.slane %v5609_v5, %v2049_v63  ;;  %v4985_v63 = vld [vmem:[%s5306_s14 + $0x130] sm:$0xff]   ;;  %v5007_v25 = vld [vmem:[%s5306_s14 + $0x260] sm:$0xff]   ;;  %v5012_v30 = vld [vmem:[%s5306_s14 + $0x2e8] sm:$0xff]  }
 0x75e   : > { %4608 = vmatpush3.bf16.msra.mxu0 %v4977_v26  ;;  %4630 = vmatpush3.bf16.msra.mxu1 %v4978_v27  ;;  %v2550_v36 = vpop.f32.mrb[54].mxu0  ;;  %v2591_v37 = vpop.f32.mrb[54].mxu1  ;;  %v4986_v5 = vld [vmem:[%s5306_s14 + $0x1b0] sm:$0xff]   ;;  %v5008_v26 = vld [vmem:[%s5306_s14 + $0x2e0] sm:$0xff]   ;;  %v5013_v31 = vld [vmem:[%s5306_s14 + $0x228] sm:$0xff]  }
 0x75f   : > { %v2551_v43 = vpop.f32.mrb[55].mxu0  ;;  %v2592_v44 = vpop.f32.mrb[55].mxu1  ;;  %4609 = vmatprep.subr.bf16.mxu0 %v4979_v28  ;;  %4631 = vmatprep.subr.bf16.mxu1 %v4980_v29  ;;  %v2424_v52 = vadd.f32 %v5635_v41, %v2050_v1  ;;  %v4992_v41 = vld [vmem:[%s5306_s14 + $0x2c0] sm:$0xff]   ;;  %v5011_v29 = vld [vmem:[%s5306_s14 + $0x268] sm:$0xff]   ;;  %v5015_v37 = vld [vmem:[%s5306_s14 + $0x270] sm:$0xff]  }
 0x760   : > { %v5009_v27 = vld [vmem:[%s5306_s14 + $0x220] sm:$0xff]   ;;  %v5014_v36 = vld [vmem:[%s5306_s14 + $0x2a8] sm:$0xff]   ;;  %v5017_v1 = vld [vmem:[%s5306_s14 + $0x230] sm:$0xff]  }
 0x761   : > { %v2600_v58 = vmax.f32 %v2424_v52, 0.0  ;;  %v5010_v28 = vld [vmem:[%s5306_s14 + $0x2a0] sm:$0xff]   ;;  %v5018_v43 = vld [vmem:[%s5306_s14 + $0x2b0] sm:$0xff]   ;;  %v5019_v44 = vld [vmem:[%s5306_s14 + $0x278] sm:$0xff]   ;;  %v2620_v52 = vpack.c.bf16 %v2604_v49, %v2604_v49 }
 0x762   : > { %4610 = vmatpush3.bf16.msra.mxu0 %v4981_v38  ;;  %4632 = vmatpush3.bf16.msra.mxu1 %v4982_v39  ;;  %v5016_v38 = vld [vmem:[%s5306_s14 + $0x2f0] sm:$0xff]   ;;  %v2078_v39 = vrot.slane %v5599_v0, %v2045_v22  ;;  %v2590_v22 = vadd.f32 %v5668_v35, %v2086_v42  ;;  %v2602_v0 = vmax.f32 %v5647_v2, 0.0  ;;  %v5026_v2 = vld [vmem:[%s5306_s14 + $0x380] sm:$0xff]   ;;  %v5037_v60 = vld [vmem:[%s5306_s14 + $0x318] sm:$0xff]  }
 0x763   : > { %4611 = vmatprep.subr.bf16.mxu0 %v4983_v45  ;;  %4633 = vmatprep.subr.bf16.mxu1 %v4984_v47  ;;  %v2616_v62 = vpack.c.bf16 %v2600_v58, %v2600_v58  ;;  %v5020_v45 = vld [vmem:[%s5306_s14 + $0x2f8] sm:$0xff]   ;;  %v5033_v58 = vld [vmem:[%s5306_s14 + $0x310] sm:$0xff]  }
 0x764   : > { %v2549_v47 = vadd.f32 %v5666_v34, %v2078_v39  ;;  %v2609_v51 = vmax.f32 %v2590_v22, 0.0  ;;  %v5025_v34 = vld [vmem:[%s5306_s14 + $0x300] sm:$0xff]   ;;  %v2618_v35 = vpack.c.bf16 %v2602_v0, %v2602_v0 }
 0x766   : > { %4612 = vmatpush3.bf16.msra.mxu0 %v4985_v63  ;;  %4634 = vmatpush3.bf16.msra.mxu1 %v4986_v5  ;;  %v5024_v63 = vld [vmem:[%s5306_s14 + $0x3c0] sm:$0xff]   ;;  %v2607_v5 = vmax.f32 %v2549_v47, 0.0  ;;  %v2625_v53 = vpack.c.bf16 %v2609_v51, %v2609_v51 }
 0x767   : > { %4613 = vmatprep.subr.bf16.mxu0 %v4987_v3  ;;  %4635 = vmatprep.subr.bf16.mxu1 %v4988_v6  ;;  %v5027_v3 = vld [vmem:[%s5306_s14 + $0x348] sm:$0xff]  }
 0x768   : > { %v2623_v6 = vpack.c.bf16 %v2607_v5, %v2607_v5 }
 0x76a   : > { %4614 = vmatpush3.bf16.msra.mxu0 %v4989_v7  ;;  %4636 = vmatpush3.bf16.msra.mxu1 %v4990_v56  ;;  %v5030_v7 = vld [vmem:[%s5306_s14 + $0x388] sm:$0xff]   ;;  %v5031_v56 = vld [vmem:[%s5306_s14 + $0x350] sm:$0xff]  }
 0x76b   : > { %4643 = vmatprep.subr.bf16.mxu0 %v4991_v40  ;;  %4665 = vmatprep.subr.bf16.mxu1 %v4992_v41  ;;  %v5034_v40 = vld [vmem:[%s5306_s14 + $0x390] sm:$0xff]   ;;  %v5035_v41 = vld [vmem:[%s5306_s14 + $0x358] sm:$0xff]  }
 0x76d   : > { %3770 = vmatmul.mubr.bf16.vlgmr.msra.gmra.mrb[60].mxu0 %v2614_v50  ;;  %3810 = vmatmul.mubr.bf16.vlgmr.msra.gmra.mrb[60].mxu1 %v2616_v62  ;;  %v5039_v50 = vld [vmem:[%s5306_s14 + $0x360] sm:$0xff]  }
 0x76e   : > { %4644 = vmatpush3.bf16.msra.mxu0 %v4993_v61  ;;  %3849 = vmatprep.mubr.bf16.mxu0 %v2619_v9  ;;  %v5038_v61 = vld [vmem:[%s5306_s14 + $0x398] sm:$0xff]   ;;  %v5040_v62 = vld [vmem:[%s5306_s14 + $0x3e0] sm:$0xff]  }
 0x76f   : > { %4666 = vmatpush3.bf16.msra.mxu1 %v4994_v8  ;;  %3889 = vmatprep.mubr.bf16.mxu1 %v2621_v12  ;;  %v5041_v8 = vld [vmem:[%s5306_s14 + $0x320] sm:$0xff]   ;;  %v5045_v12 = vld [vmem:[%s5306_s14 + $0x328] sm:$0xff]  }
 0x770   : > { %4645 = vmatprep.subr.bf16.mxu0 %v4995_v10  ;;  %4667 = vmatprep.subr.bf16.mxu1 %v4996_v11  ;;  %v5042_v9 = vld [vmem:[%s5306_s14 + $0x3a0] sm:$0xff]   ;;  %v5043_v10 = vld [vmem:[%s5306_s14 + $0x368] sm:$0xff]  }
 0x771   : > { %v5044_v11 = vld [vmem:[%s5306_s14 + $0x3e8] sm:$0xff]  }
 0x772   : > { %4646 = vmatpush3.bf16.msra.mxu0 %v4997_v13  ;;  %v5046_v13 = vld [vmem:[%s5306_s14 + $0x3a8] sm:$0xff]  }
 0x773   : > { %4668 = vmatpush3.bf16.msra.mxu1 %v4998_v14  ;;  %4647 = vmatprep.subr.bf16.mxu0 %v4999_v15  ;;  %v5047_v14 = vld [vmem:[%s5306_s14 + $0x370] sm:$0xff]  }
 0x774   : > { %4669 = vmatprep.subr.bf16.mxu1 %v5000_v16  ;;  %v5048_v15 = vld [vmem:[%s5306_s14 + $0x3f0] sm:$0xff]  }
 0x775   : > { %v5049_v16 = vld [vmem:[%s5306_s14 + $0x330] sm:$0xff]  }
 0x776   : > { %4648 = vmatpush3.bf16.msra.mxu0 %v5001_v17  ;;  %v5050_v17 = vld [vmem:[%s5306_s14 + $0x3b0] sm:$0xff]  }
 0x777   : > { %4670 = vmatpush3.bf16.msra.mxu1 %v5002_v18  ;;  %4649 = vmatprep.subr.bf16.mxu0 %v5003_v19  ;;  %v5051_v18 = vld [vmem:[%s5306_s14 + $0x378] sm:$0xff]  }
 0x778   : > { %4671 = vmatprep.subr.bf16.mxu1 %v5004_v20  ;;  %v5052_v19 = vld [vmem:[%s5306_s14 + $0x3f8] sm:$0xff]  }
 0x779   : > { %v5053_v20 = vld [vmem:[%s5306_s14 + $0x338] sm:$0xff]  }
 0x77a   : > { %4650 = vmatpush3.bf16.msra.mxu0 %v5005_v21  ;;  %v2606_v21 = vmax.f32 %v5661_v32, 0.0 }
 0x77b   : > { %4672 = vmatpush3.bf16.msra.mxu1 %v5006_v24  ;;  %4651 = vmatprep.subr.bf16.mxu0 %v5007_v25  ;;  %v5054_v24 = vld [vmem:[%s5306_s14 + $0x3b8] sm:$0xff]   ;;  %v2608_v25 = vmax.f32 %v5664_v33, 0.0 }
 0x77c   : > { %4673 = vmatprep.subr.bf16.mxu1 %v5008_v26  ;;  %v2622_v26 = vpack.c.bf16 %v2606_v21, %v2606_v21 }
 0x77e   : > { %4652 = vmatpush3.bf16.msra.mxu0 %v5009_v27  ;;  %v2624_v27 = vpack.c.bf16 %v2608_v25, %v2608_v25 }
 0x77f   : > { %4674 = vmatpush3.bf16.msra.mxu1 %v5010_v28  ;;  %4653 = vmatprep.subr.bf16.mxu0 %v5011_v29 }
 0x780   : > { %4675 = vmatprep.subr.bf16.mxu1 %v5012_v30  ;;  %v4366_v30 = vld [vmem:[%s780_s25] ss:$0 sm:$0xff] }
 0x782   : > { %4654 = vmatpush3.bf16.msra.mxu0 %v5013_v31 }
 0x783   : > { %4676 = vmatpush3.bf16.msra.mxu1 %v5014_v36  ;;  %4655 = vmatprep.subr.bf16.mxu0 %v5015_v37 }
 0x784   : > { %4677 = vmatprep.subr.bf16.mxu1 %v5016_v38 }
 0x786   : > { %4656 = vmatpush3.bf16.msra.mxu0 %v5017_v1 }
 0x787   : > { %4678 = vmatpush3.bf16.msra.mxu1 %v5018_v43  ;;  %4657 = vmatprep.subr.bf16.mxu0 %v5019_v44 }
 0x788   : > { %4679 = vmatprep.subr.bf16.mxu1 %v5020_v45 }
 0x78a   : > { %4658 = vmatpush3.bf16.msra.mxu0 %v5021_v46 }
 0x78b   : > { %4680 = vmatpush3.bf16.msra.mxu1 %v5022_v23  ;;  %4687 = vmatprep.subr.bf16.mxu0 %v5023_v48 }
 0x78c   : > { %4709 = vmatprep.subr.bf16.mxu1 %v5024_v63 }
 0x78d   : > { %3850 = vmatmul.mubr.bf16.vlgmr.msra.gmra.mrb[64].mxu0 %v2618_v35 }
 0x78e   : > { %3890 = vmatmul.mubr.bf16.vlgmr.msra.gmra.mrb[64].mxu1 %v2620_v52  ;;  %4688 = vmatpush3.bf16.msra.mxu0 %v5025_v34 }
 0x78f   : > { %3929 = vmatprep.mubr.bf16.mxu0 %v2623_v6  ;;  %4710 = vmatpush3.bf16.msra.mxu1 %v5026_v2 }
 0x790   : > { %3969 = vmatprep.mubr.bf16.mxu1 %v2625_v53  ;;  %4689 = vmatprep.subr.bf16.mxu0 %v5027_v3 }
 0x791   : > { %4711 = vmatprep.subr.bf16.mxu1 %v5028_v4 }
 0x792   : > { %4690 = vmatpush3.bf16.msra.mxu0 %v5029_v55 }
 0x793   : > { %4712 = vmatpush3.bf16.msra.mxu1 %v5030_v7  ;;  %4691 = vmatprep.subr.bf16.mxu0 %v5031_v56 }
 0x794   : > { %4713 = vmatprep.subr.bf16.mxu1 %v5032_v57 }
 0x796   : > { %4692 = vmatpush3.bf16.msra.mxu0 %v5033_v58 }
 0x797   : > { %4714 = vmatpush3.bf16.msra.mxu1 %v5034_v40  ;;  %4693 = vmatprep.subr.bf16.mxu0 %v5035_v41 }
 0x798   : > { %4715 = vmatprep.subr.bf16.mxu1 %v5036_v59 }
 0x79a   : > { %4694 = vmatpush3.bf16.msra.mxu0 %v5037_v60 }
 0x79b   : > { %4716 = vmatpush3.bf16.msra.mxu1 %v5038_v61  ;;  %4695 = vmatprep.subr.bf16.mxu0 %v5039_v50 }
 0x79c   : > { %4717 = vmatprep.subr.bf16.mxu1 %v5040_v62 }
 0x79e   : > { %4696 = vmatpush3.bf16.msra.mxu0 %v5041_v8 }
 0x79f   : > { %4718 = vmatpush3.bf16.msra.mxu1 %v5042_v9  ;;  %4697 = vmatprep.subr.bf16.mxu0 %v5043_v10 }
 0x7a0   : > { %4719 = vmatprep.subr.bf16.mxu1 %v5044_v11 }
 0x7a2   : > { %4698 = vmatpush3.bf16.msra.mxu0 %v5045_v12 }
 0x7a3   : > { %4720 = vmatpush3.bf16.msra.mxu1 %v5046_v13  ;;  %4699 = vmatprep.subr.bf16.mxu0 %v5047_v14 }
 0x7a4   : > { %4721 = vmatprep.subr.bf16.mxu1 %v5048_v15 }
 0x7a6   : > { %4700 = vmatpush3.bf16.msra.mxu0 %v5049_v16 }
 0x7a7   : > { %4722 = vmatpush3.bf16.msra.mxu1 %v5050_v17  ;;  %4701 = vmatprep.subr.bf16.mxu0 %v5051_v18 }
 0x7a8   : > { %4723 = vmatprep.subr.bf16.mxu1 %v5052_v19 }
 0x7aa   : > { %4702 = vmatpush3.bf16.msra.mxu0 %v5053_v20 }
 0x7ab   : > { %4724 = vmatpush3.bf16.msra.mxu1 %v5054_v24 }
 0x7ad   : > { %3930 = vmatmul.mubr.bf16.vlgmr.msra.gmra.mrb[68].mxu0 %v2622_v26  ;;  %v4496_v26 = vld [vmem:[%s786_s27] ss:$0 sm:$0xff]  ;;  %s5877_s27 = sld [smem:[#allocation21_spill]] (!%p4497_p8) }
 0x7ae   : > { %3970 = vmatmul.mubr.bf16.vlgmr.msra.gmra.mrb[68].mxu1 %v2624_v27 }
 0x820   : > { %v4571_v28 = vpop.f32.mrb[56].mxu0  ;;  %v4593_v29 = vpop.f32.mrb[56].mxu1 }
 0x821   : > { %v4572_v32 = vpop.f32.mrb[57].mxu0  ;;  %v4594_v31 = vpop.f32.mrb[57].mxu1 }
 0x822   : > { %v4573_v36 = vadd.f32 %v4572_v32, %v4571_v28  ;;  %v4595_v37 = vadd.f32 %v4594_v31, %v4593_v29  ;;  %v4574_v38 = vpop.f32.mrb[58].mxu0  ;;  %v4596_v33 = vpop.f32.mrb[58].mxu1 }
 0x823   : > { %v4575_v39 = vpop.f32.mrb[59].mxu0  ;;  %v4597_v42 = vpop.f32.mrb[59].mxu1 }
 0x824   : > { %v3692_v1 = vadd.f32 %v4573_v36, %v4366_v30 }
 0x826   : > { %v3732_v43 = vadd.f32 %v4595_v37, %v3692_v1  ;;  %v4498_v1 = vld [vmem:[%s5877_s27] ss:$0 sm:$0xff] (!%p4497_p8) }
 0x840   : > { %v4615_v44 = vpop.f32.mrb[60].mxu0  ;;  %v4637_v45 = vpop.f32.mrb[60].mxu1 }
 0x841   : > { %v4616_v47 = vpop.f32.mrb[61].mxu0  ;;  %v4638_v22 = vpop.f32.mrb[61].mxu1 }
 0x842   : > { %v4617_v46 = vadd.f32 %v4616_v47, %v4615_v44  ;;  %v4639_v0 = vadd.f32 %v4638_v22, %v4637_v45  ;;  %v4618_v23 = vpop.f32.mrb[62].mxu0  ;;  %v4640_v48 = vpop.f32.mrb[62].mxu1  ;;  %v4499_v44 = vld [vmem:[%s5878_s10] ss:$0 sm:$0xff] (!%p4497_p8) }
 0x843   : > { %v4619_v49 = vpop.f32.mrb[63].mxu0  ;;  %v4641_v63 = vpop.f32.mrb[63].mxu1 }
 0x844   : > { %v3772_v5 = vadd.f32 %v4617_v46, %v3732_v43 }
 0x846   : > { %v3812_v51 = vadd.f32 %v4639_v0, %v3772_v5 }
 0x860   : > { %v4659_v34 = vpop.f32.mrb[64].mxu0 }
 0x861   : > { %v4681_v35 = vpop.f32.mrb[64].mxu1  ;;  %v4660_v2 = vpop.f32.mrb[65].mxu0 }
 0x862   : > { %v4661_v52 = vadd.f32 %v4660_v2, %v4659_v34  ;;  %v4682_v3 = vpop.f32.mrb[65].mxu1  ;;  %v4662_v6 = vpop.f32.mrb[66].mxu0 }
 0x863   : > { %v4683_v4 = vadd.f32 %v4682_v3, %v4681_v35  ;;  %v4684_v53 = vpop.f32.mrb[66].mxu1  ;;  %v4663_v55 = vpop.f32.mrb[67].mxu0 }
 0x864   : > { %v3852_v7 = vadd.f32 %v4661_v52, %v3812_v51  ;;  %v4685_v56 = vpop.f32.mrb[67].mxu1 }
 0x866   : > { %v3892_v57 = vadd.f32 %v4683_v4, %v3852_v7 }
 0x880   : > { %v4703_v58 = vpop.f32.mrb[68].mxu0 }
 0x881   : > { %v4725_v40 = vpop.f32.mrb[68].mxu1  ;;  %v4704_v41 = vpop.f32.mrb[69].mxu0 }
 0x882   : > { %v4705_v59 = vadd.f32 %v4704_v41, %v4703_v58  ;;  %v4726_v60 = vpop.f32.mrb[69].mxu1  ;;  %v4706_v61 = vpop.f32.mrb[70].mxu0 }
 0x883   : > { %v4727_v50 = vadd.f32 %v4726_v60, %v4725_v40  ;;  %v4728_v62 = vpop.f32.mrb[70].mxu1  ;;  %v4707_v8 = vpop.f32.mrb[71].mxu0 }
 0x884   : > { %v3932_v9 = vadd.f32 %v4705_v59, %v3892_v57  ;;  %v4729_v10 = vpop.f32.mrb[71].mxu1 }
 0x886   : > { %v3972_v11 = vadd.f32 %v4727_v50, %v3932_v9 }
 0x888   : > { %v3977_v12 = vadd.f32 %v3972_v11, %v5517_v54  ;;  %v4495_v54 = vld [vmem:[%s783_s3] ss:$0 sm:$0xff] }
 0x88a   : > { %v3980_v13 = vsel %vm883_vm2, %v3977_v12, 0.0 }
 0x88b   : > { %3981 = vadd.xlane.f32.xlu0 %v3980_v13 }
 0x918   : > { %v3982_v14 = vpop.xlane.xlu0 %3981 }
 0x919   : > { %v3983_v15 = vmul.f32 0.03125, %v3982_v14 }
 0x91b   : > { %v3984_v16 = vsub.f32 %v3977_v12, %v3983_v15 }
 0x91d   : > { %v3985_v17 = vmul.f32 %v3984_v16, %v3984_v16 }
 0x91f   : > { %v3986_v18 = vsel %vm883_vm2, %v3985_v17, 0.0 }
 0x920   : > { %3987 = vadd.xlane.f32.xlu0 %v3986_v18 }
 0x9ad   : > { %v3988_v19 = vpop.xlane.xlu0 %3987 }
 0x9ae   : > { %v3989_v20 = vmul.f32 0.03125, %v3988_v19 }
 0x9b0   : > { %v3990_v21 = vadd.f32 1e-05, %v3989_v20 }
 0x9b2   : > { %5073 = vrsqrt.f32 %v3990_v21 }
 0x9bc   : > { %v5074_v24 = vpop.eup %5073 }
 0x9bd   : > { %v3992_v25 = vmul.f32 %v5074_v24, %v3984_v16  ;;  %4011 = sbr.rel (%p4497_p8) target bundleno = 2815 (0xaff), region = 96 }
 0x9bf   : > { %v3999_v27 = vmul.f32 %v4495_v54, %v3992_v25 }
 0x9c1   : > { %v4006_v28 = vadd.f32 %v4496_v26, %v3999_v27 }
 0x9c3   : > { %4007 = vst.msk [vmem:[#allocation2] sm:$0xff] %vm883_vm2, %v4006_v28  ;;  %v4014_v29 = vsel (!%p4497_p8), %vm883_vm2, %v4006_v28, 0.0 }
 0x9c4   : > { %4015 = vadd.xlane.f32.xlu0 %v4014_v29 }
 0xa51   : > { %v4016_v30 = vpop.xlane.xlu0 %4015 }
 0xa52   : > { %v4017_v32 = vmul.f32 0.03125, %v4016_v30 }
 0xa54   : > { %v4018_v31 = vsub.f32 %v4006_v28, %v4017_v32 }
 0xa56   : > { %v4019_v36 = vmul.f32 %v4018_v31, %v4018_v31 }
 0xa58   : > { %v4020_v37 = vsel %vm883_vm2, %v4019_v36, 0.0 }
 0xa59   : > { %4021 = vadd.xlane.f32.xlu0 %v4020_v37 }
 0xae6   : > { %v4022_v38 = vpop.xlane.xlu0 %4021 }
 0xae7   : > { %v4023_v33 = vmul.f32 0.03125, %v4022_v38 }
 0xae9   : > { %v4024_v39 = vadd.f32 1e-05, %v4023_v33 }
 0xaeb   : > { %5076 = vrsqrt.f32 %v4024_v39 }
 0xaf5   : > { %v5077_v42 = vpop.eup %5076 }
 0xaf6   : > { %v4026_v43 = vmul.f32 %v5077_v42, %v4018_v31 }
 0xaf8   : > { %v4033_v45 = vmul.f32 %v4498_v1, %v4026_v43 }
 0xafa   : > { %v4040_v47 = vadd.f32 %v4499_v44, %v4033_v45 }
 0xafc   : > { %v4041_v22 = vpack.c.bf16 %v4040_v47, %v4040_v47 }
 0xafe   : > { %4043 = vst.msk [vmem:[%s5323_s4] sm:$0xf] %vm4042_vm5, %v4041_v22 }
 0xaff PF: > { %s5879_s17 = sld [smem:[#allocation6_spill]]  ;;  %s5880_s24 = sld [smem:[#allocation4_spill]] }
 0xb00   : > { %s5881_s25 = sld [smem:[#allocation5_spill]]  ;;  %s5882_s26 = sld [smem:[#allocation7_spill]] }
 0xb01   : > { %s5883_s27 = sld [smem:[#allocation8_spill]] }
 0xb05   : > { %s27_s28 = sadd.s32 1, %s5879_s17  }
 0xb06   : > { %p24_p9 = scmp.ge.s32.totalorder %s27_s28, 6  }
 0xb08   :  { %26 = sbr.rel (!%p24_p9) target bundleno = 13 (0xd), region = 168 }

// kernel: forward.7
= control target key start
LH: loop header
LB: loop body
LE: loop exit
PB: predicated region body
PF: predicated region fallthrough
CT: control target
= control target key end

     0   :  { %v11361_v0 = vmov 0.0   ;;  %vm9528_vm0 = vmmov 0   ;;  %vm123_vm1 = vcmask 261120   ;;  %vm1492_vm2 = vcmask 1041408   ;;  %s9529_s21 = smov 120   ;;  %s11352_s2 = inlined_call_operand.vmem [shape: bf16[4,32,8], index: 2, kind: input, shape index: {}]   ;;  %s11353_s0 = inlined_call_operand.vmem [shape: bf16[8,2,32], index: 0, kind: input, shape index: {}]   ;;  %s11354_s4 = inlined_call_operand.vmem [shape: bf16[4,4,16], index: 4, kind: input, shape index: {}]   ;;  %s11355_s1 = inlined_call_operand.vmem [shape: f32[8,2,4], index: 1, kind: input, shape index: {}]   ;;  %s11356_s5 = inlined_call_operand.vmem [shape: f32[4,1,16], index: 5, kind: input, shape index: {}]   ;;  %s11357_s3 = inlined_call_operand.vmem [shape: f32[4,1,8], index: 3, kind: input, shape index: {}]   ;;  %s11358_s6 = inlined_call_operand.vmem [shape: bf16[4,8,32], index: 6, kind: input, shape index: {}]   ;;  %s11359_s7 = inlined_call_operand.vmem [shape: f32[1,32], index: 7, kind: input, shape index: {}]   ;;  %s11360_s8 = inlined_call_operand.vmem [shape: bf16[8,2,32], index: 8, kind: output, shape index: {}]  }
   0x1   :  { %8356 = vmatprep.subr.bf16.mxu0 %v11361_v0  ;;  %8364 = vmatprep.subr.bf16.mxu1 %v11361_v0  ;;  %v9580_v1 = vld [vmem:[%s11352_s2] sm:$0xff]   ;;  %v9585_v2 = vld [vmem:[%s11352_s2 + $0x10] sm:$0xff]   ;;  %v9595_v3 = vld [vmem:[%s11352_s2 + $0x8] sm:$0xff]   ;;  %vm1488_vm3 = vcmask 31744   ;;  %vm2870_vm4 = vcmask 64512   ;;  %vm4735_vm5 = vcmask 1040384  }
   0x2   :  { %8360 = vmatprep.mubr.msk.bf16.mxu0 %vm9528_vm0, %v11361_v0  ;;  %8368 = vmatprep.mubr.msk.bf16.mxu1 %vm9528_vm0, %v11361_v0  ;;  %v9602_v4 = vld [vmem:[%s11352_s2 + $0x18] sm:$0xff]   ;;  %v30_v5 = vld [vmem:[%s11353_s0] sm:$0x1]  ;;  %v9619_v7 = vld [vmem:[%s11352_s2 + $0x30] sm:$0xff]   ;;  %vm4343_vm6 = vcmask 9216   ;;  %vm4731_vm7 = vcmask 15360  }
   0x3   :  { %8357 = vmatpush3.bf16.msra.mxu0 %v9580_v1  ;;  %8365 = vmatpush3.bf16.msra.mxu1 %v9585_v2  ;;  %v9612_v6 = vld [vmem:[%s11352_s2 + $0x20] sm:$0xff]   ;;  %v9628_v8 = vld [vmem:[%s11352_s2 + $0x28] sm:$0xff]   ;;  %v9635_v9 = vld [vmem:[%s11352_s2 + $0x38] sm:$0xff]   ;;  %vm6333_vm8 = vcmask 1043456   ;;  %vm7719_vm9 = vcmask 254976   ;;  %vm7814_vm10 = vcmask 253952  }
   0x4   :  { %8358 = vmatprep.subr.bf16.mxu0 %v11361_v0  ;;  %8366 = vmatprep.subr.bf16.mxu1 %v11361_v0  ;;  %v31_v10 = vld [vmem:[%s11353_s0 + $0x1] sm:$0x1]  ;;  %v32_v11 = vld [vmem:[%s11353_s0 + $0x2] sm:$0x1]  ;;  %v33_v12 = vld [vmem:[%s11353_s0 + $0x3] sm:$0x1] }
   0x5   :  { %v34_v13 = vld [vmem:[%s11353_s0 + $0x4] sm:$0x1]  ;;  %v35_v14 = vld [vmem:[%s11353_s0 + $0x5] sm:$0x1]  ;;  %v36_v15 = vld [vmem:[%s11353_s0 + $0x6] sm:$0x1] }
   0x6   :  { %v37_v16 = vld [vmem:[%s11353_s0 + $0x7] sm:$0x1]  ;;  %v66_v17 = vld [vmem:[%s11354_s4] sm:$0x3]  ;;  %v67_v18 = vld [vmem:[%s11354_s4 + $0x2] sm:$0x3] }
   0x7   :  { %8359 = vmatpush3.bf16.msra.mxu0 %v9595_v3  ;;  %8367 = vmatpush3.bf16.msra.mxu1 %v9602_v4  ;;  %v9869_v19 = vsel %vm1492_vm2, %v66_v17, 0  ;;  %v9873_v20 = vsel %vm1492_vm2, %v67_v18, 0  ;;  %v38_v21 = vld [vmem:[%s11355_s1] sm:$0x3]  ;;  %v68_v22 = vld [vmem:[%s11354_s4 + $0x4] sm:$0x3] }
   0x8   :  { %8372 = vmatprep.subr.bf16.mxu0 %v11361_v0  ;;  %8380 = vmatprep.subr.bf16.mxu1 %v11361_v0  ;;  %v79_v23 = vpack.c.bf16 %v38_v21, %v38_v21  ;;  %v69_v24 = vld [vmem:[%s11354_s4 + $0x6] sm:$0x3]  ;;  %v9895_v25 = vsel %vm1492_vm2, %v68_v22, 0  ;;  %v39_v27 = vld [vmem:[%s11355_s1 + $0x2] sm:$0x3] }
   0x9   :  { %v9898_v26 = vsel %vm1492_vm2, %v69_v24, 0  ;;  %v80_v28 = vpack.c.bf16 %v39_v27, %v39_v27  ;;  %v40_v29 = vld [vmem:[%s11355_s1 + $0x4] sm:$0x3]  ;;  %v41_v31 = vld [vmem:[%s11355_s1 + $0x6] sm:$0x3] }
   0xa   :  { %8361 = vmatmul.mubr.msk.bf16.vlgmr.msra.gmra.mrb[0].mxu0 %vm123_vm1, %v30_v5  ;;  %8369 = vmatmul.mubr.msk.bf16.vlgmr.msra.gmra.mrb[0].mxu1 %vm123_vm1, %v30_v5  ;;  %v81_v30 = vpack.c.bf16 %v40_v29, %v40_v29  ;;  %v82_v32 = vpack.c.bf16 %v41_v31, %v41_v31  ;;  %v42_v33 = vld [vmem:[%s11355_s1 + $0x8] sm:$0x3]  ;;  %v43_v35 = vld [vmem:[%s11355_s1 + $0xa] sm:$0x3]  ;;  %v44_v45 = vld [vmem:[%s11355_s1 + $0xc] sm:$0x3] }
   0xb   :  { %8373 = vmatpush3.bf16.msra.mxu0 %v9612_v6  ;;  %8381 = vmatpush3.bf16.msra.mxu1 %v9619_v7  ;;  %v83_v34 = vpack.c.bf16 %v42_v33, %v42_v33  ;;  %v84_v36 = vpack.c.bf16 %v43_v35, %v43_v35  ;;  %v85_v49 = vpack.c.bf16 %v44_v45, %v44_v45  ;;  %v45_v63 = vld [vmem:[%s11355_s1 + $0xe] sm:$0x3] }
   0xc   :  { %8374 = vmatprep.subr.bf16.mxu0 %v11361_v0  ;;  %8382 = vmatprep.subr.bf16.mxu1 %v11361_v0 }
   0xd   :  { %8376 = vmatprep.mubr.msk.bf16.mxu0 %vm9528_vm0, %v11361_v0  ;;  %8384 = vmatprep.mubr.msk.bf16.mxu1 %vm9528_vm0, %v11361_v0 }
   0xf   :  { %8375 = vmatpush3.bf16.msra.mxu0 %v9628_v8  ;;  %8383 = vmatpush3.bf16.msra.mxu1 %v9635_v9 }
  0x10   :  { %8388 = vmatprep.subr.bf16.mxu0 %v11361_v0  ;;  %8396 = vmatprep.subr.bf16.mxu1 %v11361_v0 }
  0x12   :  { %8377 = vmatmul.mubr.msk.bf16.vlgmr.msra.gmra.mrb[4].mxu0 %vm123_vm1, %v30_v5  ;;  %8385 = vmatmul.mubr.msk.bf16.vlgmr.msra.gmra.mrb[4].mxu1 %vm123_vm1, %v30_v5 }
  0x13   :  { %8389 = vmatpush3.bf16.msra.mxu0 %v9580_v1  ;;  %8397 = vmatpush3.bf16.msra.mxu1 %v9585_v2 }
  0x14   :  { %8390 = vmatprep.subr.bf16.mxu0 %v11361_v0  ;;  %8398 = vmatprep.subr.bf16.mxu1 %v11361_v0 }
  0x15   :  { %8392 = vmatprep.mubr.msk.bf16.mxu0 %vm9528_vm0, %v11361_v0  ;;  %8400 = vmatprep.mubr.msk.bf16.mxu1 %vm9528_vm0, %v11361_v0 }
  0x17   :  { %8391 = vmatpush3.bf16.msra.mxu0 %v9595_v3  ;;  %8399 = vmatpush3.bf16.msra.mxu1 %v9602_v4 }
  0x18   :  { %8404 = vmatprep.subr.bf16.mxu0 %v11361_v0  ;;  %8412 = vmatprep.subr.bf16.mxu1 %v11361_v0 }
  0x1a   :  { %8393 = vmatmul.mubr.msk.bf16.vlgmr.msra.gmra.mrb[8].mxu0 %vm123_vm1, %v31_v10  ;;  %8401 = vmatmul.mubr.msk.bf16.vlgmr.msra.gmra.mrb[8].mxu1 %vm123_vm1, %v31_v10 }
  0x1b   :  { %8405 = vmatpush3.bf16.msra.mxu0 %v9612_v6  ;;  %8413 = vmatpush3.bf16.msra.mxu1 %v9619_v7 }
  0x1c   :  { %8406 = vmatprep.subr.bf16.mxu0 %v11361_v0  ;;  %8414 = vmatprep.subr.bf16.mxu1 %v11361_v0 }
  0x1d   :  { %8408 = vmatprep.mubr.msk.bf16.mxu0 %vm9528_vm0, %v11361_v0  ;;  %8416 = vmatprep.mubr.msk.bf16.mxu1 %vm9528_vm0, %v11361_v0 }
  0x1f   :  { %8407 = vmatpush3.bf16.msra.mxu0 %v9628_v8  ;;  %8415 = vmatpush3.bf16.msra.mxu1 %v9635_v9 }
  0x20   :  { %8420 = vmatprep.subr.bf16.mxu0 %v11361_v0  ;;  %8428 = vmatprep.subr.bf16.mxu1 %v11361_v0 }
  0x22   :  { %8409 = vmatmul.mubr.msk.bf16.vlgmr.msra.gmra.mrb[12].mxu0 %vm123_vm1, %v31_v10  ;;  %8417 = vmatmul.mubr.msk.bf16.vlgmr.msra.gmra.mrb[12].mxu1 %vm123_vm1, %v31_v10 }
  0x23   :  { %8421 = vmatpush3.bf16.msra.mxu0 %v9580_v1  ;;  %8429 = vmatpush3.bf16.msra.mxu1 %v9585_v2 }
  0x24   :  { %8422 = vmatprep.subr.bf16.mxu0 %v11361_v0  ;;  %8430 = vmatprep.subr.bf16.mxu1 %v11361_v0 }
  0x25   :  { %8424 = vmatprep.mubr.msk.bf16.mxu0 %vm9528_vm0, %v11361_v0  ;;  %8432 = vmatprep.mubr.msk.bf16.mxu1 %vm9528_vm0, %v11361_v0 }
  0x27   :  { %8423 = vmatpush3.bf16.msra.mxu0 %v9595_v3  ;;  %8431 = vmatpush3.bf16.msra.mxu1 %v9602_v4 }
  0x28   :  { %8436 = vmatprep.subr.bf16.mxu0 %v11361_v0  ;;  %8444 = vmatprep.subr.bf16.mxu1 %v11361_v0 }
  0x2a   :  { %8425 = vmatmul.mubr.msk.bf16.vlgmr.msra.gmra.mrb[16].mxu0 %vm123_vm1, %v32_v11  ;;  %8433 = vmatmul.mubr.msk.bf16.vlgmr.msra.gmra.mrb[16].mxu1 %vm123_vm1, %v32_v11 }
  0x2b   :  { %8437 = vmatpush3.bf16.msra.mxu0 %v9612_v6  ;;  %8445 = vmatpush3.bf16.msra.mxu1 %v9619_v7 }
  0x2c   :  { %8438 = vmatprep.subr.bf16.mxu0 %v11361_v0  ;;  %8446 = vmatprep.subr.bf16.mxu1 %v11361_v0 }
  0x2d   :  { %8440 = vmatprep.mubr.msk.bf16.mxu0 %vm9528_vm0, %v11361_v0  ;;  %8448 = vmatprep.mubr.msk.bf16.mxu1 %vm9528_vm0, %v11361_v0 }
  0x2f   :  { %8439 = vmatpush3.bf16.msra.mxu0 %v9628_v8  ;;  %8447 = vmatpush3.bf16.msra.mxu1 %v9635_v9 }
  0x30   :  { %8452 = vmatprep.subr.bf16.mxu0 %v11361_v0  ;;  %8460 = vmatprep.subr.bf16.mxu1 %v11361_v0 }
  0x32   :  { %8441 = vmatmul.mubr.msk.bf16.vlgmr.msra.gmra.mrb[20].mxu0 %vm123_vm1, %v32_v11  ;;  %8449 = vmatmul.mubr.msk.bf16.vlgmr.msra.gmra.mrb[20].mxu1 %vm123_vm1, %v32_v11 }
  0x33   :  { %8453 = vmatpush3.bf16.msra.mxu0 %v9580_v1  ;;  %8461 = vmatpush3.bf16.msra.mxu1 %v9585_v2 }
  0x34   :  { %8454 = vmatprep.subr.bf16.mxu0 %v11361_v0  ;;  %8462 = vmatprep.subr.bf16.mxu1 %v11361_v0 }
  0x35   :  { %8456 = vmatprep.mubr.msk.bf16.mxu0 %vm9528_vm0, %v11361_v0  ;;  %8464 = vmatprep.mubr.msk.bf16.mxu1 %vm9528_vm0, %v11361_v0 }
  0x37   :  { %8455 = vmatpush3.bf16.msra.mxu0 %v9595_v3  ;;  %8463 = vmatpush3.bf16.msra.mxu1 %v9602_v4 }
  0x38   :  { %8468 = vmatprep.subr.bf16.mxu0 %v11361_v0  ;;  %8476 = vmatprep.subr.bf16.mxu1 %v11361_v0 }
  0x3a   :  { %8457 = vmatmul.mubr.msk.bf16.vlgmr.msra.gmra.mrb[24].mxu0 %vm123_vm1, %v33_v12  ;;  %8465 = vmatmul.mubr.msk.bf16.vlgmr.msra.gmra.mrb[24].mxu1 %vm123_vm1, %v33_v12 }
  0x3b   :  { %8469 = vmatpush3.bf16.msra.mxu0 %v9612_v6  ;;  %8477 = vmatpush3.bf16.msra.mxu1 %v9619_v7 }
  0x3c   :  { %8470 = vmatprep.subr.bf16.mxu0 %v11361_v0  ;;  %8478 = vmatprep.subr.bf16.mxu1 %v11361_v0 }
  0x3d   :  { %8472 = vmatprep.mubr.msk.bf16.mxu0 %vm9528_vm0, %v11361_v0  ;;  %8480 = vmatprep.mubr.msk.bf16.mxu1 %vm9528_vm0, %v11361_v0 }
  0x3f   :  { %8471 = vmatpush3.bf16.msra.mxu0 %v9628_v8  ;;  %8479 = vmatpush3.bf16.msra.mxu1 %v9635_v9 }
  0x40   :  { %8484 = vmatprep.subr.bf16.mxu0 %v11361_v0  ;;  %8492 = vmatprep.subr.bf16.mxu1 %v11361_v0 }
  0x42   :  { %8473 = vmatmul.mubr.msk.bf16.vlgmr.msra.gmra.mrb[28].mxu0 %vm123_vm1, %v33_v12  ;;  %8481 = vmatmul.mubr.msk.bf16.vlgmr.msra.gmra.mrb[28].mxu1 %vm123_vm1, %v33_v12 }
  0x43   :  { %8485 = vmatpush3.bf16.msra.mxu0 %v9580_v1  ;;  %8493 = vmatpush3.bf16.msra.mxu1 %v9585_v2 }
  0x44   :  { %8486 = vmatprep.subr.bf16.mxu0 %v11361_v0  ;;  %8494 = vmatprep.subr.bf16.mxu1 %v11361_v0 }
  0x45   :  { %8488 = vmatprep.mubr.msk.bf16.mxu0 %vm9528_vm0, %v11361_v0  ;;  %8496 = vmatprep.mubr.msk.bf16.mxu1 %vm9528_vm0, %v11361_v0 }
  0x47   :  { %8487 = vmatpush3.bf16.msra.mxu0 %v9595_v3  ;;  %8495 = vmatpush3.bf16.msra.mxu1 %v9602_v4 }
  0x48   :  { %8500 = vmatprep.subr.bf16.mxu0 %v11361_v0  ;;  %8508 = vmatprep.subr.bf16.mxu1 %v11361_v0 }
  0x4a   :  { %8489 = vmatmul.mubr.msk.bf16.vlgmr.msra.gmra.mrb[32].mxu0 %vm123_vm1, %v34_v13  ;;  %8497 = vmatmul.mubr.msk.bf16.vlgmr.msra.gmra.mrb[32].mxu1 %vm123_vm1, %v34_v13 }
  0x4b   :  { %8501 = vmatpush3.bf16.msra.mxu0 %v9612_v6  ;;  %8509 = vmatpush3.bf16.msra.mxu1 %v9619_v7 }
  0x4c   :  { %8502 = vmatprep.subr.bf16.mxu0 %v11361_v0  ;;  %8510 = vmatprep.subr.bf16.mxu1 %v11361_v0 }
  0x4d   :  { %8504 = vmatprep.mubr.msk.bf16.mxu0 %vm9528_vm0, %v11361_v0  ;;  %8512 = vmatprep.mubr.msk.bf16.mxu1 %vm9528_vm0, %v11361_v0 }
  0x4f   :  { %8503 = vmatpush3.bf16.msra.mxu0 %v9628_v8  ;;  %8511 = vmatpush3.bf16.msra.mxu1 %v9635_v9 }
  0x50   :  { %8516 = vmatprep.subr.bf16.mxu0 %v11361_v0  ;;  %8524 = vmatprep.subr.bf16.mxu1 %v11361_v0 }
  0x52   :  { %8505 = vmatmul.mubr.msk.bf16.vlgmr.msra.gmra.mrb[36].mxu0 %vm123_vm1, %v34_v13  ;;  %8513 = vmatmul.mubr.msk.bf16.vlgmr.msra.gmra.mrb[36].mxu1 %vm123_vm1, %v34_v13 }
  0x53   :  { %8517 = vmatpush3.bf16.msra.mxu0 %v9580_v1  ;;  %8525 = vmatpush3.bf16.msra.mxu1 %v9585_v2 }
  0x54   :  { %8518 = vmatprep.subr.bf16.mxu0 %v11361_v0  ;;  %8526 = vmatprep.subr.bf16.mxu1 %v11361_v0 }
  0x55   :  { %8520 = vmatprep.mubr.msk.bf16.mxu0 %vm9528_vm0, %v11361_v0  ;;  %8528 = vmatprep.mubr.msk.bf16.mxu1 %vm9528_vm0, %v11361_v0 }
  0x57   :  { %8519 = vmatpush3.bf16.msra.mxu0 %v9595_v3  ;;  %8527 = vmatpush3.bf16.msra.mxu1 %v9602_v4 }
  0x58   :  { %8532 = vmatprep.subr.bf16.mxu0 %v11361_v0  ;;  %8540 = vmatprep.subr.bf16.mxu1 %v11361_v0 }
  0x5a   :  { %8521 = vmatmul.mubr.msk.bf16.vlgmr.msra.gmra.mrb[40].mxu0 %vm123_vm1, %v35_v14  ;;  %8529 = vmatmul.mubr.msk.bf16.vlgmr.msra.gmra.mrb[40].mxu1 %vm123_vm1, %v35_v14 }
  0x5b   :  { %8533 = vmatpush3.bf16.msra.mxu0 %v9612_v6  ;;  %8541 = vmatpush3.bf16.msra.mxu1 %v9619_v7 }
  0x5c   :  { %8534 = vmatprep.subr.bf16.mxu0 %v11361_v0  ;;  %8542 = vmatprep.subr.bf16.mxu1 %v11361_v0 }
  0x5d   :  { %8536 = vmatprep.mubr.msk.bf16.mxu0 %vm9528_vm0, %v11361_v0  ;;  %8544 = vmatprep.mubr.msk.bf16.mxu1 %vm9528_vm0, %v11361_v0 }
  0x5f   :  { %8535 = vmatpush3.bf16.msra.mxu0 %v9628_v8  ;;  %8543 = vmatpush3.bf16.msra.mxu1 %v9635_v9 }
  0x60   :  { %8548 = vmatprep.subr.bf16.mxu0 %v11361_v0  ;;  %8556 = vmatprep.subr.bf16.mxu1 %v11361_v0 }
  0x62   :  { %8537 = vmatmul.mubr.msk.bf16.vlgmr.msra.gmra.mrb[44].mxu0 %vm123_vm1, %v35_v14  ;;  %8545 = vmatmul.mubr.msk.bf16.vlgmr.msra.gmra.mrb[44].mxu1 %vm123_vm1, %v35_v14 }
  0x63   :  { %8549 = vmatpush3.bf16.msra.mxu0 %v9580_v1  ;;  %8557 = vmatpush3.bf16.msra.mxu1 %v9585_v2 }
  0x64   :  { %8550 = vmatprep.subr.bf16.mxu0 %v11361_v0  ;;  %8558 = vmatprep.subr.bf16.mxu1 %v11361_v0 }
  0x65   :  { %8552 = vmatprep.mubr.msk.bf16.mxu0 %vm9528_vm0, %v11361_v0  ;;  %8560 = vmatprep.mubr.msk.bf16.mxu1 %vm9528_vm0, %v11361_v0 }
  0x67   :  { %8551 = vmatpush3.bf16.msra.mxu0 %v9595_v3  ;;  %8559 = vmatpush3.bf16.msra.mxu1 %v9602_v4 }
  0x68   :  { %8564 = vmatprep.subr.bf16.mxu0 %v11361_v0  ;;  %8572 = vmatprep.subr.bf16.mxu1 %v11361_v0 }
  0x6a   :  { %8553 = vmatmul.mubr.msk.bf16.vlgmr.msra.gmra.mrb[48].mxu0 %vm123_vm1, %v36_v15  ;;  %8561 = vmatmul.mubr.msk.bf16.vlgmr.msra.gmra.mrb[48].mxu1 %vm123_vm1, %v36_v15 }
  0x6b   :  { %8565 = vmatpush3.bf16.msra.mxu0 %v9612_v6  ;;  %8573 = vmatpush3.bf16.msra.mxu1 %v9619_v7 }
  0x6c   :  { %8566 = vmatprep.subr.bf16.mxu0 %v11361_v0  ;;  %8574 = vmatprep.subr.bf16.mxu1 %v11361_v0 }
  0x6d   :  { %8568 = vmatprep.mubr.msk.bf16.mxu0 %vm9528_vm0, %v11361_v0  ;;  %8576 = vmatprep.mubr.msk.bf16.mxu1 %vm9528_vm0, %v11361_v0 }
  0x6f   :  { %8567 = vmatpush3.bf16.msra.mxu0 %v9628_v8  ;;  %8575 = vmatpush3.bf16.msra.mxu1 %v9635_v9 }
  0x70   :  { %8580 = vmatprep.subr.bf16.mxu0 %v11361_v0  ;;  %8588 = vmatprep.subr.bf16.mxu1 %v11361_v0 }
  0x72   :  { %8569 = vmatmul.mubr.msk.bf16.vlgmr.msra.gmra.mrb[52].mxu0 %vm123_vm1, %v36_v15  ;;  %8577 = vmatmul.mubr.msk.bf16.vlgmr.msra.gmra.mrb[52].mxu1 %vm123_vm1, %v36_v15 }
  0x73   :  { %8581 = vmatpush3.bf16.msra.mxu0 %v9580_v1  ;;  %8589 = vmatpush3.bf16.msra.mxu1 %v9585_v2 }
  0x74   :  { %8582 = vmatprep.subr.bf16.mxu0 %v11361_v0  ;;  %8590 = vmatprep.subr.bf16.mxu1 %v11361_v0 }
  0x75   :  { %8584 = vmatprep.mubr.msk.bf16.mxu0 %vm9528_vm0, %v11361_v0  ;;  %8592 = vmatprep.mubr.msk.bf16.mxu1 %vm9528_vm0, %v11361_v0 }
  0x77   :  { %8583 = vmatpush3.bf16.msra.mxu0 %v9595_v3  ;;  %8591 = vmatpush3.bf16.msra.mxu1 %v9602_v4  ;;  %v86_v4 = vpack.c.bf16 %v45_v63, %v45_v63 }
  0x78   :  { %8596 = vmatprep.subr.bf16.mxu0 %v11361_v0  ;;  %8604 = vmatprep.subr.bf16.mxu1 %v11361_v0 }
  0x7a   :  { %8585 = vmatmul.mubr.msk.bf16.vlgmr.msra.gmra.mrb[56].mxu0 %vm123_vm1, %v37_v16  ;;  %8593 = vmatmul.mubr.msk.bf16.vlgmr.msra.gmra.mrb[56].mxu1 %vm123_vm1, %v37_v16 }
  0x7b   :  { %8597 = vmatpush3.bf16.msra.mxu0 %v9612_v6  ;;  %8605 = vmatpush3.bf16.msra.mxu1 %v9619_v7 }
  0x7c   :  { %8598 = vmatprep.subr.bf16.mxu0 %v11361_v0  ;;  %8606 = vmatprep.subr.bf16.mxu1 %v11361_v0 }
  0x7d   :  { %8600 = vmatprep.mubr.msk.bf16.mxu0 %vm9528_vm0, %v11361_v0  ;;  %8608 = vmatprep.mubr.msk.bf16.mxu1 %vm9528_vm0, %v11361_v0 }
  0x7f   :  { %8599 = vmatpush3.bf16.msra.mxu0 %v9628_v8  ;;  %8607 = vmatpush3.bf16.msra.mxu1 %v9635_v9 }
  0x80   :  { %8612 = vmatprep.subr.bf16.mxu0 %v11361_v0  ;;  %8618 = vmatprep.subr.bf16.mxu1 %v11361_v0 }
  0x82   :  { %8601 = vmatmul.mubr.msk.bf16.vlgmr.msra.gmra.mrb[60].mxu0 %vm123_vm1, %v37_v16  ;;  %8609 = vmatmul.mubr.msk.bf16.vlgmr.msra.gmra.mrb[60].mxu1 %vm123_vm1, %v37_v16 }
  0x83   :  { %8613 = vmatpush3.bf16.msra.mxu0 %v9869_v19  ;;  %8619 = vmatpush3.bf16.msra.mxu1 %v9873_v20 }
  0x84   :  { %8614 = vmatprep.mubr.msk.bf16.mxu0 %vm9528_vm0, %v11361_v0  ;;  %8620 = vmatprep.mubr.msk.bf16.mxu1 %vm9528_vm0, %v11361_v0 }
  0x85   :  { %8624 = vmatprep.subr.bf16.mxu0 %v11361_v0  ;;  %8630 = vmatprep.subr.bf16.mxu1 %v11361_v0 }
  0x8a   :  { %8615 = vmatmul.mubr.msk.bf16.vlgmr.msra.gmra.mrb[64].mxu0 %vm1488_vm3, %v79_v23  ;;  %8621 = vmatmul.mubr.msk.bf16.vlgmr.msra.gmra.mrb[64].mxu1 %vm1488_vm3, %v79_v23 }
  0x8b   :  { %8625 = vmatpush3.bf16.msra.mxu0 %v9895_v25  ;;  %8631 = vmatpush3.bf16.msra.mxu1 %v9898_v26 }
  0x8c   :  { %8626 = vmatprep.mubr.msk.bf16.mxu0 %vm9528_vm0, %v11361_v0  ;;  %8632 = vmatprep.mubr.msk.bf16.mxu1 %vm9528_vm0, %v11361_v0 }
  0x8d   :  { %8636 = vmatprep.subr.bf16.mxu0 %v11361_v0  ;;  %8642 = vmatprep.subr.bf16.mxu1 %v11361_v0 }
  0x92   :  { %8627 = vmatmul.mubr.msk.bf16.vlgmr.msra.gmra.mrb[68].mxu0 %vm1488_vm3, %v79_v23  ;;  %8633 = vmatmul.mubr.msk.bf16.vlgmr.msra.gmra.mrb[68].mxu1 %vm1488_vm3, %v79_v23 }
  0x93   :  { %8637 = vmatpush3.bf16.msra.mxu0 %v9869_v19  ;;  %8643 = vmatpush3.bf16.msra.mxu1 %v9873_v20 }
  0x94   :  { %8638 = vmatprep.mubr.msk.bf16.mxu0 %vm9528_vm0, %v11361_v0  ;;  %8644 = vmatprep.mubr.msk.bf16.mxu1 %vm9528_vm0, %v11361_v0 }
  0x95   :  { %8648 = vmatprep.subr.bf16.mxu0 %v11361_v0  ;;  %8654 = vmatprep.subr.bf16.mxu1 %v11361_v0 }
  0x9a   :  { %8639 = vmatmul.mubr.msk.bf16.vlgmr.msra.gmra.mrb[72].mxu0 %vm1488_vm3, %v80_v28  ;;  %8645 = vmatmul.mubr.msk.bf16.vlgmr.msra.gmra.mrb[72].mxu1 %vm1488_vm3, %v80_v28 }
  0x9b   :  { %8649 = vmatpush3.bf16.msra.mxu0 %v9895_v25  ;;  %8655 = vmatpush3.bf16.msra.mxu1 %v9898_v26 }
  0x9c   :  { %8650 = vmatprep.mubr.msk.bf16.mxu0 %vm9528_vm0, %v11361_v0  ;;  %8656 = vmatprep.mubr.msk.bf16.mxu1 %vm9528_vm0, %v11361_v0 }
  0x9d   :  { %8660 = vmatprep.subr.bf16.mxu0 %v11361_v0  ;;  %8666 = vmatprep.subr.bf16.mxu1 %v11361_v0 }
  0xa2   :  { %8651 = vmatmul.mubr.msk.bf16.vlgmr.msra.gmra.mrb[76].mxu0 %vm1488_vm3, %v80_v28  ;;  %8657 = vmatmul.mubr.msk.bf16.vlgmr.msra.gmra.mrb[76].mxu1 %vm1488_vm3, %v80_v28 }
  0xa3   :  { %8661 = vmatpush3.bf16.msra.mxu0 %v9869_v19  ;;  %8667 = vmatpush3.bf16.msra.mxu1 %v9873_v20 }
  0xa4   :  { %8662 = vmatprep.mubr.msk.bf16.mxu0 %vm9528_vm0, %v11361_v0  ;;  %8668 = vmatprep.mubr.msk.bf16.mxu1 %vm9528_vm0, %v11361_v0 }
  0xa5   :  { %8672 = vmatprep.subr.bf16.mxu0 %v11361_v0  ;;  %8678 = vmatprep.subr.bf16.mxu1 %v11361_v0 }
  0xaa   :  { %8663 = vmatmul.mubr.msk.bf16.vlgmr.msra.gmra.mrb[80].mxu0 %vm1488_vm3, %v81_v30  ;;  %8669 = vmatmul.mubr.msk.bf16.vlgmr.msra.gmra.mrb[80].mxu1 %vm1488_vm3, %v81_v30 }
  0xab   :  { %8673 = vmatpush3.bf16.msra.mxu0 %v9895_v25  ;;  %8679 = vmatpush3.bf16.msra.mxu1 %v9898_v26 }
  0xac   :  { %8674 = vmatprep.mubr.msk.bf16.mxu0 %vm9528_vm0, %v11361_v0  ;;  %8680 = vmatprep.mubr.msk.bf16.mxu1 %vm9528_vm0, %v11361_v0 }
  0xad   :  { %8684 = vmatprep.subr.bf16.mxu0 %v11361_v0  ;;  %8690 = vmatprep.subr.bf16.mxu1 %v11361_v0 }
  0xb2   :  { %8675 = vmatmul.mubr.msk.bf16.vlgmr.msra.gmra.mrb[84].mxu0 %vm1488_vm3, %v81_v30  ;;  %8681 = vmatmul.mubr.msk.bf16.vlgmr.msra.gmra.mrb[84].mxu1 %vm1488_vm3, %v81_v30 }
  0xb3   :  { %8685 = vmatpush3.bf16.msra.mxu0 %v9869_v19  ;;  %8691 = vmatpush3.bf16.msra.mxu1 %v9873_v20 }
  0xb4   :  { %8686 = vmatprep.mubr.msk.bf16.mxu0 %vm9528_vm0, %v11361_v0  ;;  %8692 = vmatprep.mubr.msk.bf16.mxu1 %vm9528_vm0, %v11361_v0 }
  0xb5   :  { %8696 = vmatprep.subr.bf16.mxu0 %v11361_v0  ;;  %8702 = vmatprep.subr.bf16.mxu1 %v11361_v0 }
  0xba   :  { %8687 = vmatmul.mubr.msk.bf16.vlgmr.msra.gmra.mrb[88].mxu0 %vm1488_vm3, %v82_v32  ;;  %8693 = vmatmul.mubr.msk.bf16.vlgmr.msra.gmra.mrb[88].mxu1 %vm1488_vm3, %v82_v32 }
  0xbb   :  { %8697 = vmatpush3.bf16.msra.mxu0 %v9895_v25  ;;  %8703 = vmatpush3.bf16.msra.mxu1 %v9898_v26 }
  0xbc   :  { %8698 = vmatprep.mubr.msk.bf16.mxu0 %vm9528_vm0, %v11361_v0  ;;  %8704 = vmatprep.mubr.msk.bf16.mxu1 %vm9528_vm0, %v11361_v0 }
  0xbd   :  { %8708 = vmatprep.subr.bf16.mxu0 %v11361_v0  ;;  %8714 = vmatprep.subr.bf16.mxu1 %v11361_v0 }
  0xc2   :  { %8699 = vmatmul.mubr.msk.bf16.vlgmr.msra.gmra.mrb[92].mxu0 %vm1488_vm3, %v82_v32  ;;  %8705 = vmatmul.mubr.msk.bf16.vlgmr.msra.gmra.mrb[92].mxu1 %vm1488_vm3, %v82_v32 }
  0xc3   :  { %8709 = vmatpush3.bf16.msra.mxu0 %v9869_v19  ;;  %8715 = vmatpush3.bf16.msra.mxu1 %v9873_v20 }
  0xc4   :  { %8710 = vmatprep.mubr.msk.bf16.mxu0 %vm9528_vm0, %v11361_v0  ;;  %8716 = vmatprep.mubr.msk.bf16.mxu1 %vm9528_vm0, %v11361_v0 }
  0xc5   :  { %8720 = vmatprep.subr.bf16.mxu0 %v11361_v0  ;;  %8726 = vmatprep.subr.bf16.mxu1 %v11361_v0 }
  0xca   :  { %8711 = vmatmul.mubr.msk.bf16.vlgmr.msra.gmra.mrb[96].mxu0 %vm1488_vm3, %v83_v34  ;;  %8717 = vmatmul.mubr.msk.bf16.vlgmr.msra.gmra.mrb[96].mxu1 %vm1488_vm3, %v83_v34 }
  0xcb   :  { %8721 = vmatpush3.bf16.msra.mxu0 %v9895_v25  ;;  %8727 = vmatpush3.bf16.msra.mxu1 %v9898_v26 }
  0xcc   :  { %8722 = vmatprep.mubr.msk.bf16.mxu0 %vm9528_vm0, %v11361_v0  ;;  %8728 = vmatprep.mubr.msk.bf16.mxu1 %vm9528_vm0, %v11361_v0 }
  0xcd   :  { %8732 = vmatprep.subr.bf16.mxu0 %v11361_v0  ;;  %8738 = vmatprep.subr.bf16.mxu1 %v11361_v0 }
  0xd2   :  { %8723 = vmatmul.mubr.msk.bf16.vlgmr.msra.gmra.mrb[100].mxu0 %vm1488_vm3, %v83_v34  ;;  %8729 = vmatmul.mubr.msk.bf16.vlgmr.msra.gmra.mrb[100].mxu1 %vm1488_vm3, %v83_v34 }
  0xd3   :  { %8733 = vmatpush3.bf16.msra.mxu0 %v9869_v19  ;;  %8739 = vmatpush3.bf16.msra.mxu1 %v9873_v20 }
  0xd4   :  { %8734 = vmatprep.mubr.msk.bf16.mxu0 %vm9528_vm0, %v11361_v0  ;;  %8740 = vmatprep.mubr.msk.bf16.mxu1 %vm9528_vm0, %v11361_v0 }
  0xd5   :  { %8744 = vmatprep.subr.bf16.mxu0 %v11361_v0  ;;  %8750 = vmatprep.subr.bf16.mxu1 %v11361_v0 }
  0xda   :  { %8735 = vmatmul.mubr.msk.bf16.vlgmr.msra.gmra.mrb[104].mxu0 %vm1488_vm3, %v84_v36  ;;  %8741 = vmatmul.mubr.msk.bf16.vlgmr.msra.gmra.mrb[104].mxu1 %vm1488_vm3, %v84_v36 }
  0xdb   :  { %8745 = vmatpush3.bf16.msra.mxu0 %v9895_v25  ;;  %8751 = vmatpush3.bf16.msra.mxu1 %v9898_v26 }
  0xdc   :  { %8746 = vmatprep.mubr.msk.bf16.mxu0 %vm9528_vm0, %v11361_v0  ;;  %8752 = vmatprep.mubr.msk.bf16.mxu1 %vm9528_vm0, %v11361_v0 }
  0xdd   :  { %v10021_v37 = vpop.f32.mrb[0].mxu0  ;;  %8756 = vmatprep.subr.bf16.mxu0 %v11361_v0  ;;  %v10026_v39 = vpop.f32.mrb[0].mxu1  ;;  %8762 = vmatprep.subr.bf16.mxu1 %v11361_v0 }
  0xde   :  { %v8362_v38 = vpop.f32.mrb[1].mxu0  ;;  %v8370_v41 = vpop.f32.mrb[1].mxu1 }
  0xdf   :  { %v164_v40 = vpop.f32.mrb[2].mxu0  ;;  %v216_v43 = vpop.f32.mrb[2].mxu1 }
  0xe0   :  { %v8363_v42 = vpop.f32.mrb[3].mxu0  ;;  %v8371_v44 = vpop.f32.mrb[3].mxu1 }
  0xe2   :  { %8747 = vmatmul.mubr.msk.bf16.vlgmr.msra.gmra.mrb[108].mxu0 %vm1488_vm3, %v84_v36  ;;  %8753 = vmatmul.mubr.msk.bf16.vlgmr.msra.gmra.mrb[108].mxu1 %vm1488_vm3, %v84_v36 }
  0xe3   :  { %8757 = vmatpush3.bf16.msra.mxu0 %v9869_v19  ;;  %8763 = vmatpush3.bf16.msra.mxu1 %v9873_v20 }
  0xe4   :  { %8758 = vmatprep.mubr.msk.bf16.mxu0 %vm9528_vm0, %v11361_v0  ;;  %8764 = vmatprep.mubr.msk.bf16.mxu1 %vm9528_vm0, %v11361_v0 }
  0xe5   :  { %v10038_v46 = vpop.f32.mrb[4].mxu0  ;;  %8768 = vmatprep.subr.bf16.mxu0 %v11361_v0  ;;  %v10043_v48 = vpop.f32.mrb[4].mxu1  ;;  %8774 = vmatprep.subr.bf16.mxu1 %v11361_v0 }
  0xe6   :  { %v8378_v47 = vpop.f32.mrb[5].mxu0  ;;  %v8386_v51 = vpop.f32.mrb[5].mxu1 }
  0xe7   :  { %v268_v50 = vpop.f32.mrb[6].mxu0  ;;  %v320_v53 = vpop.f32.mrb[6].mxu1 }
  0xe8   :  { %v8379_v52 = vpop.f32.mrb[7].mxu0  ;;  %v8387_v54 = vpop.f32.mrb[7].mxu1 }
  0xea   :  { %8759 = vmatmul.mubr.msk.bf16.vlgmr.msra.gmra.mrb[112].mxu0 %vm1488_vm3, %v85_v49  ;;  %8765 = vmatmul.mubr.msk.bf16.vlgmr.msra.gmra.mrb[112].mxu1 %vm1488_vm3, %v85_v49 }
  0xeb   :  { %8769 = vmatpush3.bf16.msra.mxu0 %v9895_v25  ;;  %8775 = vmatpush3.bf16.msra.mxu1 %v9898_v26 }
  0xec   :  { %8770 = vmatprep.mubr.msk.bf16.mxu0 %vm9528_vm0, %v11361_v0  ;;  %8776 = vmatprep.mubr.msk.bf16.mxu1 %vm9528_vm0, %v11361_v0 }
  0xed   :  { %v10052_v55 = vpop.f32.mrb[8].mxu0  ;;  %8780 = vmatprep.subr.bf16.mxu0 %v11361_v0  ;;  %v10057_v57 = vpop.f32.mrb[8].mxu1  ;;  %8786 = vmatprep.subr.bf16.mxu1 %v11361_v0 }
  0xee   :  { %v8394_v56 = vpop.f32.mrb[9].mxu0  ;;  %v8402_v59 = vpop.f32.mrb[9].mxu1 }
  0xef   :  { %v363_v58 = vpop.f32.mrb[10].mxu0  ;;  %v403_v61 = vpop.f32.mrb[10].mxu1 }
  0xf0   :  { %v8395_v60 = vpop.f32.mrb[11].mxu0  ;;  %v8403_v62 = vpop.f32.mrb[11].mxu1 }
  0xf2   :  { %8771 = vmatmul.mubr.msk.bf16.vlgmr.msra.gmra.mrb[116].mxu0 %vm1488_vm3, %v85_v49  ;;  %8777 = vmatmul.mubr.msk.bf16.vlgmr.msra.gmra.mrb[116].mxu1 %vm1488_vm3, %v85_v49 }
  0xf3   :  { %8781 = vmatpush3.bf16.msra.mxu0 %v9869_v19  ;;  %8787 = vmatpush3.bf16.msra.mxu1 %v9873_v20 }
  0xf4   :  { %8782 = vmatprep.mubr.msk.bf16.mxu0 %vm9528_vm0, %v11361_v0  ;;  %8788 = vmatprep.mubr.msk.bf16.mxu1 %vm9528_vm0, %v11361_v0 }
  0xf5   :  { %v10069_v1 = vpop.f32.mrb[12].mxu0  ;;  %8792 = vmatprep.subr.bf16.mxu0 %v11361_v0  ;;  %v10074_v3 = vpop.f32.mrb[12].mxu1  ;;  %8798 = vmatprep.subr.bf16.mxu1 %v11361_v0 }
  0xf6   :  { %v8410_v2 = vpop.f32.mrb[13].mxu0  ;;  %v8418_v6 = vpop.f32.mrb[13].mxu1 }
  0xf7   :  { %v443_v5 = vpop.f32.mrb[14].mxu0  ;;  %v483_v8 = vpop.f32.mrb[14].mxu1 }
  0xf8   :  { %v8411_v7 = vpop.f32.mrb[15].mxu0  ;;  %v8419_v9 = vpop.f32.mrb[15].mxu1 }
  0xfa   :  { %8783 = vmatmul.mubr.msk.bf16.vlgmr.msra.gmra.mrb[120].mxu0 %vm1488_vm3, %v86_v4  ;;  %8789 = vmatmul.mubr.msk.bf16.vlgmr.msra.gmra.mrb[120].mxu1 %vm1488_vm3, %v86_v4 }
  0xfb   :  { %8793 = vmatpush3.bf16.msra.mxu0 %v9895_v25  ;;  %8799 = vmatpush3.bf16.msra.mxu1 %v9898_v26 }
  0xfc   :  { %8794 = vmatprep.mubr.msk.bf16.mxu0 %vm9528_vm0, %v11361_v0  ;;  %8800 = vmatprep.mubr.msk.bf16.mxu1 %vm9528_vm0, %v11361_v0 }
  0xfd   :  { %v10083_v10 = vpop.f32.mrb[16].mxu0  ;;  %8804 = vmatprep.subr.bf16.mxu0 %v11361_v0  ;;  %v10088_v12 = vpop.f32.mrb[16].mxu1  ;;  %8810 = vmatprep.subr.bf16.mxu1 %v11361_v0 }
  0xfe   :  { %v8426_v11 = vpop.f32.mrb[17].mxu0  ;;  %v8434_v14 = vpop.f32.mrb[17].mxu1 }
  0xff   :  { %v526_v13 = vpop.f32.mrb[18].mxu0  ;;  %v566_v16 = vpop.f32.mrb[18].mxu1 }
 0x100   :  { %v8427_v15 = vpop.f32.mrb[19].mxu0  ;;  %v8435_v17 = vpop.f32.mrb[19].mxu1 }
 0x102   :  { %8795 = vmatmul.mubr.msk.bf16.vlgmr.msra.gmra.mrb[124].mxu0 %vm1488_vm3, %v86_v4  ;;  %8801 = vmatmul.mubr.msk.bf16.vlgmr.msra.gmra.mrb[124].mxu1 %vm1488_vm3, %v86_v4 }
 0x103   :  { %8806 = vmatprep.mubr.msk.bf16.mxu0 %vm9528_vm0, %v11361_v0  ;;  %8812 = vmatprep.mubr.msk.bf16.mxu1 %vm9528_vm0, %v11361_v0 }
 0x105   :  { %v10097_v18 = vpop.f32.mrb[20].mxu0  ;;  %v10099_v20 = vpop.f32.mrb[20].mxu1 }
 0x106   :  { %v8442_v19 = vpop.f32.mrb[21].mxu0  ;;  %v8450_v22 = vpop.f32.mrb[21].mxu1 }
 0x107   :  { %v606_v21 = vpop.f32.mrb[22].mxu0  ;;  %v646_v24 = vpop.f32.mrb[22].mxu1 }
 0x108   :  { %v8443_v23 = vpop.f32.mrb[23].mxu0  ;;  %v8451_v25 = vpop.f32.mrb[23].mxu1 }
 0x10d   :  { %v10101_v26 = vpop.f32.mrb[24].mxu0  ;;  %v10103_v28 = vpop.f32.mrb[24].mxu1 }
 0x10e   :  { %v8458_v27 = vpop.f32.mrb[25].mxu0  ;;  %v8466_v30 = vpop.f32.mrb[25].mxu1 }
 0x10f   :  { %v689_v29 = vpop.f32.mrb[26].mxu0  ;;  %v729_v32 = vpop.f32.mrb[26].mxu1 }
 0x110   :  { %v8459_v31 = vpop.f32.mrb[27].mxu0  ;;  %v8467_v33 = vpop.f32.mrb[27].mxu1 }
 0x115   :  { %v10105_v34 = vpop.f32.mrb[28].mxu0  ;;  %v10107_v36 = vpop.f32.mrb[28].mxu1 }
 0x116   :  { %v8474_v35 = vpop.f32.mrb[29].mxu0  ;;  %v8482_v40 = vpop.f32.mrb[29].mxu1 }
 0x117   :  { %v769_v38 = vpop.f32.mrb[30].mxu0  ;;  %v809_v42 = vpop.f32.mrb[30].mxu1 }
 0x118   :  { %v8475_v41 = vpop.f32.mrb[31].mxu0  ;;  %v8483_v43 = vpop.f32.mrb[31].mxu1 }
 0x11d   :  { %v10109_v44 = vpop.f32.mrb[32].mxu0  ;;  %v10111_v47 = vpop.f32.mrb[32].mxu1 }
 0x11e   :  { %v8490_v45 = vpop.f32.mrb[33].mxu0  ;;  %v8498_v50 = vpop.f32.mrb[33].mxu1 }
 0x11f   :  { %v852_v49 = vpop.f32.mrb[34].mxu0  ;;  %v892_v52 = vpop.f32.mrb[34].mxu1 }
 0x120   :  { %v8491_v51 = vpop.f32.mrb[35].mxu0  ;;  %v8499_v53 = vpop.f32.mrb[35].mxu1 }
 0x125   :  { %v10113_v54 = vpop.f32.mrb[36].mxu0  ;;  %v10115_v58 = vpop.f32.mrb[36].mxu1 }
 0x126   :  { %v8506_v56 = vpop.f32.mrb[37].mxu0  ;;  %v8514_v60 = vpop.f32.mrb[37].mxu1 }
 0x127   :  { %v932_v59 = vpop.f32.mrb[38].mxu0  ;;  %v972_v62 = vpop.f32.mrb[38].mxu1 }
 0x128   :  { %v8507_v61 = vpop.f32.mrb[39].mxu0  ;;  %v8515_v63 = vpop.f32.mrb[39].mxu1 }
 0x12d   :  { %v10117_v2 = vpop.f32.mrb[40].mxu0  ;;  %v10119_v5 = vpop.f32.mrb[40].mxu1 }
 0x12e   :  { %v8522_v4 = vpop.f32.mrb[41].mxu0  ;;  %v8530_v7 = vpop.f32.mrb[41].mxu1 }
 0x12f   :  { %v1015_v6 = vpop.f32.mrb[42].mxu0  ;;  %v1055_v9 = vpop.f32.mrb[42].mxu1 }
 0x130   :  { %v8523_v8 = vpop.f32.mrb[43].mxu0  ;;  %v8531_v11 = vpop.f32.mrb[43].mxu1 }
 0x131   :  { %v10144_v11 = vld [vmem:[%s11356_s5] ss:$0 sm:$0xff] }
 0x135   :  { %v10121_v13 = vpop.f32.mrb[44].mxu0  ;;  %v10123_v15 = vpop.f32.mrb[44].mxu1 }
 0x136   :  { %v8538_v14 = vpop.f32.mrb[45].mxu0  ;;  %v8546_v17 = vpop.f32.mrb[45].mxu1 }
 0x137   :  { %v1095_v16 = vpop.f32.mrb[46].mxu0  ;;  %v1135_v21 = vpop.f32.mrb[46].mxu1  ;;  %v10149_v14 = vld [vmem:[%s11356_s5 + $0x1] ss:$0 sm:$0xff] }
 0x138   :  { %v8539_v19 = vpop.f32.mrb[47].mxu0  ;;  %v8547_v22 = vpop.f32.mrb[47].mxu1 }
 0x13d   :  { %v10125_v23 = vpop.f32.mrb[48].mxu0  ;;  %v10127_v25 = vpop.f32.mrb[48].mxu1 }
 0x13e   :  { %v8554_v24 = vpop.f32.mrb[49].mxu0  ;;  %v8562_v29 = vpop.f32.mrb[49].mxu1 }
 0x13f   :  { %v1178_v27 = vpop.f32.mrb[50].mxu0  ;;  %v1218_v31 = vpop.f32.mrb[50].mxu1 }
 0x140   :  { %v8555_v30 = vpop.f32.mrb[51].mxu0  ;;  %v8563_v32 = vpop.f32.mrb[51].mxu1 }
 0x141   :  { %v10156_v32 = vld [vmem:[%s11357_s3] ss:$0 sm:$0xff] }
 0x145   :  { %v10129_v33 = vpop.f32.mrb[52].mxu0  ;;  %v10131_v38 = vpop.f32.mrb[52].mxu1 }
 0x146   :  { %v8570_v35 = vpop.f32.mrb[53].mxu0  ;;  %v8578_v41 = vpop.f32.mrb[53].mxu1 }
 0x147   :  { %v1258_v40 = vpop.f32.mrb[54].mxu0  ;;  %v1298_v43 = vpop.f32.mrb[54].mxu1  ;;  %v10161_v41 = vld [vmem:[%s11357_s3 + $0x1] ss:$0 sm:$0xff] }
 0x148   :  { %v8571_v42 = vpop.f32.mrb[55].mxu0  ;;  %v8579_v45 = vpop.f32.mrb[55].mxu1 }
 0x149   :  { %v10169_v45 = vld [vmem:[%s11356_s5 + $0x2] ss:$0 sm:$0xff] }
 0x14d   :  { %v10133_v49 = vpop.f32.mrb[56].mxu0  ;;  %v10135_v51 = vpop.f32.mrb[56].mxu1 }
 0x14e   :  { %v8586_v50 = vpop.f32.mrb[57].mxu0  ;;  %v8594_v53 = vpop.f32.mrb[57].mxu1 }
 0x14f   :  { %v1341_v52 = vpop.f32.mrb[58].mxu0  ;;  %v1381_v59 = vpop.f32.mrb[58].mxu1  ;;  %v162_v50 = vadd.f32 %v10156_v32, %v10021_v37  ;;  %v214_v53 = vadd.f32 %v10161_v41, %v10026_v39  ;;  %v10188_v39 = vld [vmem:[%s11357_s3 + $0x2] ss:$0 sm:$0xff] }
 0x150   :  { %v8587_v56 = vpop.f32.mrb[59].mxu0  ;;  %v8595_v60 = vpop.f32.mrb[59].mxu1  ;;  %v10177_v52 = vld [vmem:[%s11356_s5 + $0x3] ss:$0 sm:$0xff] }
 0x155   :  { %v10137_v61 = vpop.f32.mrb[60].mxu0  ;;  %v10139_v63 = vpop.f32.mrb[60].mxu1 }
 0x156   :  { %v8602_v62 = vpop.f32.mrb[61].mxu0  ;;  %v8610_v6 = vpop.f32.mrb[61].mxu1 }
 0x157   :  { %v1421_v4 = vpop.f32.mrb[62].mxu0  ;;  %v1461_v8 = vpop.f32.mrb[62].mxu1 }
 0x158   :  { %v8603_v7 = vpop.f32.mrb[63].mxu0  ;;  %v8611_v9 = vpop.f32.mrb[63].mxu1 }
 0x159   :  { %v2806_v7 = vpack.c.bf16 %v162_v50, %v162_v50 }
 0x15d   :  { %v1530_v16 = vpop.f32.mrb[64].mxu0  ;;  %v1573_v19 = vpop.f32.mrb[64].mxu1 }
 0x15e   :  { %v1531_v17 = vadd.f32 %v10144_v11, %v1530_v16  ;;  %v8616_v21 = vpop.f32.mrb[65].mxu0  ;;  %v1574_v22 = vadd.f32 %v10149_v14, %v1573_v19  ;;  %v8622_v27 = vpop.f32.mrb[65].mxu1 }
 0x15f   :  { %v1533_v24 = vpop.f32.mrb[66].mxu0  ;;  %v1576_v31 = vpop.f32.mrb[66].mxu1 }
 0x160   :  { %v2838_v29 = vpack.c.bf16 %v1531_v17, %v1531_v17  ;;  %v8617_v30 = vpop.f32.mrb[67].mxu0  ;;  %v2839_v35 = vpack.c.bf16 %v1574_v22, %v1574_v22  ;;  %v8623_v40 = vpop.f32.mrb[67].mxu1  ;;  %v2807_v17 = vpack.c.bf16 %v214_v53, %v214_v53  ;;  %v10193_v22 = vld [vmem:[%s11357_s3 + $0x3] ss:$0 sm:$0xff] }
 0x161   :  { %v318_v30 = vadd.f32 %v10193_v22, %v10043_v48 }
 0x162   :  { %v2875_v42 = vsel %vm2870_vm4, %v2838_v29, 0  ;;  %4729 = vrot.lane.b32.xlu0 %v2838_v29, %s9529_s21  ;;  %v2921_v43 = vsel %vm2870_vm4, %v2839_v35, 0  ;;  %4780 = vrot.lane.b32.xlu1 %v2839_v35, %s9529_s21  ;;  %v266_v29 = vadd.f32 %v10188_v39, %v10038_v46 }
 0x163   :  { %8805 = vmatpush3.bf16.xpose.msra.mxu0 %v2875_v42  ;;  %8811 = vmatpush3.bf16.xpose.msra.mxu1 %v2921_v43 }
 0x164   :  { %8816 = vmatprep.subr.bf16.mxu0 %v11361_v0  ;;  %8822 = vmatprep.subr.bf16.mxu1 %v11361_v0  ;;  %v2808_v53 = vpack.c.bf16 %v266_v29, %v266_v29 }
 0x165   :  { %v1616_v56 = vpop.f32.mrb[68].mxu0  ;;  %v1659_v60 = vpop.f32.mrb[68].mxu1 }
 0x166   :  { %v1617_v59 = vadd.f32 %v10169_v45, %v1616_v56  ;;  %v8628_v62 = vpop.f32.mrb[69].mxu0  ;;  %v1660_v37 = vadd.f32 %v10177_v52, %v1659_v60  ;;  %v8634_v4 = vpop.f32.mrb[69].mxu1  ;;  %v2809_v60 = vpack.c.bf16 %v318_v30, %v318_v30 }
 0x167   :  { %v1619_v6 = vpop.f32.mrb[70].mxu0  ;;  %v1662_v9 = vpop.f32.mrb[70].mxu1 }
 0x168   :  { %v2840_v8 = vpack.c.bf16 %v1617_v59, %v1617_v59  ;;  %v8629_v16 = vpop.f32.mrb[71].mxu0  ;;  %v2841_v19 = vpack.c.bf16 %v1660_v37, %v1660_v37  ;;  %v8635_v21 = vpop.f32.mrb[71].mxu1 }
 0x16a   :  { %v2967_v24 = vsel %vm2870_vm4, %v2840_v8, 0  ;;  %8807 = vmatmul.mubr.msk.bf16.vlgmr.msra.gmra.mrb[128].mxu0 %vm2870_vm4, %v2806_v7  ;;  %4829 = vrot.lane.b32.xlu0 %v2840_v8, %s9529_s21  ;;  %v3013_v27 = vsel %vm2870_vm4, %v2841_v19, 0  ;;  %v361_v7 = vadd.f32 %v10156_v32, %v10052_v55  ;;  %v401_v8 = vadd.f32 %v10161_v41, %v10057_v57 }
 0x16b   :  { %8813 = vmatmul.mubr.msk.bf16.vlgmr.msra.gmra.mrb[128].mxu1 %vm2870_vm4, %v2807_v17  ;;  %8817 = vmatpush3.bf16.xpose.msra.mxu0 %v2967_v24 }
 0x16c   :  { %8823 = vmatpush3.bf16.xpose.msra.mxu1 %v3013_v27  ;;  %8818 = vmatprep.mubr.msk.bf16.mxu0 %vm9528_vm0, %v11361_v0  ;;  %v2810_v27 = vpack.c.bf16 %v361_v7, %v361_v7 }
 0x16d   :  { %v1702_v31 = vpop.f32.mrb[72].mxu0  ;;  %8824 = vmatprep.mubr.msk.bf16.mxu1 %vm9528_vm0, %v11361_v0  ;;  %8828 = vmatprep.subr.bf16.mxu0 %v11361_v0  ;;  %v1742_v40 = vpop.f32.mrb[72].mxu1 }
 0x16e   :  { %v1703_v35 = vadd.f32 %v10144_v11, %v1702_v31  ;;  %v8640_v42 = vpop.f32.mrb[73].mxu0  ;;  %8834 = vmatprep.subr.bf16.mxu1 %v11361_v0  ;;  %4878 = vrot.lane.b32.xlu1 %v2841_v19, %s9529_s21  ;;  %v1743_v46 = vadd.f32 %v10149_v14, %v1742_v40  ;;  %v8646_v43 = vpop.f32.mrb[73].mxu1  ;;  %v2811_v31 = vpack.c.bf16 %v401_v8, %v401_v8 }
 0x16f   :  { %v1705_v50 = vpop.f32.mrb[74].mxu0  ;;  %v1745_v56 = vpop.f32.mrb[74].mxu1  ;;  %v441_v43 = vadd.f32 %v10188_v39, %v10069_v1 }
 0x170   :  { %v2842_v48 = vpack.c.bf16 %v1703_v35, %v1703_v35  ;;  %v8641_v59 = vpop.f32.mrb[75].mxu0  ;;  %v2843_v62 = vpack.c.bf16 %v1743_v46, %v1743_v46  ;;  %v8647_v37 = vpop.f32.mrb[75].mxu1  ;;  %v481_v50 = vadd.f32 %v10193_v22, %v10074_v3 }
 0x171   :  { %v2812_v37 = vpack.c.bf16 %v441_v43, %v441_v43 }
 0x172   :  { %v3059_v4 = vsel %vm2870_vm4, %v2842_v48, 0  ;;  %8819 = vmatmul.mubr.msk.bf16.vlgmr.msra.gmra.mrb[132].mxu0 %vm2870_vm4, %v2808_v53  ;;  %4927 = vrot.lane.b32.xlu1 %v2842_v48, %s9529_s21  ;;  %v3105_v6 = vsel %vm2870_vm4, %v2843_v62, 0  ;;  %v2813_v7 = vpack.c.bf16 %v481_v50, %v481_v50 }
 0x173   :  { %8825 = vmatmul.mubr.msk.bf16.vlgmr.msra.gmra.mrb[132].mxu1 %vm2870_vm4, %v2809_v60  ;;  %8829 = vmatpush3.bf16.xpose.msra.mxu0 %v3059_v4 }
 0x174   :  { %8835 = vmatpush3.bf16.xpose.msra.mxu1 %v3105_v6  ;;  %8830 = vmatprep.mubr.msk.bf16.mxu0 %vm9528_vm0, %v11361_v0 }
 0x175   :  { %v1782_v9 = vpop.f32.mrb[76].mxu0  ;;  %8836 = vmatprep.mubr.msk.bf16.mxu1 %vm9528_vm0, %v11361_v0  ;;  %8840 = vmatprep.subr.bf16.mxu0 %v11361_v0  ;;  %v1822_v17 = vpop.f32.mrb[76].mxu1 }
 0x176   :  { %v1783_v16 = vadd.f32 %v10169_v45, %v1782_v9  ;;  %v8652_v19 = vpop.f32.mrb[77].mxu0  ;;  %8846 = vmatprep.subr.bf16.mxu1 %v11361_v0  ;;  %4976 = vrot.lane.b32.xlu0 %v2843_v62, %s9529_s21  ;;  %v1823_v55 = vadd.f32 %v10177_v52, %v1822_v17  ;;  %v8658_v21 = vpop.f32.mrb[77].mxu1 }
 0x177   :  { %v1785_v24 = vpop.f32.mrb[78].mxu0  ;;  %v1825_v29 = vpop.f32.mrb[78].mxu1  ;;  %v524_v19 = vadd.f32 %v10156_v32, %v10083_v10 }
 0x178   :  { %v2844_v57 = vpack.c.bf16 %v1783_v16, %v1783_v16  ;;  %v8653_v30 = vpop.f32.mrb[79].mxu0  ;;  %v2845_v35 = vpack.c.bf16 %v1823_v55, %v1823_v55  ;;  %v8659_v40 = vpop.f32.mrb[79].mxu1  ;;  %v564_v55 = vadd.f32 %v10161_v41, %v10088_v12 }
 0x17a   :  { %v3151_v42 = vsel %vm2870_vm4, %v2844_v57, 0  ;;  %8831 = vmatmul.mubr.msk.bf16.vlgmr.msra.gmra.mrb[136].mxu0 %vm2870_vm4, %v2810_v27  ;;  %5025 = vrot.lane.b32.xlu0 %v2844_v57, %s9529_s21  ;;  %v3197_v46 = vsel %vm2870_vm4, %v2845_v35, 0 }
 0x17b   :  { %8837 = vmatmul.mubr.msk.bf16.vlgmr.msra.gmra.mrb[136].mxu1 %vm2870_vm4, %v2811_v31  ;;  %8841 = vmatpush3.bf16.xpose.msra.mxu0 %v3151_v42  ;;  %v2814_v31 = vpack.c.bf16 %v524_v19, %v524_v19  ;;  %v2815_v42 = vpack.c.bf16 %v564_v55, %v564_v55  ;;  %v687_v55 = vadd.f32 %v10156_v32, %v10101_v26 }
 0x17c   :  { %8847 = vmatpush3.bf16.xpose.msra.mxu1 %v3197_v46  ;;  %8842 = vmatprep.mubr.msk.bf16.mxu0 %vm9528_vm0, %v11361_v0 }
 0x17d   :  { %v1865_v53 = vpop.f32.mrb[80].mxu0  ;;  %8848 = vmatprep.mubr.msk.bf16.mxu1 %vm9528_vm0, %v11361_v0  ;;  %8852 = vmatprep.subr.bf16.mxu0 %v11361_v0  ;;  %v1905_v56 = vpop.f32.mrb[80].mxu1 }
 0x17e   :  { %v1866_v48 = vadd.f32 %v10144_v11, %v1865_v53  ;;  %v8664_v59 = vpop.f32.mrb[81].mxu0  ;;  %8858 = vmatprep.subr.bf16.mxu1 %v11361_v0  ;;  %5074 = vrot.lane.b32.xlu0 %v2845_v35, %s9529_s21  ;;  %v1906_v1 = vadd.f32 %v10149_v14, %v1905_v56  ;;  %v8670_v60 = vpop.f32.mrb[81].mxu1  ;;  %v644_v56 = vadd.f32 %v10193_v22, %v10099_v20 }
 0x17f   :  { %v1868_v62 = vpop.f32.mrb[82].mxu0  ;;  %v1908_v4 = vpop.f32.mrb[82].mxu1 }
 0x180   :  { %v2846_v3 = vpack.c.bf16 %v1866_v48, %v1866_v48  ;;  %v8665_v6 = vpop.f32.mrb[83].mxu0  ;;  %v2847_v8 = vpack.c.bf16 %v1906_v1, %v1906_v1  ;;  %v8671_v9 = vpop.f32.mrb[83].mxu1  ;;  %v604_v48 = vadd.f32 %v10188_v39, %v10097_v18 }
 0x182   :  { %v3243_v16 = vsel %vm2870_vm4, %v2846_v3, 0  ;;  %8843 = vmatmul.mubr.msk.bf16.vlgmr.msra.gmra.mrb[140].mxu0 %vm2870_vm4, %v2812_v37  ;;  %5123 = vrot.lane.b32.xlu0 %v2846_v3, %s9529_s21  ;;  %v3289_v17 = vsel %vm2870_vm4, %v2847_v8, 0  ;;  %v2816_v4 = vpack.c.bf16 %v604_v48, %v604_v48 }
 0x183   :  { %8849 = vmatmul.mubr.msk.bf16.vlgmr.msra.gmra.mrb[140].mxu1 %vm2870_vm4, %v2813_v7  ;;  %8853 = vmatpush3.bf16.xpose.msra.mxu0 %v3243_v16 }
 0x184   :  { %8859 = vmatpush3.bf16.xpose.msra.mxu1 %v3289_v17  ;;  %8854 = vmatprep.mubr.msk.bf16.mxu0 %vm9528_vm0, %v11361_v0 }
 0x185   :  { %v1945_v21 = vpop.f32.mrb[84].mxu0  ;;  %8860 = vmatprep.mubr.msk.bf16.mxu1 %vm9528_vm0, %v11361_v0  ;;  %8864 = vmatprep.subr.bf16.mxu0 %v11361_v0  ;;  %v1985_v27 = vpop.f32.mrb[84].mxu1 }
 0x186   :  { %v1946_v24 = vadd.f32 %v10169_v45, %v1945_v21  ;;  %v8676_v57 = vpop.f32.mrb[85].mxu0  ;;  %8870 = vmatprep.subr.bf16.mxu1 %v11361_v0  ;;  %5172 = vrot.lane.b32.xlu0 %v2847_v8, %s9529_s21  ;;  %v1986_v10 = vadd.f32 %v10177_v52, %v1985_v27  ;;  %v8682_v29 = vpop.f32.mrb[85].mxu1  ;;  %v2817_v8 = vpack.c.bf16 %v644_v56, %v644_v56 }
 0x187   :  { %v1948_v30 = vpop.f32.mrb[86].mxu0  ;;  %v1988_v35 = vpop.f32.mrb[86].mxu1  ;;  %v727_v21 = vadd.f32 %v10161_v41, %v10103_v28  ;;  %v767_v56 = vadd.f32 %v10188_v39, %v10105_v34 }
 0x188   :  { %v10267_v12 = vpack.c.bf16 %v1946_v24, %v1946_v24  ;;  %v8677_v40 = vpop.f32.mrb[87].mxu0  ;;  %v10269_v46 = vpack.c.bf16 %v1986_v10, %v1986_v10  ;;  %v8683_v43 = vpop.f32.mrb[87].mxu1 }
 0x18a   :  { %v3335_v50 = vsel %vm2870_vm4, %v10267_v12, 0  ;;  %8855 = vmatmul.mubr.msk.bf16.vlgmr.msra.gmra.mrb[144].mxu0 %vm2870_vm4, %v2814_v31  ;;  %v3381_v53 = vsel %vm2870_vm4, %v10269_v46, 0  ;;  %v2818_v31 = vpack.c.bf16 %v687_v55, %v687_v55 }
 0x18b   :  { %8861 = vmatmul.mubr.msk.bf16.vlgmr.msra.gmra.mrb[144].mxu1 %vm2870_vm4, %v2815_v42  ;;  %8865 = vmatpush3.bf16.xpose.msra.mxu0 %v3335_v50  ;;  %v2819_v42 = vpack.c.bf16 %v727_v21, %v727_v21  ;;  %v850_v21 = vadd.f32 %v10156_v32, %v10109_v44 }
 0x18c   :  { %8871 = vmatpush3.bf16.xpose.msra.mxu1 %v3381_v53  ;;  %8866 = vmatprep.mubr.msk.bf16.mxu0 %vm9528_vm0, %v11361_v0 }
 0x18d   :  { %v2028_v59 = vpop.f32.mrb[88].mxu0  ;;  %8872 = vmatprep.mubr.msk.bf16.mxu1 %vm9528_vm0, %v11361_v0  ;;  %8876 = vmatprep.subr.bf16.mxu0 %v11361_v0  ;;  %v2068_v60 = vpop.f32.mrb[88].mxu1 }
 0x18e   :  { %v2029_v1 = vadd.f32 %v10144_v11, %v2028_v59  ;;  %v8688_v62 = vpop.f32.mrb[89].mxu0  ;;  %8882 = vmatprep.subr.bf16.mxu1 %v11361_v0  ;;  %v2069_v18 = vadd.f32 %v10149_v14, %v2068_v60  ;;  %v8694_v37 = vpop.f32.mrb[89].mxu1  ;;  %v807_v59 = vadd.f32 %v10193_v22, %v10107_v36 }
 0x18f   :  { %v2031_v3 = vpop.f32.mrb[90].mxu0  ;;  %v2071_v20 = vpop.f32.mrb[90].mxu1 }
 0x190   :  { %v10289_v6 = vpack.c.bf16 %v2029_v1, %v2029_v1  ;;  %v8689_v7 = vpop.f32.mrb[91].mxu0  ;;  %v10291_v9 = vpack.c.bf16 %v2069_v18, %v2069_v18  ;;  %v8695_v16 = vpop.f32.mrb[91].mxu1 }
 0x192   :  { %v3427_v17 = vsel %vm2870_vm4, %v10289_v6, 0  ;;  %8867 = vmatmul.mubr.msk.bf16.vlgmr.msra.gmra.mrb[148].mxu0 %vm2870_vm4, %v2816_v4  ;;  %v3473_v19 = vsel %vm2870_vm4, %v10291_v9, 0  ;;  %v2820_v4 = vpack.c.bf16 %v767_v56, %v767_v56 }
 0x193   :  { %8873 = vmatmul.mubr.msk.bf16.vlgmr.msra.gmra.mrb[148].mxu1 %vm2870_vm4, %v2817_v8  ;;  %8877 = vmatpush3.bf16.xpose.msra.mxu0 %v3427_v17  ;;  %v2821_v8 = vpack.c.bf16 %v807_v59, %v807_v59  ;;  %v930_v59 = vadd.f32 %v10188_v39, %v10113_v54 }
 0x194   :  { %8883 = vmatpush3.bf16.xpose.msra.mxu1 %v3473_v19  ;;  %8878 = vmatprep.mubr.msk.bf16.mxu0 %vm9528_vm0, %v11361_v0 }
 0x195   :  { %v2108_v24 = vpop.f32.mrb[92].mxu0  ;;  %8884 = vmatprep.mubr.msk.bf16.mxu1 %vm9528_vm0, %v11361_v0  ;;  %8888 = vmatprep.subr.bf16.mxu0 %v11361_v0  ;;  %v2148_v57 = vpop.f32.mrb[92].mxu1 }
 0x196   :  { %v2109_v27 = vadd.f32 %v10169_v45, %v2108_v24  ;;  %v8700_v10 = vpop.f32.mrb[93].mxu0  ;;  %8894 = vmatprep.subr.bf16.mxu1 %v11361_v0  ;;  %v2149_v26 = vadd.f32 %v10177_v52, %v2148_v57  ;;  %v8706_v29 = vpop.f32.mrb[93].mxu1  ;;  %v890_v24 = vadd.f32 %v10161_v41, %v10111_v47 }
 0x197   :  { %v2111_v30 = vpop.f32.mrb[94].mxu0  ;;  %v2151_v28 = vpop.f32.mrb[94].mxu1 }
 0x198   :  { %v10311_v35 = vpack.c.bf16 %v2109_v27, %v2109_v27  ;;  %v8701_v40 = vpop.f32.mrb[95].mxu0  ;;  %v10313_v43 = vpack.c.bf16 %v2149_v26, %v2149_v26  ;;  %v8707_v50 = vpop.f32.mrb[95].mxu1 }
 0x19a   :  { %v3519_v53 = vsel %vm2870_vm4, %v10311_v35, 0  ;;  %8879 = vmatmul.mubr.msk.bf16.vlgmr.msra.gmra.mrb[152].mxu0 %vm2870_vm4, %v2818_v31  ;;  %v3565_v48 = vsel %vm2870_vm4, %v10313_v43, 0  ;;  %v2822_v31 = vpack.c.bf16 %v850_v21, %v850_v21 }
 0x19b   :  { %8885 = vmatmul.mubr.msk.bf16.vlgmr.msra.gmra.mrb[152].mxu1 %vm2870_vm4, %v2819_v42  ;;  %8889 = vmatpush3.bf16.xpose.msra.mxu0 %v3519_v53  ;;  %v2823_v42 = vpack.c.bf16 %v890_v24, %v890_v24  ;;  %v1013_v24 = vadd.f32 %v10156_v32, %v10117_v2 }
 0x19c   :  { %8895 = vmatpush3.bf16.xpose.msra.mxu1 %v3565_v48  ;;  %8890 = vmatprep.mubr.msk.bf16.mxu0 %vm9528_vm0, %v11361_v0 }
 0x19d   :  { %v2191_v1 = vpop.f32.mrb[96].mxu0  ;;  %8896 = vmatprep.mubr.msk.bf16.mxu1 %vm9528_vm0, %v11361_v0  ;;  %8900 = vmatprep.subr.bf16.mxu0 %v11361_v0  ;;  %v2231_v62 = vpop.f32.mrb[96].mxu1 }
 0x19e   :  { %v2192_v60 = vadd.f32 %v10144_v11, %v2191_v1  ;;  %v8712_v18 = vpop.f32.mrb[97].mxu0  ;;  %8906 = vmatprep.subr.bf16.mxu1 %v11361_v0  ;;  %v2232_v34 = vadd.f32 %v10149_v14, %v2231_v62  ;;  %v8718_v37 = vpop.f32.mrb[97].mxu1  ;;  %v970_v1 = vadd.f32 %v10193_v22, %v10115_v58 }
 0x19f   :  { %v2194_v3 = vpop.f32.mrb[98].mxu0  ;;  %v2234_v36 = vpop.f32.mrb[98].mxu1 }
 0x1a0   :  { %v10333_v20 = vpack.c.bf16 %v2192_v60, %v2192_v60  ;;  %v8713_v7 = vpop.f32.mrb[99].mxu0  ;;  %v10335_v16 = vpack.c.bf16 %v2232_v34, %v2232_v34  ;;  %v8719_v17 = vpop.f32.mrb[99].mxu1 }
 0x1a2   :  { %v3611_v19 = vsel %vm2870_vm4, %v10333_v20, 0  ;;  %8891 = vmatmul.mubr.msk.bf16.vlgmr.msra.gmra.mrb[156].mxu0 %vm2870_vm4, %v2820_v4  ;;  %v3657_v55 = vsel %vm2870_vm4, %v10335_v16, 0  ;;  %v2824_v4 = vpack.c.bf16 %v930_v59, %v930_v59 }
 0x1a3   :  { %8897 = vmatmul.mubr.msk.bf16.vlgmr.msra.gmra.mrb[156].mxu1 %vm2870_vm4, %v2821_v8  ;;  %8901 = vmatpush3.bf16.xpose.msra.mxu0 %v3611_v19  ;;  %v2825_v8 = vpack.c.bf16 %v970_v1, %v970_v1  ;;  %v1093_v1 = vadd.f32 %v10188_v39, %v10121_v13 }
 0x1a4   :  { %8907 = vmatpush3.bf16.xpose.msra.mxu1 %v3657_v55  ;;  %8902 = vmatprep.mubr.msk.bf16.mxu0 %vm9528_vm0, %v11361_v0 }
 0x1a5   :  { %v2271_v27 = vpop.f32.mrb[100].mxu0  ;;  %8908 = vmatprep.mubr.msk.bf16.mxu1 %vm9528_vm0, %v11361_v0  ;;  %8912 = vmatprep.subr.bf16.mxu0 %v11361_v0  ;;  %v2311_v10 = vpop.f32.mrb[100].mxu1 }
 0x1a6   :  { %v2272_v57 = vadd.f32 %v10169_v45, %v2271_v27  ;;  %v8724_v26 = vpop.f32.mrb[101].mxu0  ;;  %8918 = vmatprep.subr.bf16.mxu1 %v11361_v0  ;;  %v2312_v44 = vadd.f32 %v10177_v52, %v2311_v10  ;;  %v8730_v29 = vpop.f32.mrb[101].mxu1  ;;  %v1053_v27 = vadd.f32 %v10161_v41, %v10119_v5 }
 0x1a7   :  { %v2274_v30 = vpop.f32.mrb[102].mxu0  ;;  %v2314_v47 = vpop.f32.mrb[102].mxu1 }
 0x1a8   :  { %v10355_v28 = vpack.c.bf16 %v2272_v57, %v2272_v57  ;;  %v8725_v40 = vpop.f32.mrb[103].mxu0  ;;  %v10357_v50 = vpack.c.bf16 %v2312_v44, %v2312_v44  ;;  %v8731_v53 = vpop.f32.mrb[103].mxu1 }
 0x1aa   :  { %v3703_v48 = vsel %vm2870_vm4, %v10355_v28, 0  ;;  %8903 = vmatmul.mubr.msk.bf16.vlgmr.msra.gmra.mrb[160].mxu0 %vm2870_vm4, %v2822_v31  ;;  %v3749_v56 = vsel %vm2870_vm4, %v10357_v50, 0  ;;  %v2826_v31 = vpack.c.bf16 %v1013_v24, %v1013_v24 }
 0x1ab   :  { %8909 = vmatmul.mubr.msk.bf16.vlgmr.msra.gmra.mrb[160].mxu1 %vm2870_vm4, %v2823_v42  ;;  %8913 = vmatpush3.bf16.xpose.msra.mxu0 %v3703_v48  ;;  %v2827_v42 = vpack.c.bf16 %v1053_v27, %v1053_v27  ;;  %v1176_v27 = vadd.f32 %v10156_v32, %v10125_v23 }
 0x1ac   :  { %8919 = vmatpush3.bf16.xpose.msra.mxu1 %v3749_v56  ;;  %8914 = vmatprep.mubr.msk.bf16.mxu0 %vm9528_vm0, %v11361_v0 }
 0x1ad   :  { %v2354_v60 = vpop.f32.mrb[104].mxu0  ;;  %8920 = vmatprep.mubr.msk.bf16.mxu1 %vm9528_vm0, %v11361_v0  ;;  %8924 = vmatprep.subr.bf16.mxu0 %v11361_v0  ;;  %v2394_v18 = vpop.f32.mrb[104].mxu1 }
 0x1ae   :  { %v2355_v62 = vadd.f32 %v10144_v11, %v2354_v60  ;;  %v8736_v34 = vpop.f32.mrb[105].mxu0  ;;  %8930 = vmatprep.subr.bf16.mxu1 %v11361_v0  ;;  %v2395_v54 = vadd.f32 %v10149_v14, %v2394_v18  ;;  %v8742_v37 = vpop.f32.mrb[105].mxu1  ;;  %v1133_v60 = vadd.f32 %v10193_v22, %v10123_v15 }
 0x1af   :  { %v2357_v3 = vpop.f32.mrb[106].mxu0  ;;  %v2397_v58 = vpop.f32.mrb[106].mxu1 }
 0x1b0   :  { %v10377_v36 = vpack.c.bf16 %v2355_v62, %v2355_v62  ;;  %v8737_v7 = vpop.f32.mrb[107].mxu0  ;;  %v10379_v17 = vpack.c.bf16 %v2395_v54, %v2395_v54  ;;  %v8743_v19 = vpop.f32.mrb[107].mxu1 }
 0x1b2   :  { %v3795_v55 = vsel %vm2870_vm4, %v10377_v36, 0  ;;  %8915 = vmatmul.mubr.msk.bf16.vlgmr.msra.gmra.mrb[164].mxu0 %vm2870_vm4, %v2824_v4  ;;  %v3841_v21 = vsel %vm2870_vm4, %v10379_v17, 0  ;;  %v2828_v4 = vpack.c.bf16 %v1093_v1, %v1093_v1 }
 0x1b3   :  { %8921 = vmatmul.mubr.msk.bf16.vlgmr.msra.gmra.mrb[164].mxu1 %vm2870_vm4, %v2825_v8  ;;  %8925 = vmatpush3.bf16.xpose.msra.mxu0 %v3795_v55  ;;  %v2829_v8 = vpack.c.bf16 %v1133_v60, %v1133_v60  ;;  %v1256_v60 = vadd.f32 %v10188_v39, %v10129_v33 }
 0x1b4   :  { %8931 = vmatpush3.bf16.xpose.msra.mxu1 %v3841_v21  ;;  %8926 = vmatprep.mubr.msk.bf16.mxu0 %vm9528_vm0, %v11361_v0 }
 0x1b5   :  { %v2434_v57 = vpop.f32.mrb[108].mxu0  ;;  %8932 = vmatprep.mubr.msk.bf16.mxu1 %vm9528_vm0, %v11361_v0  ;;  %8936 = vmatprep.subr.bf16.mxu0 %v11361_v0  ;;  %v2474_v26 = vpop.f32.mrb[108].mxu1 }
 0x1b6   :  { %v2435_v10 = vadd.f32 %v10169_v45, %v2434_v57  ;;  %v8748_v44 = vpop.f32.mrb[109].mxu0  ;;  %8942 = vmatprep.subr.bf16.mxu1 %v11361_v0  ;;  %v2475_v2 = vadd.f32 %v10177_v52, %v2474_v26  ;;  %v8754_v29 = vpop.f32.mrb[109].mxu1  ;;  %v1216_v57 = vadd.f32 %v10161_v41, %v10127_v25 }
 0x1b7   :  { %v2437_v30 = vpop.f32.mrb[110].mxu0  ;;  %v2477_v5 = vpop.f32.mrb[110].mxu1 }
 0x1b8   :  { %v10399_v47 = vpack.c.bf16 %v2435_v10, %v2435_v10  ;;  %v8749_v40 = vpop.f32.mrb[111].mxu0  ;;  %v10401_v53 = vpack.c.bf16 %v2475_v2, %v2475_v2  ;;  %v8755_v48 = vpop.f32.mrb[111].mxu1 }
 0x1ba   :  { %v3887_v56 = vsel %vm2870_vm4, %v10399_v47, 0  ;;  %8927 = vmatmul.mubr.msk.bf16.vlgmr.msra.gmra.mrb[168].mxu0 %vm2870_vm4, %v2826_v31  ;;  %v3933_v59 = vsel %vm2870_vm4, %v10401_v53, 0  ;;  %v2830_v31 = vpack.c.bf16 %v1176_v27, %v1176_v27  ;;  %v1379_v27 = vadd.f32 %v10161_v41, %v10135_v51 }
 0x1bb   :  { %8933 = vmatmul.mubr.msk.bf16.vlgmr.msra.gmra.mrb[168].mxu1 %vm2870_vm4, %v2827_v42  ;;  %8937 = vmatpush3.bf16.xpose.msra.mxu0 %v3887_v56  ;;  %v2831_v42 = vpack.c.bf16 %v1216_v57, %v1216_v57 }
 0x1bc   :  { %8943 = vmatpush3.bf16.xpose.msra.mxu1 %v3933_v59  ;;  %8938 = vmatprep.mubr.msk.bf16.mxu0 %vm9528_vm0, %v11361_v0 }
 0x1bd   :  { %v2517_v62 = vpop.f32.mrb[112].mxu0  ;;  %8944 = vmatprep.mubr.msk.bf16.mxu1 %vm9528_vm0, %v11361_v0  ;;  %8948 = vmatprep.subr.bf16.mxu0 %v11361_v0  ;;  %v2557_v34 = vpop.f32.mrb[112].mxu1 }
 0x1be   :  { %v2518_v18 = vadd.f32 %v10144_v11, %v2517_v62  ;;  %v8760_v54 = vpop.f32.mrb[113].mxu0  ;;  %8954 = vmatprep.subr.bf16.mxu1 %v11361_v0  ;;  %v2558_v13 = vadd.f32 %v10149_v14, %v2557_v34  ;;  %v8766_v37 = vpop.f32.mrb[113].mxu1  ;;  %v1296_v62 = vadd.f32 %v10193_v22, %v10131_v38 }
 0x1bf   :  { %v2520_v3 = vpop.f32.mrb[114].mxu0  ;;  %v2560_v15 = vpop.f32.mrb[114].mxu1 }
 0x1c0   :  { %v10421_v58 = vpack.c.bf16 %v2518_v18, %v2518_v18  ;;  %v8761_v7 = vpop.f32.mrb[115].mxu0  ;;  %v10423_v19 = vpack.c.bf16 %v2558_v13, %v2558_v13  ;;  %v8767_v55 = vpop.f32.mrb[115].mxu1 }
 0x1c2   :  { %v3979_v21 = vsel %vm2870_vm4, %v10421_v58, 0  ;;  %8939 = vmatmul.mubr.msk.bf16.vlgmr.msra.gmra.mrb[172].mxu0 %vm2870_vm4, %v2828_v4  ;;  %v4025_v24 = vsel %vm2870_vm4, %v10423_v19, 0  ;;  %v2832_v4 = vpack.c.bf16 %v1256_v60, %v1256_v60 }
 0x1c3   :  { %8945 = vmatmul.mubr.msk.bf16.vlgmr.msra.gmra.mrb[172].mxu1 %vm2870_vm4, %v2829_v8  ;;  %8949 = vmatpush3.bf16.xpose.msra.mxu0 %v3979_v21  ;;  %v2833_v8 = vpack.c.bf16 %v1296_v62, %v1296_v62 }
 0x1c4   :  { %8955 = vmatpush3.bf16.xpose.msra.mxu1 %v4025_v24  ;;  %8950 = vmatprep.mubr.msk.bf16.mxu0 %vm9528_vm0, %v11361_v0 }
 0x1c5   :  { %v2597_v10 = vpop.f32.mrb[116].mxu0  ;;  %8956 = vmatprep.mubr.msk.bf16.mxu1 %vm9528_vm0, %v11361_v0  ;;  %8960 = vmatprep.subr.bf16.mxu0 %v11361_v0  ;;  %v2637_v44 = vpop.f32.mrb[116].mxu1 }
 0x1c6   :  { %v2598_v26 = vadd.f32 %v10169_v45, %v2597_v10  ;;  %v8772_v2 = vpop.f32.mrb[117].mxu0  ;;  %8966 = vmatprep.subr.bf16.mxu1 %v11361_v0  ;;  %v2638_v23 = vadd.f32 %v10177_v52, %v2637_v44  ;;  %v8778_v29 = vpop.f32.mrb[117].mxu1 }
 0x1c7   :  { %v2600_v30 = vpop.f32.mrb[118].mxu0  ;;  %v2640_v25 = vpop.f32.mrb[118].mxu1 }
 0x1c8   :  { %v10443_v5 = vpack.c.bf16 %v2598_v26, %v2598_v26  ;;  %v8773_v40 = vpop.f32.mrb[119].mxu0  ;;  %v10445_v48 = vpack.c.bf16 %v2638_v23, %v2638_v23  ;;  %v8779_v56 = vpop.f32.mrb[119].mxu1  ;;  %v2835_v30 = vpack.c.bf16 %v1379_v27, %v1379_v27 }
 0x1ca   :  { %v4071_v59 = vsel %vm2870_vm4, %v10443_v5, 0  ;;  %8951 = vmatmul.mubr.msk.bf16.vlgmr.msra.gmra.mrb[176].mxu0 %vm2870_vm4, %v2830_v31  ;;  %v4117_v1 = vsel %vm2870_vm4, %v10445_v48, 0 }
 0x1cb   :  { %8957 = vmatmul.mubr.msk.bf16.vlgmr.msra.gmra.mrb[176].mxu1 %vm2870_vm4, %v2831_v42  ;;  %8961 = vmatpush3.bf16.xpose.msra.mxu0 %v4071_v59  ;;  %v1459_v42 = vadd.f32 %v10193_v22, %v10139_v63 }
 0x1cc   :  { %8967 = vmatpush3.bf16.xpose.msra.mxu1 %v4117_v1  ;;  %8962 = vmatprep.mubr.msk.bf16.mxu0 %vm9528_vm0, %v11361_v0 }
 0x1cd   :  { %v2680_v18 = vpop.f32.mrb[120].mxu0  ;;  %8968 = vmatprep.mubr.msk.bf16.mxu1 %vm9528_vm0, %v11361_v0  ;;  %8972 = vmatprep.subr.bf16.mxu0 %v11361_v0  ;;  %v2720_v54 = vpop.f32.mrb[120].mxu1  ;;  %v2837_v60 = vpack.c.bf16 %v1459_v42, %v1459_v42 }
 0x1ce   :  { %v2681_v34 = vadd.f32 %v10144_v11, %v2680_v18  ;;  %v8784_v13 = vpop.f32.mrb[121].mxu0  ;;  %8978 = vmatprep.subr.bf16.mxu1 %v11361_v0  ;;  %v2721_v33 = vadd.f32 %v10149_v14, %v2720_v54  ;;  %v8790_v37 = vpop.f32.mrb[121].mxu1  ;;  %v1339_v14 = vadd.f32 %v10156_v32, %v10133_v49 }
 0x1cf   :  { %v2683_v3 = vpop.f32.mrb[122].mxu0  ;;  %v2723_v38 = vpop.f32.mrb[122].mxu1 }
 0x1d0   :  { %v10465_v15 = vpack.c.bf16 %v2681_v34, %v2681_v34  ;;  %v8785_v7 = vpop.f32.mrb[123].mxu0  ;;  %v10467_v55 = vpack.c.bf16 %v2721_v33, %v2721_v33  ;;  %v8791_v21 = vpop.f32.mrb[123].mxu1  ;;  %v2834_v23 = vpack.c.bf16 %v1339_v14, %v1339_v14 }
 0x1d2   :  { %v4163_v11 = vsel %vm2870_vm4, %v10465_v15, 0  ;;  %8963 = vmatmul.mubr.msk.bf16.vlgmr.msra.gmra.mrb[180].mxu0 %vm2870_vm4, %v2832_v4  ;;  %v4209_v24 = vsel %vm2870_vm4, %v10467_v55, 0 }
 0x1d3   :  { %8969 = vmatmul.mubr.msk.bf16.vlgmr.msra.gmra.mrb[180].mxu1 %vm2870_vm4, %v2833_v8  ;;  %8973 = vmatpush3.bf16.xpose.msra.mxu0 %v4163_v11 }
 0x1d4   :  { %8979 = vmatpush3.bf16.xpose.msra.mxu1 %v4209_v24  ;;  %8974 = vmatprep.mubr.msk.bf16.mxu0 %vm9528_vm0, %v11361_v0  ;;  %v4730_v56 = vpop.permute.xlu0 %4729  ;;  %v4781_v1 = vpop.permute.xlu1 %4780 }
 0x1d5   :  { %v2760_v57 = vpop.f32.mrb[124].mxu0  ;;  %8980 = vmatprep.mubr.msk.bf16.mxu1 %vm9528_vm0, %v11361_v0  ;;  %8984 = vmatprep.subr.bf16.mxu0 %v11361_v0  ;;  %v2800_v26 = vpop.f32.mrb[124].mxu1 }
 0x1d6   :  { %v2761_v10 = vadd.f32 %v10169_v45, %v2760_v57  ;;  %8990 = vmatprep.subr.bf16.mxu1 %v11361_v0  ;;  %v8796_v44 = vpop.f32.mrb[125].mxu0  ;;  %v2801_v49 = vadd.f32 %v10177_v52, %v2800_v26  ;;  %v8802_v32 = vpop.f32.mrb[125].mxu1  ;;  %v1419_v52 = vadd.f32 %v10188_v39, %v10137_v61  ;;  %v4737_v61 = vsel %vm4735_vm5, %v4730_v56, 0 }
 0x1d7   :  { %v2763_v2 = vpop.f32.mrb[126].mxu0  ;;  %v2803_v51 = vpop.f32.mrb[126].mxu1  ;;  %v4786_v39 = vsel %vm4735_vm5, %v4781_v1, 0 }
 0x1d8   :  { %v10487_v29 = vpack.c.bf16 %v2761_v10, %v2761_v10  ;;  %v8797_v41 = vpop.f32.mrb[127].mxu0  ;;  %v10489_v31 = vpack.c.bf16 %v2801_v49, %v2801_v49  ;;  %v8803_v25 = vpop.f32.mrb[127].mxu1  ;;  %v2836_v59 = vpack.c.bf16 %v1419_v52, %v1419_v52 }
 0x1da   :  { %11369 = vst [vmem:[#allocation2_spill] sm:$0xff] %v10489_v31  ;;  %v4255_v45 = vsel %vm2870_vm4, %v10487_v29, 0  ;;  %8975 = vmatmul.mubr.msk.bf16.vlgmr.msra.gmra.mrb[184].mxu0 %vm2870_vm4, %v2834_v23  ;;  %v4301_v40 = vsel %vm2870_vm4, %v10489_v31, 0 }
 0x1db   :  { %8981 = vmatmul.mubr.msk.bf16.vlgmr.msra.gmra.mrb[184].mxu1 %vm2870_vm4, %v2835_v30  ;;  %8985 = vmatpush3.bf16.xpose.msra.mxu0 %v4255_v45 }
 0x1dc   :  { %8991 = vmatpush3.bf16.xpose.msra.mxu1 %v4301_v40  ;;  %8986 = vmatprep.mubr.msk.bf16.mxu0 %vm9528_vm0, %v11361_v0 }
 0x1dd   :  { %8992 = vmatprep.mubr.msk.bf16.mxu1 %vm9528_vm0, %v11361_v0  ;;  %8996 = vmatprep.subr.bf16.mxu0 %v11361_v0 }
 0x1de   :  { %9002 = vmatprep.subr.bf16.mxu1 %v11361_v0 }
 0x1e2   :  { %8987 = vmatmul.mubr.msk.bf16.vlgmr.msra.gmra.mrb[188].mxu0 %vm2870_vm4, %v2836_v59 }
 0x1e3   :  { %8993 = vmatmul.mubr.msk.bf16.vlgmr.msra.gmra.mrb[188].mxu1 %vm2870_vm4, %v2837_v60  ;;  %8997 = vmatpush3.bf16.msra.mxu0 %v4737_v61 }
 0x1e4   :  { %9003 = vmatpush3.bf16.msra.mxu1 %v4786_v39  ;;  %8998 = vmatprep.mubr.msk.bf16.mxu0 %vm9528_vm0, %v11361_v0 }
 0x1e5   :  { %9008 = vmatprep.subr.bf16.mxu0 %v11361_v0  ;;  %9004 = vmatprep.mubr.msk.bf16.mxu1 %vm9528_vm0, %v11361_v0 }
 0x1e6   :  { %9014 = vmatprep.subr.bf16.mxu1 %v11361_v0 }
 0x23d   :  { %v10517_v63 = vpop.f32.mrb[128].mxu0 }
 0x23e   :  { %v10519_v22 = vpop.f32.mrb[128].mxu1  ;;  %v8808_v62 = vpop.f32.mrb[129].mxu0  ;;  %v4344_v18 = vsel %vm4343_vm6, %v10517_v63, -inf }
 0x23f   :  { %v8814_v34 = vpop.f32.mrb[129].mxu1  ;;  %4345 = vmax.xlane.f32.xlu0 %v4344_v18  ;;  %v2914_v54 = vpop.f32.mrb[130].mxu0  ;;  %v4347_v3 = vsel %vm4343_vm6, %v10519_v22, -inf }
 0x240   :  { %v2960_v13 = vpop.f32.mrb[130].mxu1  ;;  %v8809_v33 = vpop.f32.mrb[131].mxu0 }
 0x241   :  { %v8815_v37 = vpop.f32.mrb[131].mxu1 }
 0x243   :  { %4348 = vmax.xlane.f32.xlu0 %v4347_v3 }
 0x245   :  { %v10525_v4 = vpop.f32.mrb[132].mxu0 }
 0x246   :  { %v10527_v38 = vpop.f32.mrb[132].mxu1  ;;  %v8820_v7 = vpop.f32.mrb[133].mxu0  ;;  %v4350_v8 = vsel %vm4343_vm6, %v10525_v4, -inf }
 0x247   :  { %v8826_v21 = vpop.f32.mrb[133].mxu1  ;;  %4351 = vmax.xlane.f32.xlu1 %v4350_v8  ;;  %v3006_v11 = vpop.f32.mrb[134].mxu0  ;;  %v4353_v57 = vsel %vm4343_vm6, %v10527_v38, -inf }
 0x248   :  { %v3052_v24 = vpop.f32.mrb[134].mxu1  ;;  %v8821_v14 = vpop.f32.mrb[135].mxu0 }
 0x249   :  { %v8827_v27 = vpop.f32.mrb[135].mxu1 }
 0x24b   :  { %4354 = vmax.xlane.f32.xlu1 %v4353_v57 }
 0x24d   :  { %v10533_v10 = vpop.f32.mrb[136].mxu0 }
 0x24e   :  { %v10535_v26 = vpop.f32.mrb[136].mxu1  ;;  %v8832_v44 = vpop.f32.mrb[137].mxu0 }
 0x24f   :  { %v8838_v49 = vpop.f32.mrb[137].mxu1  ;;  %v4359_v32 = vsel %vm4343_vm6, %v10535_v26, -inf  ;;  %v3098_v2 = vpop.f32.mrb[138].mxu0 }
 0x250   :  { %v3144_v23 = vpop.f32.mrb[138].mxu1  ;;  %4360 = vmax.xlane.f32.xlu1 %v4359_v32  ;;  %v8833_v51 = vpop.f32.mrb[139].mxu0 }
 0x251   :  { %v8839_v41 = vpop.f32.mrb[139].mxu1 }
 0x255   :  { %v10539_v30 = vpop.f32.mrb[140].mxu0 }
 0x256   :  { %v10541_v25 = vpop.f32.mrb[140].mxu1  ;;  %v8844_v45 = vpop.f32.mrb[141].mxu0 }
 0x257   :  { %v8850_v40 = vpop.f32.mrb[141].mxu1  ;;  %v4365_v52 = vsel %vm4343_vm6, %v10541_v25, -inf  ;;  %v3190_v42 = vpop.f32.mrb[142].mxu0 }
 0x258   :  { %v3236_v56 = vpop.f32.mrb[142].mxu1  ;;  %4366 = vmax.xlane.f32.xlu1 %v4365_v52  ;;  %v8845_v59 = vpop.f32.mrb[143].mxu0 }
 0x259   :  { %v8851_v1 = vpop.f32.mrb[143].mxu1  ;;  %5221 = vrot.lane.b32.xlu0 %v10267_v12, %s9529_s21 }
 0x25a   :  { %v4356_v1 = vsel %vm4343_vm6, %v10533_v10, -inf }
 0x25d   :  { %v10547_v60 = vpop.f32.mrb[144].mxu0 }
 0x25e   :  { %v10549_v61 = vpop.f32.mrb[144].mxu1  ;;  %v8856_v39 = vpop.f32.mrb[145].mxu0 }
 0x25f   :  { %v8862_v62 = vpop.f32.mrb[145].mxu1  ;;  %v4371_v18 = vsel %vm4343_vm6, %v10549_v61, -inf  ;;  %v3282_v34 = vpop.f32.mrb[146].mxu0 }
 0x260   :  { %v3328_v54 = vpop.f32.mrb[146].mxu1  ;;  %4372 = vmax.xlane.f32.xlu1 %v4371_v18  ;;  %v8857_v13 = vpop.f32.mrb[147].mxu0  ;;  %v4362_v34 = vsel %vm4343_vm6, %v10539_v30, -inf }
 0x261   :  { %v8863_v33 = vpop.f32.mrb[147].mxu1 }
 0x265   :  { %v10553_v37 = vpop.f32.mrb[148].mxu0 }
 0x266   :  { %v10555_v3 = vpop.f32.mrb[148].mxu1  ;;  %v8868_v7 = vpop.f32.mrb[149].mxu0 }
 0x267   :  { %v8874_v12 = vpop.f32.mrb[149].mxu1  ;;  %v4377_v8 = vsel %vm4343_vm6, %v10555_v3, -inf  ;;  %v3374_v21 = vpop.f32.mrb[150].mxu0 }
 0x268   :  { %v3420_v11 = vpop.f32.mrb[150].mxu1  ;;  %4378 = vmax.xlane.f32.xlu1 %v4377_v8  ;;  %v8869_v24 = vpop.f32.mrb[151].mxu0  ;;  %v4368_v21 = vsel %vm4343_vm6, %v10547_v60, -inf }
 0x269   :  { %v8875_v14 = vpop.f32.mrb[151].mxu1 }
 0x26d   :  { %v10559_v27 = vpop.f32.mrb[152].mxu0 }
 0x26e   :  { %v10561_v57 = vpop.f32.mrb[152].mxu1  ;;  %v8880_v44 = vpop.f32.mrb[153].mxu0 }
 0x26f   :  { %v8886_v49 = vpop.f32.mrb[153].mxu1  ;;  %v4383_v32 = vsel %vm4343_vm6, %v10561_v57, -inf  ;;  %v3466_v2 = vpop.f32.mrb[154].mxu0  ;;  %v4374_v44 = vsel %vm4343_vm6, %v10553_v37, -inf }
 0x270   :  { %v3512_v23 = vpop.f32.mrb[154].mxu1  ;;  %4384 = vmax.xlane.f32.xlu1 %v4383_v32  ;;  %v8881_v51 = vpop.f32.mrb[155].mxu0 }
 0x271   :  { %v8887_v41 = vpop.f32.mrb[155].mxu1 }
 0x275   :  { %v10565_v45 = vpop.f32.mrb[156].mxu0 }
 0x276   :  { %v10567_v40 = vpop.f32.mrb[156].mxu1  ;;  %v8892_v52 = vpop.f32.mrb[157].mxu0 }
 0x277   :  { %v8898_v42 = vpop.f32.mrb[157].mxu1  ;;  %v4389_v56 = vsel %vm4343_vm6, %v10567_v40, -inf  ;;  %v3558_v59 = vpop.f32.mrb[158].mxu0  ;;  %v4380_v52 = vsel %vm4343_vm6, %v10559_v27, -inf }
 0x278   :  { %v3604_v39 = vpop.f32.mrb[158].mxu1  ;;  %4390 = vmax.xlane.f32.xlu1 %v4389_v56  ;;  %4357 = vmax.xlane.f32.xlu0 %v4356_v1  ;;  %v8893_v62 = vpop.f32.mrb[159].mxu0  ;;  %v4386_v1 = vsel %vm4343_vm6, %v10565_v45, -inf }
 0x279   :  { %v8899_v18 = vpop.f32.mrb[159].mxu1 }
 0x27c   :  { %4363 = vmax.xlane.f32.xlu0 %v4362_v34 }
 0x27d   :  { %v10575_v54 = vpop.f32.mrb[160].mxu0 }
 0x27e   :  { %v10577_v13 = vpop.f32.mrb[160].mxu1  ;;  %v8904_v33 = vpop.f32.mrb[161].mxu0 }
 0x27f   :  { %v8910_v7 = vpop.f32.mrb[161].mxu1  ;;  %v4395_v12 = vsel %vm4343_vm6, %v10577_v13, -inf  ;;  %v3650_v8 = vpop.f32.mrb[162].mxu0 }
 0x280   :  { %v3696_v11 = vpop.f32.mrb[162].mxu1  ;;  %4396 = vmax.xlane.f32.xlu1 %v4395_v12  ;;  %4369 = vmax.xlane.f32.xlu0 %v4368_v21  ;;  %v8905_v24 = vpop.f32.mrb[163].mxu0  ;;  %v4392_v12 = vsel %vm4343_vm6, %v10575_v54, -inf }
 0x281   :  { %v8911_v14 = vpop.f32.mrb[163].mxu1 }
 0x284   :  { %4375 = vmax.xlane.f32.xlu0 %v4374_v44 }
 0x285   :  { %v10585_v49 = vpop.f32.mrb[164].mxu0 }
 0x286   :  { %v10587_v32 = vpop.f32.mrb[164].mxu1  ;;  %v8916_v2 = vpop.f32.mrb[165].mxu0  ;;  %v4398_v24 = vsel %vm4343_vm6, %v10585_v49, -inf }
 0x287   :  { %v8922_v23 = vpop.f32.mrb[165].mxu1  ;;  %v4401_v51 = vsel %vm4343_vm6, %v10587_v32, -inf  ;;  %v3742_v41 = vpop.f32.mrb[166].mxu0 }
 0x288   :  { %v3788_v42 = vpop.f32.mrb[166].mxu1  ;;  %4402 = vmax.xlane.f32.xlu1 %v4401_v51  ;;  %4381 = vmax.xlane.f32.xlu0 %v4380_v52  ;;  %v8917_v56 = vpop.f32.mrb[167].mxu0 }
 0x289   :  { %v8923_v59 = vpop.f32.mrb[167].mxu1 }
 0x28c   :  { %4387 = vmax.xlane.f32.xlu0 %v4386_v1 }
 0x28d   :  { %v10595_v39 = vpop.f32.mrb[168].mxu0 }
 0x28e   :  { %v10597_v62 = vpop.f32.mrb[168].mxu1  ;;  %v8928_v18 = vpop.f32.mrb[169].mxu0  ;;  %v4404_v41 = vsel %vm4343_vm6, %v10595_v39, -inf }
 0x28f   :  { %v8934_v34 = vpop.f32.mrb[169].mxu1  ;;  %v4407_v33 = vsel %vm4343_vm6, %v10597_v62, -inf  ;;  %v3834_v7 = vpop.f32.mrb[170].mxu0 }
 0x290   :  { %v3880_v8 = vpop.f32.mrb[170].mxu1  ;;  %4408 = vmax.xlane.f32.xlu1 %v4407_v33  ;;  %4393 = vmax.xlane.f32.xlu0 %v4392_v12  ;;  %v8929_v21 = vpop.f32.mrb[171].mxu0 }
 0x291   :  { %v8935_v11 = vpop.f32.mrb[171].mxu1 }
 0x294   :  { %4399 = vmax.xlane.f32.xlu0 %v4398_v24 }
 0x295   :  { %v10605_v14 = vpop.f32.mrb[172].mxu0 }
 0x296   :  { %v10607_v44 = vpop.f32.mrb[172].mxu1  ;;  %v8940_v2 = vpop.f32.mrb[173].mxu0  ;;  %v4410_v59 = vsel %vm4343_vm6, %v10605_v14, -inf }
 0x297   :  { %v8946_v23 = vpop.f32.mrb[173].mxu1  ;;  %v3926_v51 = vpop.f32.mrb[174].mxu0  ;;  %v4413_v12 = vsel %vm4343_vm6, %v10607_v44, -inf }
 0x298   :  { %v3972_v52 = vpop.f32.mrb[174].mxu1  ;;  %4405 = vmax.xlane.f32.xlu0 %v4404_v41  ;;  %v8941_v42 = vpop.f32.mrb[175].mxu0 }
 0x299   :  { %v8947_v56 = vpop.f32.mrb[175].mxu1 }
 0x29c   :  { %4411 = vmax.xlane.f32.xlu0 %v4410_v59 }
 0x29d   :  { %v10613_v1 = vpop.f32.mrb[176].mxu0 }
 0x29e   :  { %v10615_v18 = vpop.f32.mrb[176].mxu1  ;;  %v8952_v34 = vpop.f32.mrb[177].mxu0  ;;  %v4416_v24 = vsel %vm4343_vm6, %v10613_v1, -inf }
 0x29f   :  { %v8958_v33 = vpop.f32.mrb[177].mxu1  ;;  %v4018_v7 = vpop.f32.mrb[178].mxu0  ;;  %v4419_v42 = vsel %vm4343_vm6, %v10615_v18, -inf }
 0x2a0   :  { %v4064_v8 = vpop.f32.mrb[178].mxu1  ;;  %4414 = vmax.xlane.f32.xlu0 %v4413_v12  ;;  %v8953_v21 = vpop.f32.mrb[179].mxu0 }
 0x2a1   :  { %v8959_v11 = vpop.f32.mrb[179].mxu1  ;;  %v10627_v34 = vpop.permute.xlu0 %4829 }
 0x2a4   :  { %4417 = vmax.xlane.f32.xlu0 %v4416_v24 }
 0x2a5   :  { %v10621_v2 = vpop.f32.mrb[180].mxu0  ;;  %v10631_v12 = vpop.permute.xlu0 %4976 }
 0x2a6   :  { %v10623_v23 = vpop.f32.mrb[180].mxu1  ;;  %v8964_v51 = vpop.f32.mrb[181].mxu0  ;;  %v4422_v7 = vsel %vm4343_vm6, %v10621_v2, -inf }
 0x2a7   :  { %11370 = vst [vmem:[#allocation3_spill] sm:$0xff] %v10623_v23  ;;  %v8970_v41 = vpop.f32.mrb[181].mxu1  ;;  %v4110_v52 = vpop.f32.mrb[182].mxu0 }
 0x2a8   :  { %v4156_v56 = vpop.f32.mrb[182].mxu1  ;;  %4420 = vmax.xlane.f32.xlu0 %v4419_v42  ;;  %v8965_v59 = vpop.f32.mrb[183].mxu0  ;;  %v4425_v52 = vsel %vm4343_vm6, %v10623_v23, -inf }
 0x2a9   :  { %v8971_v33 = vpop.f32.mrb[183].mxu1 }
 0x2ac   :  { %4423 = vmax.xlane.f32.xlu0 %v4422_v7  ;;  %v10643_v7 = vpop.permute.xlu0 %5025 }
 0x2ad   :  { %v10633_v8 = vpop.f32.mrb[184].mxu0  ;;  %11373 = vst [vmem:[#allocation6_spill] sm:$0xff] %v10643_v7 }
 0x2ae   :  { %11371 = vst [vmem:[#allocation4_spill] sm:$0xff] %v10633_v8  ;;  %v10635_v21 = vpop.f32.mrb[184].mxu1  ;;  %v8976_v11 = vpop.f32.mrb[185].mxu0  ;;  %v4428_v33 = vsel %vm4343_vm6, %v10633_v8, -inf }
 0x2af   :  { %11372 = vst [vmem:[#allocation5_spill] sm:$0xff] %v10635_v21  ;;  %v8982_v24 = vpop.f32.mrb[185].mxu1  ;;  %v4431_v51 = vsel %vm4343_vm6, %v10635_v21, -inf  ;;  %v4202_v41 = vpop.f32.mrb[186].mxu0 }
 0x2b0   :  { %v4248_v42 = vpop.f32.mrb[186].mxu1  ;;  %4432 = vmax.xlane.f32.xlu1 %v4431_v51  ;;  %4426 = vmax.xlane.f32.xlu0 %v4425_v52  ;;  %v8977_v56 = vpop.f32.mrb[187].mxu0 }
 0x2b1   :  { %v8983_v59 = vpop.f32.mrb[187].mxu1 }
 0x2b4   :  { %4429 = vmax.xlane.f32.xlu0 %v4428_v33  ;;  %v10653_v33 = vpop.permute.xlu0 %5074 }
 0x2b5   :  { %v10645_v11 = vpop.f32.mrb[188].mxu0  ;;  %11376 = vst [vmem:[#allocation9_spill] sm:$0xff] %v10653_v33 }
 0x2b6   :  { %11374 = vst [vmem:[#allocation7_spill] sm:$0xff] %v10645_v11  ;;  %v10647_v24 = vpop.f32.mrb[188].mxu1  ;;  %v8988_v0 = vpop.f32.mrb[189].mxu0  ;;  %v4434_v41 = vsel %vm4343_vm6, %v10645_v11, -inf }
 0x2b7   :  { %11375 = vst [vmem:[#allocation8_spill] sm:$0xff] %v10647_v24  ;;  %v8994_v31 = vpop.f32.mrb[189].mxu1  ;;  %v4437_v51 = vsel %vm4343_vm6, %v10647_v24, -inf  ;;  %v4294_v52 = vpop.f32.mrb[190].mxu0 }
 0x2b8   :  { %v4340_v42 = vpop.f32.mrb[190].mxu1  ;;  %4438 = vmax.xlane.f32.xlu1 %v4437_v51  ;;  %4435 = vmax.xlane.f32.xlu0 %v4434_v41  ;;  %v8989_v56 = vpop.f32.mrb[191].mxu0 }
 0x2b9   :  { %v8995_v59 = vpop.f32.mrb[191].mxu1  ;;  %v10655_v7 = vpop.permute.xlu0 %5123 }
 0x2ba   :  { %11377 = vst [vmem:[#allocation10_spill] sm:$0xff] %v10655_v7  ;;  %v10659_v0 = vpop.permute.xlu1 %4878 }
 0x2bd   :  { %v10657_v21 = vpop.permute.xlu0 %5172 }
 0x2be   :  { %11378 = vst [vmem:[#allocation11_spill] sm:$0xff] %v10657_v21  ;;  %v10664_v42 = vpop.permute.xlu1 %4927 }
 0x2cc   :  { %v4346_v8 = vpop.xlane.xlu0 %4345 }
 0x2cd   :  { %v4440_v31 = vsub.f32 %v10517_v63, %v4346_v8 }
 0x2ce   :  { %5270 = vrot.lane.b32.xlu0 %v10269_v46, %s9529_s21 }
 0x2cf   :  { %v4472_v52 = vmul.f32 1.442695, %v4440_v31 }
 0x2d0   :  { %v4349_v41 = vpop.xlane.xlu0 %4348 }
 0x2d1   :  { %9391 = vpow2.f32 %v4472_v52  ;;  %v4441_v51 = vsub.f32 %v10519_v22, %v4349_v41 }
 0x2d3   :  { %v4474_v56 = vmul.f32 1.442695, %v4441_v51 }
 0x2d4   :  { %v4352_v59 = vpop.xlane.xlu1 %4351 }
 0x2d5   :  { %9393 = vpow2.f32 %v4474_v56  ;;  %v4442_v21 = vsub.f32 %v10525_v4, %v4352_v59 }
 0x2d7   :  { %v4476_v7 = vmul.f32 1.442695, %v4442_v21 }
 0x2d8   :  { %v4355_v33 = vpop.xlane.xlu1 %4354 }
 0x2d9   :  { %9395 = vpow2.f32 %v4476_v7  ;;  %v4443_v63 = vsub.f32 %v10527_v38, %v4355_v33  ;;  %v10685_v33 = vpop.permute.xlu0 %5221 }
 0x2da   :  { %11379 = vst [vmem:[#allocation12_spill] sm:$0xff] %v10685_v33 }
 0x2db   :  { %v10669_v8 = vpop.eup %9391  ;;  %v4478_v46 = vmul.f32 1.442695, %v4443_v63 }
 0x2dc   :  { %v4536_v31 = vsel %vm4343_vm6, %v10669_v8, 0.0 }
 0x2dd   :  { %9397 = vpow2.f32 %v4478_v46  ;;  %4537 = vadd.xlane.f32.xlu1 %v4536_v31  ;;  %v4361_v41 = vpop.xlane.xlu1 %4360 }
 0x2de   :  { %v4445_v51 = vsub.f32 %v10535_v26, %v4361_v41 }
 0x2df   :  { %v10673_v52 = vpop.eup %9393 }
 0x2e0   :  { %v4539_v22 = vsel %vm4343_vm6, %v10673_v52, 0.0  ;;  %v4482_v46 = vmul.f32 1.442695, %v4445_v51 }
 0x2e1   :  { %4540 = vadd.xlane.f32.xlu1 %v4539_v22 }
 0x2e3   :  { %v10677_v4 = vpop.eup %9395 }
 0x2e4   :  { %v4542_v21 = vsel %vm4343_vm6, %v10677_v4, 0.0 }
 0x2e5   :  { %4543 = vadd.xlane.f32.xlu1 %v4542_v21  ;;  %v4367_v22 = vpop.xlane.xlu1 %4366 }
 0x2e6   :  { %v4447_v24 = vsub.f32 %v10541_v25, %v4367_v22 }
 0x2e7   :  { %v10681_v38 = vpop.eup %9397 }
 0x2e8   :  { %v4545_v7 = vsel %vm4343_vm6, %v10681_v38, 0.0  ;;  %v4486_v23 = vmul.f32 1.442695, %v4447_v24 }
 0x2e9   :  { %4546 = vadd.xlane.f32.xlu1 %v4545_v7 }
 0x2ed   :  { %v4373_v41 = vpop.xlane.xlu1 %4372 }
 0x305   :  { %v4358_v56 = vpop.xlane.xlu0 %4357 }
 0x306   :  { %v4444_v59 = vsub.f32 %v10533_v10, %v4358_v56 }
 0x308   :  { %v4480_v63 = vmul.f32 1.442695, %v4444_v59 }
 0x309   :  { %v4364_v31 = vpop.xlane.xlu0 %4363 }
 0x30a   :  { %v4446_v21 = vsub.f32 %v10539_v30, %v4364_v31  ;;  %9399 = vpow2.f32 %v4480_v63  ;;  %v4449_v30 = vsub.f32 %v10549_v61, %v4373_v41 }
 0x30b   :  { %9401 = vpow2.f32 %v4482_v46 }
 0x30c   :  { %v4484_v11 = vmul.f32 1.442695, %v4446_v21 }
 0x30d   :  { %v4370_v7 = vpop.xlane.xlu0 %4369 }
 0x30e   :  { %9403 = vpow2.f32 %v4484_v11  ;;  %v4448_v33 = vsub.f32 %v10547_v60, %v4370_v7  ;;  %v4490_v11 = vmul.f32 1.442695, %v4449_v30 }
 0x30f   :  { %9405 = vpow2.f32 %v4486_v23 }
 0x310   :  { %v4488_v59 = vmul.f32 1.442695, %v4448_v33 }
 0x311   :  { %v4376_v26 = vpop.xlane.xlu0 %4375 }
 0x312   :  { %v4450_v10 = vsub.f32 %v10553_v37, %v4376_v26  ;;  %v4379_v26 = vpop.xlane.xlu1 %4378 }
 0x314   :  { %v4492_v56 = vmul.f32 1.442695, %v4450_v10  ;;  %v10693_v51 = vpop.eup %9399  ;;  %v4451_v10 = vsub.f32 %v10555_v3, %v4379_v26 }
 0x315   :  { %v4548_v25 = vsel %vm4343_vm6, %v10693_v51, 0.0  ;;  %v10698_v63 = vpop.eup %9401  ;;  %v4382_v41 = vpop.xlane.xlu0 %4381 }
 0x316   :  { %9407 = vpow2.f32 %v4492_v56  ;;  %4549 = vadd.xlane.f32.xlu1 %v4548_v25  ;;  %v4551_v60 = vsel %vm4343_vm6, %v10698_v63, 0.0 }
 0x317   :  { %9409 = vpow2.f32 %v4488_v59 }
 0x318   :  { %v10702_v37 = vpop.eup %9403  ;;  %9411 = vpow2.f32 %v4490_v11 }
 0x319   :  { %v4554_v61 = vsel %vm4343_vm6, %v10702_v37, 0.0  ;;  %v10706_v23 = vpop.eup %9405  ;;  %v4388_v56 = vpop.xlane.xlu0 %4387 }
 0x31a   :  { %4552 = vadd.xlane.f32.xlu1 %v4551_v60  ;;  %v4557_v46 = vsel %vm4343_vm6, %v10706_v23, 0.0 }
 0x31e   :  { %4555 = vadd.xlane.f32.xlu1 %v4554_v61 }
 0x320   :  { %v10708_v24 = vpop.eup %9407 }
 0x321   :  { %v4566_v33 = vsel %vm4343_vm6, %v10708_v24, 0.0  ;;  %v10714_v31 = vpop.eup %9409 }
 0x322   :  { %4567 = vadd.xlane.f32.xlu0 %v4566_v33  ;;  %4558 = vadd.xlane.f32.xlu1 %v4557_v46  ;;  %v4560_v22 = vsel %vm4343_vm6, %v10714_v31, 0.0  ;;  %v10718_v21 = vpop.eup %9411 }
 0x323   :  { %v4563_v7 = vsel %vm4343_vm6, %v10718_v21, 0.0 }
 0x326   :  { %4561 = vadd.xlane.f32.xlu1 %v4560_v22 }
 0x32a   :  { %4564 = vadd.xlane.f32.xlu1 %v4563_v7 }
 0x338   :  { %5319 = vrot.lane.b32.xlu0 %v10289_v6, %s9529_s21  ;;  %v4494_v6 = vmul.f32 1.442695, %v4451_v10 }
 0x33a   :  { %9413 = vpow2.f32 %v4494_v6 }
 0x33b   :  { %6005 = vrot.lane.b32.xlu1 %v10443_v5, %s9529_s21  ;;  %v4385_v5 = vpop.xlane.xlu1 %4384 }
 0x33c   :  { %5368 = vrot.lane.b32.xlu0 %v10291_v9, %s9529_s21  ;;  %v4452_v9 = vsub.f32 %v10559_v27, %v4382_v41 }
 0x33e   :  { %v4496_v30 = vmul.f32 1.442695, %v4452_v9 }
 0x340   :  { %5417 = vrot.lane.b32.xlu0 %v10311_v35, %s9529_s21  ;;  %v4453_v35 = vsub.f32 %v10561_v57, %v4385_v5  ;;  %9415 = vpow2.f32 %v4496_v30 }
 0x342   :  { %v4498_v3 = vmul.f32 1.442695, %v4453_v35 }
 0x344   :  { %5466 = vrot.lane.b32.xlu0 %v10313_v43, %s9529_s21  ;;  %v4391_v43 = vpop.xlane.xlu1 %4390  ;;  %9417 = vpow2.f32 %v4498_v3  ;;  %v10747_v11 = vpop.eup %9413 }
 0x348   :  { %5515 = vrot.lane.b32.xlu0 %v10333_v20, %s9529_s21  ;;  %v4394_v20 = vpop.xlane.xlu0 %4393  ;;  %v4397_v59 = vpop.xlane.xlu1 %4396 }
 0x349   :  { %v4456_v61 = vsub.f32 %v10575_v54, %v4394_v20  ;;  %v4457_v33 = vsub.f32 %v10577_v13, %v4397_v59 }
 0x34b   :  { %v4504_v46 = vmul.f32 1.442695, %v4456_v61  ;;  %v4506_v7 = vmul.f32 1.442695, %v4457_v33  ;;  %v4835_v61 = vsel %vm4735_vm5, %v10627_v34, 0 }
 0x34c   :  { %5564 = vrot.lane.b32.xlu0 %v10335_v16, %s9529_s21  ;;  %v4454_v16 = vsub.f32 %v10565_v45, %v4388_v56  ;;  %v4403_v27 = vpop.xlane.xlu1 %4402  ;;  %v4400_v57 = vpop.xlane.xlu0 %4399  ;;  %v4569_v45 = vsel %vm4343_vm6, %v10747_v11, 0.0 }
 0x34d   :  { %v4459_v6 = vsub.f32 %v10587_v32, %v4403_v27 }
 0x34e   :  { %v4500_v25 = vmul.f32 1.442695, %v4454_v16 }
 0x34f   :  { %v4510_v35 = vmul.f32 1.442695, %v4459_v6 }
 0x350   :  { %5613 = vrot.lane.b32.xlu0 %v10355_v28, %s9529_s21  ;;  %v4455_v28 = vsub.f32 %v10567_v40, %v4391_v43  ;;  %9419 = vpow2.f32 %v4500_v25  ;;  %v4409_v60 = vpop.xlane.xlu1 %4408  ;;  %v4406_v40 = vpop.xlane.xlu0 %4405 }
 0x351   :  { %v4461_v20 = vsub.f32 %v10597_v62, %v4409_v60 }
 0x353   :  { %v4514_v27 = vmul.f32 1.442695, %v4461_v20  ;;  %v11381_v20 = vld [vmem:[#allocation3_spill] sm:$0xff] }
 0x354   :  { %5662 = vrot.lane.b32.xlu0 %v10357_v50, %s9529_s21  ;;  %v4502_v50 = vmul.f32 1.442695, %v4455_v28  ;;  %v4412_v41 = vpop.xlane.xlu0 %4411 }
 0x356   :  { %9421 = vpow2.f32 %v4502_v50 }
 0x357   :  { %9423 = vpow2.f32 %v4504_v46  ;;  %v11380_v46 = vmov 0.0  }
 0x358   :  { %5711 = vrot.lane.b32.xlu0 %v10377_v36, %s9529_s21  ;;  %v10754_v36 = vpop.eup %9415  ;;  %9425 = vpow2.f32 %v4506_v7  ;;  %v4415_v56 = vpop.xlane.xlu0 %4414 }
 0x359   :  { %v4572_v22 = vsel %vm4343_vm6, %v10754_v36, 0.0  ;;  %v10763_v54 = vpop.eup %9417 }
 0x35a   :  { %v4575_v13 = vsel %vm4343_vm6, %v10763_v54, 0.0  ;;  %v10772_v10 = vpop.eup %9419 }
 0x35c   :  { %5760 = vrot.lane.b32.xlu0 %v10379_v17, %s9529_s21  ;;  %v10759_v17 = vpop.xlane.xlu1 %4432  ;;  %v4418_v59 = vpop.xlane.xlu0 %4417 }
 0x35d   :  { %v4464_v7 = vsub.f32 %v10613_v1, %v4418_v59  ;;  %v4933_v1 = vsel %vm4735_vm5, %v10664_v42, 0 }
 0x35f   :  { %4570 = vadd.xlane.f32.xlu1 %v4569_v45  ;;  %v4463_v45 = vsub.f32 %v10607_v44, %v4415_v56  ;;  %v4884_v44 = vsel %vm4735_vm5, %v10659_v0, 0 }
 0x360   :  { %5809 = vrot.lane.b32.xlu0 %v10399_v47, %s9529_s21  ;;  %v4458_v47 = vsub.f32 %v10585_v49, %v4400_v57  ;;  %v10768_v26 = vpop.xlane.xlu1 %4438  ;;  %v4578_v49 = vsel %vm4343_vm6, %v10772_v10, 0.0  ;;  %v10779_v9 = vpop.eup %9421 }
 0x361   :  { %v4581_v32 = vsel %vm4343_vm6, %v10779_v9, 0.0  ;;  %v10786_v30 = vpop.eup %9423 }
 0x362   :  { %v10793_v16 = vpop.eup %9425 }
 0x363   :  { %4573 = vadd.xlane.f32.xlu1 %v4572_v22  ;;  %v4587_v57 = vsel %vm4343_vm6, %v10793_v16, 0.0 }
 0x364   :  { %5858 = vrot.lane.b32.xlu0 %v10401_v53, %s9529_s21  ;;  %v4508_v53 = vmul.f32 1.442695, %v4458_v47 }
 0x367   :  { %4576 = vadd.xlane.f32.xlu1 %v4575_v13 }
 0x368   :  { %5907 = vrot.lane.b32.xlu0 %v10421_v58, %s9529_s21  ;;  %v4460_v58 = vsub.f32 %v10595_v39, %v4406_v40  ;;  %v4584_v39 = vsel %vm4343_vm6, %v10786_v30, 0.0 }
 0x36a   :  { %v4538_v5 = vpop.xlane.xlu1 %4537 }
 0x36b   :  { %9427 = vrcp.f32 %v4538_v5  ;;  %4579 = vadd.xlane.f32.xlu1 %v4578_v49 }
 0x36c   :  { %5956 = vrot.lane.b32.xlu0 %v10423_v19, %s9529_s21  ;;  %9429 = vpow2.f32 %v4508_v53  ;;  %v4512_v19 = vmul.f32 1.442695, %v4460_v58 }
 0x36e   :  { %v4541_v43 = vpop.xlane.xlu1 %4540 }
 0x36f   :  { %9431 = vrcp.f32 %v4541_v43  ;;  %4582 = vadd.xlane.f32.xlu1 %v4581_v32 }
 0x370   :  { %6054 = vrot.lane.b32.xlu0 %v10445_v48, %s9529_s21  ;;  %9433 = vpow2.f32 %v4510_v35  ;;  %v4462_v48 = vsub.f32 %v10605_v14, %v4412_v41  ;;  %v4421_v14 = vpop.xlane.xlu0 %4420 }
 0x371   :  { %v4465_v53 = vsub.f32 %v10615_v18, %v4421_v14  ;;  %v4982_v18 = vsel %vm4735_vm5, %v10631_v12, 0 }
 0x372   :  { %v4544_v3 = vpop.xlane.xlu1 %4543 }
 0x373   :  { %9435 = vrcp.f32 %v4544_v3  ;;  %4585 = vadd.xlane.f32.xlu1 %v4584_v39 }
 0x374   :  { %6103 = vrot.lane.b32.xlu0 %v10465_v15, %s9529_s21  ;;  %9437 = vpow2.f32 %v4512_v19  ;;  %v4424_v41 = vpop.xlane.xlu0 %4423 }
 0x375   :  { %v9428_v28 = vpop.eup %9427  ;;  %v4466_v58 = vsub.f32 %v10621_v2, %v4424_v41 }
 0x376   :  { %v4633_v62 = vmul.f32 %v9428_v28, %v10669_v8  ;;  %v4547_v25 = vpop.xlane.xlu1 %4546  ;;  %v10801_v50 = vpop.eup %9429  ;;  %v4516_v8 = vmul.f32 1.442695, %v4462_v48  ;;  %v11382_v28 = vld [vmem:[#allocation4_spill] sm:$0xff] }
 0x377   :  { %9439 = vrcp.f32 %v4547_v25  ;;  %4588 = vadd.xlane.f32.xlu1 %v4587_v57  ;;  %v4590_v33 = vsel %vm4343_vm6, %v10801_v50, 0.0  ;;  %v4524_v12 = vmul.f32 1.442695, %v4466_v58  ;;  %v11383_v25 = vld [vmem:[#allocation5_spill] sm:$0xff] }
 0x378   :  { %6152 = vrot.lane.b32.xlu0 %v10467_v55, %s9529_s21  ;;  %v4696_v15 = vpack.c.bf16 %v4633_v62, %v4633_v62  ;;  %9441 = vpow2.f32 %v4514_v27  ;;  %v4427_v42 = vpop.xlane.xlu0 %4426  ;;  %v4469_v57 = vsub.f32 %v11383_v25, %v10759_v17  ;;  %v11385_v17 = vld [vmem:[#allocation8_spill] sm:$0xff] }
 0x379   :  { %v9432_v60 = vpop.eup %9431  ;;  %9443 = vpow2.f32 %v4516_v8  ;;  %v4467_v19 = vsub.f32 %v11381_v20, %v4427_v42 }
 0x37a   :  { %v4635_v40 = vmul.f32 %v9432_v60, %v10673_v52  ;;  %8999 = vmatmul.mubr.msk.bf16.vlgmr.msra.gmra.mrb[192].mxu0 %vm4731_vm7, %v4696_v15  ;;  %v10814_v55 = vpop.eup %9433  ;;  %v4518_v52 = vmul.f32 1.442695, %v4463_v45  ;;  %v4530_v8 = vmul.f32 1.442695, %v4469_v57  ;;  %v11384_v45 = vld [vmem:[#allocation7_spill] sm:$0xff] }
 0x37b   :  { %9009 = vmatpush3.bf16.msra.mxu0 %v4835_v61  ;;  %9010 = vmatprep.mubr.msk.bf16.mxu0 %vm9528_vm0, %v11380_v46  ;;  %v4526_v39 = vmul.f32 1.442695, %v4467_v19  ;;  %v11386_v19 = vld [vmem:[#allocation6_spill] sm:$0xff] }
 0x37c   :  { %4591 = vadd.xlane.f32.xlu1 %v4590_v33  ;;  %6201 = vrot.lane.b32.xlu0 %v10487_v29, %s9529_s21  ;;  %v4697_v34 = vpack.c.bf16 %v4635_v40, %v4635_v40  ;;  %v4593_v29 = vsel %vm4343_vm6, %v10814_v55, 0.0  ;;  %9445 = vpow2.f32 %v4518_v52  ;;  %v4430_v3 = vpop.xlane.xlu0 %4429 }
 0x37d   :  { %v9436_v22 = vpop.eup %9435  ;;  %9020 = vmatprep.subr.bf16.mxu0 %v11380_v46  ;;  %v4468_v27 = vsub.f32 %v11382_v28, %v4430_v3  ;;  %v5031_v3 = vsel %vm4735_vm5, %v11386_v19, 0 }
 0x37e   :  { %v4637_v47 = vmul.f32 %v9436_v22, %v10677_v4  ;;  %9005 = vmatmul.mubr.msk.bf16.vlgmr.msra.gmra.mrb[192].mxu1 %vm4731_vm7, %v4697_v34  ;;  %v10828_v13 = vpop.eup %9437  ;;  %v4520_v4 = vmul.f32 1.442695, %v4464_v7  ;;  %v4471_v22 = vsub.f32 %v11385_v17, %v10768_v26 }
 0x37f   :  { %9015 = vmatpush3.bf16.msra.mxu1 %v4884_v44  ;;  %9016 = vmatprep.mubr.msk.bf16.mxu1 %vm9528_vm0, %v11380_v46  ;;  %v4596_v49 = vsel %vm4343_vm6, %v10828_v13, 0.0  ;;  %v4528_v15 = vmul.f32 1.442695, %v4468_v27 }
 0x380   :  { %4594 = vadd.xlane.f32.xlu1 %v4593_v29  ;;  %v4698_v0 = vpack.c.bf16 %v4637_v47, %v4637_v47  ;;  %9026 = vmatprep.subr.bf16.mxu1 %v11380_v46  ;;  %9447 = vpow2.f32 %v4520_v4  ;;  %v4436_v60 = vpop.xlane.xlu0 %4435  ;;  %v4534_v47 = vmul.f32 1.442695, %v4471_v22 }
 0x381   :  { %v9440_v6 = vpop.eup %9439  ;;  %v4470_v40 = vsub.f32 %v11384_v45, %v4436_v60 }
 0x382   :  { %v4639_v5 = vmul.f32 %v9440_v6, %v10681_v38  ;;  %9011 = vmatmul.mubr.msk.bf16.vlgmr.msra.gmra.mrb[196].mxu0 %vm4731_vm7, %v4698_v0  ;;  %v10840_v56 = vpop.eup %9441  ;;  %v4522_v38 = vmul.f32 1.442695, %v4465_v53 }
 0x383   :  { %9021 = vmatpush3.bf16.msra.mxu0 %v4933_v1  ;;  %9022 = vmatprep.mubr.msk.bf16.mxu0 %vm9528_vm0, %v11380_v46  ;;  %v4599_v43 = vsel %vm4343_vm6, %v10840_v56, 0.0  ;;  %v10851_v32 = vpop.eup %9443  ;;  %v4532_v44 = vmul.f32 1.442695, %v4470_v40 }
 0x384   :  { %4597 = vadd.xlane.f32.xlu1 %v4596_v49  ;;  %v4699_v35 = vpack.c.bf16 %v4639_v5, %v4639_v5  ;;  %9032 = vmatprep.subr.bf16.mxu0 %v11380_v46  ;;  %9449 = vpow2.f32 %v4522_v38  ;;  %v4602_v2 = vsel %vm4343_vm6, %v10851_v32, 0.0 }
 0x385   :  { %9451 = vpow2.f32 %v4524_v12 }
 0x386   :  { %9017 = vmatmul.mubr.msk.bf16.vlgmr.msra.gmra.mrb[196].mxu1 %vm4731_vm7, %v4699_v35  ;;  %v10857_v59 = vpop.eup %9445  ;;  %9453 = vpow2.f32 %v4526_v39 }
 0x387   :  { %9027 = vmatpush3.bf16.msra.mxu1 %v4982_v18  ;;  %9028 = vmatprep.mubr.msk.bf16.mxu1 %vm9528_vm0, %v11380_v46  ;;  %v4605_v48 = vsel %vm4343_vm6, %v10857_v59, 0.0  ;;  %9455 = vpow2.f32 %v4528_v15 }
 0x388   :  { %4600 = vadd.xlane.f32.xlu1 %v4599_v43  ;;  %9038 = vmatprep.subr.bf16.mxu1 %v11380_v46  ;;  %9457 = vpow2.f32 %v4530_v8  ;;  %v5271_v43 = vpop.permute.xlu0 %5270 }
 0x389   :  { %9459 = vpow2.f32 %v4532_v44 }
 0x38a   :  { %v10862_v62 = vpop.eup %9447  ;;  %9461 = vpow2.f32 %v4534_v47 }
 0x38b   :  { %v4608_v61 = vsel %vm4343_vm6, %v10862_v62, 0.0 }
 0x38c   :  { %4603 = vadd.xlane.f32.xlu1 %v4602_v2 }
 0x38e   :  { %v10868_v14 = vpop.eup %9449 }
 0x38f   :  { %v4611_v33 = vsel %vm4343_vm6, %v10868_v14, 0.0  ;;  %v10873_v34 = vpop.eup %9451 }
 0x390   :  { %4606 = vadd.xlane.f32.xlu1 %v4605_v48  ;;  %v4614_v52 = vsel %vm4343_vm6, %v10873_v34, 0.0  ;;  %v10879_v7 = vpop.eup %9453  ;;  %v11387_v48 = vld [vmem:[#allocation9_spill] sm:$0xff] }
 0x391   :  { %v4617_v41 = vsel %vm4343_vm6, %v10879_v7, 0.0  ;;  %v10883_v29 = vpop.eup %9455  ;;  %v5080_v25 = vsel %vm4735_vm5, %v11387_v48, 0 }
 0x392   :  { %v4620_v0 = vsel %vm4343_vm6, %v10883_v29, 0.0  ;;  %v10887_v26 = vpop.eup %9457 }
 0x393   :  { %v4623_v1 = vsel %vm4343_vm6, %v10887_v26, 0.0  ;;  %v10891_v4 = vpop.eup %9459 }
 0x394   :  { %4609 = vadd.xlane.f32.xlu1 %v4608_v61  ;;  %v4626_v5 = vsel %vm4343_vm6, %v10891_v4, 0.0  ;;  %v10895_v49 = vpop.eup %9461  ;;  %v11388_v61 = vld [vmem:[#allocation10_spill] sm:$0xff] }
 0x395   :  { %v4629_v18 = vsel %vm4343_vm6, %v10895_v49, 0.0  ;;  %v5129_v8 = vsel %vm4735_vm5, %v11388_v61, 0 }
 0x398   :  { %4612 = vadd.xlane.f32.xlu1 %v4611_v33  ;;  %v11389_v33 = vld [vmem:[#allocation11_spill] sm:$0xff] }
 0x399   :  { %v5178_v17 = vsel %vm4735_vm5, %v11389_v33, 0 }
 0x39c   :  { %4615 = vadd.xlane.f32.xlu1 %v4614_v52 }
 0x3a0   :  { %4618 = vadd.xlane.f32.xlu1 %v4617_v41  ;;  %v11391_v41 = vld [vmem:[#allocation12_spill] sm:$0xff] }
 0x3a3   :  { %v4550_v6 = vpop.xlane.xlu1 %4549 }
 0x3a4   :  { %4621 = vadd.xlane.f32.xlu1 %v4620_v0  ;;  %9463 = vrcp.f32 %v4550_v6  ;;  %v5227_v0 = vsel %vm4735_vm5, %v11391_v41, 0 }
 0x3a7   :  { %v4553_v53 = vpop.xlane.xlu1 %4552 }
 0x3a8   :  { %4624 = vadd.xlane.f32.xlu1 %v4623_v1  ;;  %9465 = vrcp.f32 %v4553_v53  ;;  %v5276_v53 = vsel %vm4735_vm5, %v5271_v43, 0 }
 0x3ab   :  { %v4556_v35 = vpop.xlane.xlu1 %4555 }
 0x3ac   :  { %4627 = vadd.xlane.f32.xlu1 %v4626_v5  ;;  %9467 = vrcp.f32 %v4556_v35 }
 0x3ae   :  { %v9464_v42 = vpop.eup %9463 }
 0x3af   :  { %v4641_v38 = vmul.f32 %v9464_v42, %v10693_v51  ;;  %v4559_v58 = vpop.xlane.xlu1 %4558  ;;  %v4568_v28 = vpop.xlane.xlu0 %4567 }
 0x3b0   :  { %4630 = vadd.xlane.f32.xlu1 %v4629_v18  ;;  %9469 = vrcp.f32 %v4559_v58 }
 0x3b1   :  { %v4700_v12 = vpack.c.bf16 %v4641_v38, %v4641_v38 }
 0x3b2   :  { %v9466_v20 = vpop.eup %9465 }
 0x3b3   :  { %v4643_v2 = vmul.f32 %v9466_v20, %v10698_v63  ;;  %9023 = vmatmul.mubr.msk.bf16.vlgmr.msra.gmra.mrb[200].mxu0 %vm4731_vm7, %v4700_v12  ;;  %v4562_v39 = vpop.xlane.xlu1 %4561  ;;  %v5320_v5 = vpop.permute.xlu0 %5319 }
 0x3b4   :  { %9033 = vmatpush3.bf16.msra.mxu0 %v5031_v3  ;;  %9471 = vrcp.f32 %v4562_v39  ;;  %9034 = vmatprep.mubr.msk.bf16.mxu0 %vm9528_vm0, %v11380_v46  ;;  %v5325_v35 = vsel %vm4735_vm5, %v5320_v5, 0 }
 0x3b5   :  { %v4701_v51 = vpack.c.bf16 %v4643_v2, %v4643_v2  ;;  %9044 = vmatprep.subr.bf16.mxu0 %v11380_v46  ;;  %9473 = vrcp.f32 %v4568_v28 }
 0x3b6   :  { %v9468_v27 = vpop.eup %9467 }
 0x3b7   :  { %v4645_v57 = vmul.f32 %v9468_v27, %v10702_v37  ;;  %9029 = vmatmul.mubr.msk.bf16.vlgmr.msra.gmra.mrb[200].mxu1 %vm4731_vm7, %v4701_v51  ;;  %v4565_v63 = vpop.xlane.xlu1 %4564 }
 0x3b8   :  { %9039 = vmatpush3.bf16.msra.mxu1 %v5080_v25  ;;  %9475 = vrcp.f32 %v4565_v63  ;;  %9040 = vmatprep.mubr.msk.bf16.mxu1 %vm9528_vm0, %v11380_v46 }
 0x3b9   :  { %v4702_v15 = vpack.c.bf16 %v4645_v57, %v4645_v57  ;;  %9050 = vmatprep.subr.bf16.mxu1 %v11380_v46 }
 0x3ba   :  { %v9470_v60 = vpop.eup %9469 }
 0x3bb   :  { %v4647_v45 = vmul.f32 %v9470_v60, %v10706_v23  ;;  %9035 = vmatmul.mubr.msk.bf16.vlgmr.msra.gmra.mrb[204].mxu0 %vm4731_vm7, %v4702_v15  ;;  %v11390_v23 = vld [vmem:[#allocation2_spill] sm:$0xff]  ;;  %v10948_v18 = vpop.permute.xlu1 %6005 }
 0x3bc   :  { %9045 = vmatpush3.bf16.msra.mxu0 %v5129_v8  ;;  %9046 = vmatprep.mubr.msk.bf16.mxu0 %vm9528_vm0, %v11380_v46 }
 0x3bd   :  { %v4703_v37 = vpack.c.bf16 %v4647_v45, %v4647_v45  ;;  %9056 = vmatprep.subr.bf16.mxu0 %v11380_v46 }
 0x3be   :  { %v9472_v40 = vpop.eup %9471 }
 0x3bf   :  { %v4649_v22 = vmul.f32 %v9472_v40, %v10714_v31  ;;  %9041 = vmatmul.mubr.msk.bf16.vlgmr.msra.gmra.mrb[204].mxu1 %vm4731_vm7, %v4703_v37  ;;  %v9474_v44 = vpop.eup %9473 }
 0x3c0   :  { %9051 = vmatpush3.bf16.msra.mxu1 %v5178_v17  ;;  %9052 = vmatprep.mubr.msk.bf16.mxu1 %vm9528_vm0, %v11380_v46  ;;  %v4653_v31 = vmul.f32 %v9474_v44, %v10708_v24  ;;  %v5369_v24 = vpop.permute.xlu0 %5368 }
 0x3c1   :  { %6250 = vrot.lane.b32.xlu1 %v11390_v23, %s9529_s21  ;;  %v4704_v52 = vpack.c.bf16 %v4649_v22, %v4649_v22  ;;  %9062 = vmatprep.subr.bf16.mxu1 %v11380_v46  ;;  %v5374_v48 = vsel %vm4735_vm5, %v5369_v24, 0 }
 0x3c2   :  { %v9476_v47 = vpop.eup %9475 }
 0x3c3   :  { %v4651_v6 = vmul.f32 %v9476_v47, %v10718_v21  ;;  %9047 = vmatmul.mubr.msk.bf16.vlgmr.msra.gmra.mrb[208].mxu0 %vm4731_vm7, %v4704_v52  ;;  %v4706_v21 = vpack.c.bf16 %v4653_v31, %v4653_v31 }
 0x3c4   :  { %9057 = vmatpush3.bf16.msra.mxu0 %v5227_v0  ;;  %9058 = vmatprep.mubr.msk.bf16.mxu0 %vm9528_vm0, %v11380_v46  ;;  %v5418_v42 = vpop.permute.xlu0 %5417 }
 0x3c5   :  { %v4705_v1 = vpack.c.bf16 %v4651_v6, %v4651_v6  ;;  %9068 = vmatprep.subr.bf16.mxu0 %v11380_v46  ;;  %v5423_v15 = vsel %vm4735_vm5, %v5418_v42, 0 }
 0x3c7   :  { %9053 = vmatmul.mubr.msk.bf16.vlgmr.msra.gmra.mrb[208].mxu1 %vm4731_vm7, %v4705_v1 }
 0x3c8   :  { %9063 = vmatpush3.bf16.msra.mxu1 %v5276_v53  ;;  %9064 = vmatprep.mubr.msk.bf16.mxu1 %vm9528_vm0, %v11380_v46  ;;  %v5467_v38 = vpop.permute.xlu0 %5466 }
 0x3c9   :  { %9074 = vmatprep.subr.bf16.mxu1 %v11380_v46  ;;  %v5472_v37 = vsel %vm4735_vm5, %v5467_v38, 0 }
 0x3cb   :  { %9059 = vmatmul.mubr.msk.bf16.vlgmr.msra.gmra.mrb[212].mxu0 %vm4731_vm7, %v4706_v21 }
 0x3cc   :  { %9069 = vmatpush3.bf16.msra.mxu0 %v5325_v35  ;;  %9070 = vmatprep.mubr.msk.bf16.mxu0 %vm9528_vm0, %v11380_v46  ;;  %v5516_v43 = vpop.permute.xlu0 %5515 }
 0x3cd   :  { %9080 = vmatprep.subr.bf16.mxu0 %v11380_v46  ;;  %v5521_v23 = vsel %vm4735_vm5, %v5516_v43, 0 }
 0x3d0   :  { %v5565_v19 = vpop.permute.xlu0 %5564 }
 0x3d1   :  { %v5570_v41 = vsel %vm4735_vm5, %v5565_v19, 0 }
 0x3d4   :  { %v5614_v27 = vpop.permute.xlu0 %5613 }
 0x3d5   :  { %v5619_v53 = vsel %vm4735_vm5, %v5614_v27, 0 }
 0x3ec   :  { %v4571_v58 = vpop.xlane.xlu1 %4570 }
 0x3ed   :  { %9477 = vrcp.f32 %v4571_v58 }
 0x3f0   :  { %v4574_v12 = vpop.xlane.xlu1 %4573 }
 0x3f1   :  { %9479 = vrcp.f32 %v4574_v12 }
 0x3f4   :  { %v4577_v20 = vpop.xlane.xlu1 %4576 }
 0x3f5   :  { %9481 = vrcp.f32 %v4577_v20 }
 0x3f7   :  { %v9478_v3 = vpop.eup %9477 }
 0x3f8   :  { %v4655_v2 = vmul.f32 %v9478_v3, %v10747_v11  ;;  %v4580_v39 = vpop.xlane.xlu1 %4579 }
 0x3f9   :  { %9483 = vrcp.f32 %v4580_v39 }
 0x3fa   :  { %v4707_v28 = vpack.c.bf16 %v4655_v2, %v4655_v2 }
 0x3fb   :  { %v9480_v51 = vpop.eup %9479 }
 0x3fc   :  { %v4657_v25 = vmul.f32 %v9480_v51, %v10754_v36  ;;  %v4583_v57 = vpop.xlane.xlu1 %4582  ;;  %9065 = vmatmul.mubr.msk.bf16.vlgmr.msra.gmra.mrb[212].mxu1 %vm4731_vm7, %v4707_v28  ;;  %v5663_v36 = vpop.permute.xlu0 %5662 }
 0x3fd   :  { %9485 = vrcp.f32 %v4583_v57  ;;  %9075 = vmatpush3.bf16.msra.mxu1 %v5374_v48  ;;  %9076 = vmatprep.mubr.msk.bf16.mxu1 %vm9528_vm0, %v11380_v46  ;;  %v5668_v42 = vsel %vm4735_vm5, %v5663_v36, 0 }
 0x3fe   :  { %v4708_v63 = vpack.c.bf16 %v4657_v25, %v4657_v25  ;;  %9086 = vmatprep.subr.bf16.mxu1 %v11380_v46 }
 0x3ff   :  { %v9482_v11 = vpop.eup %9481 }
 0x400   :  { %v4659_v60 = vmul.f32 %v9482_v11, %v10763_v54  ;;  %v4586_v61 = vpop.xlane.xlu1 %4585  ;;  %9071 = vmatmul.mubr.msk.bf16.vlgmr.msra.gmra.mrb[216].mxu0 %vm4731_vm7, %v4708_v63  ;;  %v5712_v22 = vpop.permute.xlu0 %5711 }
 0x401   :  { %9487 = vrcp.f32 %v4586_v61  ;;  %9081 = vmatpush3.bf16.msra.mxu0 %v5423_v15  ;;  %9082 = vmatprep.mubr.msk.bf16.mxu0 %vm9528_vm0, %v11380_v46  ;;  %v5717_v12 = vsel %vm4735_vm5, %v5712_v22, 0 }
 0x402   :  { %v4709_v8 = vpack.c.bf16 %v4659_v60, %v4659_v60  ;;  %9092 = vmatprep.subr.bf16.mxu0 %v11380_v46 }
 0x403   :  { %v9484_v45 = vpop.eup %9483 }
 0x404   :  { %v4661_v40 = vmul.f32 %v9484_v45, %v10772_v10  ;;  %v4589_v33 = vpop.xlane.xlu1 %4588  ;;  %9077 = vmatmul.mubr.msk.bf16.vlgmr.msra.gmra.mrb[216].mxu1 %vm4731_vm7, %v4709_v8 }
 0x405   :  { %9489 = vrcp.f32 %v4589_v33  ;;  %9087 = vmatpush3.bf16.msra.mxu1 %v5472_v37  ;;  %9088 = vmatprep.mubr.msk.bf16.mxu1 %vm9528_vm0, %v11380_v46 }
 0x406   :  { %v4710_v54 = vpack.c.bf16 %v4661_v40, %v4661_v40  ;;  %9098 = vmatprep.subr.bf16.mxu1 %v11380_v46 }
 0x407   :  { %v9486_v17 = vpop.eup %9485 }
 0x408   :  { %v4663_v44 = vmul.f32 %v9486_v17, %v10779_v9  ;;  %9083 = vmatmul.mubr.msk.bf16.vlgmr.msra.gmra.mrb[220].mxu0 %vm4731_vm7, %v4710_v54  ;;  %v5761_v9 = vpop.permute.xlu0 %5760 }
 0x409   :  { %v4592_v52 = vpop.xlane.xlu1 %4591  ;;  %9093 = vmatpush3.bf16.msra.mxu0 %v5521_v23  ;;  %9094 = vmatprep.mubr.msk.bf16.mxu0 %vm9528_vm0, %v11380_v46  ;;  %v5766_v39 = vsel %vm4735_vm5, %v5761_v9, 0 }
 0x40a   :  { %9491 = vrcp.f32 %v4592_v52  ;;  %v4711_v10 = vpack.c.bf16 %v4663_v44, %v4663_v44  ;;  %9104 = vmatprep.subr.bf16.mxu0 %v11380_v46  ;;  %v6011_v52 = vsel %vm4735_vm5, %v10948_v18, 0 }
 0x40b   :  { %v9488_v47 = vpop.eup %9487 }
 0x40c   :  { %v4665_v0 = vmul.f32 %v9488_v47, %v10786_v30  ;;  %9089 = vmatmul.mubr.msk.bf16.vlgmr.msra.gmra.mrb[220].mxu1 %vm4731_vm7, %v4711_v10  ;;  %v5810_v24 = vpop.permute.xlu0 %5809 }
 0x40d   :  { %v4595_v6 = vpop.xlane.xlu1 %4594  ;;  %9099 = vmatpush3.bf16.msra.mxu1 %v5570_v41  ;;  %9100 = vmatprep.mubr.msk.bf16.mxu1 %vm9528_vm0, %v11380_v46  ;;  %v5815_v25 = vsel %vm4735_vm5, %v5810_v24, 0 }
 0x40e   :  { %9493 = vrcp.f32 %v4595_v6  ;;  %v4712_v31 = vpack.c.bf16 %v4665_v0, %v4665_v0  ;;  %9110 = vmatprep.subr.bf16.mxu1 %v11380_v46 }
 0x40f   :  { %v9490_v1 = vpop.eup %9489 }
 0x410   :  { %v4667_v5 = vmul.f32 %v9490_v1, %v10793_v16  ;;  %9095 = vmatmul.mubr.msk.bf16.vlgmr.msra.gmra.mrb[224].mxu0 %vm4731_vm7, %v4712_v31 }
 0x411   :  { %v4598_v21 = vpop.xlane.xlu1 %4597  ;;  %9105 = vmatpush3.bf16.msra.mxu0 %v5619_v53  ;;  %9106 = vmatprep.mubr.msk.bf16.mxu0 %vm9528_vm0, %v11380_v46 }
 0x412   :  { %9495 = vrcp.f32 %v4598_v21  ;;  %v4713_v30 = vpack.c.bf16 %v4667_v5, %v4667_v5  ;;  %9116 = vmatprep.subr.bf16.mxu0 %v11380_v46 }
 0x414   :  { %v9492_v35 = vpop.eup %9491  ;;  %9101 = vmatmul.mubr.msk.bf16.vlgmr.msra.gmra.mrb[224].mxu1 %vm4731_vm7, %v4713_v30 }
 0x415   :  { %v4669_v38 = vmul.f32 %v9492_v35, %v10801_v50  ;;  %v4601_v58 = vpop.xlane.xlu1 %4600  ;;  %9111 = vmatpush3.bf16.msra.mxu1 %v5668_v42  ;;  %9112 = vmatprep.mubr.msk.bf16.mxu1 %vm9528_vm0, %v11380_v46  ;;  %v5859_v50 = vpop.permute.xlu0 %5858 }
 0x416   :  { %9497 = vrcp.f32 %v4601_v58  ;;  %9122 = vmatprep.subr.bf16.mxu1 %v11380_v46  ;;  %v5864_v15 = vsel %vm4735_vm5, %v5859_v50, 0 }
 0x417   :  { %v4714_v16 = vpack.c.bf16 %v4669_v38, %v4669_v38 }
 0x418   :  { %v9494_v43 = vpop.eup %9493 }
 0x419   :  { %v4671_v20 = vmul.f32 %v9494_v43, %v10814_v55  ;;  %v4604_v19 = vpop.xlane.xlu1 %4603  ;;  %9107 = vmatmul.mubr.msk.bf16.vlgmr.msra.gmra.mrb[228].mxu0 %vm4731_vm7, %v4714_v16  ;;  %v5908_v48 = vpop.permute.xlu0 %5907 }
 0x41a   :  { %9499 = vrcp.f32 %v4604_v19  ;;  %9117 = vmatpush3.bf16.msra.mxu0 %v5717_v12  ;;  %9118 = vmatprep.mubr.msk.bf16.mxu0 %vm9528_vm0, %v11380_v46  ;;  %v5913_v45 = vsel %vm4735_vm5, %v5908_v48, 0  ;;  %v74_v19 = vld [vmem:[%s11358_s6] sm:$0xf] }
 0x41b   :  { %v4715_v3 = vpack.c.bf16 %v4671_v20, %v4671_v20  ;;  %9128 = vmatprep.subr.bf16.mxu0 %v11380_v46 }
 0x41c   :  { %v9496_v2 = vpop.eup %9495 }
 0x41d   :  { %v4673_v28 = vmul.f32 %v9496_v2, %v10828_v13  ;;  %v4607_v51 = vpop.xlane.xlu1 %4606  ;;  %9113 = vmatmul.mubr.msk.bf16.vlgmr.msra.gmra.mrb[228].mxu1 %vm4731_vm7, %v4715_v3  ;;  %v11069_v2 = vsel %vm6333_vm8, %v74_v19, 0 }
 0x41e   :  { %9501 = vrcp.f32 %v4607_v51  ;;  %9123 = vmatpush3.bf16.msra.mxu1 %v5766_v39  ;;  %9124 = vmatprep.mubr.msk.bf16.mxu1 %vm9528_vm0, %v11380_v46 }
 0x41f   :  { %v4716_v55 = vpack.c.bf16 %v4673_v28, %v4673_v28  ;;  %9134 = vmatprep.subr.bf16.mxu1 %v11380_v46  ;;  %v75_v28 = vld [vmem:[%s11358_s6 + $0x4] sm:$0xf] }
 0x420   :  { %v9498_v27 = vpop.eup %9497 }
 0x421   :  { %v4675_v57 = vmul.f32 %v9498_v27, %v10840_v56  ;;  %v4610_v63 = vpop.xlane.xlu1 %4609  ;;  %9119 = vmatmul.mubr.msk.bf16.vlgmr.msra.gmra.mrb[232].mxu0 %vm4731_vm7, %v4716_v55  ;;  %v5957_v56 = vpop.permute.xlu0 %5956  ;;  %v11081_v55 = vsel %vm6333_vm8, %v75_v28, 0  ;;  %v76_v27 = vld [vmem:[%s11358_s6 + $0x8] sm:$0xf] }
 0x422   :  { %9503 = vrcp.f32 %v4610_v63  ;;  %9129 = vmatpush3.bf16.msra.mxu0 %v5815_v25  ;;  %9130 = vmatprep.mubr.msk.bf16.mxu0 %vm9528_vm0, %v11380_v46  ;;  %v5962_v17 = vsel %vm4735_vm5, %v5957_v56, 0  ;;  %v11092_v63 = vsel %vm6333_vm8, %v76_v27, 0 }
 0x423   :  { %v4717_v13 = vpack.c.bf16 %v4675_v57, %v4675_v57  ;;  %9140 = vmatprep.subr.bf16.mxu0 %v11380_v46 }
 0x424   :  { %v9500_v11 = vpop.eup %9499 }
 0x425   :  { %v4677_v60 = vmul.f32 %v9500_v11, %v10851_v32  ;;  %v4613_v61 = vpop.xlane.xlu1 %4612  ;;  %9125 = vmatmul.mubr.msk.bf16.vlgmr.msra.gmra.mrb[232].mxu1 %vm4731_vm7, %v4717_v13  ;;  %v6055_v54 = vpop.permute.xlu0 %6054  ;;  %v77_v11 = vld [vmem:[%s11358_s6 + $0xc] sm:$0xf] }
 0x426   :  { %9505 = vrcp.f32 %v4613_v61  ;;  %9135 = vmatpush3.bf16.msra.mxu1 %v5864_v15  ;;  %9136 = vmatprep.mubr.msk.bf16.mxu1 %vm9528_vm0, %v11380_v46  ;;  %v6060_v6 = vsel %vm4735_vm5, %v6055_v54, 0 }
 0x427   :  { %v4718_v36 = vpack.c.bf16 %v4677_v60, %v4677_v60  ;;  %9146 = vmatprep.subr.bf16.mxu1 %v11380_v46 }
 0x428   :  { %v9502_v8 = vpop.eup %9501 }
 0x429   :  { %v4679_v37 = vmul.f32 %v9502_v8, %v10857_v59  ;;  %v4616_v40 = vpop.xlane.xlu1 %4615  ;;  %9131 = vmatmul.mubr.msk.bf16.vlgmr.msra.gmra.mrb[236].mxu0 %vm4731_vm7, %v4718_v36  ;;  %v11103_v36 = vsel %vm6333_vm8, %v77_v11, 0 }
 0x42a   :  { %9507 = vrcp.f32 %v4616_v40  ;;  %9141 = vmatpush3.bf16.msra.mxu0 %v5913_v45  ;;  %9142 = vmatprep.mubr.msk.bf16.mxu0 %vm9528_vm0, %v11380_v46 }
 0x42b   :  { %v4719_v32 = vpack.c.bf16 %v4679_v37, %v4679_v37  ;;  %9152 = vmatprep.subr.bf16.mxu0 %v11380_v46 }
 0x42c   :  { %v9504_v33 = vpop.eup %9503 }
 0x42d   :  { %v4681_v22 = vmul.f32 %v9504_v33, %v10862_v62  ;;  %v4619_v23 = vpop.xlane.xlu1 %4618  ;;  %9137 = vmatmul.mubr.msk.bf16.vlgmr.msra.gmra.mrb[236].mxu1 %vm4731_vm7, %v4719_v32  ;;  %v6104_v62 = vpop.permute.xlu0 %6103 }
 0x42e   :  { %9509 = vrcp.f32 %v4619_v23  ;;  %9147 = vmatpush3.bf16.msra.mxu1 %v5962_v17  ;;  %9148 = vmatprep.mubr.msk.bf16.mxu1 %vm9528_vm0, %v11380_v46  ;;  %v6109_v53 = vsel %vm4735_vm5, %v6104_v62, 0 }
 0x42f   :  { %v4720_v59 = vpack.c.bf16 %v4681_v22, %v4681_v22  ;;  %9158 = vmatprep.subr.bf16.mxu1 %v11380_v46 }
 0x430   :  { %v9506_v44 = vpop.eup %9505 }
 0x431   :  { %v4683_v10 = vmul.f32 %v9506_v44, %v10868_v14  ;;  %v4622_v47 = vpop.xlane.xlu1 %4621  ;;  %9143 = vmatmul.mubr.msk.bf16.vlgmr.msra.gmra.mrb[240].mxu0 %vm4731_vm7, %v4720_v59  ;;  %v6153_v1 = vpop.permute.xlu0 %6152 }
 0x432   :  { %9511 = vrcp.f32 %v4622_v47  ;;  %9153 = vmatpush3.bf16.msra.mxu0 %v6011_v52  ;;  %9154 = vmatprep.mubr.msk.bf16.mxu0 %vm9528_vm0, %v11380_v46  ;;  %v6158_v35 = vsel %vm4735_vm5, %v6153_v1, 0 }
 0x433   :  { %v4721_v41 = vpack.c.bf16 %v4683_v10, %v4683_v10  ;;  %9164 = vmatprep.subr.bf16.mxu0 %v11380_v46 }
 0x434   :  { %v9508_v0 = vpop.eup %9507 }
 0x435   :  { %v4685_v9 = vmul.f32 %v9508_v0, %v10873_v34  ;;  %v4625_v18 = vpop.xlane.xlu1 %4624  ;;  %9149 = vmatmul.mubr.msk.bf16.vlgmr.msra.gmra.mrb[240].mxu1 %vm4731_vm7, %v4721_v41 }
 0x436   :  { %9513 = vrcp.f32 %v4625_v18  ;;  %9159 = vmatpush3.bf16.msra.mxu1 %v6060_v6  ;;  %9160 = vmatprep.mubr.msk.bf16.mxu1 %vm9528_vm0, %v11380_v46 }
 0x437   :  { %v4722_v14 = vpack.c.bf16 %v4685_v9, %v4685_v9  ;;  %9170 = vmatprep.subr.bf16.mxu1 %v11380_v46 }
 0x438   :  { %v9510_v31 = vpop.eup %9509 }
 0x439   :  { %v4687_v5 = vmul.f32 %v9510_v31, %v10879_v7  ;;  %v4628_v21 = vpop.xlane.xlu1 %4627  ;;  %9155 = vmatmul.mubr.msk.bf16.vlgmr.msra.gmra.mrb[244].mxu0 %vm4731_vm7, %v4722_v14  ;;  %v6202_v7 = vpop.permute.xlu0 %6201 }
 0x43a   :  { %9515 = vrcp.f32 %v4628_v21  ;;  %9165 = vmatpush3.bf16.msra.mxu0 %v6109_v53  ;;  %9166 = vmatprep.mubr.msk.bf16.mxu0 %vm9528_vm0, %v11380_v46  ;;  %v6207_v16 = vsel %vm4735_vm5, %v6202_v7, 0 }
 0x43b   :  { %v4723_v34 = vpack.c.bf16 %v4687_v5, %v4687_v5  ;;  %9176 = vmatprep.subr.bf16.mxu0 %v11380_v46 }
 0x43c   :  { %v9512_v30 = vpop.eup %9511 }
 0x43d   :  { %v4689_v24 = vmul.f32 %v9512_v30, %v10883_v29  ;;  %v4631_v42 = vpop.xlane.xlu1 %4630  ;;  %9161 = vmatmul.mubr.msk.bf16.vlgmr.msra.gmra.mrb[244].mxu1 %vm4731_vm7, %v4723_v34 }
 0x43e   :  { %9517 = vrcp.f32 %v4631_v42  ;;  %9171 = vmatpush3.bf16.msra.mxu1 %v6158_v35  ;;  %9172 = vmatprep.mubr.msk.bf16.mxu1 %vm9528_vm0, %v11380_v46 }
 0x43f   :  { %v4724_v38 = vpack.c.bf16 %v4689_v24, %v4689_v24  ;;  %9182 = vmatprep.subr.bf16.mxu1 %v11380_v46 }
 0x440   :  { %v9514_v58 = vpop.eup %9513 }
 0x441   :  { %v4691_v43 = vmul.f32 %v9514_v58, %v10887_v26  ;;  %9167 = vmatmul.mubr.msk.bf16.vlgmr.msra.gmra.mrb[248].mxu0 %vm4731_vm7, %v4724_v38  ;;  %v6251_v29 = vpop.permute.xlu1 %6250 }
 0x442   :  { %9177 = vmatpush3.bf16.msra.mxu0 %v6207_v16  ;;  %9178 = vmatprep.mubr.msk.bf16.mxu0 %vm9528_vm0, %v11380_v46  ;;  %v6256_v26 = vsel %vm4735_vm5, %v6251_v29, 0 }
 0x443   :  { %v4725_v12 = vpack.c.bf16 %v4691_v43, %v4691_v43  ;;  %9188 = vmatprep.subr.bf16.mxu0 %v11380_v46 }
 0x444   :  { %v9516_v20 = vpop.eup %9515 }
 0x445   :  { %v4693_v50 = vmul.f32 %v9516_v20, %v10891_v4  ;;  %9173 = vmatmul.mubr.msk.bf16.vlgmr.msra.gmra.mrb[248].mxu1 %vm4731_vm7, %v4725_v12 }
 0x446   :  { %9183 = vmatpush3.bf16.msra.mxu1 %v6256_v26  ;;  %9184 = vmatprep.mubr.msk.bf16.mxu1 %vm9528_vm0, %v11380_v46 }
 0x447   :  { %v4726_v3 = vpack.c.bf16 %v4693_v50, %v4693_v50  ;;  %9194 = vmatprep.subr.bf16.mxu1 %v11380_v46 }
 0x448   :  { %v9518_v39 = vpop.eup %9517 }
 0x449   :  { %v4695_v4 = vmul.f32 %v9518_v39, %v10895_v49  ;;  %9179 = vmatmul.mubr.msk.bf16.vlgmr.msra.gmra.mrb[252].mxu0 %vm4731_vm7, %v4726_v3 }
 0x44a   :  { %9189 = vmatpush3.bf16.msra.mxu0 %v11069_v2  ;;  %9190 = vmatprep.mubr.msk.bf16.mxu0 %vm9528_vm0, %v11380_v46 }
 0x44b   :  { %v4727_v51 = vpack.c.bf16 %v4695_v4, %v4695_v4  ;;  %9200 = vmatprep.subr.bf16.mxu0 %v11380_v46 }
 0x44d   :  { %9185 = vmatmul.mubr.msk.bf16.vlgmr.msra.gmra.mrb[252].mxu1 %vm4731_vm7, %v4727_v51  ;;  %v4773_v49 = vpop.f32.mrb[192].mxu0 }
 0x44e   :  { %v6298_v48 = vpack.c.bf16 %v4773_v49, %v4773_v49  ;;  %v9000_v25 = vpop.f32.mrb[193].mxu0  ;;  %9195 = vmatpush3.bf16.msra.mxu1 %v11081_v55  ;;  %9196 = vmatprep.mubr.msk.bf16.mxu1 %vm9528_vm0, %v11380_v46 }
 0x44f   :  { %v4776_v57 = vpop.f32.mrb[194].mxu0  ;;  %9206 = vmatprep.subr.bf16.mxu1 %v11380_v46 }
 0x450   :  { %v9001_v13 = vpop.f32.mrb[195].mxu0 }
 0x451   :  { %9191 = vmatmul.mubr.msk.bf16.vlgmr.msra.gmra.mrb[0].mxu0 %vm2870_vm4, %v6298_v48  ;;  %v4822_v15 = vpop.f32.mrb[192].mxu1 }
 0x452   :  { %v6299_v60 = vpack.c.bf16 %v4822_v15, %v4822_v15  ;;  %v9006_v61 = vpop.f32.mrb[193].mxu1  ;;  %9201 = vmatpush3.bf16.msra.mxu0 %v11092_v63  ;;  %9202 = vmatprep.mubr.msk.bf16.mxu0 %vm9528_vm0, %v11380_v46 }
 0x453   :  { %v4825_v56 = vpop.f32.mrb[194].mxu1  ;;  %9212 = vmatprep.subr.bf16.mxu0 %v11380_v46 }
 0x454   :  { %v9007_v8 = vpop.f32.mrb[195].mxu1 }
 0x455   :  { %9197 = vmatmul.mubr.msk.bf16.vlgmr.msra.gmra.mrb[0].mxu1 %vm2870_vm4, %v6299_v60  ;;  %v4871_v45 = vpop.f32.mrb[196].mxu0 }
 0x456   :  { %v6300_v37 = vpack.c.bf16 %v4871_v45, %v4871_v45  ;;  %v9012_v40 = vpop.f32.mrb[197].mxu0  ;;  %9207 = vmatpush3.bf16.msra.mxu1 %v11103_v36  ;;  %9208 = vmatprep.mubr.msk.bf16.mxu1 %vm9528_vm0, %v11380_v46 }
 0x457   :  { %v4874_v32 = vpop.f32.mrb[198].mxu0  ;;  %9218 = vmatprep.subr.bf16.mxu1 %v11380_v46 }
 0x458   :  { %v9013_v33 = vpop.f32.mrb[199].mxu0 }
 0x459   :  { %9203 = vmatmul.mubr.msk.bf16.vlgmr.msra.gmra.mrb[4].mxu0 %vm2870_vm4, %v6300_v37  ;;  %v4920_v54 = vpop.f32.mrb[196].mxu1 }
 0x45a   :  { %v6301_v17 = vpack.c.bf16 %v4920_v54, %v4920_v54  ;;  %v9018_v22 = vpop.f32.mrb[197].mxu1  ;;  %9213 = vmatpush3.bf16.msra.mxu0 %v11069_v2  ;;  %9214 = vmatprep.mubr.msk.bf16.mxu0 %vm9528_vm0, %v11380_v46 }
 0x45b   :  { %v4923_v23 = vpop.f32.mrb[198].mxu1  ;;  %9224 = vmatprep.subr.bf16.mxu0 %v11380_v46 }
 0x45c   :  { %v9019_v59 = vpop.f32.mrb[199].mxu1 }
 0x45d   :  { %9209 = vmatmul.mubr.msk.bf16.vlgmr.msra.gmra.mrb[4].mxu1 %vm2870_vm4, %v6301_v17 }
 0x45e   :  { %9219 = vmatpush3.bf16.msra.mxu1 %v11081_v55  ;;  %9220 = vmatprep.mubr.msk.bf16.mxu1 %vm9528_vm0, %v11380_v46 }
 0x45f   :  { %9230 = vmatprep.subr.bf16.mxu1 %v11380_v46 }
 0x486   :  { %v4969_v44 = vpop.f32.mrb[200].mxu0 }
 0x487   :  { %v6302_v52 = vpack.c.bf16 %v4969_v44, %v4969_v44  ;;  %v9024_v10 = vpop.f32.mrb[201].mxu0 }
 0x488   :  { %v4972_v47 = vpop.f32.mrb[202].mxu0 }
 0x489   :  { %v9025_v62 = vpop.f32.mrb[203].mxu0  ;;  %9215 = vmatmul.mubr.msk.bf16.vlgmr.msra.gmra.mrb[8].mxu0 %vm2870_vm4, %v6302_v52 }
 0x48a   :  { %v5018_v41 = vpop.f32.mrb[200].mxu1  ;;  %9225 = vmatpush3.bf16.msra.mxu0 %v11092_v63  ;;  %9226 = vmatprep.mubr.msk.bf16.mxu0 %vm9528_vm0, %v11380_v46 }
 0x48b   :  { %v6303_v0 = vpack.c.bf16 %v5018_v41, %v5018_v41  ;;  %v9030_v6 = vpop.f32.mrb[201].mxu1  ;;  %9236 = vmatprep.subr.bf16.mxu0 %v11380_v46 }
 0x48c   :  { %v5021_v9 = vpop.f32.mrb[202].mxu1 }
 0x48d   :  { %v9031_v18 = vpop.f32.mrb[203].mxu1  ;;  %9221 = vmatmul.mubr.msk.bf16.vlgmr.msra.gmra.mrb[8].mxu1 %vm2870_vm4, %v6303_v0 }
 0x48e   :  { %v5067_v14 = vpop.f32.mrb[204].mxu0  ;;  %9231 = vmatpush3.bf16.msra.mxu1 %v11103_v36  ;;  %9232 = vmatprep.mubr.msk.bf16.mxu1 %vm9528_vm0, %v11380_v46 }
 0x48f   :  { %v6304_v31 = vpack.c.bf16 %v5067_v14, %v5067_v14  ;;  %v9036_v1 = vpop.f32.mrb[205].mxu0  ;;  %9242 = vmatprep.subr.bf16.mxu1 %v11380_v46 }
 0x490   :  { %v5070_v53 = vpop.f32.mrb[206].mxu0 }
 0x491   :  { %v9037_v5 = vpop.f32.mrb[207].mxu0  ;;  %9227 = vmatmul.mubr.msk.bf16.vlgmr.msra.gmra.mrb[12].mxu0 %vm2870_vm4, %v6304_v31 }
 0x492   :  { %v5116_v21 = vpop.f32.mrb[204].mxu1  ;;  %9237 = vmatpush3.bf16.msra.mxu0 %v11069_v2  ;;  %9238 = vmatprep.mubr.msk.bf16.mxu0 %vm9528_vm0, %v11380_v46 }
 0x493   :  { %v6305_v34 = vpack.c.bf16 %v5116_v21, %v5116_v21  ;;  %v9042_v30 = vpop.f32.mrb[205].mxu1  ;;  %9248 = vmatprep.subr.bf16.mxu0 %v11380_v46 }
 0x494   :  { %v5119_v35 = vpop.f32.mrb[206].mxu1 }
 0x495   :  { %v9043_v24 = vpop.f32.mrb[207].mxu1  ;;  %9233 = vmatmul.mubr.msk.bf16.vlgmr.msra.gmra.mrb[12].mxu1 %vm2870_vm4, %v6305_v34 }
 0x496   :  { %v5165_v42 = vpop.f32.mrb[208].mxu0  ;;  %9243 = vmatpush3.bf16.msra.mxu1 %v11081_v55  ;;  %9244 = vmatprep.mubr.msk.bf16.mxu1 %vm9528_vm0, %v11380_v46 }
 0x497   :  { %v6306_v7 = vpack.c.bf16 %v5165_v42, %v5165_v42  ;;  %v9048_v38 = vpop.f32.mrb[209].mxu0  ;;  %9254 = vmatprep.subr.bf16.mxu1 %v11380_v46 }
 0x498   :  { %v5168_v58 = vpop.f32.mrb[210].mxu0 }
 0x499   :  { %v9049_v16 = vpop.f32.mrb[211].mxu0  ;;  %9239 = vmatmul.mubr.msk.bf16.vlgmr.msra.gmra.mrb[16].mxu0 %vm2870_vm4, %v6306_v7 }
 0x49a   :  { %v5214_v43 = vpop.f32.mrb[208].mxu1  ;;  %9249 = vmatpush3.bf16.msra.mxu0 %v11092_v63  ;;  %9250 = vmatprep.mubr.msk.bf16.mxu0 %vm9528_vm0, %v11380_v46 }
 0x49b   :  { %v6307_v29 = vpack.c.bf16 %v5214_v43, %v5214_v43  ;;  %v9054_v12 = vpop.f32.mrb[209].mxu1  ;;  %9260 = vmatprep.subr.bf16.mxu0 %v11380_v46 }
 0x49c   :  { %v5217_v20 = vpop.f32.mrb[210].mxu1 }
 0x49d   :  { %v9055_v19 = vpop.f32.mrb[211].mxu1  ;;  %9245 = vmatmul.mubr.msk.bf16.vlgmr.msra.gmra.mrb[16].mxu1 %vm2870_vm4, %v6307_v29 }
 0x49e   :  { %v5263_v50 = vpop.f32.mrb[212].mxu0  ;;  %9255 = vmatpush3.bf16.msra.mxu1 %v11103_v36  ;;  %9256 = vmatprep.mubr.msk.bf16.mxu1 %vm9528_vm0, %v11380_v46 }
 0x49f   :  { %v6308_v26 = vpack.c.bf16 %v5263_v50, %v5263_v50  ;;  %v9060_v3 = vpop.f32.mrb[213].mxu0  ;;  %9266 = vmatprep.subr.bf16.mxu1 %v11380_v46 }
 0x4a0   :  { %v5266_v39 = vpop.f32.mrb[214].mxu0 }
 0x4a1   :  { %v9061_v28 = vpop.f32.mrb[215].mxu0  ;;  %9251 = vmatmul.mubr.msk.bf16.vlgmr.msra.gmra.mrb[20].mxu0 %vm2870_vm4, %v6308_v26 }
 0x4a2   :  { %9261 = vmatpush3.bf16.msra.mxu0 %v11069_v2  ;;  %9262 = vmatprep.mubr.msk.bf16.mxu0 %vm9528_vm0, %v11380_v46 }
 0x4a3   :  { %9272 = vmatprep.subr.bf16.mxu0 %v11380_v46 }
 0x4cf   :  { %v5312_v4 = vpop.f32.mrb[212].mxu1 }
 0x4d0   :  { %v6309_v51 = vpack.c.bf16 %v5312_v4, %v5312_v4  ;;  %v9066_v27 = vpop.f32.mrb[213].mxu1 }
 0x4d1   :  { %v5315_v49 = vpop.f32.mrb[214].mxu1 }
 0x4d2   :  { %v9067_v48 = vpop.f32.mrb[215].mxu1  ;;  %9257 = vmatmul.mubr.msk.bf16.vlgmr.msra.gmra.mrb[20].mxu1 %vm2870_vm4, %v6309_v51 }
 0x4d3   :  { %v5361_v25 = vpop.f32.mrb[216].mxu0  ;;  %9267 = vmatpush3.bf16.msra.mxu1 %v11081_v55  ;;  %9268 = vmatprep.mubr.msk.bf16.mxu1 %vm9528_vm0, %v11380_v46 }
 0x4d4   :  { %v6310_v57 = vpack.c.bf16 %v5361_v25, %v5361_v25  ;;  %v9072_v13 = vpop.f32.mrb[217].mxu0  ;;  %9278 = vmatprep.subr.bf16.mxu1 %v11380_v46 }
 0x4d5   :  { %v5364_v11 = vpop.f32.mrb[218].mxu0 }
 0x4d6   :  { %v9073_v15 = vpop.f32.mrb[219].mxu0  ;;  %9263 = vmatmul.mubr.msk.bf16.vlgmr.msra.gmra.mrb[24].mxu0 %vm2870_vm4, %v6310_v57 }
 0x4d7   :  { %v5410_v60 = vpop.f32.mrb[216].mxu1  ;;  %9273 = vmatpush3.bf16.msra.mxu0 %v11092_v63  ;;  %9274 = vmatprep.mubr.msk.bf16.mxu0 %vm9528_vm0, %v11380_v46 }
 0x4d8   :  { %v6311_v61 = vpack.c.bf16 %v5410_v60, %v5410_v60  ;;  %v9078_v56 = vpop.f32.mrb[217].mxu1  ;;  %9284 = vmatprep.subr.bf16.mxu0 %v11380_v46 }
 0x4d9   :  { %v5413_v8 = vpop.f32.mrb[218].mxu1 }
 0x4da   :  { %v9079_v45 = vpop.f32.mrb[219].mxu1  ;;  %9269 = vmatmul.mubr.msk.bf16.vlgmr.msra.gmra.mrb[24].mxu1 %vm2870_vm4, %v6311_v61 }
 0x4db   :  { %v5459_v37 = vpop.f32.mrb[220].mxu0  ;;  %9279 = vmatpush3.bf16.msra.mxu1 %v11103_v36  ;;  %9280 = vmatprep.mubr.msk.bf16.mxu1 %vm9528_vm0, %v11380_v46 }
 0x4dc   :  { %v6312_v40 = vpack.c.bf16 %v5459_v37, %v5459_v37  ;;  %v9084_v32 = vpop.f32.mrb[221].mxu0  ;;  %9290 = vmatprep.subr.bf16.mxu1 %v11380_v46 }
 0x4dd   :  { %v5462_v33 = vpop.f32.mrb[222].mxu0 }
 0x4de   :  { %v9085_v54 = vpop.f32.mrb[223].mxu0  ;;  %9275 = vmatmul.mubr.msk.bf16.vlgmr.msra.gmra.mrb[28].mxu0 %vm2870_vm4, %v6312_v40 }
 0x4df   :  { %v5508_v17 = vpop.f32.mrb[220].mxu1  ;;  %9285 = vmatpush3.bf16.msra.mxu0 %v11069_v2  ;;  %9286 = vmatprep.mubr.msk.bf16.mxu0 %vm9528_vm0, %v11380_v46 }
 0x4e0   :  { %v6313_v22 = vpack.c.bf16 %v5508_v17, %v5508_v17  ;;  %v9090_v23 = vpop.f32.mrb[221].mxu1  ;;  %9296 = vmatprep.subr.bf16.mxu0 %v11380_v46 }
 0x4e1   :  { %v5511_v59 = vpop.f32.mrb[222].mxu1 }
 0x4e2   :  { %v9091_v44 = vpop.f32.mrb[223].mxu1  ;;  %9281 = vmatmul.mubr.msk.bf16.vlgmr.msra.gmra.mrb[28].mxu1 %vm2870_vm4, %v6313_v22 }
 0x4e3   :  { %v5557_v52 = vpop.f32.mrb[224].mxu0  ;;  %9291 = vmatpush3.bf16.msra.mxu1 %v11081_v55  ;;  %9292 = vmatprep.mubr.msk.bf16.mxu1 %vm9528_vm0, %v11380_v46 }
 0x4e4   :  { %v6314_v10 = vpack.c.bf16 %v5557_v52, %v5557_v52  ;;  %v9096_v47 = vpop.f32.mrb[225].mxu0  ;;  %9302 = vmatprep.subr.bf16.mxu1 %v11380_v46 }
 0x4e5   :  { %v5560_v62 = vpop.f32.mrb[226].mxu0 }
 0x4e6   :  { %v9097_v41 = vpop.f32.mrb[227].mxu0  ;;  %9287 = vmatmul.mubr.msk.bf16.vlgmr.msra.gmra.mrb[32].mxu0 %vm2870_vm4, %v6314_v10 }
 0x4e7   :  { %v5606_v0 = vpop.f32.mrb[224].mxu1  ;;  %9297 = vmatpush3.bf16.msra.mxu0 %v11092_v63  ;;  %9298 = vmatprep.mubr.msk.bf16.mxu0 %vm9528_vm0, %v11380_v46 }
 0x4e8   :  { %v6315_v6 = vpack.c.bf16 %v5606_v0, %v5606_v0  ;;  %v9102_v9 = vpop.f32.mrb[225].mxu1  ;;  %9308 = vmatprep.subr.bf16.mxu0 %v11380_v46 }
 0x4e9   :  { %v5609_v18 = vpop.f32.mrb[226].mxu1 }
 0x4ea   :  { %v9103_v14 = vpop.f32.mrb[227].mxu1  ;;  %9293 = vmatmul.mubr.msk.bf16.vlgmr.msra.gmra.mrb[32].mxu1 %vm2870_vm4, %v6315_v6 }
 0x4eb   :  { %9303 = vmatpush3.bf16.msra.mxu1 %v11103_v36  ;;  %9304 = vmatprep.mubr.msk.bf16.mxu1 %vm9528_vm0, %v11380_v46 }
 0x4ec   :  { %v5655_v31 = vpop.f32.mrb[228].mxu0  ;;  %9314 = vmatprep.subr.bf16.mxu1 %v11380_v46 }
 0x4ed   :  { %v6316_v1 = vpack.c.bf16 %v5655_v31, %v5655_v31  ;;  %v9108_v53 = vpop.f32.mrb[229].mxu0 }
 0x4ee   :  { %v5658_v5 = vpop.f32.mrb[230].mxu0 }
 0x4ef   :  { %v9109_v21 = vpop.f32.mrb[231].mxu0  ;;  %9299 = vmatmul.mubr.msk.bf16.vlgmr.msra.gmra.mrb[36].mxu0 %vm2870_vm4, %v6316_v1 }
 0x4f0   :  { %v5704_v34 = vpop.f32.mrb[228].mxu1  ;;  %9309 = vmatpush3.bf16.msra.mxu0 %v11069_v2  ;;  %9310 = vmatprep.mubr.msk.bf16.mxu0 %vm9528_vm0, %v11380_v46 }
 0x4f1   :  { %v6317_v30 = vpack.c.bf16 %v5704_v34, %v5704_v34  ;;  %v9114_v35 = vpop.f32.mrb[229].mxu1  ;;  %9320 = vmatprep.subr.bf16.mxu0 %v11380_v46 }
 0x4f2   :  { %v5707_v24 = vpop.f32.mrb[230].mxu1 }
 0x4f3   :  { %v9115_v42 = vpop.f32.mrb[231].mxu1  ;;  %9305 = vmatmul.mubr.msk.bf16.vlgmr.msra.gmra.mrb[36].mxu1 %vm2870_vm4, %v6317_v30 }
 0x4f4   :  { %v5753_v7 = vpop.f32.mrb[232].mxu0  ;;  %9315 = vmatpush3.bf16.msra.mxu1 %v11081_v55  ;;  %9316 = vmatprep.mubr.msk.bf16.mxu1 %vm9528_vm0, %v11380_v46 }
 0x4f5   :  { %v6318_v38 = vpack.c.bf16 %v5753_v7, %v5753_v7  ;;  %v9120_v58 = vpop.f32.mrb[233].mxu0  ;;  %9326 = vmatprep.subr.bf16.mxu1 %v11380_v46 }
 0x4f6   :  { %v5756_v16 = vpop.f32.mrb[234].mxu0 }
 0x4f7   :  { %v9121_v43 = vpop.f32.mrb[235].mxu0  ;;  %9311 = vmatmul.mubr.msk.bf16.vlgmr.msra.gmra.mrb[40].mxu0 %vm2870_vm4, %v6318_v38 }
 0x4f8   :  { %v5802_v29 = vpop.f32.mrb[232].mxu1  ;;  %9321 = vmatpush3.bf16.msra.mxu0 %v11092_v63  ;;  %9322 = vmatprep.mubr.msk.bf16.mxu0 %vm9528_vm0, %v11380_v46 }
 0x4f9   :  { %v6319_v12 = vpack.c.bf16 %v5802_v29, %v5802_v29  ;;  %v9126_v20 = vpop.f32.mrb[233].mxu1  ;;  %9332 = vmatprep.subr.bf16.mxu0 %v11380_v46 }
 0x4fa   :  { %v5805_v19 = vpop.f32.mrb[234].mxu1 }
 0x4fb   :  { %v9127_v50 = vpop.f32.mrb[235].mxu1  ;;  %9317 = vmatmul.mubr.msk.bf16.vlgmr.msra.gmra.mrb[40].mxu1 %vm2870_vm4, %v6319_v12 }
 0x4fc   :  { %v5851_v26 = vpop.f32.mrb[236].mxu0  ;;  %9327 = vmatpush3.bf16.msra.mxu1 %v11103_v36  ;;  %9328 = vmatprep.mubr.msk.bf16.mxu1 %vm9528_vm0, %v11380_v46 }
 0x4fd   :  { %v6320_v3 = vpack.c.bf16 %v5851_v26, %v5851_v26  ;;  %v9132_v39 = vpop.f32.mrb[237].mxu0  ;;  %9338 = vmatprep.subr.bf16.mxu1 %v11380_v46 }
 0x4fe   :  { %v5854_v28 = vpop.f32.mrb[238].mxu0 }
 0x4ff   :  { %v9133_v4 = vpop.f32.mrb[239].mxu0  ;;  %9323 = vmatmul.mubr.msk.bf16.vlgmr.msra.gmra.mrb[44].mxu0 %vm2870_vm4, %v6320_v3 }
 0x500   :  { %v5900_v51 = vpop.f32.mrb[236].mxu1  ;;  %9333 = vmatpush3.bf16.msra.mxu0 %v11069_v2  ;;  %9334 = vmatprep.mubr.msk.bf16.mxu0 %vm9528_vm0, %v11380_v46  ;;  %v11257_v4 = vld [vmem:[%s11359_s7] ss:$0 sm:$0xff] }
 0x501   :  { %v6321_v27 = vpack.c.bf16 %v5900_v51, %v5900_v51  ;;  %v9138_v49 = vpop.f32.mrb[237].mxu1  ;;  %9344 = vmatprep.subr.bf16.mxu0 %v11380_v46 }
 0x502   :  { %v5903_v48 = vpop.f32.mrb[238].mxu1 }
 0x503   :  { %v9139_v25 = vpop.f32.mrb[239].mxu1  ;;  %9329 = vmatmul.mubr.msk.bf16.vlgmr.msra.gmra.mrb[44].mxu1 %vm2870_vm4, %v6321_v27  ;;  %v9519_v48 = vld [vmem:[%s11353_s0] sm:$0x1] }
 0x504   :  { %v5949_v57 = vpop.f32.mrb[240].mxu0  ;;  %9339 = vmatpush3.bf16.msra.mxu1 %v11081_v55  ;;  %9340 = vmatprep.mubr.msk.bf16.mxu1 %vm9528_vm0, %v11380_v46  ;;  %v7790_v25 = vunpack.c.l.bf16 %v9519_v48 }
 0x505   :  { %v6322_v13 = vpack.c.bf16 %v5949_v57, %v5949_v57  ;;  %v9144_v11 = vpop.f32.mrb[241].mxu0  ;;  %9350 = vmatprep.subr.bf16.mxu1 %v11380_v46 }
 0x506   :  { %v5952_v15 = vpop.f32.mrb[242].mxu0 }
 0x507   :  { %v9145_v60 = vpop.f32.mrb[243].mxu0  ;;  %9335 = vmatmul.mubr.msk.bf16.vlgmr.msra.gmra.mrb[48].mxu0 %vm2870_vm4, %v6322_v13 }
 0x508   :  { %v5998_v61 = vpop.f32.mrb[240].mxu1  ;;  %9345 = vmatpush3.bf16.msra.mxu0 %v11092_v63  ;;  %9346 = vmatprep.mubr.msk.bf16.mxu0 %vm9528_vm0, %v11380_v46 }
 0x509   :  { %v6323_v56 = vpack.c.bf16 %v5998_v61, %v5998_v61  ;;  %v9150_v8 = vpop.f32.mrb[241].mxu1  ;;  %9356 = vmatprep.subr.bf16.mxu0 %v11380_v46 }
 0x50a   :  { %v6001_v45 = vpop.f32.mrb[242].mxu1 }
 0x50b   :  { %v9151_v37 = vpop.f32.mrb[243].mxu1  ;;  %9341 = vmatmul.mubr.msk.bf16.vlgmr.msra.gmra.mrb[48].mxu1 %vm2870_vm4, %v6323_v56 }
 0x50c   :  { %v6047_v40 = vpop.f32.mrb[244].mxu0  ;;  %9351 = vmatpush3.bf16.msra.mxu1 %v11103_v36  ;;  %9352 = vmatprep.mubr.msk.bf16.mxu1 %vm9528_vm0, %v11380_v46 }
 0x50d   :  { %v6324_v32 = vpack.c.bf16 %v6047_v40, %v6047_v40  ;;  %v9156_v33 = vpop.f32.mrb[245].mxu0  ;;  %9362 = vmatprep.subr.bf16.mxu1 %v11380_v46 }
 0x50e   :  { %v6050_v54 = vpop.f32.mrb[246].mxu0 }
 0x50f   :  { %v9157_v17 = vpop.f32.mrb[247].mxu0  ;;  %9347 = vmatmul.mubr.msk.bf16.vlgmr.msra.gmra.mrb[52].mxu0 %vm2870_vm4, %v6324_v32 }
 0x510   :  { %v6096_v22 = vpop.f32.mrb[244].mxu1  ;;  %9357 = vmatpush3.bf16.msra.mxu0 %v11069_v2  ;;  %9358 = vmatprep.mubr.msk.bf16.mxu0 %vm9528_vm0, %v11380_v46 }
 0x511   :  { %v6325_v23 = vpack.c.bf16 %v6096_v22, %v6096_v22  ;;  %v9162_v59 = vpop.f32.mrb[245].mxu1  ;;  %9368 = vmatprep.subr.bf16.mxu0 %v11380_v46 }
 0x512   :  { %v6099_v44 = vpop.f32.mrb[246].mxu1 }
 0x513   :  { %v9163_v52 = vpop.f32.mrb[247].mxu1  ;;  %9353 = vmatmul.mubr.msk.bf16.vlgmr.msra.gmra.mrb[52].mxu1 %vm2870_vm4, %v6325_v23 }
 0x514   :  { %v6145_v10 = vpop.f32.mrb[248].mxu0  ;;  %9363 = vmatpush3.bf16.msra.mxu1 %v11081_v55  ;;  %9364 = vmatprep.mubr.msk.bf16.mxu1 %vm9528_vm0, %v11380_v46 }
 0x515   :  { %v6326_v47 = vpack.c.bf16 %v6145_v10, %v6145_v10  ;;  %v9168_v62 = vpop.f32.mrb[249].mxu0  ;;  %9374 = vmatprep.subr.bf16.mxu1 %v11380_v46 }
 0x516   :  { %v6148_v2 = vpop.f32.mrb[250].mxu0 }
 0x517   :  { %v9169_v41 = vpop.f32.mrb[251].mxu0  ;;  %9359 = vmatmul.mubr.msk.bf16.vlgmr.msra.gmra.mrb[56].mxu0 %vm2870_vm4, %v6326_v47 }
 0x518   :  { %v6194_v0 = vpop.f32.mrb[248].mxu1  ;;  %9369 = vmatpush3.bf16.msra.mxu0 %v11092_v63  ;;  %9370 = vmatprep.mubr.msk.bf16.mxu0 %vm9528_vm0, %v11380_v46 }
 0x519   :  { %v6327_v6 = vpack.c.bf16 %v6194_v0, %v6194_v0  ;;  %v9174_v9 = vpop.f32.mrb[249].mxu1 }
 0x51a   :  { %v6197_v55 = vpop.f32.mrb[250].mxu1 }
 0x51b   :  { %v9175_v18 = vpop.f32.mrb[251].mxu1  ;;  %9365 = vmatmul.mubr.msk.bf16.vlgmr.msra.gmra.mrb[56].mxu1 %vm2870_vm4, %v6327_v6  ;;  %v9520_v6 = vld [vmem:[%s11353_s0 + $0x1] sm:$0x1] }
 0x51c   :  { %v6243_v14 = vpop.f32.mrb[252].mxu0  ;;  %9375 = vmatpush3.bf16.msra.mxu1 %v11103_v36  ;;  %9376 = vmatprep.mubr.msk.bf16.mxu1 %vm9528_vm0, %v11380_v46  ;;  %v7791_v9 = vunpack.c.l.bf16 %v9520_v6 }
 0x51d   :  { %v6328_v31 = vpack.c.bf16 %v6243_v14, %v6243_v14  ;;  %v9180_v1 = vpop.f32.mrb[253].mxu0 }
 0x51e   :  { %v6246_v53 = vpop.f32.mrb[254].mxu0 }
 0x51f   :  { %v9181_v5 = vpop.f32.mrb[255].mxu0  ;;  %9371 = vmatmul.mubr.msk.bf16.vlgmr.msra.gmra.mrb[60].mxu0 %vm2870_vm4, %v6328_v31 }
 0x520   :  { %v6292_v63 = vpop.f32.mrb[252].mxu1 }
 0x521   :  { %v6329_v21 = vpack.c.bf16 %v6292_v63, %v6292_v63  ;;  %v9186_v34 = vpop.f32.mrb[253].mxu1 }
 0x522   :  { %v6295_v30 = vpop.f32.mrb[254].mxu1 }
 0x523   :  { %v9187_v35 = vpop.f32.mrb[255].mxu1  ;;  %9377 = vmatmul.mubr.msk.bf16.vlgmr.msra.gmra.mrb[60].mxu1 %vm2870_vm4, %v6329_v21 }
 0x524   :  { %v6371_v24 = vpop.f32.mrb[0].mxu0 }
 0x525   :  { %v9192_v42 = vpop.f32.mrb[1].mxu0  ;;  %v7720_v46 = vsel %vm7719_vm9, %v6371_v24, 0.0 }
 0x526   :  { %v6374_v36 = vpop.f32.mrb[2].mxu0 }
 0x527   :  { %v9193_v7 = vpop.f32.mrb[3].mxu0 }
 0x528   :  { %v6417_v38 = vpop.f32.mrb[0].mxu1 }
 0x529   :  { %v7721_v58 = vsel %vm7719_vm9, %v6417_v38, 0.0  ;;  %v9198_v16 = vpop.f32.mrb[1].mxu1 }
 0x52a   :  { %v7722_v43 = vadd.f32 %v7721_v58, %v7720_v46  ;;  %v6420_v29 = vpop.f32.mrb[2].mxu1 }
 0x52b   :  { %v9199_v12 = vpop.f32.mrb[3].mxu1 }
 0x52c   :  { %v6463_v20 = vpop.f32.mrb[4].mxu0 }
 0x52d   :  { %v7723_v19 = vsel %vm7719_vm9, %v6463_v20, 0.0  ;;  %v9204_v50 = vpop.f32.mrb[5].mxu0 }
 0x52e   :  { %v7724_v26 = vadd.f32 %v7723_v19, %v7722_v43  ;;  %v6466_v3 = vpop.f32.mrb[6].mxu0 }
 0x52f   :  { %v9205_v39 = vpop.f32.mrb[7].mxu0 }
 0x530   :  { %v6509_v28 = vpop.f32.mrb[4].mxu1 }
 0x531   :  { %v7725_v51 = vsel %vm7719_vm9, %v6509_v28, 0.0  ;;  %v9210_v27 = vpop.f32.mrb[5].mxu1 }
 0x532   :  { %v7726_v49 = vadd.f32 %v7725_v51, %v7724_v26  ;;  %v6512_v57 = vpop.f32.mrb[6].mxu1  ;;  %v9521_v26 = vld [vmem:[%s11353_s0 + $0x2] sm:$0x1] }
 0x533   :  { %v9211_v13 = vpop.f32.mrb[7].mxu1  ;;  %v7792_v3 = vunpack.c.l.bf16 %v9521_v26 }
 0x534   :  { %v7782_v11 = vadd.f32 %v11257_v4, %v7726_v49 }
 0x536   :  { %v7798_v15 = vadd.f32 %v7790_v25, %v7782_v11 }
 0x538   :  { %v7806_v60 = vpack.c.bf16 %v7798_v15, %v7798_v15 }
 0x53a   :  { %7815 = vst.msk [vmem:[%s11360_s8] sm:$0x1] %vm7814_vm10, %v7806_v60 }
 0x55c   :  { %v6552_v61 = vpop.f32.mrb[8].mxu0 }
 0x55d   :  { %v9216_v56 = vpop.f32.mrb[9].mxu0  ;;  %v7727_v40 = vsel %vm7719_vm9, %v6552_v61, 0.0 }
 0x55e   :  { %v6555_v8 = vpop.f32.mrb[10].mxu0 }
 0x55f   :  { %v9217_v45 = vpop.f32.mrb[11].mxu0 }
 0x560   :  { %v6595_v37 = vpop.f32.mrb[8].mxu1 }
 0x561   :  { %v7728_v32 = vsel %vm7719_vm9, %v6595_v37, 0.0  ;;  %v9222_v33 = vpop.f32.mrb[9].mxu1 }
 0x562   :  { %v7729_v54 = vadd.f32 %v7728_v32, %v7727_v40  ;;  %v6598_v17 = vpop.f32.mrb[10].mxu1 }
 0x563   :  { %v9223_v22 = vpop.f32.mrb[11].mxu1 }
 0x564   :  { %v6638_v23 = vpop.f32.mrb[12].mxu0 }
 0x565   :  { %v7730_v59 = vsel %vm7719_vm9, %v6638_v23, 0.0  ;;  %v9228_v44 = vpop.f32.mrb[13].mxu0 }
 0x566   :  { %v7731_v52 = vadd.f32 %v7730_v59, %v7729_v54  ;;  %v6641_v10 = vpop.f32.mrb[14].mxu0 }
 0x567   :  { %v9229_v47 = vpop.f32.mrb[15].mxu0 }
 0x568   :  { %v6681_v62 = vpop.f32.mrb[12].mxu1 }
 0x569   :  { %v7732_v2 = vsel %vm7719_vm9, %v6681_v62, 0.0  ;;  %v9234_v41 = vpop.f32.mrb[13].mxu1 }
 0x56a   :  { %v7733_v0 = vadd.f32 %v7732_v2, %v7731_v52  ;;  %v6684_v55 = vpop.f32.mrb[14].mxu1  ;;  %v9522_v52 = vld [vmem:[%s11353_s0 + $0x3] sm:$0x1] }
 0x56b   :  { %v9235_v18 = vpop.f32.mrb[15].mxu1  ;;  %v7793_v10 = vunpack.c.l.bf16 %v9522_v52 }
 0x56c   :  { %v7783_v14 = vadd.f32 %v11257_v4, %v7733_v0  ;;  %v6724_v31 = vpop.f32.mrb[16].mxu0 }
 0x56d   :  { %v9240_v1 = vpop.f32.mrb[17].mxu0  ;;  %v7734_v30 = vsel %vm7719_vm9, %v6724_v31, 0.0 }
 0x56e   :  { %v7799_v53 = vadd.f32 %v7791_v9, %v7783_v14  ;;  %v6727_v5 = vpop.f32.mrb[18].mxu0 }
 0x56f   :  { %v9241_v63 = vpop.f32.mrb[19].mxu0 }
 0x570   :  { %v7807_v21 = vpack.c.bf16 %v7799_v53, %v7799_v53  ;;  %v6767_v34 = vpop.f32.mrb[16].mxu1 }
 0x571   :  { %v7735_v35 = vsel %vm7719_vm9, %v6767_v34, 0.0  ;;  %v9246_v24 = vpop.f32.mrb[17].mxu1 }
 0x572   :  { %7816 = vst.msk [vmem:[%s11360_s8 + $0x1] sm:$0x1] %vm7814_vm10, %v7807_v21  ;;  %v7736_v42 = vadd.f32 %v7735_v35, %v7734_v30  ;;  %v6770_v36 = vpop.f32.mrb[18].mxu1 }
 0x573   :  { %v9247_v7 = vpop.f32.mrb[19].mxu1 }
 0x574   :  { %v6810_v38 = vpop.f32.mrb[20].mxu0 }
 0x575   :  { %v7737_v46 = vsel %vm7719_vm9, %v6810_v38, 0.0  ;;  %v9252_v58 = vpop.f32.mrb[21].mxu0 }
 0x576   :  { %v7738_v16 = vadd.f32 %v7737_v46, %v7736_v42  ;;  %v6813_v43 = vpop.f32.mrb[22].mxu0 }
 0x577   :  { %v9253_v29 = vpop.f32.mrb[23].mxu0 }
 0x5a5   :  { %v6853_v12 = vpop.f32.mrb[20].mxu1 }
 0x5a6   :  { %v7739_v20 = vsel %vm7719_vm9, %v6853_v12, 0.0  ;;  %v9258_v19 = vpop.f32.mrb[21].mxu1 }
 0x5a7   :  { %v7740_v50 = vadd.f32 %v7739_v20, %v7738_v16  ;;  %v6856_v39 = vpop.f32.mrb[22].mxu1  ;;  %v9523_v16 = vld [vmem:[%s11353_s0 + $0x4] sm:$0x1] }
 0x5a8   :  { %v9259_v28 = vpop.f32.mrb[23].mxu1  ;;  %v7794_v43 = vunpack.c.l.bf16 %v9523_v16 }
 0x5a9   :  { %v7784_v51 = vadd.f32 %v11257_v4, %v7740_v50  ;;  %v6896_v27 = vpop.f32.mrb[24].mxu0 }
 0x5aa   :  { %v9264_v49 = vpop.f32.mrb[25].mxu0  ;;  %v7741_v15 = vsel %vm7719_vm9, %v6896_v27, 0.0 }
 0x5ab   :  { %v7800_v48 = vadd.f32 %v7792_v3, %v7784_v51  ;;  %v6899_v25 = vpop.f32.mrb[26].mxu0 }
 0x5ac   :  { %v9265_v57 = vpop.f32.mrb[27].mxu0 }
 0x5ad   :  { %v7808_v13 = vpack.c.bf16 %v7800_v48, %v7800_v48  ;;  %v6939_v11 = vpop.f32.mrb[24].mxu1 }
 0x5ae   :  { %v7742_v60 = vsel %vm7719_vm9, %v6939_v11, 0.0  ;;  %v9270_v61 = vpop.f32.mrb[25].mxu1 }
 0x5af   :  { %7817 = vst.msk [vmem:[%s11360_s8 + $0x2] sm:$0x1] %vm7814_vm10, %v7808_v13  ;;  %v7743_v56 = vadd.f32 %v7742_v60, %v7741_v15  ;;  %v6942_v8 = vpop.f32.mrb[26].mxu1 }
 0x5b0   :  { %v9271_v45 = vpop.f32.mrb[27].mxu1 }
 0x5b1   :  { %v6982_v37 = vpop.f32.mrb[28].mxu0 }
 0x5b2   :  { %v7744_v40 = vsel %vm7719_vm9, %v6982_v37, 0.0  ;;  %v9276_v32 = vpop.f32.mrb[29].mxu0 }
 0x5b3   :  { %v7745_v33 = vadd.f32 %v7744_v40, %v7743_v56  ;;  %v6985_v54 = vpop.f32.mrb[30].mxu0 }
 0x5b4   :  { %v9277_v17 = vpop.f32.mrb[31].mxu0 }
 0x5b5   :  { %v7025_v22 = vpop.f32.mrb[28].mxu1 }
 0x5b6   :  { %v7746_v23 = vsel %vm7719_vm9, %v7025_v22, 0.0  ;;  %v9282_v59 = vpop.f32.mrb[29].mxu1 }
 0x5b7   :  { %v7747_v44 = vadd.f32 %v7746_v23, %v7745_v33  ;;  %v7028_v47 = vpop.f32.mrb[30].mxu1  ;;  %v9524_v33 = vld [vmem:[%s11353_s0 + $0x5] sm:$0x1] }
 0x5b8   :  { %v9283_v62 = vpop.f32.mrb[31].mxu1  ;;  %v7795_v54 = vunpack.c.l.bf16 %v9524_v33 }
 0x5b9   :  { %v7785_v2 = vadd.f32 %v11257_v4, %v7747_v44  ;;  %v7068_v41 = vpop.f32.mrb[32].mxu0 }
 0x5ba   :  { %v9288_v0 = vpop.f32.mrb[33].mxu0  ;;  %v7748_v31 = vsel %vm7719_vm9, %v7068_v41, 0.0 }
 0x5bb   :  { %v7801_v6 = vadd.f32 %v7793_v10, %v7785_v2  ;;  %v7071_v9 = vpop.f32.mrb[34].mxu0 }
 0x5bc   :  { %v9289_v55 = vpop.f32.mrb[35].mxu0 }
 0x5bd   :  { %v7809_v18 = vpack.c.bf16 %v7801_v6, %v7801_v6  ;;  %v7111_v14 = vpop.f32.mrb[32].mxu1 }
 0x5be   :  { %v7749_v1 = vsel %vm7719_vm9, %v7111_v14, 0.0  ;;  %v9294_v53 = vpop.f32.mrb[33].mxu1 }
 0x5bf   :  { %7818 = vst.msk [vmem:[%s11360_s8 + $0x3] sm:$0x1] %vm7814_vm10, %v7809_v18  ;;  %v7750_v5 = vadd.f32 %v7749_v1, %v7748_v31  ;;  %v7114_v63 = vpop.f32.mrb[34].mxu1 }
 0x5c0   :  { %v9295_v21 = vpop.f32.mrb[35].mxu1 }
 0x5c2   :  { %v7154_v34 = vpop.f32.mrb[36].mxu0 }
 0x5c3   :  { %v7751_v30 = vsel %vm7719_vm9, %v7154_v34, 0.0  ;;  %v9300_v35 = vpop.f32.mrb[37].mxu0 }
 0x5c4   :  { %v7752_v24 = vadd.f32 %v7751_v30, %v7750_v5  ;;  %v7157_v42 = vpop.f32.mrb[38].mxu0 }
 0x5c5   :  { %v9301_v36 = vpop.f32.mrb[39].mxu0 }
 0x5c6   :  { %v7197_v7 = vpop.f32.mrb[36].mxu1 }
 0x5c7   :  { %v7753_v38 = vsel %vm7719_vm9, %v7197_v7, 0.0  ;;  %v9306_v46 = vpop.f32.mrb[37].mxu1 }
 0x5c8   :  { %v7754_v58 = vadd.f32 %v7753_v38, %v7752_v24  ;;  %v7200_v29 = vpop.f32.mrb[38].mxu1  ;;  %v9525_v24 = vld [vmem:[%s11353_s0 + $0x6] sm:$0x1] }
 0x5c9   :  { %v9307_v12 = vpop.f32.mrb[39].mxu1  ;;  %v7796_v42 = vunpack.c.l.bf16 %v9525_v24 }
 0x5ca   :  { %v7786_v20 = vadd.f32 %v11257_v4, %v7754_v58  ;;  %v7240_v19 = vpop.f32.mrb[40].mxu0 }
 0x5cb   :  { %v9312_v50 = vpop.f32.mrb[41].mxu0  ;;  %v7755_v27 = vsel %vm7719_vm9, %v7240_v19, 0.0 }
 0x5cc   :  { %v7802_v26 = vadd.f32 %v7794_v43, %v7786_v20  ;;  %v7243_v3 = vpop.f32.mrb[42].mxu0 }
 0x5cd   :  { %v9313_v39 = vpop.f32.mrb[43].mxu0 }
 0x5ce   :  { %v7810_v28 = vpack.c.bf16 %v7802_v26, %v7802_v26  ;;  %v7283_v51 = vpop.f32.mrb[40].mxu1 }
 0x5cf   :  { %v7756_v49 = vsel %vm7719_vm9, %v7283_v51, 0.0  ;;  %v9318_v48 = vpop.f32.mrb[41].mxu1 }
 0x5d0   :  { %7819 = vst.msk [vmem:[%s11360_s8 + $0x4] sm:$0x1] %vm7814_vm10, %v7810_v28  ;;  %v7757_v25 = vadd.f32 %v7756_v49, %v7755_v27  ;;  %v7286_v57 = vpop.f32.mrb[42].mxu1 }
 0x5d1   :  { %v9319_v13 = vpop.f32.mrb[43].mxu1 }
 0x5d2   :  { %v7326_v11 = vpop.f32.mrb[44].mxu0 }
 0x5d3   :  { %v7758_v15 = vsel %vm7719_vm9, %v7326_v11, 0.0  ;;  %v9324_v60 = vpop.f32.mrb[45].mxu0 }
 0x5d4   :  { %v7759_v61 = vadd.f32 %v7758_v15, %v7757_v25  ;;  %v7329_v56 = vpop.f32.mrb[46].mxu0 }
 0x5d5   :  { %v9325_v8 = vpop.f32.mrb[47].mxu0 }
 0x5d6   :  { %v7369_v45 = vpop.f32.mrb[44].mxu1 }
 0x5d7   :  { %v7760_v37 = vsel %vm7719_vm9, %v7369_v45, 0.0  ;;  %v9330_v40 = vpop.f32.mrb[45].mxu1 }
 0x5d8   :  { %v7761_v32 = vadd.f32 %v7760_v37, %v7759_v61  ;;  %v7372_v17 = vpop.f32.mrb[46].mxu1  ;;  %v9526_v61 = vld [vmem:[%s11353_s0 + $0x7] sm:$0x1] }
 0x5d9   :  { %v9331_v22 = vpop.f32.mrb[47].mxu1  ;;  %v7797_v56 = vunpack.c.l.bf16 %v9526_v61 }
 0x5da   :  { %v7787_v23 = vadd.f32 %v11257_v4, %v7761_v32  ;;  %v7412_v59 = vpop.f32.mrb[48].mxu0 }
 0x5db   :  { %v9336_v44 = vpop.f32.mrb[49].mxu0  ;;  %v7762_v41 = vsel %vm7719_vm9, %v7412_v59, 0.0 }
 0x5dc   :  { %v7803_v52 = vadd.f32 %v7795_v54, %v7787_v23  ;;  %v7415_v10 = vpop.f32.mrb[50].mxu0 }
 0x5dd   :  { %v9337_v47 = vpop.f32.mrb[51].mxu0 }
 0x5de   :  { %v7811_v62 = vpack.c.bf16 %v7803_v52, %v7803_v52  ;;  %v7455_v2 = vpop.f32.mrb[48].mxu1 }
 0x5df   :  { %v7763_v0 = vsel %vm7719_vm9, %v7455_v2, 0.0  ;;  %v9342_v6 = vpop.f32.mrb[49].mxu1 }
 0x5e0   :  { %7820 = vst.msk [vmem:[%s11360_s8 + $0x5] sm:$0x1] %vm7814_vm10, %v7811_v62  ;;  %v7764_v9 = vadd.f32 %v7763_v0, %v7762_v41  ;;  %v7458_v55 = vpop.f32.mrb[50].mxu1 }
 0x5e1   :  { %v9343_v18 = vpop.f32.mrb[51].mxu1 }
 0x5e2   :  { %v7498_v14 = vpop.f32.mrb[52].mxu0 }
 0x5e3   :  { %v7765_v31 = vsel %vm7719_vm9, %v7498_v14, 0.0  ;;  %v9348_v1 = vpop.f32.mrb[53].mxu0 }
 0x5e4   :  { %v7766_v53 = vadd.f32 %v7765_v31, %v7764_v9  ;;  %v7501_v5 = vpop.f32.mrb[54].mxu0 }
 0x5e5   :  { %v9349_v63 = vpop.f32.mrb[55].mxu0 }
 0x5e6   :  { %v7541_v21 = vpop.f32.mrb[52].mxu1 }
 0x5e7   :  { %v7767_v34 = vsel %vm7719_vm9, %v7541_v21, 0.0  ;;  %v9354_v30 = vpop.f32.mrb[53].mxu1 }
 0x5e8   :  { %v7768_v35 = vadd.f32 %v7767_v34, %v7766_v53  ;;  %v7544_v36 = vpop.f32.mrb[54].mxu1 }
 0x5e9   :  { %v9355_v7 = vpop.f32.mrb[55].mxu1 }
 0x5ea   :  { %v7788_v38 = vadd.f32 %v11257_v4, %v7768_v35  ;;  %v7584_v46 = vpop.f32.mrb[56].mxu0 }
 0x5eb   :  { %v9360_v58 = vpop.f32.mrb[57].mxu0  ;;  %v7769_v19 = vsel %vm7719_vm9, %v7584_v46, 0.0 }
 0x5ec   :  { %v7804_v16 = vadd.f32 %v7796_v42, %v7788_v38  ;;  %v7587_v43 = vpop.f32.mrb[58].mxu0 }
 0x5ed   :  { %v9361_v29 = vpop.f32.mrb[59].mxu0 }
 0x5ee   :  { %v7812_v12 = vpack.c.bf16 %v7804_v16, %v7804_v16  ;;  %v7627_v20 = vpop.f32.mrb[56].mxu1 }
 0x5ef   :  { %v7770_v50 = vsel %vm7719_vm9, %v7627_v20, 0.0  ;;  %v9366_v26 = vpop.f32.mrb[57].mxu1 }
 0x5f0   :  { %7821 = vst.msk [vmem:[%s11360_s8 + $0x6] sm:$0x1] %vm7814_vm10, %v7812_v12  ;;  %v7771_v3 = vadd.f32 %v7770_v50, %v7769_v19  ;;  %v7630_v39 = vpop.f32.mrb[58].mxu1 }
 0x5f1   :  { %v9367_v28 = vpop.f32.mrb[59].mxu1 }
 0x5f2   :  { %v7670_v51 = vpop.f32.mrb[60].mxu0 }
 0x5f3   :  { %v7772_v27 = vsel %vm7719_vm9, %v7670_v51, 0.0  ;;  %v9372_v49 = vpop.f32.mrb[61].mxu0 }
 0x5f4   :  { %v7773_v48 = vadd.f32 %v7772_v27, %v7771_v3  ;;  %v7673_v25 = vpop.f32.mrb[62].mxu0 }
 0x5f5   :  { %v9373_v57 = vpop.f32.mrb[63].mxu0 }
 0x5f6   :  { %v7713_v13 = vpop.f32.mrb[60].mxu1 }
 0x5f7   :  { %v7774_v11 = vsel %vm7719_vm9, %v7713_v13, 0.0  ;;  %v9378_v15 = vpop.f32.mrb[61].mxu1 }
 0x5f8   :  { %v7775_v60 = vadd.f32 %v7774_v11, %v7773_v48  ;;  %v7716_v8 = vpop.f32.mrb[62].mxu1 }
 0x5f9   :  { %v9379_v45 = vpop.f32.mrb[63].mxu1 }
 0x5fa   :  { %v7789_v37 = vadd.f32 %v11257_v4, %v7775_v60 }
 0x5fc   :  { %v7805_v40 = vadd.f32 %v7797_v56, %v7789_v37 }
 0x5fe   :  { %v7813_v32 = vpack.c.bf16 %v7805_v40, %v7805_v40 }
 0x600   :  { %7822 = vst.msk [vmem:[%s11360_s8 + $0x7] sm:$0x1] %vm7814_vm10, %v7813_v32 }

// kernel: forward.9
= control target key start
LH: loop header
LB: loop body
LE: loop exit
PB: predicated region body
PF: predicated region fallthrough
CT: control target
= control target key end

     0   :  { %v13056_v0 = vmov 0.0   ;;  %vm10788_vm0 = vmmov 0   ;;  %vm154_vm1 = vcmask 261120   ;;  %vm2911_vm2 = vcmask 64512   ;;  %s10789_s30 = smov 120   ;;  %s13032_s1 = inlined_call_operand.vmem [shape: bf16[4,32,8], index: 1, kind: input, shape index: {}]   ;;  %s13033_s0 = inlined_call_operand.vmem [shape: bf16[8,2,32], index: 0, kind: input, shape index: {}]   ;;  %s13034_s3 = inlined_call_operand.vmem [shape: bf16[4,32,16], index: 3, kind: input, shape index: {}]   ;;  %s13035_s4 = inlined_call_operand.vmem [shape: f32[4,1,16], index: 4, kind: input, shape index: {}]   ;;  %s13036_s2 = inlined_call_operand.vmem [shape: f32[4,1,8], index: 2, kind: input, shape index: {}]   ;;  %s13037_s5 = inlined_call_operand.vmem [shape: bf16[4,8,32], index: 5, kind: input, shape index: {}]   ;;  %s13038_s7 = inlined_call_operand.vmem [shape: bf16[32,256], index: 7, kind: input, shape index: {}]   ;;  %s13039_s9 = inlined_call_operand.vmem [shape: bf16[256,256], index: 9, kind: input, shape index: {}]   ;;  %s13040_s6 = inlined_call_operand.vmem [shape: f32[1,32], index: 6, kind: input, shape index: {}]   ;;  %s13041_s11 = inlined_call_operand.vmem [shape: bf16[256,128], index: 11, kind: input, shape index: {}]   ;;  %s13042_s8 = inlined_call_operand.vmem [shape: f32[1,256], index: 8, kind: input, shape index: {}]   ;;  %s13043_s13 = inlined_call_operand.vmem [shape: bf16[128,128], index: 13, kind: input, shape index: {}]   ;;  %s13044_s10 = inlined_call_operand.vmem [shape: f32[1,256], index: 10, kind: input, shape index: {}]   ;;  %s13045_s15 = inlined_call_operand.vmem [shape: bf16[128,64], index: 15, kind: input, shape index: {}]   ;;  %s13046_s12 = inlined_call_operand.vmem [shape: f32[1,128], index: 12, kind: input, shape index: {}]   ;;  %s13047_s14 = inlined_call_operand.vmem [shape: f32[1,128], index: 14, kind: input, shape index: {}]   ;;  %s13048_s17 = inlined_call_operand.vmem [shape: bf16[64,1], index: 17, kind: input, shape index: {}]   ;;  %s13049_s18 = inlined_call_operand.<no memory space> [shape: f32[1,1], index: 18, kind: input, shape index: {}]   ;;  %s13050_s16 = inlined_call_operand.vmem [shape: f32[1,64], index: 16, kind: input, shape index: {}]   ;;  %s13051_s19 = inlined_call_operand.vmem [shape: f32[2,1], index: 19, kind: output, shape index: {}]  }
   0x1   :  { %13064 = sst [smem:[#allocation14_spill]] %s13032_s1  ;;  %9395 = vmatprep.subr.bf16.mxu0 %v13056_v0  ;;  %9403 = vmatprep.subr.bf16.mxu1 %v13056_v0  ;;  %vm4776_vm3 = vcmask 1040384   ;;  %vm4384_vm4 = vcmask 9216   ;;  %vm4772_vm5 = vcmask 15360   ;;  %vm6374_vm6 = vcmask 1043456  }
   0x2   :  { %13065 = sst [smem:[#allocation15_spill]] %s13033_s0  ;;  %s13068_s20 = sld [smem:[#allocation14_spill]]  ;;  %9399 = vmatprep.mubr.msk.bf16.mxu0 %vm10788_vm0, %v13056_v0  ;;  %9407 = vmatprep.mubr.msk.bf16.mxu1 %vm10788_vm0, %v13056_v0  ;;  %vm7760_vm7 = vcmask 254976   ;;  %vm8653_vm8 = vcmask 523264   ;;  %vm8697_vm9 = vcmask 1024  }
   0x3   :  { %13066 = sst [smem:[#allocation16_spill]] %s13034_s3  ;;  %s13069_s26 = sld [smem:[#allocation15_spill]] }
   0x4   :  { %13067 = sst [smem:[#allocation17_spill]] %s13035_s4  ;;  %s13070_s3 = sld [smem:[#allocation16_spill]] }
   0x5   :  { %s13071_s24 = sld [smem:[#allocation17_spill]] }
   0x8   :  { %v10896_v1 = vld [vmem:[%s13068_s20] sm:$0xff]   ;;  %v10901_v2 = vld [vmem:[%s13068_s20 + $0x10] sm:$0xff]   ;;  %v10911_v3 = vld [vmem:[%s13068_s20 + $0x8] sm:$0xff]  }
   0x9   :  { %9396 = vmatpush3.bf16.msra.mxu0 %v10896_v1  ;;  %9404 = vmatpush3.bf16.msra.mxu1 %v10901_v2  ;;  %v10918_v4 = vld [vmem:[%s13068_s20 + $0x18] sm:$0xff]   ;;  %v10924_v5 = vld [vmem:[%s13069_s26] sm:$0x1]  ;;  %v10937_v7 = vld [vmem:[%s13068_s20 + $0x30] sm:$0xff]  }
   0xa   :  { %9397 = vmatprep.subr.bf16.mxu0 %v13056_v0  ;;  %9405 = vmatprep.subr.bf16.mxu1 %v13056_v0  ;;  %v10930_v6 = vld [vmem:[%s13068_s20 + $0x20] sm:$0xff]   ;;  %v10948_v8 = vld [vmem:[%s13068_s20 + $0x28] sm:$0xff]   ;;  %v10955_v9 = vld [vmem:[%s13068_s20 + $0x38] sm:$0xff]  }
   0xb   :  { %v10982_v10 = vld [vmem:[%s13069_s26 + $0x1] sm:$0x1]  ;;  %v11019_v11 = vld [vmem:[%s13069_s26 + $0x2] sm:$0x1]  ;;  %v11056_v12 = vld [vmem:[%s13069_s26 + $0x3] sm:$0x1] }
   0xc   :  { %v11093_v13 = vld [vmem:[%s13069_s26 + $0x4] sm:$0x1]  ;;  %v11130_v14 = vld [vmem:[%s13069_s26 + $0x5] sm:$0x1]  ;;  %v11167_v15 = vld [vmem:[%s13069_s26 + $0x6] sm:$0x1] }
   0xd   :  { %9398 = vmatpush3.bf16.msra.mxu0 %v10911_v3  ;;  %9406 = vmatpush3.bf16.msra.mxu1 %v10918_v4  ;;  %v11204_v16 = vld [vmem:[%s13069_s26 + $0x7] sm:$0x1]  ;;  %v11232_v18 = vld [vmem:[%s13070_s3 + $0x10] sm:$0xff]   ;;  %v11243_v19 = vld [vmem:[%s13070_s3 + $0x8] sm:$0xff]  }
   0xe   :  { %9411 = vmatprep.subr.bf16.mxu0 %v13056_v0  ;;  %9419 = vmatprep.subr.bf16.mxu1 %v13056_v0  ;;  %v11225_v17 = vld [vmem:[%s13070_s3] sm:$0xff]   ;;  %v11250_v20 = vld [vmem:[%s13070_s3 + $0x18] sm:$0xff]   ;;  %v11268_v22 = vld [vmem:[%s13070_s3 + $0x30] sm:$0xff]  }
   0xf   :  { %v11261_v21 = vld [vmem:[%s13070_s3 + $0x20] sm:$0xff]   ;;  %v11279_v23 = vld [vmem:[%s13070_s3 + $0x28] sm:$0xff]   ;;  %v11286_v24 = vld [vmem:[%s13070_s3 + $0x38] sm:$0xff]  }
  0x10   :  { %9400 = vmatmul.mubr.msk.bf16.vlgmr.msra.gmra.mrb[0].mxu0 %vm154_vm1, %v10924_v5  ;;  %9408 = vmatmul.mubr.msk.bf16.vlgmr.msra.gmra.mrb[0].mxu1 %vm154_vm1, %v10924_v5 }
  0x11   :  { %9412 = vmatpush3.bf16.msra.mxu0 %v10930_v6  ;;  %9420 = vmatpush3.bf16.msra.mxu1 %v10937_v7 }
  0x12   :  { %9413 = vmatprep.subr.bf16.mxu0 %v13056_v0  ;;  %9421 = vmatprep.subr.bf16.mxu1 %v13056_v0 }
  0x13   :  { %9415 = vmatprep.mubr.msk.bf16.mxu0 %vm10788_vm0, %v13056_v0  ;;  %9423 = vmatprep.mubr.msk.bf16.mxu1 %vm10788_vm0, %v13056_v0 }
  0x15   :  { %9414 = vmatpush3.bf16.msra.mxu0 %v10948_v8  ;;  %9422 = vmatpush3.bf16.msra.mxu1 %v10955_v9 }
  0x16   :  { %9427 = vmatprep.subr.bf16.mxu0 %v13056_v0  ;;  %9435 = vmatprep.subr.bf16.mxu1 %v13056_v0 }
  0x18   :  { %9416 = vmatmul.mubr.msk.bf16.vlgmr.msra.gmra.mrb[4].mxu0 %vm154_vm1, %v10924_v5  ;;  %9424 = vmatmul.mubr.msk.bf16.vlgmr.msra.gmra.mrb[4].mxu1 %vm154_vm1, %v10924_v5 }
  0x19   :  { %9428 = vmatpush3.bf16.msra.mxu0 %v10896_v1  ;;  %9436 = vmatpush3.bf16.msra.mxu1 %v10901_v2 }
  0x1a   :  { %9429 = vmatprep.subr.bf16.mxu0 %v13056_v0  ;;  %9437 = vmatprep.subr.bf16.mxu1 %v13056_v0 }
  0x1b   :  { %9431 = vmatprep.mubr.msk.bf16.mxu0 %vm10788_vm0, %v13056_v0  ;;  %9439 = vmatprep.mubr.msk.bf16.mxu1 %vm10788_vm0, %v13056_v0 }
  0x1d   :  { %9430 = vmatpush3.bf16.msra.mxu0 %v10911_v3  ;;  %9438 = vmatpush3.bf16.msra.mxu1 %v10918_v4 }
  0x1e   :  { %9443 = vmatprep.subr.bf16.mxu0 %v13056_v0  ;;  %9451 = vmatprep.subr.bf16.mxu1 %v13056_v0 }
  0x20   :  { %9432 = vmatmul.mubr.msk.bf16.vlgmr.msra.gmra.mrb[8].mxu0 %vm154_vm1, %v10982_v10  ;;  %9440 = vmatmul.mubr.msk.bf16.vlgmr.msra.gmra.mrb[8].mxu1 %vm154_vm1, %v10982_v10 }
  0x21   :  { %9444 = vmatpush3.bf16.msra.mxu0 %v10930_v6  ;;  %9452 = vmatpush3.bf16.msra.mxu1 %v10937_v7 }
  0x22   :  { %9445 = vmatprep.subr.bf16.mxu0 %v13056_v0  ;;  %9453 = vmatprep.subr.bf16.mxu1 %v13056_v0 }
  0x23   :  { %9447 = vmatprep.mubr.msk.bf16.mxu0 %vm10788_vm0, %v13056_v0  ;;  %9455 = vmatprep.mubr.msk.bf16.mxu1 %vm10788_vm0, %v13056_v0 }
  0x25   :  { %9446 = vmatpush3.bf16.msra.mxu0 %v10948_v8  ;;  %9454 = vmatpush3.bf16.msra.mxu1 %v10955_v9 }
  0x26   :  { %9459 = vmatprep.subr.bf16.mxu0 %v13056_v0  ;;  %9467 = vmatprep.subr.bf16.mxu1 %v13056_v0 }
  0x28   :  { %9448 = vmatmul.mubr.msk.bf16.vlgmr.msra.gmra.mrb[12].mxu0 %vm154_vm1, %v10982_v10  ;;  %9456 = vmatmul.mubr.msk.bf16.vlgmr.msra.gmra.mrb[12].mxu1 %vm154_vm1, %v10982_v10 }
  0x29   :  { %9460 = vmatpush3.bf16.msra.mxu0 %v10896_v1  ;;  %9468 = vmatpush3.bf16.msra.mxu1 %v10901_v2 }
  0x2a   :  { %9461 = vmatprep.subr.bf16.mxu0 %v13056_v0  ;;  %9469 = vmatprep.subr.bf16.mxu1 %v13056_v0 }
  0x2b   :  { %9463 = vmatprep.mubr.msk.bf16.mxu0 %vm10788_vm0, %v13056_v0  ;;  %9471 = vmatprep.mubr.msk.bf16.mxu1 %vm10788_vm0, %v13056_v0 }
  0x2d   :  { %9462 = vmatpush3.bf16.msra.mxu0 %v10911_v3  ;;  %9470 = vmatpush3.bf16.msra.mxu1 %v10918_v4 }
  0x2e   :  { %9475 = vmatprep.subr.bf16.mxu0 %v13056_v0  ;;  %9483 = vmatprep.subr.bf16.mxu1 %v13056_v0 }
  0x30   :  { %9464 = vmatmul.mubr.msk.bf16.vlgmr.msra.gmra.mrb[16].mxu0 %vm154_vm1, %v11019_v11  ;;  %9472 = vmatmul.mubr.msk.bf16.vlgmr.msra.gmra.mrb[16].mxu1 %vm154_vm1, %v11019_v11 }
  0x31   :  { %9476 = vmatpush3.bf16.msra.mxu0 %v10930_v6  ;;  %9484 = vmatpush3.bf16.msra.mxu1 %v10937_v7 }
  0x32   :  { %9477 = vmatprep.subr.bf16.mxu0 %v13056_v0  ;;  %9485 = vmatprep.subr.bf16.mxu1 %v13056_v0 }
  0x33   :  { %9479 = vmatprep.mubr.msk.bf16.mxu0 %vm10788_vm0, %v13056_v0  ;;  %9487 = vmatprep.mubr.msk.bf16.mxu1 %vm10788_vm0, %v13056_v0 }
  0x35   :  { %9478 = vmatpush3.bf16.msra.mxu0 %v10948_v8  ;;  %9486 = vmatpush3.bf16.msra.mxu1 %v10955_v9 }
  0x36   :  { %9491 = vmatprep.subr.bf16.mxu0 %v13056_v0  ;;  %9499 = vmatprep.subr.bf16.mxu1 %v13056_v0 }
  0x38   :  { %9480 = vmatmul.mubr.msk.bf16.vlgmr.msra.gmra.mrb[20].mxu0 %vm154_vm1, %v11019_v11  ;;  %9488 = vmatmul.mubr.msk.bf16.vlgmr.msra.gmra.mrb[20].mxu1 %vm154_vm1, %v11019_v11 }
  0x39   :  { %9492 = vmatpush3.bf16.msra.mxu0 %v10896_v1  ;;  %9500 = vmatpush3.bf16.msra.mxu1 %v10901_v2 }
  0x3a   :  { %9493 = vmatprep.subr.bf16.mxu0 %v13056_v0  ;;  %9501 = vmatprep.subr.bf16.mxu1 %v13056_v0 }
  0x3b   :  { %9495 = vmatprep.mubr.msk.bf16.mxu0 %vm10788_vm0, %v13056_v0  ;;  %9503 = vmatprep.mubr.msk.bf16.mxu1 %vm10788_vm0, %v13056_v0 }
  0x3d   :  { %9494 = vmatpush3.bf16.msra.mxu0 %v10911_v3  ;;  %9502 = vmatpush3.bf16.msra.mxu1 %v10918_v4 }
  0x3e   :  { %9507 = vmatprep.subr.bf16.mxu0 %v13056_v0  ;;  %9515 = vmatprep.subr.bf16.mxu1 %v13056_v0 }
  0x40   :  { %9496 = vmatmul.mubr.msk.bf16.vlgmr.msra.gmra.mrb[24].mxu0 %vm154_vm1, %v11056_v12  ;;  %9504 = vmatmul.mubr.msk.bf16.vlgmr.msra.gmra.mrb[24].mxu1 %vm154_vm1, %v11056_v12 }
  0x41   :  { %9508 = vmatpush3.bf16.msra.mxu0 %v10930_v6  ;;  %9516 = vmatpush3.bf16.msra.mxu1 %v10937_v7 }
  0x42   :  { %9509 = vmatprep.subr.bf16.mxu0 %v13056_v0  ;;  %9517 = vmatprep.subr.bf16.mxu1 %v13056_v0 }
  0x43   :  { %9511 = vmatprep.mubr.msk.bf16.mxu0 %vm10788_vm0, %v13056_v0  ;;  %9519 = vmatprep.mubr.msk.bf16.mxu1 %vm10788_vm0, %v13056_v0 }
  0x45   :  { %9510 = vmatpush3.bf16.msra.mxu0 %v10948_v8  ;;  %9518 = vmatpush3.bf16.msra.mxu1 %v10955_v9 }
  0x46   :  { %9523 = vmatprep.subr.bf16.mxu0 %v13056_v0  ;;  %9531 = vmatprep.subr.bf16.mxu1 %v13056_v0 }
  0x48   :  { %9512 = vmatmul.mubr.msk.bf16.vlgmr.msra.gmra.mrb[28].mxu0 %vm154_vm1, %v11056_v12  ;;  %9520 = vmatmul.mubr.msk.bf16.vlgmr.msra.gmra.mrb[28].mxu1 %vm154_vm1, %v11056_v12 }
  0x49   :  { %9524 = vmatpush3.bf16.msra.mxu0 %v10896_v1  ;;  %9532 = vmatpush3.bf16.msra.mxu1 %v10901_v2 }
  0x4a   :  { %9525 = vmatprep.subr.bf16.mxu0 %v13056_v0  ;;  %9533 = vmatprep.subr.bf16.mxu1 %v13056_v0 }
  0x4b   :  { %9527 = vmatprep.mubr.msk.bf16.mxu0 %vm10788_vm0, %v13056_v0  ;;  %9535 = vmatprep.mubr.msk.bf16.mxu1 %vm10788_vm0, %v13056_v0 }
  0x4d   :  { %9526 = vmatpush3.bf16.msra.mxu0 %v10911_v3  ;;  %9534 = vmatpush3.bf16.msra.mxu1 %v10918_v4 }
  0x4e   :  { %9539 = vmatprep.subr.bf16.mxu0 %v13056_v0  ;;  %9547 = vmatprep.subr.bf16.mxu1 %v13056_v0 }
  0x50   :  { %9528 = vmatmul.mubr.msk.bf16.vlgmr.msra.gmra.mrb[32].mxu0 %vm154_vm1, %v11093_v13  ;;  %9536 = vmatmul.mubr.msk.bf16.vlgmr.msra.gmra.mrb[32].mxu1 %vm154_vm1, %v11093_v13 }
  0x51   :  { %9540 = vmatpush3.bf16.msra.mxu0 %v10930_v6  ;;  %9548 = vmatpush3.bf16.msra.mxu1 %v10937_v7 }
  0x52   :  { %9541 = vmatprep.subr.bf16.mxu0 %v13056_v0  ;;  %9549 = vmatprep.subr.bf16.mxu1 %v13056_v0 }
  0x53   :  { %9543 = vmatprep.mubr.msk.bf16.mxu0 %vm10788_vm0, %v13056_v0  ;;  %9551 = vmatprep.mubr.msk.bf16.mxu1 %vm10788_vm0, %v13056_v0 }
  0x55   :  { %9542 = vmatpush3.bf16.msra.mxu0 %v10948_v8  ;;  %9550 = vmatpush3.bf16.msra.mxu1 %v10955_v9 }
  0x56   :  { %9555 = vmatprep.subr.bf16.mxu0 %v13056_v0  ;;  %9563 = vmatprep.subr.bf16.mxu1 %v13056_v0 }
  0x58   :  { %9544 = vmatmul.mubr.msk.bf16.vlgmr.msra.gmra.mrb[36].mxu0 %vm154_vm1, %v11093_v13  ;;  %9552 = vmatmul.mubr.msk.bf16.vlgmr.msra.gmra.mrb[36].mxu1 %vm154_vm1, %v11093_v13 }
  0x59   :  { %9556 = vmatpush3.bf16.msra.mxu0 %v10896_v1  ;;  %9564 = vmatpush3.bf16.msra.mxu1 %v10901_v2 }
  0x5a   :  { %9557 = vmatprep.subr.bf16.mxu0 %v13056_v0  ;;  %9565 = vmatprep.subr.bf16.mxu1 %v13056_v0 }
  0x5b   :  { %9559 = vmatprep.mubr.msk.bf16.mxu0 %vm10788_vm0, %v13056_v0  ;;  %9567 = vmatprep.mubr.msk.bf16.mxu1 %vm10788_vm0, %v13056_v0 }
  0x5d   :  { %9558 = vmatpush3.bf16.msra.mxu0 %v10911_v3  ;;  %9566 = vmatpush3.bf16.msra.mxu1 %v10918_v4 }
  0x5e   :  { %9571 = vmatprep.subr.bf16.mxu0 %v13056_v0  ;;  %9579 = vmatprep.subr.bf16.mxu1 %v13056_v0 }
  0x60   :  { %9560 = vmatmul.mubr.msk.bf16.vlgmr.msra.gmra.mrb[40].mxu0 %vm154_vm1, %v11130_v14  ;;  %9568 = vmatmul.mubr.msk.bf16.vlgmr.msra.gmra.mrb[40].mxu1 %vm154_vm1, %v11130_v14 }
  0x61   :  { %9572 = vmatpush3.bf16.msra.mxu0 %v10930_v6  ;;  %9580 = vmatpush3.bf16.msra.mxu1 %v10937_v7 }
  0x62   :  { %9573 = vmatprep.subr.bf16.mxu0 %v13056_v0  ;;  %9581 = vmatprep.subr.bf16.mxu1 %v13056_v0 }
  0x63   :  { %9575 = vmatprep.mubr.msk.bf16.mxu0 %vm10788_vm0, %v13056_v0  ;;  %9583 = vmatprep.mubr.msk.bf16.mxu1 %vm10788_vm0, %v13056_v0 }
  0x65   :  { %9574 = vmatpush3.bf16.msra.mxu0 %v10948_v8  ;;  %9582 = vmatpush3.bf16.msra.mxu1 %v10955_v9 }
  0x66   :  { %9587 = vmatprep.subr.bf16.mxu0 %v13056_v0  ;;  %9595 = vmatprep.subr.bf16.mxu1 %v13056_v0 }
  0x68   :  { %9576 = vmatmul.mubr.msk.bf16.vlgmr.msra.gmra.mrb[44].mxu0 %vm154_vm1, %v11130_v14  ;;  %9584 = vmatmul.mubr.msk.bf16.vlgmr.msra.gmra.mrb[44].mxu1 %vm154_vm1, %v11130_v14 }
  0x69   :  { %9588 = vmatpush3.bf16.msra.mxu0 %v10896_v1  ;;  %9596 = vmatpush3.bf16.msra.mxu1 %v10901_v2 }
  0x6a   :  { %9589 = vmatprep.subr.bf16.mxu0 %v13056_v0  ;;  %9597 = vmatprep.subr.bf16.mxu1 %v13056_v0 }
  0x6b   :  { %9591 = vmatprep.mubr.msk.bf16.mxu0 %vm10788_vm0, %v13056_v0  ;;  %9599 = vmatprep.mubr.msk.bf16.mxu1 %vm10788_vm0, %v13056_v0 }
  0x6d   :  { %9590 = vmatpush3.bf16.msra.mxu0 %v10911_v3  ;;  %9598 = vmatpush3.bf16.msra.mxu1 %v10918_v4 }
  0x6e   :  { %9603 = vmatprep.subr.bf16.mxu0 %v13056_v0  ;;  %9611 = vmatprep.subr.bf16.mxu1 %v13056_v0 }
  0x70   :  { %9592 = vmatmul.mubr.msk.bf16.vlgmr.msra.gmra.mrb[48].mxu0 %vm154_vm1, %v11167_v15  ;;  %9600 = vmatmul.mubr.msk.bf16.vlgmr.msra.gmra.mrb[48].mxu1 %vm154_vm1, %v11167_v15 }
  0x71   :  { %9604 = vmatpush3.bf16.msra.mxu0 %v10930_v6  ;;  %9612 = vmatpush3.bf16.msra.mxu1 %v10937_v7 }
  0x72   :  { %9605 = vmatprep.subr.bf16.mxu0 %v13056_v0  ;;  %9613 = vmatprep.subr.bf16.mxu1 %v13056_v0 }
  0x73   :  { %9607 = vmatprep.mubr.msk.bf16.mxu0 %vm10788_vm0, %v13056_v0  ;;  %9615 = vmatprep.mubr.msk.bf16.mxu1 %vm10788_vm0, %v13056_v0 }
  0x75   :  { %9606 = vmatpush3.bf16.msra.mxu0 %v10948_v8  ;;  %9614 = vmatpush3.bf16.msra.mxu1 %v10955_v9 }
  0x76   :  { %9619 = vmatprep.subr.bf16.mxu0 %v13056_v0  ;;  %9627 = vmatprep.subr.bf16.mxu1 %v13056_v0 }
  0x78   :  { %9608 = vmatmul.mubr.msk.bf16.vlgmr.msra.gmra.mrb[52].mxu0 %vm154_vm1, %v11167_v15  ;;  %9616 = vmatmul.mubr.msk.bf16.vlgmr.msra.gmra.mrb[52].mxu1 %vm154_vm1, %v11167_v15 }
  0x79   :  { %9620 = vmatpush3.bf16.msra.mxu0 %v10896_v1  ;;  %9628 = vmatpush3.bf16.msra.mxu1 %v10901_v2 }
  0x7a   :  { %9621 = vmatprep.subr.bf16.mxu0 %v13056_v0  ;;  %9629 = vmatprep.subr.bf16.mxu1 %v13056_v0 }
  0x7b   :  { %9623 = vmatprep.mubr.msk.bf16.mxu0 %vm10788_vm0, %v13056_v0  ;;  %9631 = vmatprep.mubr.msk.bf16.mxu1 %vm10788_vm0, %v13056_v0 }
  0x7d   :  { %9622 = vmatpush3.bf16.msra.mxu0 %v10911_v3  ;;  %9630 = vmatpush3.bf16.msra.mxu1 %v10918_v4 }
  0x7e   :  { %9635 = vmatprep.subr.bf16.mxu0 %v13056_v0  ;;  %9643 = vmatprep.subr.bf16.mxu1 %v13056_v0 }
  0x80   :  { %9624 = vmatmul.mubr.msk.bf16.vlgmr.msra.gmra.mrb[56].mxu0 %vm154_vm1, %v11204_v16  ;;  %9632 = vmatmul.mubr.msk.bf16.vlgmr.msra.gmra.mrb[56].mxu1 %vm154_vm1, %v11204_v16 }
  0x81   :  { %9636 = vmatpush3.bf16.msra.mxu0 %v10930_v6  ;;  %9644 = vmatpush3.bf16.msra.mxu1 %v10937_v7 }
  0x82   :  { %9637 = vmatprep.subr.bf16.mxu0 %v13056_v0  ;;  %9645 = vmatprep.subr.bf16.mxu1 %v13056_v0 }
  0x83   :  { %9639 = vmatprep.mubr.msk.bf16.mxu0 %vm10788_vm0, %v13056_v0  ;;  %9647 = vmatprep.mubr.msk.bf16.mxu1 %vm10788_vm0, %v13056_v0 }
  0x85   :  { %9638 = vmatpush3.bf16.msra.mxu0 %v10948_v8  ;;  %9646 = vmatpush3.bf16.msra.mxu1 %v10955_v9 }
  0x86   :  { %9651 = vmatprep.subr.bf16.mxu0 %v13056_v0  ;;  %9659 = vmatprep.subr.bf16.mxu1 %v13056_v0 }
  0x88   :  { %9640 = vmatmul.mubr.msk.bf16.vlgmr.msra.gmra.mrb[60].mxu0 %vm154_vm1, %v11204_v16  ;;  %9648 = vmatmul.mubr.msk.bf16.vlgmr.msra.gmra.mrb[60].mxu1 %vm154_vm1, %v11204_v16 }
  0x89   :  { %9652 = vmatpush3.bf16.msra.mxu0 %v11225_v17  ;;  %9660 = vmatpush3.bf16.msra.mxu1 %v11232_v18 }
  0x8a   :  { %9653 = vmatprep.subr.bf16.mxu0 %v13056_v0  ;;  %9661 = vmatprep.subr.bf16.mxu1 %v13056_v0 }
  0x8b   :  { %9655 = vmatprep.mubr.msk.bf16.mxu0 %vm10788_vm0, %v13056_v0  ;;  %9663 = vmatprep.mubr.msk.bf16.mxu1 %vm10788_vm0, %v13056_v0 }
  0x8d   :  { %9654 = vmatpush3.bf16.msra.mxu0 %v11243_v19  ;;  %9662 = vmatpush3.bf16.msra.mxu1 %v11250_v20 }
  0x8e   :  { %9667 = vmatprep.subr.bf16.mxu0 %v13056_v0  ;;  %9675 = vmatprep.subr.bf16.mxu1 %v13056_v0 }
  0x90   :  { %9656 = vmatmul.mubr.msk.bf16.vlgmr.msra.gmra.mrb[64].mxu0 %vm154_vm1, %v10924_v5  ;;  %9664 = vmatmul.mubr.msk.bf16.vlgmr.msra.gmra.mrb[64].mxu1 %vm154_vm1, %v10924_v5 }
  0x91   :  { %9668 = vmatpush3.bf16.msra.mxu0 %v11261_v21  ;;  %9676 = vmatpush3.bf16.msra.mxu1 %v11268_v22 }
  0x92   :  { %9669 = vmatprep.subr.bf16.mxu0 %v13056_v0  ;;  %9677 = vmatprep.subr.bf16.mxu1 %v13056_v0 }
  0x93   :  { %9671 = vmatprep.mubr.msk.bf16.mxu0 %vm10788_vm0, %v13056_v0  ;;  %9679 = vmatprep.mubr.msk.bf16.mxu1 %vm10788_vm0, %v13056_v0 }
  0x95   :  { %9670 = vmatpush3.bf16.msra.mxu0 %v11279_v23  ;;  %9678 = vmatpush3.bf16.msra.mxu1 %v11286_v24 }
  0x96   :  { %9683 = vmatprep.subr.bf16.mxu0 %v13056_v0  ;;  %9691 = vmatprep.subr.bf16.mxu1 %v13056_v0 }
  0x98   :  { %9672 = vmatmul.mubr.msk.bf16.vlgmr.msra.gmra.mrb[68].mxu0 %vm154_vm1, %v10924_v5  ;;  %9680 = vmatmul.mubr.msk.bf16.vlgmr.msra.gmra.mrb[68].mxu1 %vm154_vm1, %v10924_v5 }
  0x99   :  { %9684 = vmatpush3.bf16.msra.mxu0 %v11225_v17  ;;  %9692 = vmatpush3.bf16.msra.mxu1 %v11232_v18 }
  0x9a   :  { %9685 = vmatprep.subr.bf16.mxu0 %v13056_v0  ;;  %9693 = vmatprep.subr.bf16.mxu1 %v13056_v0 }
  0x9b   :  { %9687 = vmatprep.mubr.msk.bf16.mxu0 %vm10788_vm0, %v13056_v0  ;;  %9695 = vmatprep.mubr.msk.bf16.mxu1 %vm10788_vm0, %v13056_v0 }
  0x9d   :  { %9686 = vmatpush3.bf16.msra.mxu0 %v11243_v19  ;;  %9694 = vmatpush3.bf16.msra.mxu1 %v11250_v20 }
  0x9e   :  { %9699 = vmatprep.subr.bf16.mxu0 %v13056_v0  ;;  %9707 = vmatprep.subr.bf16.mxu1 %v13056_v0 }
  0xa0   :  { %9688 = vmatmul.mubr.msk.bf16.vlgmr.msra.gmra.mrb[72].mxu0 %vm154_vm1, %v10982_v10  ;;  %9696 = vmatmul.mubr.msk.bf16.vlgmr.msra.gmra.mrb[72].mxu1 %vm154_vm1, %v10982_v10 }
  0xa1   :  { %9700 = vmatpush3.bf16.msra.mxu0 %v11261_v21  ;;  %9708 = vmatpush3.bf16.msra.mxu1 %v11268_v22 }
  0xa2   :  { %9701 = vmatprep.subr.bf16.mxu0 %v13056_v0  ;;  %9709 = vmatprep.subr.bf16.mxu1 %v13056_v0 }
  0xa3   :  { %9703 = vmatprep.mubr.msk.bf16.mxu0 %vm10788_vm0, %v13056_v0  ;;  %9711 = vmatprep.mubr.msk.bf16.mxu1 %vm10788_vm0, %v13056_v0 }
  0xa5   :  { %9702 = vmatpush3.bf16.msra.mxu0 %v11279_v23  ;;  %9710 = vmatpush3.bf16.msra.mxu1 %v11286_v24 }
  0xa6   :  { %9715 = vmatprep.subr.bf16.mxu0 %v13056_v0  ;;  %9723 = vmatprep.subr.bf16.mxu1 %v13056_v0 }
  0xa8   :  { %9704 = vmatmul.mubr.msk.bf16.vlgmr.msra.gmra.mrb[76].mxu0 %vm154_vm1, %v10982_v10  ;;  %9712 = vmatmul.mubr.msk.bf16.vlgmr.msra.gmra.mrb[76].mxu1 %vm154_vm1, %v10982_v10 }
  0xa9   :  { %9716 = vmatpush3.bf16.msra.mxu0 %v11225_v17  ;;  %9724 = vmatpush3.bf16.msra.mxu1 %v11232_v18 }
  0xaa   :  { %9717 = vmatprep.subr.bf16.mxu0 %v13056_v0  ;;  %9725 = vmatprep.subr.bf16.mxu1 %v13056_v0 }
  0xab   :  { %9719 = vmatprep.mubr.msk.bf16.mxu0 %vm10788_vm0, %v13056_v0  ;;  %9727 = vmatprep.mubr.msk.bf16.mxu1 %vm10788_vm0, %v13056_v0 }
  0xad   :  { %9718 = vmatpush3.bf16.msra.mxu0 %v11243_v19  ;;  %9726 = vmatpush3.bf16.msra.mxu1 %v11250_v20 }
  0xae   :  { %9731 = vmatprep.subr.bf16.mxu0 %v13056_v0  ;;  %9739 = vmatprep.subr.bf16.mxu1 %v13056_v0 }
  0xb0   :  { %9720 = vmatmul.mubr.msk.bf16.vlgmr.msra.gmra.mrb[80].mxu0 %vm154_vm1, %v11019_v11  ;;  %9728 = vmatmul.mubr.msk.bf16.vlgmr.msra.gmra.mrb[80].mxu1 %vm154_vm1, %v11019_v11 }
  0xb1   :  { %9732 = vmatpush3.bf16.msra.mxu0 %v11261_v21  ;;  %9740 = vmatpush3.bf16.msra.mxu1 %v11268_v22 }
  0xb2   :  { %9733 = vmatprep.subr.bf16.mxu0 %v13056_v0  ;;  %9741 = vmatprep.subr.bf16.mxu1 %v13056_v0 }
  0xb3   :  { %9735 = vmatprep.mubr.msk.bf16.mxu0 %vm10788_vm0, %v13056_v0  ;;  %9743 = vmatprep.mubr.msk.bf16.mxu1 %vm10788_vm0, %v13056_v0 }
  0xb5   :  { %9734 = vmatpush3.bf16.msra.mxu0 %v11279_v23  ;;  %9742 = vmatpush3.bf16.msra.mxu1 %v11286_v24 }
  0xb6   :  { %9747 = vmatprep.subr.bf16.mxu0 %v13056_v0  ;;  %9755 = vmatprep.subr.bf16.mxu1 %v13056_v0 }
  0xb8   :  { %9736 = vmatmul.mubr.msk.bf16.vlgmr.msra.gmra.mrb[84].mxu0 %vm154_vm1, %v11019_v11  ;;  %9744 = vmatmul.mubr.msk.bf16.vlgmr.msra.gmra.mrb[84].mxu1 %vm154_vm1, %v11019_v11 }
  0xb9   :  { %9748 = vmatpush3.bf16.msra.mxu0 %v11225_v17  ;;  %9756 = vmatpush3.bf16.msra.mxu1 %v11232_v18 }
  0xba   :  { %9749 = vmatprep.subr.bf16.mxu0 %v13056_v0  ;;  %9757 = vmatprep.subr.bf16.mxu1 %v13056_v0 }
  0xbb   :  { %9751 = vmatprep.mubr.msk.bf16.mxu0 %vm10788_vm0, %v13056_v0  ;;  %9759 = vmatprep.mubr.msk.bf16.mxu1 %vm10788_vm0, %v13056_v0 }
  0xbd   :  { %9750 = vmatpush3.bf16.msra.mxu0 %v11243_v19  ;;  %9758 = vmatpush3.bf16.msra.mxu1 %v11250_v20 }
  0xbe   :  { %9763 = vmatprep.subr.bf16.mxu0 %v13056_v0  ;;  %9771 = vmatprep.subr.bf16.mxu1 %v13056_v0 }
  0xc0   :  { %9752 = vmatmul.mubr.msk.bf16.vlgmr.msra.gmra.mrb[88].mxu0 %vm154_vm1, %v11056_v12  ;;  %9760 = vmatmul.mubr.msk.bf16.vlgmr.msra.gmra.mrb[88].mxu1 %vm154_vm1, %v11056_v12 }
  0xc1   :  { %9764 = vmatpush3.bf16.msra.mxu0 %v11261_v21  ;;  %9772 = vmatpush3.bf16.msra.mxu1 %v11268_v22 }
  0xc2   :  { %9765 = vmatprep.subr.bf16.mxu0 %v13056_v0  ;;  %9773 = vmatprep.subr.bf16.mxu1 %v13056_v0 }
  0xc3   :  { %9767 = vmatprep.mubr.msk.bf16.mxu0 %vm10788_vm0, %v13056_v0  ;;  %9775 = vmatprep.mubr.msk.bf16.mxu1 %vm10788_vm0, %v13056_v0 }
  0xc5   :  { %9766 = vmatpush3.bf16.msra.mxu0 %v11279_v23  ;;  %9774 = vmatpush3.bf16.msra.mxu1 %v11286_v24 }
  0xc6   :  { %9779 = vmatprep.subr.bf16.mxu0 %v13056_v0  ;;  %9787 = vmatprep.subr.bf16.mxu1 %v13056_v0 }
  0xc8   :  { %9768 = vmatmul.mubr.msk.bf16.vlgmr.msra.gmra.mrb[92].mxu0 %vm154_vm1, %v11056_v12  ;;  %9776 = vmatmul.mubr.msk.bf16.vlgmr.msra.gmra.mrb[92].mxu1 %vm154_vm1, %v11056_v12 }
  0xc9   :  { %9780 = vmatpush3.bf16.msra.mxu0 %v11225_v17  ;;  %9788 = vmatpush3.bf16.msra.mxu1 %v11232_v18 }
  0xca   :  { %9781 = vmatprep.subr.bf16.mxu0 %v13056_v0  ;;  %9789 = vmatprep.subr.bf16.mxu1 %v13056_v0 }
  0xcb   :  { %9783 = vmatprep.mubr.msk.bf16.mxu0 %vm10788_vm0, %v13056_v0  ;;  %9791 = vmatprep.mubr.msk.bf16.mxu1 %vm10788_vm0, %v13056_v0 }
  0xcd   :  { %9782 = vmatpush3.bf16.msra.mxu0 %v11243_v19  ;;  %9790 = vmatpush3.bf16.msra.mxu1 %v11250_v20 }
  0xce   :  { %9795 = vmatprep.subr.bf16.mxu0 %v13056_v0  ;;  %9803 = vmatprep.subr.bf16.mxu1 %v13056_v0 }
  0xd0   :  { %9784 = vmatmul.mubr.msk.bf16.vlgmr.msra.gmra.mrb[96].mxu0 %vm154_vm1, %v11093_v13  ;;  %9792 = vmatmul.mubr.msk.bf16.vlgmr.msra.gmra.mrb[96].mxu1 %vm154_vm1, %v11093_v13 }
  0xd1   :  { %9796 = vmatpush3.bf16.msra.mxu0 %v11261_v21  ;;  %9804 = vmatpush3.bf16.msra.mxu1 %v11268_v22 }
  0xd2   :  { %9797 = vmatprep.subr.bf16.mxu0 %v13056_v0  ;;  %9805 = vmatprep.subr.bf16.mxu1 %v13056_v0 }
  0xd3   :  { %9799 = vmatprep.mubr.msk.bf16.mxu0 %vm10788_vm0, %v13056_v0  ;;  %9807 = vmatprep.mubr.msk.bf16.mxu1 %vm10788_vm0, %v13056_v0 }
  0xd5   :  { %9798 = vmatpush3.bf16.msra.mxu0 %v11279_v23  ;;  %9806 = vmatpush3.bf16.msra.mxu1 %v11286_v24 }
  0xd6   :  { %9811 = vmatprep.subr.bf16.mxu0 %v13056_v0  ;;  %9819 = vmatprep.subr.bf16.mxu1 %v13056_v0 }
  0xd8   :  { %9800 = vmatmul.mubr.msk.bf16.vlgmr.msra.gmra.mrb[100].mxu0 %vm154_vm1, %v11093_v13  ;;  %9808 = vmatmul.mubr.msk.bf16.vlgmr.msra.gmra.mrb[100].mxu1 %vm154_vm1, %v11093_v13 }
  0xd9   :  { %9812 = vmatpush3.bf16.msra.mxu0 %v11225_v17  ;;  %9820 = vmatpush3.bf16.msra.mxu1 %v11232_v18 }
  0xda   :  { %9813 = vmatprep.subr.bf16.mxu0 %v13056_v0  ;;  %9821 = vmatprep.subr.bf16.mxu1 %v13056_v0 }
  0xdb   :  { %9815 = vmatprep.mubr.msk.bf16.mxu0 %vm10788_vm0, %v13056_v0  ;;  %9823 = vmatprep.mubr.msk.bf16.mxu1 %vm10788_vm0, %v13056_v0 }
  0xdd   :  { %9814 = vmatpush3.bf16.msra.mxu0 %v11243_v19  ;;  %9822 = vmatpush3.bf16.msra.mxu1 %v11250_v20 }
  0xde   :  { %9827 = vmatprep.subr.bf16.mxu0 %v13056_v0  ;;  %9835 = vmatprep.subr.bf16.mxu1 %v13056_v0 }
  0xe0   :  { %9816 = vmatmul.mubr.msk.bf16.vlgmr.msra.gmra.mrb[104].mxu0 %vm154_vm1, %v11130_v14  ;;  %9824 = vmatmul.mubr.msk.bf16.vlgmr.msra.gmra.mrb[104].mxu1 %vm154_vm1, %v11130_v14 }
  0xe1   :  { %9828 = vmatpush3.bf16.msra.mxu0 %v11261_v21  ;;  %9836 = vmatpush3.bf16.msra.mxu1 %v11268_v22 }
  0xe2   :  { %9829 = vmatprep.subr.bf16.mxu0 %v13056_v0  ;;  %9837 = vmatprep.subr.bf16.mxu1 %v13056_v0 }
  0xe3   :  { %v11448_v25 = vpop.f32.mrb[0].mxu0  ;;  %9831 = vmatprep.mubr.msk.bf16.mxu0 %vm10788_vm0, %v13056_v0  ;;  %v11453_v27 = vpop.f32.mrb[0].mxu1  ;;  %9839 = vmatprep.mubr.msk.bf16.mxu1 %vm10788_vm0, %v13056_v0 }
  0xe4   :  { %v9401_v26 = vpop.f32.mrb[1].mxu0  ;;  %v9409_v29 = vpop.f32.mrb[1].mxu1 }
  0xe5   :  { %v195_v28 = vpop.f32.mrb[2].mxu0  ;;  %9830 = vmatpush3.bf16.msra.mxu0 %v11279_v23  ;;  %9838 = vmatpush3.bf16.msra.mxu1 %v11286_v24  ;;  %v247_v31 = vpop.f32.mrb[2].mxu1 }
  0xe6   :  { %v9402_v30 = vpop.f32.mrb[3].mxu0  ;;  %9843 = vmatprep.subr.bf16.mxu0 %v13056_v0  ;;  %v9410_v32 = vpop.f32.mrb[3].mxu1  ;;  %9851 = vmatprep.subr.bf16.mxu1 %v13056_v0 }
  0xe8   :  { %9832 = vmatmul.mubr.msk.bf16.vlgmr.msra.gmra.mrb[108].mxu0 %vm154_vm1, %v11130_v14  ;;  %9840 = vmatmul.mubr.msk.bf16.vlgmr.msra.gmra.mrb[108].mxu1 %vm154_vm1, %v11130_v14 }
  0xe9   :  { %9844 = vmatpush3.bf16.msra.mxu0 %v11225_v17  ;;  %9852 = vmatpush3.bf16.msra.mxu1 %v11232_v18 }
  0xea   :  { %9845 = vmatprep.subr.bf16.mxu0 %v13056_v0  ;;  %9853 = vmatprep.subr.bf16.mxu1 %v13056_v0 }
  0xeb   :  { %v11468_v33 = vpop.f32.mrb[4].mxu0  ;;  %9847 = vmatprep.mubr.msk.bf16.mxu0 %vm10788_vm0, %v13056_v0  ;;  %v11473_v35 = vpop.f32.mrb[4].mxu1  ;;  %9855 = vmatprep.mubr.msk.bf16.mxu1 %vm10788_vm0, %v13056_v0 }
  0xec   :  { %v9417_v34 = vpop.f32.mrb[5].mxu0  ;;  %v9425_v37 = vpop.f32.mrb[5].mxu1 }
  0xed   :  { %v299_v36 = vpop.f32.mrb[6].mxu0  ;;  %9846 = vmatpush3.bf16.msra.mxu0 %v11243_v19  ;;  %9854 = vmatpush3.bf16.msra.mxu1 %v11250_v20  ;;  %v351_v39 = vpop.f32.mrb[6].mxu1 }
  0xee   :  { %v9418_v38 = vpop.f32.mrb[7].mxu0  ;;  %9859 = vmatprep.subr.bf16.mxu0 %v13056_v0  ;;  %v9426_v40 = vpop.f32.mrb[7].mxu1  ;;  %9867 = vmatprep.subr.bf16.mxu1 %v13056_v0 }
  0xf0   :  { %9848 = vmatmul.mubr.msk.bf16.vlgmr.msra.gmra.mrb[112].mxu0 %vm154_vm1, %v11167_v15  ;;  %9856 = vmatmul.mubr.msk.bf16.vlgmr.msra.gmra.mrb[112].mxu1 %vm154_vm1, %v11167_v15 }
  0xf1   :  { %9860 = vmatpush3.bf16.msra.mxu0 %v11261_v21  ;;  %9868 = vmatpush3.bf16.msra.mxu1 %v11268_v22 }
  0xf2   :  { %9861 = vmatprep.subr.bf16.mxu0 %v13056_v0  ;;  %9869 = vmatprep.subr.bf16.mxu1 %v13056_v0 }
  0xf3   :  { %v11488_v41 = vpop.f32.mrb[8].mxu0  ;;  %9863 = vmatprep.mubr.msk.bf16.mxu0 %vm10788_vm0, %v13056_v0  ;;  %v11493_v43 = vpop.f32.mrb[8].mxu1  ;;  %9871 = vmatprep.mubr.msk.bf16.mxu1 %vm10788_vm0, %v13056_v0 }
  0xf4   :  { %v9433_v42 = vpop.f32.mrb[9].mxu0  ;;  %v9441_v45 = vpop.f32.mrb[9].mxu1 }
  0xf5   :  { %v394_v44 = vpop.f32.mrb[10].mxu0  ;;  %9862 = vmatpush3.bf16.msra.mxu0 %v11279_v23  ;;  %9870 = vmatpush3.bf16.msra.mxu1 %v11286_v24  ;;  %v434_v47 = vpop.f32.mrb[10].mxu1 }
  0xf6   :  { %v9434_v46 = vpop.f32.mrb[11].mxu0  ;;  %9875 = vmatprep.subr.bf16.mxu0 %v13056_v0  ;;  %v9442_v48 = vpop.f32.mrb[11].mxu1  ;;  %9883 = vmatprep.subr.bf16.mxu1 %v13056_v0 }
  0xf8   :  { %9864 = vmatmul.mubr.msk.bf16.vlgmr.msra.gmra.mrb[116].mxu0 %vm154_vm1, %v11167_v15  ;;  %9872 = vmatmul.mubr.msk.bf16.vlgmr.msra.gmra.mrb[116].mxu1 %vm154_vm1, %v11167_v15 }
  0xf9   :  { %9876 = vmatpush3.bf16.msra.mxu0 %v11225_v17  ;;  %9884 = vmatpush3.bf16.msra.mxu1 %v11232_v18 }
  0xfa   :  { %9877 = vmatprep.subr.bf16.mxu0 %v13056_v0  ;;  %9885 = vmatprep.subr.bf16.mxu1 %v13056_v0 }
  0xfb   :  { %v11508_v49 = vpop.f32.mrb[12].mxu0  ;;  %9879 = vmatprep.mubr.msk.bf16.mxu0 %vm10788_vm0, %v13056_v0  ;;  %v11513_v51 = vpop.f32.mrb[12].mxu1  ;;  %9887 = vmatprep.mubr.msk.bf16.mxu1 %vm10788_vm0, %v13056_v0 }
  0xfc   :  { %v9449_v50 = vpop.f32.mrb[13].mxu0  ;;  %v9457_v53 = vpop.f32.mrb[13].mxu1 }
  0xfd   :  { %v474_v52 = vpop.f32.mrb[14].mxu0  ;;  %9878 = vmatpush3.bf16.msra.mxu0 %v11243_v19  ;;  %9886 = vmatpush3.bf16.msra.mxu1 %v11250_v20  ;;  %v514_v55 = vpop.f32.mrb[14].mxu1 }
  0xfe   :  { %v9450_v54 = vpop.f32.mrb[15].mxu0  ;;  %9891 = vmatprep.subr.bf16.mxu0 %v13056_v0  ;;  %v9458_v56 = vpop.f32.mrb[15].mxu1  ;;  %9899 = vmatprep.subr.bf16.mxu1 %v13056_v0 }
 0x100   :  { %9880 = vmatmul.mubr.msk.bf16.vlgmr.msra.gmra.mrb[120].mxu0 %vm154_vm1, %v11204_v16  ;;  %9888 = vmatmul.mubr.msk.bf16.vlgmr.msra.gmra.mrb[120].mxu1 %vm154_vm1, %v11204_v16 }
 0x101   :  { %9892 = vmatpush3.bf16.msra.mxu0 %v11261_v21  ;;  %9900 = vmatpush3.bf16.msra.mxu1 %v11268_v22 }
 0x102   :  { %9893 = vmatprep.subr.bf16.mxu0 %v13056_v0  ;;  %9901 = vmatprep.subr.bf16.mxu1 %v13056_v0 }
 0x103   :  { %v11528_v57 = vpop.f32.mrb[16].mxu0  ;;  %9895 = vmatprep.mubr.msk.bf16.mxu0 %vm10788_vm0, %v13056_v0  ;;  %v11533_v59 = vpop.f32.mrb[16].mxu1  ;;  %9903 = vmatprep.mubr.msk.bf16.mxu1 %vm10788_vm0, %v13056_v0 }
 0x104   :  { %v9465_v58 = vpop.f32.mrb[17].mxu0  ;;  %v9473_v61 = vpop.f32.mrb[17].mxu1 }
 0x105   :  { %v557_v60 = vpop.f32.mrb[18].mxu0  ;;  %9894 = vmatpush3.bf16.msra.mxu0 %v11279_v23  ;;  %9902 = vmatpush3.bf16.msra.mxu1 %v11286_v24  ;;  %v597_v63 = vpop.f32.mrb[18].mxu1 }
 0x106   :  { %v9466_v62 = vpop.f32.mrb[19].mxu0  ;;  %9907 = vmatprep.subr.bf16.mxu0 %v13056_v0  ;;  %v9474_v1 = vpop.f32.mrb[19].mxu1  ;;  %9913 = vmatprep.subr.bf16.mxu1 %v13056_v0 }
 0x108   :  { %9896 = vmatmul.mubr.msk.bf16.vlgmr.msra.gmra.mrb[124].mxu0 %vm154_vm1, %v11204_v16  ;;  %9904 = vmatmul.mubr.msk.bf16.vlgmr.msra.gmra.mrb[124].mxu1 %vm154_vm1, %v11204_v16 }
 0x109   :  { %9909 = vmatprep.mubr.msk.bf16.mxu0 %vm10788_vm0, %v13056_v0  ;;  %9915 = vmatprep.mubr.msk.bf16.mxu1 %vm10788_vm0, %v13056_v0 }
 0x10b   :  { %v11549_v2 = vpop.f32.mrb[20].mxu0  ;;  %v11551_v4 = vpop.f32.mrb[20].mxu1 }
 0x10c   :  { %v9481_v3 = vpop.f32.mrb[21].mxu0  ;;  %v9489_v6 = vpop.f32.mrb[21].mxu1 }
 0x10d   :  { %v637_v5 = vpop.f32.mrb[22].mxu0  ;;  %v677_v8 = vpop.f32.mrb[22].mxu1 }
 0x10e   :  { %v9482_v7 = vpop.f32.mrb[23].mxu0  ;;  %v9490_v9 = vpop.f32.mrb[23].mxu1 }
 0x113   :  { %v11553_v10 = vpop.f32.mrb[24].mxu0  ;;  %v11555_v12 = vpop.f32.mrb[24].mxu1 }
 0x114   :  { %v9497_v11 = vpop.f32.mrb[25].mxu0  ;;  %v9505_v14 = vpop.f32.mrb[25].mxu1 }
 0x115   :  { %v720_v13 = vpop.f32.mrb[26].mxu0  ;;  %v760_v16 = vpop.f32.mrb[26].mxu1 }
 0x116   :  { %v9498_v15 = vpop.f32.mrb[27].mxu0  ;;  %v9506_v17 = vpop.f32.mrb[27].mxu1 }
 0x11b   :  { %v11557_v18 = vpop.f32.mrb[28].mxu0  ;;  %v11559_v20 = vpop.f32.mrb[28].mxu1 }
 0x11c   :  { %v9513_v19 = vpop.f32.mrb[29].mxu0  ;;  %v9521_v22 = vpop.f32.mrb[29].mxu1 }
 0x11d   :  { %v800_v21 = vpop.f32.mrb[30].mxu0  ;;  %v840_v24 = vpop.f32.mrb[30].mxu1 }
 0x11e   :  { %v9514_v23 = vpop.f32.mrb[31].mxu0  ;;  %v9522_v26 = vpop.f32.mrb[31].mxu1 }
 0x123   :  { %v11561_v28 = vpop.f32.mrb[32].mxu0  ;;  %v11563_v30 = vpop.f32.mrb[32].mxu1 }
 0x124   :  { %v9529_v29 = vpop.f32.mrb[33].mxu0  ;;  %v9537_v32 = vpop.f32.mrb[33].mxu1 }
 0x125   :  { %v883_v31 = vpop.f32.mrb[34].mxu0  ;;  %v923_v36 = vpop.f32.mrb[34].mxu1 }
 0x126   :  { %v9530_v34 = vpop.f32.mrb[35].mxu0  ;;  %v9538_v37 = vpop.f32.mrb[35].mxu1 }
 0x12b   :  { %v11565_v38 = vpop.f32.mrb[36].mxu0  ;;  %v11567_v40 = vpop.f32.mrb[36].mxu1 }
 0x12c   :  { %v9545_v39 = vpop.f32.mrb[37].mxu0  ;;  %v9553_v44 = vpop.f32.mrb[37].mxu1 }
 0x12d   :  { %v963_v42 = vpop.f32.mrb[38].mxu0  ;;  %v1003_v46 = vpop.f32.mrb[38].mxu1 }
 0x12e   :  { %v9546_v45 = vpop.f32.mrb[39].mxu0  ;;  %v9554_v47 = vpop.f32.mrb[39].mxu1 }
 0x133   :  { %v11569_v48 = vpop.f32.mrb[40].mxu0  ;;  %v11571_v52 = vpop.f32.mrb[40].mxu1 }
 0x134   :  { %v9561_v50 = vpop.f32.mrb[41].mxu0  ;;  %v9569_v54 = vpop.f32.mrb[41].mxu1 }
 0x135   :  { %v1046_v53 = vpop.f32.mrb[42].mxu0  ;;  %v1086_v56 = vpop.f32.mrb[42].mxu1 }
 0x136   :  { %v9562_v55 = vpop.f32.mrb[43].mxu0  ;;  %v9570_v58 = vpop.f32.mrb[43].mxu1 }
 0x137   :  { %v11596_v58 = vld [vmem:[%s13071_s24] ss:$0 sm:$0xff] }
 0x13b   :  { %v11573_v60 = vpop.f32.mrb[44].mxu0  ;;  %v11575_v62 = vpop.f32.mrb[44].mxu1 }
 0x13c   :  { %v9577_v61 = vpop.f32.mrb[45].mxu0  ;;  %v9585_v1 = vpop.f32.mrb[45].mxu1 }
 0x13d   :  { %v1126_v63 = vpop.f32.mrb[46].mxu0  ;;  %v1166_v5 = vpop.f32.mrb[46].mxu1  ;;  %v11601_v61 = vld [vmem:[%s13071_s24 + $0x1] ss:$0 sm:$0xff] }
 0x13e   :  { %v9578_v3 = vpop.f32.mrb[47].mxu0  ;;  %v9586_v6 = vpop.f32.mrb[47].mxu1 }
 0x143   :  { %v11577_v7 = vpop.f32.mrb[48].mxu0  ;;  %v11579_v9 = vpop.f32.mrb[48].mxu1 }
 0x144   :  { %v9593_v8 = vpop.f32.mrb[49].mxu0  ;;  %v9601_v13 = vpop.f32.mrb[49].mxu1 }
 0x145   :  { %v1209_v11 = vpop.f32.mrb[50].mxu0  ;;  %v1249_v15 = vpop.f32.mrb[50].mxu1 }
 0x146   :  { %v9594_v14 = vpop.f32.mrb[51].mxu0  ;;  %v9602_v16 = vpop.f32.mrb[51].mxu1 }
 0x147   :  { %v11608_v16 = vld [vmem:[%s13036_s2] ss:$0 sm:$0xff] }
 0x14b   :  { %v11581_v17 = vpop.f32.mrb[52].mxu0  ;;  %v11583_v21 = vpop.f32.mrb[52].mxu1 }
 0x14c   :  { %v9609_v19 = vpop.f32.mrb[53].mxu0  ;;  %v9617_v23 = vpop.f32.mrb[53].mxu1 }
 0x14d   :  { %v1289_v22 = vpop.f32.mrb[54].mxu0  ;;  %v1329_v26 = vpop.f32.mrb[54].mxu1  ;;  %v11613_v23 = vld [vmem:[%s13036_s2 + $0x1] ss:$0 sm:$0xff] }
 0x14e   :  { %v9610_v24 = vpop.f32.mrb[55].mxu0  ;;  %v9618_v29 = vpop.f32.mrb[55].mxu1 }
 0x14f   :  { %v11621_v29 = vld [vmem:[%s13071_s24 + $0x2] ss:$0 sm:$0xff] }
 0x153   :  { %v11585_v31 = vpop.f32.mrb[56].mxu0  ;;  %v11587_v34 = vpop.f32.mrb[56].mxu1 }
 0x154   :  { %v9625_v32 = vpop.f32.mrb[57].mxu0  ;;  %v9633_v37 = vpop.f32.mrb[57].mxu1 }
 0x155   :  { %v1372_v36 = vpop.f32.mrb[58].mxu0  ;;  %v1412_v42 = vpop.f32.mrb[58].mxu1  ;;  %v193_v32 = vadd.f32 %v11608_v16, %v11448_v25  ;;  %v245_v37 = vadd.f32 %v11613_v23, %v11453_v27  ;;  %v11640_v27 = vld [vmem:[%s13036_s2 + $0x2] ss:$0 sm:$0xff] }
 0x156   :  { %v9626_v39 = vpop.f32.mrb[59].mxu0  ;;  %v9634_v44 = vpop.f32.mrb[59].mxu1  ;;  %v11629_v36 = vld [vmem:[%s13071_s24 + $0x3] ss:$0 sm:$0xff] }
 0x15b   :  { %v11589_v45 = vpop.f32.mrb[60].mxu0  ;;  %v11591_v47 = vpop.f32.mrb[60].mxu1 }
 0x15c   :  { %v9641_v46 = vpop.f32.mrb[61].mxu0  ;;  %v9649_v53 = vpop.f32.mrb[61].mxu1 }
 0x15d   :  { %v1452_v50 = vpop.f32.mrb[62].mxu0  ;;  %v1492_v55 = vpop.f32.mrb[62].mxu1 }
 0x15e   :  { %v9642_v54 = vpop.f32.mrb[63].mxu0  ;;  %v9650_v56 = vpop.f32.mrb[63].mxu1 }
 0x15f   :  { %v2847_v54 = vpack.c.bf16 %v193_v32, %v193_v32 }
 0x163   :  { %v1565_v63 = vpop.f32.mrb[64].mxu0  ;;  %v1617_v1 = vpop.f32.mrb[64].mxu1 }
 0x164   :  { %v9657_v3 = vpop.f32.mrb[65].mxu0  ;;  %v1566_v5 = vadd.f32 %v11596_v58, %v1565_v63  ;;  %v1618_v6 = vadd.f32 %v11601_v61, %v1617_v1  ;;  %v9665_v11 = vpop.f32.mrb[65].mxu1  ;;  %v2848_v1 = vpack.c.bf16 %v245_v37, %v245_v37 }
 0x165   :  { %v1568_v8 = vpop.f32.mrb[66].mxu0  ;;  %v1620_v14 = vpop.f32.mrb[66].mxu1 }
 0x166   :  { %v9658_v13 = vpop.f32.mrb[67].mxu0  ;;  %v2879_v15 = vpack.c.bf16 %v1566_v5, %v1566_v5  ;;  %v2880_v19 = vpack.c.bf16 %v1618_v6, %v1618_v6  ;;  %v9666_v22 = vpop.f32.mrb[67].mxu1  ;;  %v11645_v6 = vld [vmem:[%s13036_s2 + $0x3] ss:$0 sm:$0xff] }
 0x167   :  { %v297_v13 = vadd.f32 %v11640_v27, %v11468_v33  ;;  %v349_v14 = vadd.f32 %v11645_v6, %v11473_v35 }
 0x168   :  { %4770 = vrot.lane.b32.xlu0 %v2879_v15, %s10789_s30  ;;  %v2916_v24 = vsel %vm2911_vm2, %v2879_v15, 0  ;;  %v2962_v26 = vsel %vm2911_vm2, %v2880_v19, 0  ;;  %4821 = vrot.lane.b32.xlu1 %v2880_v19, %s10789_s30 }
 0x169   :  { %9908 = vmatpush3.bf16.xpose.msra.mxu0 %v2916_v24  ;;  %9914 = vmatpush3.bf16.xpose.msra.mxu1 %v2962_v26  ;;  %v2849_v37 = vpack.c.bf16 %v297_v13, %v297_v13 }
 0x16a   :  { %9919 = vmatprep.subr.bf16.mxu0 %v13056_v0  ;;  %9925 = vmatprep.subr.bf16.mxu1 %v13056_v0 }
 0x16b   :  { %v1669_v39 = vpop.f32.mrb[68].mxu0  ;;  %v1721_v44 = vpop.f32.mrb[68].mxu1 }
 0x16c   :  { %v1670_v42 = vadd.f32 %v11621_v29, %v1669_v39  ;;  %v9673_v46 = vpop.f32.mrb[69].mxu0  ;;  %v1722_v25 = vadd.f32 %v11629_v36, %v1721_v44  ;;  %v9681_v50 = vpop.f32.mrb[69].mxu1  ;;  %v2850_v44 = vpack.c.bf16 %v349_v14, %v349_v14 }
 0x16d   :  { %v1672_v53 = vpop.f32.mrb[70].mxu0  ;;  %v1724_v56 = vpop.f32.mrb[70].mxu1 }
 0x16e   :  { %v2881_v55 = vpack.c.bf16 %v1670_v42, %v1670_v42  ;;  %v9674_v63 = vpop.f32.mrb[71].mxu0  ;;  %v2882_v3 = vpack.c.bf16 %v1722_v25, %v1722_v25  ;;  %v9682_v5 = vpop.f32.mrb[71].mxu1 }
 0x170   :  { %9910 = vmatmul.mubr.msk.bf16.vlgmr.msra.gmra.mrb[128].mxu0 %vm2911_vm2, %v2847_v54  ;;  %v3008_v8 = vsel %vm2911_vm2, %v2881_v55, 0  ;;  %4870 = vrot.lane.b32.xlu0 %v2881_v55, %s10789_s30  ;;  %v3054_v11 = vsel %vm2911_vm2, %v2882_v3, 0  ;;  %v392_v54 = vadd.f32 %v11608_v16, %v11488_v41  ;;  %v432_v55 = vadd.f32 %v11613_v23, %v11493_v43 }
 0x171   :  { %9916 = vmatmul.mubr.msk.bf16.vlgmr.msra.gmra.mrb[128].mxu1 %vm2911_vm2, %v2848_v1  ;;  %9920 = vmatpush3.bf16.xpose.msra.mxu0 %v3008_v8 }
 0x172   :  { %9926 = vmatpush3.bf16.xpose.msra.mxu1 %v3054_v11  ;;  %9921 = vmatprep.mubr.msk.bf16.mxu0 %vm10788_vm0, %v13056_v0  ;;  %v2851_v11 = vpack.c.bf16 %v392_v54, %v392_v54 }
 0x173   :  { %v1761_v15 = vpop.f32.mrb[72].mxu0  ;;  %9927 = vmatprep.mubr.msk.bf16.mxu1 %vm10788_vm0, %v13056_v0  ;;  %9931 = vmatprep.subr.bf16.mxu0 %v13056_v0  ;;  %v1801_v22 = vpop.f32.mrb[72].mxu1 }
 0x174   :  { %v1762_v19 = vadd.f32 %v11596_v58, %v1761_v15  ;;  %v9689_v24 = vpop.f32.mrb[73].mxu0  ;;  %9937 = vmatprep.subr.bf16.mxu1 %v13056_v0  ;;  %4919 = vrot.lane.b32.xlu1 %v2882_v3, %s10789_s30  ;;  %v1802_v33 = vadd.f32 %v11601_v61, %v1801_v22  ;;  %v9697_v26 = vpop.f32.mrb[73].mxu1  ;;  %v2852_v15 = vpack.c.bf16 %v432_v55, %v432_v55 }
 0x175   :  { %v1764_v32 = vpop.f32.mrb[74].mxu0  ;;  %v1804_v39 = vpop.f32.mrb[74].mxu1  ;;  %v472_v26 = vadd.f32 %v11640_v27, %v11508_v49 }
 0x176   :  { %v2883_v35 = vpack.c.bf16 %v1762_v19, %v1762_v19  ;;  %v9690_v42 = vpop.f32.mrb[75].mxu0  ;;  %v2884_v46 = vpack.c.bf16 %v1802_v33, %v1802_v33  ;;  %v9698_v25 = vpop.f32.mrb[75].mxu1  ;;  %v512_v32 = vadd.f32 %v11645_v6, %v11513_v51 }
 0x177   :  { %v2853_v25 = vpack.c.bf16 %v472_v26, %v472_v26 }
 0x178   :  { %9922 = vmatmul.mubr.msk.bf16.vlgmr.msra.gmra.mrb[132].mxu0 %vm2911_vm2, %v2849_v37  ;;  %v3100_v50 = vsel %vm2911_vm2, %v2883_v35, 0  ;;  %4968 = vrot.lane.b32.xlu1 %v2883_v35, %s10789_s30  ;;  %v3146_v53 = vsel %vm2911_vm2, %v2884_v46, 0  ;;  %v2854_v54 = vpack.c.bf16 %v512_v32, %v512_v32 }
 0x179   :  { %9928 = vmatmul.mubr.msk.bf16.vlgmr.msra.gmra.mrb[132].mxu1 %vm2911_vm2, %v2850_v44  ;;  %9932 = vmatpush3.bf16.xpose.msra.mxu0 %v3100_v50 }
 0x17a   :  { %9938 = vmatpush3.bf16.xpose.msra.mxu1 %v3146_v53  ;;  %9933 = vmatprep.mubr.msk.bf16.mxu0 %vm10788_vm0, %v13056_v0 }
 0x17b   :  { %v1841_v56 = vpop.f32.mrb[76].mxu0  ;;  %9939 = vmatprep.mubr.msk.bf16.mxu1 %vm10788_vm0, %v13056_v0  ;;  %9943 = vmatprep.subr.bf16.mxu0 %v13056_v0  ;;  %v1881_v1 = vpop.f32.mrb[76].mxu1 }
 0x17c   :  { %v1842_v63 = vadd.f32 %v11621_v29, %v1841_v56  ;;  %v9705_v3 = vpop.f32.mrb[77].mxu0  ;;  %9949 = vmatprep.subr.bf16.mxu1 %v13056_v0  ;;  %5017 = vrot.lane.b32.xlu0 %v2884_v46, %s10789_s30  ;;  %v1882_v41 = vadd.f32 %v11629_v36, %v1881_v1  ;;  %v9713_v5 = vpop.f32.mrb[77].mxu1 }
 0x17d   :  { %v1844_v8 = vpop.f32.mrb[78].mxu0  ;;  %v1884_v13 = vpop.f32.mrb[78].mxu1  ;;  %v555_v3 = vadd.f32 %v11608_v16, %v11528_v57 }
 0x17e   :  { %v2885_v43 = vpack.c.bf16 %v1842_v63, %v1842_v63  ;;  %v9706_v14 = vpop.f32.mrb[79].mxu0  ;;  %v2886_v19 = vpack.c.bf16 %v1882_v41, %v1882_v41  ;;  %v9714_v22 = vpop.f32.mrb[79].mxu1  ;;  %v595_v41 = vadd.f32 %v11613_v23, %v11533_v59 }
 0x180   :  { %9934 = vmatmul.mubr.msk.bf16.vlgmr.msra.gmra.mrb[136].mxu0 %vm2911_vm2, %v2851_v11  ;;  %v3192_v24 = vsel %vm2911_vm2, %v2885_v43, 0  ;;  %5066 = vrot.lane.b32.xlu0 %v2885_v43, %s10789_s30  ;;  %v3238_v33 = vsel %vm2911_vm2, %v2886_v19, 0 }
 0x181   :  { %9940 = vmatmul.mubr.msk.bf16.vlgmr.msra.gmra.mrb[136].mxu1 %vm2911_vm2, %v2852_v15  ;;  %9944 = vmatpush3.bf16.xpose.msra.mxu0 %v3192_v24  ;;  %v2855_v15 = vpack.c.bf16 %v555_v3, %v555_v3  ;;  %v2856_v24 = vpack.c.bf16 %v595_v41, %v595_v41  ;;  %v718_v41 = vadd.f32 %v11608_v16, %v11553_v10 }
 0x182   :  { %9950 = vmatpush3.bf16.xpose.msra.mxu1 %v3238_v33  ;;  %9945 = vmatprep.mubr.msk.bf16.mxu0 %vm10788_vm0, %v13056_v0 }
 0x183   :  { %v1921_v37 = vpop.f32.mrb[80].mxu0  ;;  %9951 = vmatprep.mubr.msk.bf16.mxu1 %vm10788_vm0, %v13056_v0  ;;  %9955 = vmatprep.subr.bf16.mxu0 %v13056_v0  ;;  %v1961_v39 = vpop.f32.mrb[80].mxu1 }
 0x184   :  { %v1922_v35 = vadd.f32 %v11596_v58, %v1921_v37  ;;  %v9721_v42 = vpop.f32.mrb[81].mxu0  ;;  %9961 = vmatprep.subr.bf16.mxu1 %v13056_v0  ;;  %5115 = vrot.lane.b32.xlu0 %v2886_v19, %s10789_s30  ;;  %v1962_v49 = vadd.f32 %v11601_v61, %v1961_v39  ;;  %v9729_v44 = vpop.f32.mrb[81].mxu1  ;;  %v675_v39 = vadd.f32 %v11645_v6, %v11551_v4 }
 0x185   :  { %v1924_v46 = vpop.f32.mrb[82].mxu0  ;;  %v1964_v50 = vpop.f32.mrb[82].mxu1 }
 0x186   :  { %v2887_v51 = vpack.c.bf16 %v1922_v35, %v1922_v35  ;;  %v9722_v53 = vpop.f32.mrb[83].mxu0  ;;  %v2888_v55 = vpack.c.bf16 %v1962_v49, %v1962_v49  ;;  %v9730_v56 = vpop.f32.mrb[83].mxu1  ;;  %v635_v35 = vadd.f32 %v11640_v27, %v11549_v2 }
 0x188   :  { %v3284_v63 = vsel %vm2911_vm2, %v2887_v51, 0  ;;  %9946 = vmatmul.mubr.msk.bf16.vlgmr.msra.gmra.mrb[140].mxu0 %vm2911_vm2, %v2853_v25  ;;  %5164 = vrot.lane.b32.xlu0 %v2887_v51, %s10789_s30  ;;  %v3330_v1 = vsel %vm2911_vm2, %v2888_v55, 0  ;;  %v2857_v50 = vpack.c.bf16 %v635_v35, %v635_v35 }
 0x189   :  { %9952 = vmatmul.mubr.msk.bf16.vlgmr.msra.gmra.mrb[140].mxu1 %vm2911_vm2, %v2854_v54  ;;  %9956 = vmatpush3.bf16.xpose.msra.mxu0 %v3284_v63 }
 0x18a   :  { %9962 = vmatpush3.bf16.xpose.msra.mxu1 %v3330_v1  ;;  %9957 = vmatprep.mubr.msk.bf16.mxu0 %vm10788_vm0, %v13056_v0 }
 0x18b   :  { %v2001_v5 = vpop.f32.mrb[84].mxu0  ;;  %9963 = vmatprep.mubr.msk.bf16.mxu1 %vm10788_vm0, %v13056_v0  ;;  %9967 = vmatprep.subr.bf16.mxu0 %v13056_v0  ;;  %v2041_v11 = vpop.f32.mrb[84].mxu1 }
 0x18c   :  { %v2002_v8 = vadd.f32 %v11621_v29, %v2001_v5  ;;  %v9737_v43 = vpop.f32.mrb[85].mxu0  ;;  %9973 = vmatprep.subr.bf16.mxu1 %v13056_v0  ;;  %5213 = vrot.lane.b32.xlu0 %v2888_v55, %s10789_s30  ;;  %v2042_v57 = vadd.f32 %v11629_v36, %v2041_v11  ;;  %v9745_v13 = vpop.f32.mrb[85].mxu1  ;;  %v2858_v55 = vpack.c.bf16 %v675_v39, %v675_v39 }
 0x18d   :  { %v2004_v14 = vpop.f32.mrb[86].mxu0  ;;  %v2044_v19 = vpop.f32.mrb[86].mxu1  ;;  %v758_v5 = vadd.f32 %v11613_v23, %v11555_v12  ;;  %v798_v39 = vadd.f32 %v11640_v27, %v11557_v18 }
 0x18e   :  { %v11719_v59 = vpack.c.bf16 %v2002_v8, %v2002_v8  ;;  %v9738_v22 = vpop.f32.mrb[87].mxu0  ;;  %v11721_v33 = vpack.c.bf16 %v2042_v57, %v2042_v57  ;;  %v9746_v26 = vpop.f32.mrb[87].mxu1 }
 0x190   :  { %v3376_v32 = vsel %vm2911_vm2, %v11719_v59, 0  ;;  %9958 = vmatmul.mubr.msk.bf16.vlgmr.msra.gmra.mrb[144].mxu0 %vm2911_vm2, %v2855_v15  ;;  %v3422_v37 = vsel %vm2911_vm2, %v11721_v33, 0  ;;  %v2859_v15 = vpack.c.bf16 %v718_v41, %v718_v41 }
 0x191   :  { %9964 = vmatmul.mubr.msk.bf16.vlgmr.msra.gmra.mrb[144].mxu1 %vm2911_vm2, %v2856_v24  ;;  %9968 = vmatpush3.bf16.xpose.msra.mxu0 %v3376_v32  ;;  %v2860_v24 = vpack.c.bf16 %v758_v5, %v758_v5  ;;  %v881_v5 = vadd.f32 %v11608_v16, %v11561_v28 }
 0x192   :  { %9974 = vmatpush3.bf16.xpose.msra.mxu1 %v3422_v37  ;;  %9969 = vmatprep.mubr.msk.bf16.mxu0 %vm10788_vm0, %v13056_v0 }
 0x193   :  { %v2081_v42 = vpop.f32.mrb[88].mxu0  ;;  %9975 = vmatprep.mubr.msk.bf16.mxu1 %vm10788_vm0, %v13056_v0  ;;  %9979 = vmatprep.subr.bf16.mxu0 %v13056_v0  ;;  %v2121_v44 = vpop.f32.mrb[88].mxu1 }
 0x194   :  { %v2082_v49 = vadd.f32 %v11596_v58, %v2081_v42  ;;  %v9753_v46 = vpop.f32.mrb[89].mxu0  ;;  %9985 = vmatprep.subr.bf16.mxu1 %v13056_v0  ;;  %v2122_v2 = vadd.f32 %v11601_v61, %v2121_v44  ;;  %v9761_v25 = vpop.f32.mrb[89].mxu1  ;;  %v838_v42 = vadd.f32 %v11645_v6, %v11559_v20 }
 0x195   :  { %v2084_v51 = vpop.f32.mrb[90].mxu0  ;;  %v2124_v4 = vpop.f32.mrb[90].mxu1 }
 0x196   :  { %v11741_v53 = vpack.c.bf16 %v2082_v49, %v2082_v49  ;;  %v9754_v54 = vpop.f32.mrb[91].mxu0  ;;  %v11743_v56 = vpack.c.bf16 %v2122_v2, %v2122_v2  ;;  %v9762_v63 = vpop.f32.mrb[91].mxu1 }
 0x198   :  { %v3468_v1 = vsel %vm2911_vm2, %v11741_v53, 0  ;;  %9970 = vmatmul.mubr.msk.bf16.vlgmr.msra.gmra.mrb[148].mxu0 %vm2911_vm2, %v2857_v50  ;;  %v3514_v3 = vsel %vm2911_vm2, %v11743_v56, 0  ;;  %v2861_v50 = vpack.c.bf16 %v798_v39, %v798_v39 }
 0x199   :  { %9976 = vmatmul.mubr.msk.bf16.vlgmr.msra.gmra.mrb[148].mxu1 %vm2911_vm2, %v2858_v55  ;;  %9980 = vmatpush3.bf16.xpose.msra.mxu0 %v3468_v1  ;;  %v2862_v55 = vpack.c.bf16 %v838_v42, %v838_v42  ;;  %v961_v42 = vadd.f32 %v11640_v27, %v11565_v38 }
 0x19a   :  { %9986 = vmatpush3.bf16.xpose.msra.mxu1 %v3514_v3  ;;  %9981 = vmatprep.mubr.msk.bf16.mxu0 %vm10788_vm0, %v13056_v0 }
 0x19b   :  { %v2161_v8 = vpop.f32.mrb[92].mxu0  ;;  %9987 = vmatprep.mubr.msk.bf16.mxu1 %vm10788_vm0, %v13056_v0  ;;  %9991 = vmatprep.subr.bf16.mxu0 %v13056_v0  ;;  %v2201_v43 = vpop.f32.mrb[92].mxu1 }
 0x19c   :  { %v2162_v11 = vadd.f32 %v11621_v29, %v2161_v8  ;;  %v9769_v57 = vpop.f32.mrb[93].mxu0  ;;  %9997 = vmatprep.subr.bf16.mxu1 %v13056_v0  ;;  %v2202_v10 = vadd.f32 %v11629_v36, %v2201_v43  ;;  %v9777_v13 = vpop.f32.mrb[93].mxu1  ;;  %v921_v8 = vadd.f32 %v11613_v23, %v11563_v30 }
 0x19d   :  { %v2164_v14 = vpop.f32.mrb[94].mxu0  ;;  %v2204_v12 = vpop.f32.mrb[94].mxu1 }
 0x19e   :  { %v11763_v19 = vpack.c.bf16 %v2162_v11, %v2162_v11  ;;  %v9770_v22 = vpop.f32.mrb[95].mxu0  ;;  %v11765_v26 = vpack.c.bf16 %v2202_v10, %v2202_v10  ;;  %v9778_v32 = vpop.f32.mrb[95].mxu1 }
 0x1a0   :  { %v3560_v37 = vsel %vm2911_vm2, %v11763_v19, 0  ;;  %9982 = vmatmul.mubr.msk.bf16.vlgmr.msra.gmra.mrb[152].mxu0 %vm2911_vm2, %v2859_v15  ;;  %v3606_v35 = vsel %vm2911_vm2, %v11765_v26, 0  ;;  %v2863_v15 = vpack.c.bf16 %v881_v5, %v881_v5 }
 0x1a1   :  { %9988 = vmatmul.mubr.msk.bf16.vlgmr.msra.gmra.mrb[152].mxu1 %vm2911_vm2, %v2860_v24  ;;  %9992 = vmatpush3.bf16.xpose.msra.mxu0 %v3560_v37  ;;  %v2864_v24 = vpack.c.bf16 %v921_v8, %v921_v8  ;;  %v1044_v8 = vadd.f32 %v11608_v16, %v11569_v48 }
 0x1a2   :  { %9998 = vmatpush3.bf16.xpose.msra.mxu1 %v3606_v35  ;;  %9993 = vmatprep.mubr.msk.bf16.mxu0 %vm10788_vm0, %v13056_v0 }
 0x1a3   :  { %v2241_v49 = vpop.f32.mrb[96].mxu0  ;;  %9999 = vmatprep.mubr.msk.bf16.mxu1 %vm10788_vm0, %v13056_v0  ;;  %10003 = vmatprep.subr.bf16.mxu0 %v13056_v0  ;;  %v2281_v46 = vpop.f32.mrb[96].mxu1 }
 0x1a4   :  { %v2242_v44 = vadd.f32 %v11596_v58, %v2241_v49  ;;  %v9785_v2 = vpop.f32.mrb[97].mxu0  ;;  %10009 = vmatprep.subr.bf16.mxu1 %v13056_v0  ;;  %v2282_v18 = vadd.f32 %v11601_v61, %v2281_v46  ;;  %v9793_v25 = vpop.f32.mrb[97].mxu1  ;;  %v1001_v49 = vadd.f32 %v11645_v6, %v11567_v40 }
 0x1a5   :  { %v2244_v51 = vpop.f32.mrb[98].mxu0  ;;  %v2284_v20 = vpop.f32.mrb[98].mxu1 }
 0x1a6   :  { %v11785_v4 = vpack.c.bf16 %v2242_v44, %v2242_v44  ;;  %v9786_v54 = vpop.f32.mrb[99].mxu0  ;;  %v11787_v63 = vpack.c.bf16 %v2282_v18, %v2282_v18  ;;  %v9794_v1 = vpop.f32.mrb[99].mxu1 }
 0x1a8   :  { %v3652_v3 = vsel %vm2911_vm2, %v11785_v4, 0  ;;  %9994 = vmatmul.mubr.msk.bf16.vlgmr.msra.gmra.mrb[156].mxu0 %vm2911_vm2, %v2861_v50  ;;  %v3698_v41 = vsel %vm2911_vm2, %v11787_v63, 0  ;;  %v2865_v50 = vpack.c.bf16 %v961_v42, %v961_v42 }
 0x1a9   :  { %10000 = vmatmul.mubr.msk.bf16.vlgmr.msra.gmra.mrb[156].mxu1 %vm2911_vm2, %v2862_v55  ;;  %10004 = vmatpush3.bf16.xpose.msra.mxu0 %v3652_v3  ;;  %v2866_v55 = vpack.c.bf16 %v1001_v49, %v1001_v49  ;;  %v1124_v49 = vadd.f32 %v11640_v27, %v11573_v60 }
 0x1aa   :  { %10010 = vmatpush3.bf16.xpose.msra.mxu1 %v3698_v41  ;;  %10005 = vmatprep.mubr.msk.bf16.mxu0 %vm10788_vm0, %v13056_v0 }
 0x1ab   :  { %v2321_v11 = vpop.f32.mrb[100].mxu0  ;;  %10011 = vmatprep.mubr.msk.bf16.mxu1 %vm10788_vm0, %v13056_v0  ;;  %10015 = vmatprep.subr.bf16.mxu0 %v13056_v0  ;;  %v2361_v57 = vpop.f32.mrb[100].mxu1 }
 0x1ac   :  { %v2322_v43 = vadd.f32 %v11621_v29, %v2321_v11  ;;  %v9801_v10 = vpop.f32.mrb[101].mxu0  ;;  %10021 = vmatprep.subr.bf16.mxu1 %v13056_v0  ;;  %v2362_v28 = vadd.f32 %v11629_v36, %v2361_v57  ;;  %v9809_v13 = vpop.f32.mrb[101].mxu1  ;;  %v1084_v11 = vadd.f32 %v11613_v23, %v11571_v52 }
 0x1ad   :  { %v2324_v14 = vpop.f32.mrb[102].mxu0  ;;  %v2364_v30 = vpop.f32.mrb[102].mxu1 }
 0x1ae   :  { %v11807_v12 = vpack.c.bf16 %v2322_v43, %v2322_v43  ;;  %v9802_v22 = vpop.f32.mrb[103].mxu0  ;;  %v11809_v32 = vpack.c.bf16 %v2362_v28, %v2362_v28  ;;  %v9810_v37 = vpop.f32.mrb[103].mxu1 }
 0x1b0   :  { %v3744_v35 = vsel %vm2911_vm2, %v11807_v12, 0  ;;  %10006 = vmatmul.mubr.msk.bf16.vlgmr.msra.gmra.mrb[160].mxu0 %vm2911_vm2, %v2863_v15  ;;  %v3790_v39 = vsel %vm2911_vm2, %v11809_v32, 0  ;;  %v2867_v15 = vpack.c.bf16 %v1044_v8, %v1044_v8 }
 0x1b1   :  { %10012 = vmatmul.mubr.msk.bf16.vlgmr.msra.gmra.mrb[160].mxu1 %vm2911_vm2, %v2864_v24  ;;  %10016 = vmatpush3.bf16.xpose.msra.mxu0 %v3744_v35  ;;  %v2868_v24 = vpack.c.bf16 %v1084_v11, %v1084_v11  ;;  %v1207_v11 = vadd.f32 %v11608_v16, %v11577_v7 }
 0x1b2   :  { %10022 = vmatpush3.bf16.xpose.msra.mxu1 %v3790_v39  ;;  %10017 = vmatprep.mubr.msk.bf16.mxu0 %vm10788_vm0, %v13056_v0 }
 0x1b3   :  { %v2401_v44 = vpop.f32.mrb[104].mxu0  ;;  %10023 = vmatprep.mubr.msk.bf16.mxu1 %vm10788_vm0, %v13056_v0  ;;  %10027 = vmatprep.subr.bf16.mxu0 %v13056_v0  ;;  %v2441_v2 = vpop.f32.mrb[104].mxu1 }
 0x1b4   :  { %v2402_v46 = vadd.f32 %v11596_v58, %v2401_v44  ;;  %v9817_v18 = vpop.f32.mrb[105].mxu0  ;;  %10033 = vmatprep.subr.bf16.mxu1 %v13056_v0  ;;  %v2442_v38 = vadd.f32 %v11601_v61, %v2441_v2  ;;  %v9825_v25 = vpop.f32.mrb[105].mxu1  ;;  %v1164_v44 = vadd.f32 %v11645_v6, %v11575_v62 }
 0x1b5   :  { %v2404_v51 = vpop.f32.mrb[106].mxu0  ;;  %v2444_v40 = vpop.f32.mrb[106].mxu1 }
 0x1b6   :  { %v11829_v20 = vpack.c.bf16 %v2402_v46, %v2402_v46  ;;  %v9818_v54 = vpop.f32.mrb[107].mxu0  ;;  %v11831_v1 = vpack.c.bf16 %v2442_v38, %v2442_v38  ;;  %v9826_v3 = vpop.f32.mrb[107].mxu1 }
 0x1b8   :  { %v3836_v41 = vsel %vm2911_vm2, %v11829_v20, 0  ;;  %10018 = vmatmul.mubr.msk.bf16.vlgmr.msra.gmra.mrb[164].mxu0 %vm2911_vm2, %v2865_v50  ;;  %v3882_v5 = vsel %vm2911_vm2, %v11831_v1, 0  ;;  %v2869_v50 = vpack.c.bf16 %v1124_v49, %v1124_v49 }
 0x1b9   :  { %10024 = vmatmul.mubr.msk.bf16.vlgmr.msra.gmra.mrb[164].mxu1 %vm2911_vm2, %v2866_v55  ;;  %10028 = vmatpush3.bf16.xpose.msra.mxu0 %v3836_v41  ;;  %v2870_v55 = vpack.c.bf16 %v1164_v44, %v1164_v44  ;;  %v1287_v44 = vadd.f32 %v11640_v27, %v11581_v17 }
 0x1ba   :  { %10034 = vmatpush3.bf16.xpose.msra.mxu1 %v3882_v5  ;;  %10029 = vmatprep.mubr.msk.bf16.mxu0 %vm10788_vm0, %v13056_v0 }
 0x1bb   :  { %v2481_v43 = vpop.f32.mrb[108].mxu0  ;;  %10035 = vmatprep.mubr.msk.bf16.mxu1 %vm10788_vm0, %v13056_v0  ;;  %10039 = vmatprep.subr.bf16.mxu0 %v13056_v0  ;;  %v2521_v10 = vpop.f32.mrb[108].mxu1 }
 0x1bc   :  { %v2482_v57 = vadd.f32 %v11621_v29, %v2481_v43  ;;  %v9833_v28 = vpop.f32.mrb[109].mxu0  ;;  %10045 = vmatprep.subr.bf16.mxu1 %v13056_v0  ;;  %v2522_v48 = vadd.f32 %v11629_v36, %v2521_v10  ;;  %v9841_v13 = vpop.f32.mrb[109].mxu1  ;;  %v1247_v43 = vadd.f32 %v11613_v23, %v11579_v9 }
 0x1bd   :  { %v2484_v14 = vpop.f32.mrb[110].mxu0  ;;  %v2524_v52 = vpop.f32.mrb[110].mxu1 }
 0x1be   :  { %v11851_v30 = vpack.c.bf16 %v2482_v57, %v2482_v57  ;;  %v9834_v22 = vpop.f32.mrb[111].mxu0  ;;  %v11853_v37 = vpack.c.bf16 %v2522_v48, %v2522_v48  ;;  %v9842_v35 = vpop.f32.mrb[111].mxu1 }
 0x1c0   :  { %v3928_v39 = vsel %vm2911_vm2, %v11851_v30, 0  ;;  %10030 = vmatmul.mubr.msk.bf16.vlgmr.msra.gmra.mrb[168].mxu0 %vm2911_vm2, %v2867_v15  ;;  %v3974_v42 = vsel %vm2911_vm2, %v11853_v37, 0  ;;  %v2871_v15 = vpack.c.bf16 %v1207_v11, %v1207_v11  ;;  %v1410_v11 = vadd.f32 %v11613_v23, %v11587_v34 }
 0x1c1   :  { %10036 = vmatmul.mubr.msk.bf16.vlgmr.msra.gmra.mrb[168].mxu1 %vm2911_vm2, %v2868_v24  ;;  %10040 = vmatpush3.bf16.xpose.msra.mxu0 %v3928_v39  ;;  %v2872_v24 = vpack.c.bf16 %v1247_v43, %v1247_v43 }
 0x1c2   :  { %10046 = vmatpush3.bf16.xpose.msra.mxu1 %v3974_v42  ;;  %10041 = vmatprep.mubr.msk.bf16.mxu0 %vm10788_vm0, %v13056_v0 }
 0x1c3   :  { %v2561_v46 = vpop.f32.mrb[112].mxu0  ;;  %10047 = vmatprep.mubr.msk.bf16.mxu1 %vm10788_vm0, %v13056_v0  ;;  %10051 = vmatprep.subr.bf16.mxu0 %v13056_v0  ;;  %v2601_v18 = vpop.f32.mrb[112].mxu1 }
 0x1c4   :  { %v2562_v2 = vadd.f32 %v11596_v58, %v2561_v46  ;;  %v9849_v38 = vpop.f32.mrb[113].mxu0  ;;  %10057 = vmatprep.subr.bf16.mxu1 %v13056_v0  ;;  %v2602_v60 = vadd.f32 %v11601_v61, %v2601_v18  ;;  %v9857_v25 = vpop.f32.mrb[113].mxu1  ;;  %v1327_v46 = vadd.f32 %v11645_v6, %v11583_v21 }
 0x1c5   :  { %v2564_v51 = vpop.f32.mrb[114].mxu0  ;;  %v2604_v62 = vpop.f32.mrb[114].mxu1 }
 0x1c6   :  { %v11873_v40 = vpack.c.bf16 %v2562_v2, %v2562_v2  ;;  %v9850_v54 = vpop.f32.mrb[115].mxu0  ;;  %v11875_v3 = vpack.c.bf16 %v2602_v60, %v2602_v60  ;;  %v9858_v41 = vpop.f32.mrb[115].mxu1 }
 0x1c8   :  { %v4020_v5 = vsel %vm2911_vm2, %v11873_v40, 0  ;;  %10042 = vmatmul.mubr.msk.bf16.vlgmr.msra.gmra.mrb[172].mxu0 %vm2911_vm2, %v2869_v50  ;;  %v4066_v8 = vsel %vm2911_vm2, %v11875_v3, 0  ;;  %v2873_v50 = vpack.c.bf16 %v1287_v44, %v1287_v44 }
 0x1c9   :  { %10048 = vmatmul.mubr.msk.bf16.vlgmr.msra.gmra.mrb[172].mxu1 %vm2911_vm2, %v2870_v55  ;;  %10052 = vmatpush3.bf16.xpose.msra.mxu0 %v4020_v5  ;;  %v2874_v55 = vpack.c.bf16 %v1327_v46, %v1327_v46 }
 0x1ca   :  { %10058 = vmatpush3.bf16.xpose.msra.mxu1 %v4066_v8  ;;  %10053 = vmatprep.mubr.msk.bf16.mxu0 %vm10788_vm0, %v13056_v0 }
 0x1cb   :  { %v2641_v57 = vpop.f32.mrb[116].mxu0  ;;  %10059 = vmatprep.mubr.msk.bf16.mxu1 %vm10788_vm0, %v13056_v0  ;;  %10063 = vmatprep.subr.bf16.mxu0 %v13056_v0  ;;  %v2681_v28 = vpop.f32.mrb[116].mxu1 }
 0x1cc   :  { %v2642_v10 = vadd.f32 %v11621_v29, %v2641_v57  ;;  %v9865_v48 = vpop.f32.mrb[117].mxu0  ;;  %10069 = vmatprep.subr.bf16.mxu1 %v13056_v0  ;;  %v2682_v7 = vadd.f32 %v11629_v36, %v2681_v28  ;;  %v9873_v13 = vpop.f32.mrb[117].mxu1 }
 0x1cd   :  { %v2644_v14 = vpop.f32.mrb[118].mxu0  ;;  %v2684_v9 = vpop.f32.mrb[118].mxu1 }
 0x1ce   :  { %v11895_v52 = vpack.c.bf16 %v2642_v10, %v2642_v10  ;;  %v9866_v22 = vpop.f32.mrb[119].mxu0  ;;  %v11897_v35 = vpack.c.bf16 %v2682_v7, %v2682_v7  ;;  %v9874_v39 = vpop.f32.mrb[119].mxu1  ;;  %v2876_v14 = vpack.c.bf16 %v1410_v11, %v1410_v11 }
 0x1d0   :  { %v4112_v42 = vsel %vm2911_vm2, %v11895_v52, 0  ;;  %10054 = vmatmul.mubr.msk.bf16.vlgmr.msra.gmra.mrb[176].mxu0 %vm2911_vm2, %v2871_v15  ;;  %v4158_v49 = vsel %vm2911_vm2, %v11897_v35, 0 }
 0x1d1   :  { %10060 = vmatmul.mubr.msk.bf16.vlgmr.msra.gmra.mrb[176].mxu1 %vm2911_vm2, %v2872_v24  ;;  %10064 = vmatpush3.bf16.xpose.msra.mxu0 %v4112_v42  ;;  %v1490_v24 = vadd.f32 %v11645_v6, %v11591_v47 }
 0x1d2   :  { %10070 = vmatpush3.bf16.xpose.msra.mxu1 %v4158_v49  ;;  %10065 = vmatprep.mubr.msk.bf16.mxu0 %vm10788_vm0, %v13056_v0 }
 0x1d3   :  { %v2721_v2 = vpop.f32.mrb[120].mxu0  ;;  %10071 = vmatprep.mubr.msk.bf16.mxu1 %vm10788_vm0, %v13056_v0  ;;  %10075 = vmatprep.subr.bf16.mxu0 %v13056_v0  ;;  %v2761_v38 = vpop.f32.mrb[120].mxu1  ;;  %v2878_v44 = vpack.c.bf16 %v1490_v24, %v1490_v24 }
 0x1d4   :  { %v2722_v18 = vadd.f32 %v11596_v58, %v2721_v2  ;;  %v9881_v60 = vpop.f32.mrb[121].mxu0  ;;  %10081 = vmatprep.subr.bf16.mxu1 %v13056_v0  ;;  %v2762_v17 = vadd.f32 %v11601_v61, %v2761_v38  ;;  %v9889_v25 = vpop.f32.mrb[121].mxu1  ;;  %v1370_v61 = vadd.f32 %v11608_v16, %v11585_v31 }
 0x1d5   :  { %v2724_v51 = vpop.f32.mrb[122].mxu0  ;;  %v2764_v21 = vpop.f32.mrb[122].mxu1 }
 0x1d6   :  { %v11917_v62 = vpack.c.bf16 %v2722_v18, %v2722_v18  ;;  %v9882_v54 = vpop.f32.mrb[123].mxu0  ;;  %v11919_v41 = vpack.c.bf16 %v2762_v17, %v2762_v17  ;;  %v9890_v5 = vpop.f32.mrb[123].mxu1  ;;  %v2875_v7 = vpack.c.bf16 %v1370_v61, %v1370_v61 }
 0x1d8   :  { %v4204_v58 = vsel %vm2911_vm2, %v11917_v62, 0  ;;  %10066 = vmatmul.mubr.msk.bf16.vlgmr.msra.gmra.mrb[180].mxu0 %vm2911_vm2, %v2873_v50  ;;  %v4250_v8 = vsel %vm2911_vm2, %v11919_v41, 0 }
 0x1d9   :  { %10072 = vmatmul.mubr.msk.bf16.vlgmr.msra.gmra.mrb[180].mxu1 %vm2911_vm2, %v2874_v55  ;;  %10076 = vmatpush3.bf16.xpose.msra.mxu0 %v4204_v58 }
 0x1da   :  { %10082 = vmatpush3.bf16.xpose.msra.mxu1 %v4250_v8  ;;  %10077 = vmatprep.mubr.msk.bf16.mxu0 %vm10788_vm0, %v13056_v0  ;;  %v4771_v39 = vpop.permute.xlu0 %4770  ;;  %v4822_v49 = vpop.permute.xlu1 %4821 }
 0x1db   :  { %v2801_v43 = vpop.f32.mrb[124].mxu0  ;;  %10083 = vmatprep.mubr.msk.bf16.mxu1 %vm10788_vm0, %v13056_v0  ;;  %10087 = vmatprep.subr.bf16.mxu0 %v13056_v0  ;;  %v2841_v10 = vpop.f32.mrb[124].mxu1 }
 0x1dc   :  { %v2802_v57 = vadd.f32 %v11621_v29, %v2801_v43  ;;  %10093 = vmatprep.subr.bf16.mxu1 %v13056_v0  ;;  %v9897_v28 = vpop.f32.mrb[125].mxu0  ;;  %v2842_v31 = vadd.f32 %v11629_v36, %v2841_v10  ;;  %v9905_v16 = vpop.f32.mrb[125].mxu1  ;;  %v1450_v36 = vadd.f32 %v11640_v27, %v11589_v45  ;;  %v4778_v45 = vsel %vm4776_vm3, %v4771_v39, 0 }
 0x1dd   :  { %v2804_v48 = vpop.f32.mrb[126].mxu0  ;;  %v2844_v34 = vpop.f32.mrb[126].mxu1  ;;  %v4827_v27 = vsel %vm4776_vm3, %v4822_v49, 0 }
 0x1de   :  { %v11939_v13 = vpack.c.bf16 %v2802_v57, %v2802_v57  ;;  %v9898_v23 = vpop.f32.mrb[127].mxu0  ;;  %v11941_v15 = vpack.c.bf16 %v2842_v31, %v2842_v31  ;;  %v9906_v9 = vpop.f32.mrb[127].mxu1  ;;  %v2877_v42 = vpack.c.bf16 %v1450_v36, %v1450_v36 }
 0x1e0   :  { %13072 = vst [vmem:[#allocation3_spill] sm:$0xff] %v11941_v15  ;;  %v4296_v29 = vsel %vm2911_vm2, %v11939_v13, 0  ;;  %10078 = vmatmul.mubr.msk.bf16.vlgmr.msra.gmra.mrb[184].mxu0 %vm2911_vm2, %v2875_v7  ;;  %v4342_v22 = vsel %vm2911_vm2, %v11941_v15, 0 }
 0x1e1   :  { %10084 = vmatmul.mubr.msk.bf16.vlgmr.msra.gmra.mrb[184].mxu1 %vm2911_vm2, %v2876_v14  ;;  %10088 = vmatpush3.bf16.xpose.msra.mxu0 %v4296_v29 }
 0x1e2   :  { %10094 = vmatpush3.bf16.xpose.msra.mxu1 %v4342_v22  ;;  %10089 = vmatprep.mubr.msk.bf16.mxu0 %vm10788_vm0, %v13056_v0 }
 0x1e3   :  { %10095 = vmatprep.mubr.msk.bf16.mxu1 %vm10788_vm0, %v13056_v0  ;;  %10099 = vmatprep.subr.bf16.mxu0 %v13056_v0 }
 0x1e4   :  { %10105 = vmatprep.subr.bf16.mxu1 %v13056_v0 }
 0x1e8   :  { %10090 = vmatmul.mubr.msk.bf16.vlgmr.msra.gmra.mrb[188].mxu0 %vm2911_vm2, %v2877_v42 }
 0x1e9   :  { %10096 = vmatmul.mubr.msk.bf16.vlgmr.msra.gmra.mrb[188].mxu1 %vm2911_vm2, %v2878_v44  ;;  %10100 = vmatpush3.bf16.msra.mxu0 %v4778_v45 }
 0x1ea   :  { %10106 = vmatpush3.bf16.msra.mxu1 %v4827_v27  ;;  %10101 = vmatprep.mubr.msk.bf16.mxu0 %vm10788_vm0, %v13056_v0 }
 0x1eb   :  { %10111 = vmatprep.subr.bf16.mxu0 %v13056_v0  ;;  %10107 = vmatprep.mubr.msk.bf16.mxu1 %vm10788_vm0, %v13056_v0 }
 0x1ec   :  { %10117 = vmatprep.subr.bf16.mxu1 %v13056_v0 }
 0x243   :  { %v11969_v47 = vpop.f32.mrb[128].mxu0 }
 0x244   :  { %v11971_v6 = vpop.f32.mrb[128].mxu1  ;;  %v9911_v46 = vpop.f32.mrb[129].mxu0  ;;  %v4385_v2 = vsel %vm4384_vm4, %v11969_v47, -inf }
 0x245   :  { %v9917_v18 = vpop.f32.mrb[129].mxu1  ;;  %4386 = vmax.xlane.f32.xlu0 %v4385_v2  ;;  %v2955_v38 = vpop.f32.mrb[130].mxu0  ;;  %v4388_v51 = vsel %vm4384_vm4, %v11971_v6, -inf }
 0x246   :  { %v3001_v60 = vpop.f32.mrb[130].mxu1  ;;  %v9912_v17 = vpop.f32.mrb[131].mxu0 }
 0x247   :  { %v9918_v25 = vpop.f32.mrb[131].mxu1 }
 0x249   :  { %4389 = vmax.xlane.f32.xlu0 %v4388_v51 }
 0x24b   :  { %v11977_v50 = vpop.f32.mrb[132].mxu0 }
 0x24c   :  { %v11979_v21 = vpop.f32.mrb[132].mxu1  ;;  %v9923_v54 = vpop.f32.mrb[133].mxu0  ;;  %v4391_v55 = vsel %vm4384_vm4, %v11977_v50, -inf }
 0x24d   :  { %v9929_v5 = vpop.f32.mrb[133].mxu1  ;;  %4392 = vmax.xlane.f32.xlu1 %v4391_v55  ;;  %v3047_v58 = vpop.f32.mrb[134].mxu0  ;;  %v4394_v43 = vsel %vm4384_vm4, %v11979_v21, -inf }
 0x24e   :  { %v3093_v8 = vpop.f32.mrb[134].mxu1  ;;  %v9924_v61 = vpop.f32.mrb[135].mxu0 }
 0x24f   :  { %v9930_v11 = vpop.f32.mrb[135].mxu1 }
 0x251   :  { %4395 = vmax.xlane.f32.xlu1 %v4394_v43 }
 0x253   :  { %v11985_v57 = vpop.f32.mrb[136].mxu0 }
 0x254   :  { %v11987_v10 = vpop.f32.mrb[136].mxu1  ;;  %v9935_v28 = vpop.f32.mrb[137].mxu0 }
 0x255   :  { %v9941_v31 = vpop.f32.mrb[137].mxu1  ;;  %v4400_v16 = vsel %vm4384_vm4, %v11987_v10, -inf  ;;  %v3139_v48 = vpop.f32.mrb[138].mxu0 }
 0x256   :  { %v3185_v7 = vpop.f32.mrb[138].mxu1  ;;  %4401 = vmax.xlane.f32.xlu1 %v4400_v16  ;;  %v9936_v34 = vpop.f32.mrb[139].mxu0 }
 0x257   :  { %v9942_v23 = vpop.f32.mrb[139].mxu1 }
 0x25b   :  { %v11991_v14 = vpop.f32.mrb[140].mxu0 }
 0x25c   :  { %v11993_v9 = vpop.f32.mrb[140].mxu1  ;;  %v9947_v29 = vpop.f32.mrb[141].mxu0 }
 0x25d   :  { %v9953_v22 = vpop.f32.mrb[141].mxu1  ;;  %v4406_v36 = vsel %vm4384_vm4, %v11993_v9, -inf  ;;  %v3231_v24 = vpop.f32.mrb[142].mxu0 }
 0x25e   :  { %v3277_v39 = vpop.f32.mrb[142].mxu1  ;;  %4407 = vmax.xlane.f32.xlu1 %v4406_v36  ;;  %v9948_v42 = vpop.f32.mrb[143].mxu0 }
 0x25f   :  { %v9954_v49 = vpop.f32.mrb[143].mxu1  ;;  %5262 = vrot.lane.b32.xlu0 %v11719_v59, %s10789_s30 }
 0x260   :  { %v4397_v49 = vsel %vm4384_vm4, %v11985_v57, -inf }
 0x263   :  { %v11999_v44 = vpop.f32.mrb[144].mxu0 }
 0x264   :  { %v12001_v45 = vpop.f32.mrb[144].mxu1  ;;  %v9959_v27 = vpop.f32.mrb[145].mxu0 }
 0x265   :  { %v9965_v46 = vpop.f32.mrb[145].mxu1  ;;  %v4412_v2 = vsel %vm4384_vm4, %v12001_v45, -inf  ;;  %v3323_v18 = vpop.f32.mrb[146].mxu0 }
 0x266   :  { %v3369_v38 = vpop.f32.mrb[146].mxu1  ;;  %4413 = vmax.xlane.f32.xlu1 %v4412_v2  ;;  %v9960_v60 = vpop.f32.mrb[147].mxu0  ;;  %v4403_v18 = vsel %vm4384_vm4, %v11991_v14, -inf }
 0x267   :  { %v9966_v17 = vpop.f32.mrb[147].mxu1 }
 0x26b   :  { %v12005_v25 = vpop.f32.mrb[148].mxu0 }
 0x26c   :  { %v12007_v51 = vpop.f32.mrb[148].mxu1  ;;  %v9971_v54 = vpop.f32.mrb[149].mxu0 }
 0x26d   :  { %v9977_v59 = vpop.f32.mrb[149].mxu1  ;;  %v4418_v55 = vsel %vm4384_vm4, %v12007_v51, -inf  ;;  %v3415_v5 = vpop.f32.mrb[150].mxu0 }
 0x26e   :  { %v3461_v58 = vpop.f32.mrb[150].mxu1  ;;  %4419 = vmax.xlane.f32.xlu1 %v4418_v55  ;;  %v9972_v8 = vpop.f32.mrb[151].mxu0  ;;  %v4409_v5 = vsel %vm4384_vm4, %v11999_v44, -inf }
 0x26f   :  { %v9978_v61 = vpop.f32.mrb[151].mxu1 }
 0x273   :  { %v12011_v11 = vpop.f32.mrb[152].mxu0 }
 0x274   :  { %v12013_v43 = vpop.f32.mrb[152].mxu1  ;;  %v9983_v28 = vpop.f32.mrb[153].mxu0 }
 0x275   :  { %v9989_v31 = vpop.f32.mrb[153].mxu1  ;;  %v4424_v16 = vsel %vm4384_vm4, %v12013_v43, -inf  ;;  %v3507_v48 = vpop.f32.mrb[154].mxu0  ;;  %v4415_v28 = vsel %vm4384_vm4, %v12005_v25, -inf }
 0x276   :  { %v3553_v7 = vpop.f32.mrb[154].mxu1  ;;  %4425 = vmax.xlane.f32.xlu1 %v4424_v16  ;;  %v9984_v34 = vpop.f32.mrb[155].mxu0 }
 0x277   :  { %v9990_v23 = vpop.f32.mrb[155].mxu1 }
 0x27b   :  { %v12017_v29 = vpop.f32.mrb[156].mxu0 }
 0x27c   :  { %v12019_v22 = vpop.f32.mrb[156].mxu1  ;;  %v9995_v36 = vpop.f32.mrb[157].mxu0 }
 0x27d   :  { %v10001_v24 = vpop.f32.mrb[157].mxu1  ;;  %v4430_v39 = vsel %vm4384_vm4, %v12019_v22, -inf  ;;  %v3599_v42 = vpop.f32.mrb[158].mxu0  ;;  %v4421_v36 = vsel %vm4384_vm4, %v12011_v11, -inf }
 0x27e   :  { %v3645_v27 = vpop.f32.mrb[158].mxu1  ;;  %4431 = vmax.xlane.f32.xlu1 %v4430_v39  ;;  %4398 = vmax.xlane.f32.xlu0 %v4397_v49  ;;  %v9996_v46 = vpop.f32.mrb[159].mxu0  ;;  %v4427_v49 = vsel %vm4384_vm4, %v12017_v29, -inf }
 0x27f   :  { %v10002_v2 = vpop.f32.mrb[159].mxu1 }
 0x282   :  { %4404 = vmax.xlane.f32.xlu0 %v4403_v18 }
 0x283   :  { %v12027_v38 = vpop.f32.mrb[160].mxu0 }
 0x284   :  { %v12029_v60 = vpop.f32.mrb[160].mxu1  ;;  %v10007_v17 = vpop.f32.mrb[161].mxu0 }
 0x285   :  { %v10013_v54 = vpop.f32.mrb[161].mxu1  ;;  %v4436_v59 = vsel %vm4384_vm4, %v12029_v60, -inf  ;;  %v3691_v55 = vpop.f32.mrb[162].mxu0 }
 0x286   :  { %v3737_v58 = vpop.f32.mrb[162].mxu1  ;;  %4437 = vmax.xlane.f32.xlu1 %v4436_v59  ;;  %4410 = vmax.xlane.f32.xlu0 %v4409_v5  ;;  %v10008_v8 = vpop.f32.mrb[163].mxu0  ;;  %v4433_v59 = vsel %vm4384_vm4, %v12027_v38, -inf }
 0x287   :  { %v10014_v61 = vpop.f32.mrb[163].mxu1 }
 0x28a   :  { %4416 = vmax.xlane.f32.xlu0 %v4415_v28 }
 0x28b   :  { %v12037_v31 = vpop.f32.mrb[164].mxu0 }
 0x28c   :  { %v12039_v16 = vpop.f32.mrb[164].mxu1  ;;  %v10019_v48 = vpop.f32.mrb[165].mxu0  ;;  %v4439_v8 = vsel %vm4384_vm4, %v12037_v31, -inf }
 0x28d   :  { %v10025_v7 = vpop.f32.mrb[165].mxu1  ;;  %v4442_v34 = vsel %vm4384_vm4, %v12039_v16, -inf  ;;  %v3783_v23 = vpop.f32.mrb[166].mxu0 }
 0x28e   :  { %v3829_v24 = vpop.f32.mrb[166].mxu1  ;;  %4443 = vmax.xlane.f32.xlu1 %v4442_v34  ;;  %4422 = vmax.xlane.f32.xlu0 %v4421_v36  ;;  %v10020_v39 = vpop.f32.mrb[167].mxu0 }
 0x28f   :  { %v10026_v42 = vpop.f32.mrb[167].mxu1 }
 0x292   :  { %4428 = vmax.xlane.f32.xlu0 %v4427_v49 }
 0x293   :  { %v12047_v27 = vpop.f32.mrb[168].mxu0 }
 0x294   :  { %v12049_v46 = vpop.f32.mrb[168].mxu1  ;;  %v10031_v2 = vpop.f32.mrb[169].mxu0  ;;  %v4445_v23 = vsel %vm4384_vm4, %v12047_v27, -inf }
 0x295   :  { %v10037_v18 = vpop.f32.mrb[169].mxu1  ;;  %v4448_v17 = vsel %vm4384_vm4, %v12049_v46, -inf  ;;  %v3875_v54 = vpop.f32.mrb[170].mxu0 }
 0x296   :  { %v3921_v55 = vpop.f32.mrb[170].mxu1  ;;  %4449 = vmax.xlane.f32.xlu1 %v4448_v17  ;;  %4434 = vmax.xlane.f32.xlu0 %v4433_v59  ;;  %v10032_v5 = vpop.f32.mrb[171].mxu0 }
 0x297   :  { %v10038_v58 = vpop.f32.mrb[171].mxu1 }
 0x29a   :  { %4440 = vmax.xlane.f32.xlu0 %v4439_v8 }
 0x29b   :  { %v12057_v61 = vpop.f32.mrb[172].mxu0 }
 0x29c   :  { %v12059_v28 = vpop.f32.mrb[172].mxu1  ;;  %v10043_v48 = vpop.f32.mrb[173].mxu0  ;;  %v4451_v42 = vsel %vm4384_vm4, %v12057_v61, -inf }
 0x29d   :  { %v10049_v7 = vpop.f32.mrb[173].mxu1  ;;  %v3967_v34 = vpop.f32.mrb[174].mxu0  ;;  %v4454_v59 = vsel %vm4384_vm4, %v12059_v28, -inf }
 0x29e   :  { %v4013_v36 = vpop.f32.mrb[174].mxu1  ;;  %4446 = vmax.xlane.f32.xlu0 %v4445_v23  ;;  %v10044_v24 = vpop.f32.mrb[175].mxu0 }
 0x29f   :  { %v10050_v39 = vpop.f32.mrb[175].mxu1 }
 0x2a2   :  { %4452 = vmax.xlane.f32.xlu0 %v4451_v42 }
 0x2a3   :  { %v12065_v49 = vpop.f32.mrb[176].mxu0 }
 0x2a4   :  { %v12067_v2 = vpop.f32.mrb[176].mxu1  ;;  %v10055_v18 = vpop.f32.mrb[177].mxu0  ;;  %v4457_v8 = vsel %vm4384_vm4, %v12065_v49, -inf }
 0x2a5   :  { %v10061_v17 = vpop.f32.mrb[177].mxu1  ;;  %v4059_v54 = vpop.f32.mrb[178].mxu0  ;;  %v4460_v24 = vsel %vm4384_vm4, %v12067_v2, -inf }
 0x2a6   :  { %v4105_v55 = vpop.f32.mrb[178].mxu1  ;;  %4455 = vmax.xlane.f32.xlu0 %v4454_v59  ;;  %v10056_v5 = vpop.f32.mrb[179].mxu0 }
 0x2a7   :  { %v10062_v58 = vpop.f32.mrb[179].mxu1  ;;  %v12079_v18 = vpop.permute.xlu0 %4870 }
 0x2aa   :  { %4458 = vmax.xlane.f32.xlu0 %v4457_v8 }
 0x2ab   :  { %v12073_v48 = vpop.f32.mrb[180].mxu0  ;;  %v12083_v59 = vpop.permute.xlu0 %5017 }
 0x2ac   :  { %v12075_v7 = vpop.f32.mrb[180].mxu1  ;;  %v10067_v34 = vpop.f32.mrb[181].mxu0  ;;  %v4463_v54 = vsel %vm4384_vm4, %v12073_v48, -inf }
 0x2ad   :  { %13073 = vst [vmem:[#allocation4_spill] sm:$0xff] %v12075_v7  ;;  %v10073_v23 = vpop.f32.mrb[181].mxu1  ;;  %v4151_v36 = vpop.f32.mrb[182].mxu0 }
 0x2ae   :  { %v4197_v39 = vpop.f32.mrb[182].mxu1  ;;  %4461 = vmax.xlane.f32.xlu0 %v4460_v24  ;;  %v10068_v42 = vpop.f32.mrb[183].mxu0  ;;  %v4466_v36 = vsel %vm4384_vm4, %v12075_v7, -inf }
 0x2af   :  { %v10074_v17 = vpop.f32.mrb[183].mxu1 }
 0x2b2   :  { %4464 = vmax.xlane.f32.xlu0 %v4463_v54  ;;  %v12095_v54 = vpop.permute.xlu0 %5066 }
 0x2b3   :  { %v12085_v55 = vpop.f32.mrb[184].mxu0  ;;  %13076 = vst [vmem:[#allocation7_spill] sm:$0xff] %v12095_v54 }
 0x2b4   :  { %13074 = vst [vmem:[#allocation5_spill] sm:$0xff] %v12085_v55  ;;  %v12087_v5 = vpop.f32.mrb[184].mxu1  ;;  %v10079_v58 = vpop.f32.mrb[185].mxu0  ;;  %v4469_v17 = vsel %vm4384_vm4, %v12085_v55, -inf }
 0x2b5   :  { %13075 = vst [vmem:[#allocation6_spill] sm:$0xff] %v12087_v5  ;;  %v10085_v8 = vpop.f32.mrb[185].mxu1  ;;  %v4472_v34 = vsel %vm4384_vm4, %v12087_v5, -inf  ;;  %v4243_v23 = vpop.f32.mrb[186].mxu0 }
 0x2b6   :  { %v4289_v24 = vpop.f32.mrb[186].mxu1  ;;  %4473 = vmax.xlane.f32.xlu1 %v4472_v34  ;;  %4467 = vmax.xlane.f32.xlu0 %v4466_v36  ;;  %v10080_v39 = vpop.f32.mrb[187].mxu0 }
 0x2b7   :  { %v10086_v42 = vpop.f32.mrb[187].mxu1 }
 0x2ba   :  { %4470 = vmax.xlane.f32.xlu0 %v4469_v17  ;;  %v12105_v17 = vpop.permute.xlu0 %5115 }
 0x2bb   :  { %v12097_v58 = vpop.f32.mrb[188].mxu0  ;;  %13079 = vst [vmem:[#allocation10_spill] sm:$0xff] %v12105_v17 }
 0x2bc   :  { %13077 = vst [vmem:[#allocation8_spill] sm:$0xff] %v12097_v58  ;;  %v12099_v8 = vpop.f32.mrb[188].mxu1  ;;  %v10091_v0 = vpop.f32.mrb[189].mxu0  ;;  %v4475_v23 = vsel %vm4384_vm4, %v12097_v58, -inf }
 0x2bd   :  { %13078 = vst [vmem:[#allocation9_spill] sm:$0xff] %v12099_v8  ;;  %v10097_v15 = vpop.f32.mrb[189].mxu1  ;;  %v4478_v34 = vsel %vm4384_vm4, %v12099_v8, -inf  ;;  %v4335_v36 = vpop.f32.mrb[190].mxu0 }
 0x2be   :  { %v4381_v24 = vpop.f32.mrb[190].mxu1  ;;  %4479 = vmax.xlane.f32.xlu1 %v4478_v34  ;;  %4476 = vmax.xlane.f32.xlu0 %v4475_v23  ;;  %v10092_v39 = vpop.f32.mrb[191].mxu0 }
 0x2bf   :  { %v10098_v42 = vpop.f32.mrb[191].mxu1  ;;  %v12107_v54 = vpop.permute.xlu0 %5164 }
 0x2c0   :  { %13080 = vst [vmem:[#allocation11_spill] sm:$0xff] %v12107_v54  ;;  %v12111_v0 = vpop.permute.xlu1 %4919 }
 0x2c3   :  { %v12109_v5 = vpop.permute.xlu0 %5213 }
 0x2c4   :  { %13081 = vst [vmem:[#allocation12_spill] sm:$0xff] %v12109_v5  ;;  %v12116_v24 = vpop.permute.xlu1 %4968 }
 0x2d2   :  { %v4387_v55 = vpop.xlane.xlu0 %4386 }
 0x2d3   :  { %v4481_v15 = vsub.f32 %v11969_v47, %v4387_v55 }
 0x2d4   :  { %5311 = vrot.lane.b32.xlu0 %v11721_v33, %s10789_s30 }
 0x2d5   :  { %v4513_v36 = vmul.f32 1.442695, %v4481_v15 }
 0x2d6   :  { %v4390_v23 = vpop.xlane.xlu0 %4389 }
 0x2d7   :  { %10645 = vpow2.f32 %v4513_v36  ;;  %v4482_v34 = vsub.f32 %v11971_v6, %v4390_v23 }
 0x2d9   :  { %v4515_v39 = vmul.f32 1.442695, %v4482_v34 }
 0x2da   :  { %v4393_v42 = vpop.xlane.xlu1 %4392 }
 0x2db   :  { %10647 = vpow2.f32 %v4515_v39  ;;  %v4483_v5 = vsub.f32 %v11977_v50, %v4393_v42 }
 0x2dd   :  { %v4517_v54 = vmul.f32 1.442695, %v4483_v5 }
 0x2de   :  { %v4396_v17 = vpop.xlane.xlu1 %4395 }
 0x2df   :  { %10649 = vpow2.f32 %v4517_v54  ;;  %v4484_v47 = vsub.f32 %v11979_v21, %v4396_v17  ;;  %v12137_v17 = vpop.permute.xlu0 %5262 }
 0x2e0   :  { %13082 = vst [vmem:[#allocation13_spill] sm:$0xff] %v12137_v17 }
 0x2e1   :  { %v12121_v55 = vpop.eup %10645  ;;  %v4519_v33 = vmul.f32 1.442695, %v4484_v47 }
 0x2e2   :  { %v4577_v15 = vsel %vm4384_vm4, %v12121_v55, 0.0 }
 0x2e3   :  { %10651 = vpow2.f32 %v4519_v33  ;;  %4578 = vadd.xlane.f32.xlu1 %v4577_v15  ;;  %v4402_v23 = vpop.xlane.xlu1 %4401 }
 0x2e4   :  { %v4486_v34 = vsub.f32 %v11987_v10, %v4402_v23 }
 0x2e5   :  { %v12125_v36 = vpop.eup %10647 }
 0x2e6   :  { %v4580_v6 = vsel %vm4384_vm4, %v12125_v36, 0.0  ;;  %v4523_v33 = vmul.f32 1.442695, %v4486_v34 }
 0x2e7   :  { %4581 = vadd.xlane.f32.xlu1 %v4580_v6 }
 0x2e9   :  { %v12129_v50 = vpop.eup %10649 }
 0x2ea   :  { %v4583_v5 = vsel %vm4384_vm4, %v12129_v50, 0.0 }
 0x2eb   :  { %4584 = vadd.xlane.f32.xlu1 %v4583_v5  ;;  %v4408_v6 = vpop.xlane.xlu1 %4407 }
 0x2ec   :  { %v4488_v8 = vsub.f32 %v11993_v9, %v4408_v6 }
 0x2ed   :  { %v12133_v21 = vpop.eup %10651 }
 0x2ee   :  { %v4586_v54 = vsel %vm4384_vm4, %v12133_v21, 0.0  ;;  %v4527_v7 = vmul.f32 1.442695, %v4488_v8 }
 0x2ef   :  { %4587 = vadd.xlane.f32.xlu1 %v4586_v54 }
 0x2f3   :  { %v4414_v23 = vpop.xlane.xlu1 %4413 }
 0x30b   :  { %v4399_v39 = vpop.xlane.xlu0 %4398 }
 0x30c   :  { %v4485_v42 = vsub.f32 %v11985_v57, %v4399_v39 }
 0x30e   :  { %v4521_v47 = vmul.f32 1.442695, %v4485_v42 }
 0x30f   :  { %v4405_v15 = vpop.xlane.xlu0 %4404 }
 0x310   :  { %v4487_v5 = vsub.f32 %v11991_v14, %v4405_v15  ;;  %10653 = vpow2.f32 %v4521_v47  ;;  %v4490_v14 = vsub.f32 %v12001_v45, %v4414_v23 }
 0x311   :  { %10655 = vpow2.f32 %v4523_v33 }
 0x312   :  { %v4525_v58 = vmul.f32 1.442695, %v4487_v5 }
 0x313   :  { %v4411_v54 = vpop.xlane.xlu0 %4410 }
 0x314   :  { %10657 = vpow2.f32 %v4525_v58  ;;  %v4489_v17 = vsub.f32 %v11999_v44, %v4411_v54  ;;  %v4531_v58 = vmul.f32 1.442695, %v4490_v14 }
 0x315   :  { %10659 = vpow2.f32 %v4527_v7 }
 0x316   :  { %v4529_v42 = vmul.f32 1.442695, %v4489_v17 }
 0x317   :  { %v4417_v10 = vpop.xlane.xlu0 %4416 }
 0x318   :  { %v4491_v57 = vsub.f32 %v12005_v25, %v4417_v10  ;;  %v4420_v10 = vpop.xlane.xlu1 %4419 }
 0x31a   :  { %v4533_v39 = vmul.f32 1.442695, %v4491_v57  ;;  %v12145_v34 = vpop.eup %10653  ;;  %v4492_v57 = vsub.f32 %v12007_v51, %v4420_v10 }
 0x31b   :  { %v4589_v9 = vsel %vm4384_vm4, %v12145_v34, 0.0  ;;  %v12150_v47 = vpop.eup %10655  ;;  %v4423_v23 = vpop.xlane.xlu0 %4422 }
 0x31c   :  { %10661 = vpow2.f32 %v4533_v39  ;;  %4590 = vadd.xlane.f32.xlu1 %v4589_v9  ;;  %v4592_v44 = vsel %vm4384_vm4, %v12150_v47, 0.0 }
 0x31d   :  { %10663 = vpow2.f32 %v4529_v42 }
 0x31e   :  { %v12154_v25 = vpop.eup %10657  ;;  %10665 = vpow2.f32 %v4531_v58 }
 0x31f   :  { %v4595_v45 = vsel %vm4384_vm4, %v12154_v25, 0.0  ;;  %v12158_v7 = vpop.eup %10659  ;;  %v4429_v39 = vpop.xlane.xlu0 %4428 }
 0x320   :  { %4593 = vadd.xlane.f32.xlu1 %v4592_v44  ;;  %v4598_v33 = vsel %vm4384_vm4, %v12158_v7, 0.0 }
 0x324   :  { %4596 = vadd.xlane.f32.xlu1 %v4595_v45 }
 0x326   :  { %v12160_v8 = vpop.eup %10661 }
 0x327   :  { %v4607_v17 = vsel %vm4384_vm4, %v12160_v8, 0.0  ;;  %v12166_v15 = vpop.eup %10663 }
 0x328   :  { %4608 = vadd.xlane.f32.xlu0 %v4607_v17  ;;  %4599 = vadd.xlane.f32.xlu1 %v4598_v33  ;;  %v4601_v6 = vsel %vm4384_vm4, %v12166_v15, 0.0  ;;  %v12170_v5 = vpop.eup %10665 }
 0x329   :  { %v4604_v54 = vsel %vm4384_vm4, %v12170_v5, 0.0 }
 0x32c   :  { %4602 = vadd.xlane.f32.xlu1 %v4601_v6 }
 0x330   :  { %4605 = vadd.xlane.f32.xlu1 %v4604_v54 }
 0x33e   :  { %5360 = vrot.lane.b32.xlu0 %v11741_v53, %s10789_s30  ;;  %v4535_v53 = vmul.f32 1.442695, %v4492_v57 }
 0x340   :  { %10667 = vpow2.f32 %v4535_v53 }
 0x341   :  { %6046 = vrot.lane.b32.xlu1 %v11895_v52, %s10789_s30  ;;  %v4426_v52 = vpop.xlane.xlu1 %4425 }
 0x342   :  { %5409 = vrot.lane.b32.xlu0 %v11743_v56, %s10789_s30  ;;  %v4493_v56 = vsub.f32 %v12011_v11, %v4423_v23 }
 0x344   :  { %v4537_v14 = vmul.f32 1.442695, %v4493_v56 }
 0x346   :  { %5458 = vrot.lane.b32.xlu0 %v11763_v19, %s10789_s30  ;;  %v4494_v19 = vsub.f32 %v12013_v43, %v4426_v52  ;;  %10669 = vpow2.f32 %v4537_v14 }
 0x348   :  { %v4539_v51 = vmul.f32 1.442695, %v4494_v19 }
 0x34a   :  { %5507 = vrot.lane.b32.xlu0 %v11765_v26, %s10789_s30  ;;  %v4432_v26 = vpop.xlane.xlu1 %4431  ;;  %10671 = vpow2.f32 %v4539_v51  ;;  %v12199_v58 = vpop.eup %10667 }
 0x34e   :  { %5556 = vrot.lane.b32.xlu0 %v11785_v4, %s10789_s30  ;;  %v4435_v4 = vpop.xlane.xlu0 %4434  ;;  %v4438_v42 = vpop.xlane.xlu1 %4437 }
 0x34f   :  { %v4497_v45 = vsub.f32 %v12027_v38, %v4435_v4  ;;  %v4498_v17 = vsub.f32 %v12029_v60, %v4438_v42 }
 0x351   :  { %v4545_v33 = vmul.f32 1.442695, %v4497_v45  ;;  %v4547_v54 = vmul.f32 1.442695, %v4498_v17  ;;  %v4876_v45 = vsel %vm4776_vm3, %v12079_v18, 0 }
 0x352   :  { %5605 = vrot.lane.b32.xlu0 %v11787_v63, %s10789_s30  ;;  %v4495_v63 = vsub.f32 %v12017_v29, %v4429_v39  ;;  %v4444_v11 = vpop.xlane.xlu1 %4443  ;;  %v4441_v43 = vpop.xlane.xlu0 %4440  ;;  %v4610_v29 = vsel %vm4384_vm4, %v12199_v58, 0.0 }
 0x353   :  { %v4500_v53 = vsub.f32 %v12039_v16, %v4444_v11 }
 0x354   :  { %v4541_v9 = vmul.f32 1.442695, %v4495_v63 }
 0x355   :  { %v4551_v19 = vmul.f32 1.442695, %v4500_v53 }
 0x356   :  { %5654 = vrot.lane.b32.xlu0 %v11807_v12, %s10789_s30  ;;  %v4496_v12 = vsub.f32 %v12019_v22, %v4432_v26  ;;  %10673 = vpow2.f32 %v4541_v9  ;;  %v4450_v44 = vpop.xlane.xlu1 %4449  ;;  %v4447_v22 = vpop.xlane.xlu0 %4446 }
 0x357   :  { %v4502_v4 = vsub.f32 %v12049_v46, %v4450_v44 }
 0x359   :  { %v4555_v11 = vmul.f32 1.442695, %v4502_v4  ;;  %v13084_v4 = vld [vmem:[#allocation4_spill] sm:$0xff] }
 0x35a   :  { %5703 = vrot.lane.b32.xlu0 %v11809_v32, %s10789_s30  ;;  %v4543_v32 = vmul.f32 1.442695, %v4496_v12  ;;  %v4453_v23 = vpop.xlane.xlu0 %4452 }
 0x35c   :  { %10675 = vpow2.f32 %v4543_v32 }
 0x35d   :  { %10677 = vpow2.f32 %v4545_v33  ;;  %v13083_v33 = vmov 0.0  }
 0x35e   :  { %5752 = vrot.lane.b32.xlu0 %v11829_v20, %s10789_s30  ;;  %v12206_v20 = vpop.eup %10669  ;;  %10679 = vpow2.f32 %v4547_v54  ;;  %v4456_v39 = vpop.xlane.xlu0 %4455 }
 0x35f   :  { %v4613_v6 = vsel %vm4384_vm4, %v12206_v20, 0.0  ;;  %v12215_v38 = vpop.eup %10671 }
 0x360   :  { %v4616_v60 = vsel %vm4384_vm4, %v12215_v38, 0.0  ;;  %v12224_v57 = vpop.eup %10673 }
 0x362   :  { %5801 = vrot.lane.b32.xlu0 %v11831_v1, %s10789_s30  ;;  %v12211_v1 = vpop.xlane.xlu1 %4473  ;;  %v4459_v42 = vpop.xlane.xlu0 %4458 }
 0x363   :  { %v4505_v54 = vsub.f32 %v12065_v49, %v4459_v42  ;;  %v4974_v49 = vsel %vm4776_vm3, %v12116_v24, 0 }
 0x365   :  { %4611 = vadd.xlane.f32.xlu1 %v4610_v29  ;;  %v4504_v29 = vsub.f32 %v12059_v28, %v4456_v39  ;;  %v4925_v28 = vsel %vm4776_vm3, %v12111_v0, 0 }
 0x366   :  { %5850 = vrot.lane.b32.xlu0 %v11851_v30, %s10789_s30  ;;  %v4499_v30 = vsub.f32 %v12037_v31, %v4441_v43  ;;  %v12220_v10 = vpop.xlane.xlu1 %4479  ;;  %v4619_v31 = vsel %vm4384_vm4, %v12224_v57, 0.0  ;;  %v12231_v56 = vpop.eup %10675 }
 0x367   :  { %v4622_v16 = vsel %vm4384_vm4, %v12231_v56, 0.0  ;;  %v12238_v14 = vpop.eup %10677 }
 0x368   :  { %v12245_v63 = vpop.eup %10679 }
 0x369   :  { %4614 = vadd.xlane.f32.xlu1 %v4613_v6  ;;  %v4628_v43 = vsel %vm4384_vm4, %v12245_v63, 0.0 }
 0x36a   :  { %5899 = vrot.lane.b32.xlu0 %v11853_v37, %s10789_s30  ;;  %v4549_v37 = vmul.f32 1.442695, %v4499_v30 }
 0x36d   :  { %4617 = vadd.xlane.f32.xlu1 %v4616_v60 }
 0x36e   :  { %5948 = vrot.lane.b32.xlu0 %v11873_v40, %s10789_s30  ;;  %v4501_v40 = vsub.f32 %v12047_v27, %v4447_v22  ;;  %v4625_v27 = vsel %vm4384_vm4, %v12238_v14, 0.0 }
 0x370   :  { %v4579_v52 = vpop.xlane.xlu1 %4578 }
 0x371   :  { %10681 = vrcp.f32 %v4579_v52  ;;  %4620 = vadd.xlane.f32.xlu1 %v4619_v31 }
 0x372   :  { %5997 = vrot.lane.b32.xlu0 %v11875_v3, %s10789_s30  ;;  %10683 = vpow2.f32 %v4549_v37  ;;  %v4553_v3 = vmul.f32 1.442695, %v4501_v40 }
 0x374   :  { %v4582_v26 = vpop.xlane.xlu1 %4581 }
 0x375   :  { %10685 = vrcp.f32 %v4582_v26  ;;  %4623 = vadd.xlane.f32.xlu1 %v4622_v16 }
 0x376   :  { %6095 = vrot.lane.b32.xlu0 %v11897_v35, %s10789_s30  ;;  %10687 = vpow2.f32 %v4551_v19  ;;  %v4503_v35 = vsub.f32 %v12057_v61, %v4453_v23  ;;  %v4462_v61 = vpop.xlane.xlu0 %4461 }
 0x377   :  { %v4506_v37 = vsub.f32 %v12067_v2, %v4462_v61  ;;  %v5023_v2 = vsel %vm4776_vm3, %v12083_v59, 0 }
 0x378   :  { %v4585_v51 = vpop.xlane.xlu1 %4584 }
 0x379   :  { %10689 = vrcp.f32 %v4585_v51  ;;  %4626 = vadd.xlane.f32.xlu1 %v4625_v27 }
 0x37a   :  { %6144 = vrot.lane.b32.xlu0 %v11917_v62, %s10789_s30  ;;  %10691 = vpow2.f32 %v4553_v3  ;;  %v4465_v23 = vpop.xlane.xlu0 %4464 }
 0x37b   :  { %v10682_v12 = vpop.eup %10681  ;;  %v4507_v40 = vsub.f32 %v12073_v48, %v4465_v23 }
 0x37c   :  { %v4674_v46 = vmul.f32 %v10682_v12, %v12121_v55  ;;  %v4588_v9 = vpop.xlane.xlu1 %4587  ;;  %v12253_v32 = vpop.eup %10683  ;;  %v4557_v55 = vmul.f32 1.442695, %v4503_v35  ;;  %v13085_v12 = vld [vmem:[#allocation5_spill] sm:$0xff] }
 0x37d   :  { %10693 = vrcp.f32 %v4588_v9  ;;  %4629 = vadd.xlane.f32.xlu1 %v4628_v43  ;;  %v4631_v17 = vsel %vm4384_vm4, %v12253_v32, 0.0  ;;  %v4565_v59 = vmul.f32 1.442695, %v4507_v40  ;;  %v13086_v9 = vld [vmem:[#allocation6_spill] sm:$0xff] }
 0x37e   :  { %6193 = vrot.lane.b32.xlu0 %v11919_v41, %s10789_s30  ;;  %v4737_v62 = vpack.c.bf16 %v4674_v46, %v4674_v46  ;;  %10695 = vpow2.f32 %v4555_v11  ;;  %v4468_v24 = vpop.xlane.xlu0 %4467  ;;  %v4510_v43 = vsub.f32 %v13086_v9, %v12211_v1  ;;  %v13088_v1 = vld [vmem:[#allocation9_spill] sm:$0xff] }
 0x37f   :  { %v10686_v44 = vpop.eup %10685  ;;  %10697 = vpow2.f32 %v4557_v55  ;;  %v4508_v3 = vsub.f32 %v13084_v4, %v4468_v24 }
 0x380   :  { %v4676_v22 = vmul.f32 %v10686_v44, %v12125_v36  ;;  %10102 = vmatmul.mubr.msk.bf16.vlgmr.msra.gmra.mrb[192].mxu0 %vm4772_vm5, %v4737_v62  ;;  %v12266_v41 = vpop.eup %10687  ;;  %v4559_v36 = vmul.f32 1.442695, %v4504_v29  ;;  %v4571_v55 = vmul.f32 1.442695, %v4510_v43  ;;  %v13087_v29 = vld [vmem:[#allocation8_spill] sm:$0xff] }
 0x381   :  { %10112 = vmatpush3.bf16.msra.mxu0 %v4876_v45  ;;  %10113 = vmatprep.mubr.msk.bf16.mxu0 %vm10788_vm0, %v13083_v33  ;;  %v4567_v27 = vmul.f32 1.442695, %v4508_v3  ;;  %v13089_v3 = vld [vmem:[#allocation7_spill] sm:$0xff] }
 0x382   :  { %4632 = vadd.xlane.f32.xlu1 %v4631_v17  ;;  %6242 = vrot.lane.b32.xlu0 %v11939_v13, %s10789_s30  ;;  %v4738_v18 = vpack.c.bf16 %v4676_v22, %v4676_v22  ;;  %v4634_v13 = vsel %vm4384_vm4, %v12266_v41, 0.0  ;;  %10699 = vpow2.f32 %v4559_v36  ;;  %v4471_v51 = vpop.xlane.xlu0 %4470 }
 0x383   :  { %v10690_v6 = vpop.eup %10689  ;;  %10123 = vmatprep.subr.bf16.mxu0 %v13083_v33  ;;  %v4509_v11 = vsub.f32 %v13085_v12, %v4471_v51  ;;  %v5072_v51 = vsel %vm4776_vm3, %v13089_v3, 0 }
 0x384   :  { %v4678_v30 = vmul.f32 %v10690_v6, %v12129_v50  ;;  %10108 = vmatmul.mubr.msk.bf16.vlgmr.msra.gmra.mrb[192].mxu1 %vm4772_vm5, %v4738_v18  ;;  %v12280_v60 = vpop.eup %10691  ;;  %v4561_v50 = vmul.f32 1.442695, %v4505_v54  ;;  %v4512_v6 = vsub.f32 %v13088_v1, %v12220_v10 }
 0x385   :  { %10118 = vmatpush3.bf16.msra.mxu1 %v4925_v28  ;;  %10119 = vmatprep.mubr.msk.bf16.mxu1 %vm10788_vm0, %v13083_v33  ;;  %v4637_v31 = vsel %vm4384_vm4, %v12280_v60, 0.0  ;;  %v4569_v62 = vmul.f32 1.442695, %v4509_v11 }
 0x386   :  { %4635 = vadd.xlane.f32.xlu1 %v4634_v13  ;;  %v4739_v0 = vpack.c.bf16 %v4678_v30, %v4678_v30  ;;  %10129 = vmatprep.subr.bf16.mxu1 %v13083_v33  ;;  %10701 = vpow2.f32 %v4561_v50  ;;  %v4477_v44 = vpop.xlane.xlu0 %4476  ;;  %v4575_v30 = vmul.f32 1.442695, %v4512_v6 }
 0x387   :  { %v10694_v53 = vpop.eup %10693  ;;  %v4511_v22 = vsub.f32 %v13087_v29, %v4477_v44 }
 0x388   :  { %v4680_v52 = vmul.f32 %v10694_v53, %v12133_v21  ;;  %10114 = vmatmul.mubr.msk.bf16.vlgmr.msra.gmra.mrb[196].mxu0 %vm4772_vm5, %v4739_v0  ;;  %v12292_v39 = vpop.eup %10695  ;;  %v4563_v21 = vmul.f32 1.442695, %v4506_v37 }
 0x389   :  { %10124 = vmatpush3.bf16.msra.mxu0 %v4974_v49  ;;  %10125 = vmatprep.mubr.msk.bf16.mxu0 %vm10788_vm0, %v13083_v33  ;;  %v4640_v26 = vsel %vm4384_vm4, %v12292_v39, 0.0  ;;  %v12303_v16 = vpop.eup %10697  ;;  %v4573_v28 = vmul.f32 1.442695, %v4511_v22 }
 0x38a   :  { %4638 = vadd.xlane.f32.xlu1 %v4637_v31  ;;  %v4740_v19 = vpack.c.bf16 %v4680_v52, %v4680_v52  ;;  %10135 = vmatprep.subr.bf16.mxu0 %v13083_v33  ;;  %10703 = vpow2.f32 %v4563_v21  ;;  %v4643_v48 = vsel %vm4384_vm4, %v12303_v16, 0.0 }
 0x38b   :  { %10705 = vpow2.f32 %v4565_v59 }
 0x38c   :  { %10120 = vmatmul.mubr.msk.bf16.vlgmr.msra.gmra.mrb[196].mxu1 %vm4772_vm5, %v4740_v19  ;;  %v12309_v42 = vpop.eup %10699  ;;  %10707 = vpow2.f32 %v4567_v27 }
 0x38d   :  { %10130 = vmatpush3.bf16.msra.mxu1 %v5023_v2  ;;  %10131 = vmatprep.mubr.msk.bf16.mxu1 %vm10788_vm0, %v13083_v33  ;;  %v4646_v35 = vsel %vm4384_vm4, %v12309_v42, 0.0  ;;  %10709 = vpow2.f32 %v4569_v62 }
 0x38e   :  { %4641 = vadd.xlane.f32.xlu1 %v4640_v26  ;;  %10141 = vmatprep.subr.bf16.mxu1 %v13083_v33  ;;  %10711 = vpow2.f32 %v4571_v55  ;;  %v5312_v26 = vpop.permute.xlu0 %5311 }
 0x38f   :  { %10713 = vpow2.f32 %v4573_v28 }
 0x390   :  { %v12314_v46 = vpop.eup %10701  ;;  %10715 = vpow2.f32 %v4575_v30 }
 0x391   :  { %v4649_v45 = vsel %vm4384_vm4, %v12314_v46, 0.0 }
 0x392   :  { %4644 = vadd.xlane.f32.xlu1 %v4643_v48 }
 0x394   :  { %v12320_v61 = vpop.eup %10703 }
 0x395   :  { %v4652_v17 = vsel %vm4384_vm4, %v12320_v61, 0.0  ;;  %v12325_v18 = vpop.eup %10705 }
 0x396   :  { %4647 = vadd.xlane.f32.xlu1 %v4646_v35  ;;  %v4655_v36 = vsel %vm4384_vm4, %v12325_v18, 0.0  ;;  %v12331_v54 = vpop.eup %10707  ;;  %v13090_v35 = vld [vmem:[#allocation10_spill] sm:$0xff] }
 0x397   :  { %v4658_v23 = vsel %vm4384_vm4, %v12331_v54, 0.0  ;;  %v12335_v13 = vpop.eup %10709  ;;  %v5121_v9 = vsel %vm4776_vm3, %v13090_v35, 0 }
 0x398   :  { %v4661_v0 = vsel %vm4384_vm4, %v12335_v13, 0.0  ;;  %v12339_v10 = vpop.eup %10711 }
 0x399   :  { %v4664_v49 = vsel %vm4384_vm4, %v12339_v10, 0.0  ;;  %v12343_v50 = vpop.eup %10713 }
 0x39a   :  { %4650 = vadd.xlane.f32.xlu1 %v4649_v45  ;;  %v4667_v52 = vsel %vm4384_vm4, %v12343_v50, 0.0  ;;  %v12347_v31 = vpop.eup %10715  ;;  %v13091_v45 = vld [vmem:[#allocation11_spill] sm:$0xff] }
 0x39b   :  { %v4670_v2 = vsel %vm4384_vm4, %v12347_v31, 0.0  ;;  %v5170_v55 = vsel %vm4776_vm3, %v13091_v45, 0 }
 0x39e   :  { %4653 = vadd.xlane.f32.xlu1 %v4652_v17  ;;  %v13092_v17 = vld [vmem:[#allocation12_spill] sm:$0xff] }
 0x39f   :  { %v5219_v1 = vsel %vm4776_vm3, %v13092_v17, 0 }
 0x3a2   :  { %4656 = vadd.xlane.f32.xlu1 %v4655_v36 }
 0x3a6   :  { %4659 = vadd.xlane.f32.xlu1 %v4658_v23  ;;  %v13094_v23 = vld [vmem:[#allocation13_spill] sm:$0xff] }
 0x3a9   :  { %v4591_v53 = vpop.xlane.xlu1 %4590 }
 0x3aa   :  { %4662 = vadd.xlane.f32.xlu1 %v4661_v0  ;;  %10717 = vrcp.f32 %v4591_v53  ;;  %v5268_v0 = vsel %vm4776_vm3, %v13094_v23, 0 }
 0x3ad   :  { %v4594_v37 = vpop.xlane.xlu1 %4593 }
 0x3ae   :  { %4665 = vadd.xlane.f32.xlu1 %v4664_v49  ;;  %10719 = vrcp.f32 %v4594_v37  ;;  %v5317_v37 = vsel %vm4776_vm3, %v5312_v26, 0 }
 0x3b1   :  { %v4597_v19 = vpop.xlane.xlu1 %4596 }
 0x3b2   :  { %4668 = vadd.xlane.f32.xlu1 %v4667_v52  ;;  %10721 = vrcp.f32 %v4597_v19 }
 0x3b4   :  { %v10718_v24 = vpop.eup %10717 }
 0x3b5   :  { %v4682_v21 = vmul.f32 %v10718_v24, %v12145_v34  ;;  %v4600_v40 = vpop.xlane.xlu1 %4599  ;;  %v4609_v12 = vpop.xlane.xlu0 %4608 }
 0x3b6   :  { %4671 = vadd.xlane.f32.xlu1 %v4670_v2  ;;  %10723 = vrcp.f32 %v4600_v40 }
 0x3b7   :  { %v4741_v59 = vpack.c.bf16 %v4682_v21, %v4682_v21 }
 0x3b8   :  { %v10720_v4 = vpop.eup %10719 }
 0x3b9   :  { %v4684_v48 = vmul.f32 %v10720_v4, %v12150_v47  ;;  %10126 = vmatmul.mubr.msk.bf16.vlgmr.msra.gmra.mrb[200].mxu0 %vm4772_vm5, %v4741_v59  ;;  %v4603_v27 = vpop.xlane.xlu1 %4602  ;;  %v5361_v52 = vpop.permute.xlu0 %5360 }
 0x3ba   :  { %10136 = vmatpush3.bf16.msra.mxu0 %v5072_v51  ;;  %10725 = vrcp.f32 %v4603_v27  ;;  %10137 = vmatprep.mubr.msk.bf16.mxu0 %vm10788_vm0, %v13083_v33  ;;  %v5366_v19 = vsel %vm4776_vm3, %v5361_v52, 0 }
 0x3bb   :  { %v4742_v34 = vpack.c.bf16 %v4684_v48, %v4684_v48  ;;  %10147 = vmatprep.subr.bf16.mxu0 %v13083_v33  ;;  %10727 = vrcp.f32 %v4609_v12 }
 0x3bc   :  { %v10722_v11 = vpop.eup %10721 }
 0x3bd   :  { %v4686_v43 = vmul.f32 %v10722_v11, %v12154_v25  ;;  %10132 = vmatmul.mubr.msk.bf16.vlgmr.msra.gmra.mrb[200].mxu1 %vm4772_vm5, %v4742_v34  ;;  %v4606_v47 = vpop.xlane.xlu1 %4605 }
 0x3be   :  { %10142 = vmatpush3.bf16.msra.mxu1 %v5121_v9  ;;  %10729 = vrcp.f32 %v4606_v47  ;;  %10143 = vmatprep.mubr.msk.bf16.mxu1 %vm10788_vm0, %v13083_v33 }
 0x3bf   :  { %v4743_v62 = vpack.c.bf16 %v4686_v43, %v4686_v43  ;;  %10153 = vmatprep.subr.bf16.mxu1 %v13083_v33 }
 0x3c0   :  { %v10724_v44 = vpop.eup %10723 }
 0x3c1   :  { %v4688_v29 = vmul.f32 %v10724_v44, %v12158_v7  ;;  %10138 = vmatmul.mubr.msk.bf16.vlgmr.msra.gmra.mrb[204].mxu0 %vm4772_vm5, %v4743_v62  ;;  %v13093_v7 = vld [vmem:[#allocation3_spill] sm:$0xff]  ;;  %v12400_v2 = vpop.permute.xlu1 %6046 }
 0x3c2   :  { %10148 = vmatpush3.bf16.msra.mxu0 %v5170_v55  ;;  %10149 = vmatprep.mubr.msk.bf16.mxu0 %vm10788_vm0, %v13083_v33 }
 0x3c3   :  { %v4744_v25 = vpack.c.bf16 %v4688_v29, %v4688_v29  ;;  %10159 = vmatprep.subr.bf16.mxu0 %v13083_v33 }
 0x3c4   :  { %v10726_v22 = vpop.eup %10725 }
 0x3c5   :  { %v4690_v6 = vmul.f32 %v10726_v22, %v12166_v15  ;;  %10144 = vmatmul.mubr.msk.bf16.vlgmr.msra.gmra.mrb[204].mxu1 %vm4772_vm5, %v4744_v25  ;;  %v10728_v28 = vpop.eup %10727 }
 0x3c6   :  { %10154 = vmatpush3.bf16.msra.mxu1 %v5219_v1  ;;  %10155 = vmatprep.mubr.msk.bf16.mxu1 %vm10788_vm0, %v13083_v33  ;;  %v4694_v15 = vmul.f32 %v10728_v28, %v12160_v8  ;;  %v5410_v8 = vpop.permute.xlu0 %5409 }
 0x3c7   :  { %6291 = vrot.lane.b32.xlu1 %v13093_v7, %s10789_s30  ;;  %v4745_v36 = vpack.c.bf16 %v4690_v6, %v4690_v6  ;;  %10165 = vmatprep.subr.bf16.mxu1 %v13083_v33  ;;  %v5415_v35 = vsel %vm4776_vm3, %v5410_v8, 0 }
 0x3c8   :  { %v10730_v30 = vpop.eup %10729 }
 0x3c9   :  { %v4692_v53 = vmul.f32 %v10730_v30, %v12170_v5  ;;  %10150 = vmatmul.mubr.msk.bf16.vlgmr.msra.gmra.mrb[208].mxu0 %vm4772_vm5, %v4745_v36  ;;  %v4747_v5 = vpack.c.bf16 %v4694_v15, %v4694_v15 }
 0x3ca   :  { %10160 = vmatpush3.bf16.msra.mxu0 %v5268_v0  ;;  %10161 = vmatprep.mubr.msk.bf16.mxu0 %vm10788_vm0, %v13083_v33  ;;  %v5459_v24 = vpop.permute.xlu0 %5458 }
 0x3cb   :  { %v4746_v49 = vpack.c.bf16 %v4692_v53, %v4692_v53  ;;  %10171 = vmatprep.subr.bf16.mxu0 %v13083_v33  ;;  %v5464_v62 = vsel %vm4776_vm3, %v5459_v24, 0 }
 0x3cd   :  { %10156 = vmatmul.mubr.msk.bf16.vlgmr.msra.gmra.mrb[208].mxu1 %vm4772_vm5, %v4746_v49 }
 0x3ce   :  { %10166 = vmatpush3.bf16.msra.mxu1 %v5317_v37  ;;  %10167 = vmatprep.mubr.msk.bf16.mxu1 %vm10788_vm0, %v13083_v33  ;;  %v5508_v21 = vpop.permute.xlu0 %5507 }
 0x3cf   :  { %10177 = vmatprep.subr.bf16.mxu1 %v13083_v33  ;;  %v5513_v25 = vsel %vm4776_vm3, %v5508_v21, 0 }
 0x3d1   :  { %10162 = vmatmul.mubr.msk.bf16.vlgmr.msra.gmra.mrb[212].mxu0 %vm4772_vm5, %v4747_v5 }
 0x3d2   :  { %10172 = vmatpush3.bf16.msra.mxu0 %v5366_v19  ;;  %10173 = vmatprep.mubr.msk.bf16.mxu0 %vm10788_vm0, %v13083_v33  ;;  %v5557_v26 = vpop.permute.xlu0 %5556 }
 0x3d3   :  { %10183 = vmatprep.subr.bf16.mxu0 %v13083_v33  ;;  %v5562_v7 = vsel %vm4776_vm3, %v5557_v26, 0 }
 0x3d6   :  { %v5606_v3 = vpop.permute.xlu0 %5605 }
 0x3d7   :  { %v5611_v23 = vsel %vm4776_vm3, %v5606_v3, 0 }
 0x3da   :  { %v5655_v11 = vpop.permute.xlu0 %5654 }
 0x3db   :  { %v5660_v37 = vsel %vm4776_vm3, %v5655_v11, 0 }
 0x3f2   :  { %v4612_v40 = vpop.xlane.xlu1 %4611 }
 0x3f3   :  { %10731 = vrcp.f32 %v4612_v40 }
 0x3f6   :  { %v4615_v59 = vpop.xlane.xlu1 %4614 }
 0x3f7   :  { %10733 = vrcp.f32 %v4615_v59 }
 0x3fa   :  { %v4618_v4 = vpop.xlane.xlu1 %4617 }
 0x3fb   :  { %10735 = vrcp.f32 %v4618_v4 }
 0x3fd   :  { %v10732_v51 = vpop.eup %10731 }
 0x3fe   :  { %v4696_v48 = vmul.f32 %v10732_v51, %v12199_v58  ;;  %v4621_v27 = vpop.xlane.xlu1 %4620 }
 0x3ff   :  { %10737 = vrcp.f32 %v4621_v27 }
 0x400   :  { %v4748_v12 = vpack.c.bf16 %v4696_v48, %v4696_v48 }
 0x401   :  { %v10734_v34 = vpop.eup %10733 }
 0x402   :  { %v4698_v9 = vmul.f32 %v10734_v34, %v12206_v20  ;;  %v4624_v43 = vpop.xlane.xlu1 %4623  ;;  %10168 = vmatmul.mubr.msk.bf16.vlgmr.msra.gmra.mrb[212].mxu1 %vm4772_vm5, %v4748_v12  ;;  %v5704_v20 = vpop.permute.xlu0 %5703 }
 0x403   :  { %10739 = vrcp.f32 %v4624_v43  ;;  %10178 = vmatpush3.bf16.msra.mxu1 %v5415_v35  ;;  %10179 = vmatprep.mubr.msk.bf16.mxu1 %vm10788_vm0, %v13083_v33  ;;  %v5709_v24 = vsel %vm4776_vm3, %v5704_v20, 0 }
 0x404   :  { %v4749_v47 = vpack.c.bf16 %v4698_v9, %v4698_v9  ;;  %10189 = vmatprep.subr.bf16.mxu1 %v13083_v33 }
 0x405   :  { %v10736_v58 = vpop.eup %10735 }
 0x406   :  { %v4700_v44 = vmul.f32 %v10736_v58, %v12215_v38  ;;  %v4627_v45 = vpop.xlane.xlu1 %4626  ;;  %10174 = vmatmul.mubr.msk.bf16.vlgmr.msra.gmra.mrb[216].mxu0 %vm4772_vm5, %v4749_v47  ;;  %v5753_v6 = vpop.permute.xlu0 %5752 }
 0x407   :  { %10741 = vrcp.f32 %v4627_v45  ;;  %10184 = vmatpush3.bf16.msra.mxu0 %v5464_v62  ;;  %10185 = vmatprep.mubr.msk.bf16.mxu0 %vm10788_vm0, %v13083_v33  ;;  %v5758_v59 = vsel %vm4776_vm3, %v5753_v6, 0 }
 0x408   :  { %v4750_v55 = vpack.c.bf16 %v4700_v44, %v4700_v44  ;;  %10195 = vmatprep.subr.bf16.mxu0 %v13083_v33 }
 0x409   :  { %v10738_v29 = vpop.eup %10737 }
 0x40a   :  { %v4702_v22 = vmul.f32 %v10738_v29, %v12224_v57  ;;  %v4630_v17 = vpop.xlane.xlu1 %4629  ;;  %10180 = vmatmul.mubr.msk.bf16.vlgmr.msra.gmra.mrb[216].mxu1 %vm4772_vm5, %v4750_v55 }
 0x40b   :  { %10743 = vrcp.f32 %v4630_v17  ;;  %10190 = vmatpush3.bf16.msra.mxu1 %v5513_v25  ;;  %10191 = vmatprep.mubr.msk.bf16.mxu1 %vm10788_vm0, %v13083_v33 }
 0x40c   :  { %v4751_v38 = vpack.c.bf16 %v4702_v22, %v4702_v22  ;;  %10201 = vmatprep.subr.bf16.mxu1 %v13083_v33 }
 0x40d   :  { %v10740_v1 = vpop.eup %10739 }
 0x40e   :  { %v4704_v28 = vmul.f32 %v10740_v1, %v12231_v56  ;;  %10186 = vmatmul.mubr.msk.bf16.vlgmr.msra.gmra.mrb[220].mxu0 %vm4772_vm5, %v4751_v38  ;;  %v5802_v56 = vpop.permute.xlu0 %5801 }
 0x40f   :  { %v4633_v36 = vpop.xlane.xlu1 %4632  ;;  %10196 = vmatpush3.bf16.msra.mxu0 %v5562_v7  ;;  %10197 = vmatprep.mubr.msk.bf16.mxu0 %vm10788_vm0, %v13083_v33  ;;  %v5807_v27 = vsel %vm4776_vm3, %v5802_v56, 0 }
 0x410   :  { %10745 = vrcp.f32 %v4633_v36  ;;  %v4752_v57 = vpack.c.bf16 %v4704_v28, %v4704_v28  ;;  %10207 = vmatprep.subr.bf16.mxu0 %v13083_v33  ;;  %v6052_v36 = vsel %vm4776_vm3, %v12400_v2, 0 }
 0x411   :  { %v10742_v30 = vpop.eup %10741 }
 0x412   :  { %v4706_v0 = vmul.f32 %v10742_v30, %v12238_v14  ;;  %10192 = vmatmul.mubr.msk.bf16.vlgmr.msra.gmra.mrb[220].mxu1 %vm4772_vm5, %v4752_v57  ;;  %v5851_v8 = vpop.permute.xlu0 %5850 }
 0x413   :  { %v4636_v53 = vpop.xlane.xlu1 %4635  ;;  %10202 = vmatpush3.bf16.msra.mxu1 %v5611_v23  ;;  %10203 = vmatprep.mubr.msk.bf16.mxu1 %vm10788_vm0, %v13083_v33  ;;  %v5856_v9 = vsel %vm4776_vm3, %v5851_v8, 0 }
 0x414   :  { %10747 = vrcp.f32 %v4636_v53  ;;  %v4753_v15 = vpack.c.bf16 %v4706_v0, %v4706_v0  ;;  %10213 = vmatprep.subr.bf16.mxu1 %v13083_v33 }
 0x415   :  { %v10744_v49 = vpop.eup %10743 }
 0x416   :  { %v4708_v52 = vmul.f32 %v10744_v49, %v12245_v63  ;;  %10198 = vmatmul.mubr.msk.bf16.vlgmr.msra.gmra.mrb[224].mxu0 %vm4772_vm5, %v4753_v15 }
 0x417   :  { %v4639_v5 = vpop.xlane.xlu1 %4638  ;;  %10208 = vmatpush3.bf16.msra.mxu0 %v5660_v37  ;;  %10209 = vmatprep.mubr.msk.bf16.mxu0 %vm10788_vm0, %v13083_v33 }
 0x418   :  { %10749 = vrcp.f32 %v4639_v5  ;;  %v4754_v14 = vpack.c.bf16 %v4708_v52, %v4708_v52  ;;  %10219 = vmatprep.subr.bf16.mxu0 %v13083_v33 }
 0x41a   :  { %v10746_v19 = vpop.eup %10745  ;;  %10204 = vmatmul.mubr.msk.bf16.vlgmr.msra.gmra.mrb[224].mxu1 %vm4772_vm5, %v4754_v14 }
 0x41b   :  { %v4710_v21 = vmul.f32 %v10746_v19, %v12253_v32  ;;  %v4642_v40 = vpop.xlane.xlu1 %4641  ;;  %10214 = vmatpush3.bf16.msra.mxu1 %v5709_v24  ;;  %10215 = vmatprep.mubr.msk.bf16.mxu1 %vm10788_vm0, %v13083_v33  ;;  %v5900_v32 = vpop.permute.xlu0 %5899 }
 0x41c   :  { %10751 = vrcp.f32 %v4642_v40  ;;  %10225 = vmatprep.subr.bf16.mxu1 %v13083_v33  ;;  %v5905_v62 = vsel %vm4776_vm3, %v5900_v32, 0 }
 0x41d   :  { %v4755_v63 = vpack.c.bf16 %v4710_v21, %v4710_v21 }
 0x41e   :  { %v10748_v26 = vpop.eup %10747 }
 0x41f   :  { %v4712_v4 = vmul.f32 %v10748_v26, %v12266_v41  ;;  %v4645_v3 = vpop.xlane.xlu1 %4644  ;;  %10210 = vmatmul.mubr.msk.bf16.vlgmr.msra.gmra.mrb[228].mxu0 %vm4772_vm5, %v4755_v63  ;;  %v5949_v35 = vpop.permute.xlu0 %5948 }
 0x420   :  { %10753 = vrcp.f32 %v4645_v3  ;;  %10220 = vmatpush3.bf16.msra.mxu0 %v5758_v59  ;;  %10221 = vmatprep.mubr.msk.bf16.mxu0 %vm10788_vm0, %v13083_v33  ;;  %v5954_v29 = vsel %vm4776_vm3, %v5949_v35, 0  ;;  %v113_v3 = vld [vmem:[%s13037_s5] sm:$0xf] }
 0x421   :  { %v4756_v51 = vpack.c.bf16 %v4712_v4, %v4712_v4  ;;  %10231 = vmatprep.subr.bf16.mxu0 %v13083_v33 }
 0x422   :  { %v10750_v48 = vpop.eup %10749 }
 0x423   :  { %v4714_v12 = vmul.f32 %v10750_v48, %v12280_v60  ;;  %v4648_v34 = vpop.xlane.xlu1 %4647  ;;  %10216 = vmatmul.mubr.msk.bf16.vlgmr.msra.gmra.mrb[228].mxu1 %vm4772_vm5, %v4756_v51  ;;  %v12521_v48 = vsel %vm6374_vm6, %v113_v3, 0 }
 0x424   :  { %10755 = vrcp.f32 %v4648_v34  ;;  %10226 = vmatpush3.bf16.msra.mxu1 %v5807_v27  ;;  %10227 = vmatprep.mubr.msk.bf16.mxu1 %vm10788_vm0, %v13083_v33 }
 0x425   :  { %v4757_v41 = vpack.c.bf16 %v4714_v12, %v4714_v12  ;;  %10237 = vmatprep.subr.bf16.mxu1 %v13083_v33  ;;  %v114_v12 = vld [vmem:[%s13037_s5 + $0x4] sm:$0xf] }
 0x426   :  { %v10752_v11 = vpop.eup %10751 }
 0x427   :  { %v4716_v43 = vmul.f32 %v10752_v11, %v12292_v39  ;;  %v4651_v47 = vpop.xlane.xlu1 %4650  ;;  %10222 = vmatmul.mubr.msk.bf16.vlgmr.msra.gmra.mrb[232].mxu0 %vm4772_vm5, %v4757_v41  ;;  %v5998_v39 = vpop.permute.xlu0 %5997  ;;  %v12533_v41 = vsel %vm6374_vm6, %v114_v12, 0  ;;  %v115_v11 = vld [vmem:[%s13037_s5 + $0x8] sm:$0xf] }
 0x428   :  { %10757 = vrcp.f32 %v4651_v47  ;;  %10232 = vmatpush3.bf16.msra.mxu0 %v5856_v9  ;;  %10233 = vmatprep.mubr.msk.bf16.mxu0 %vm10788_vm0, %v13083_v33  ;;  %v6003_v1 = vsel %vm4776_vm3, %v5998_v39, 0  ;;  %v12544_v47 = vsel %vm6374_vm6, %v115_v11, 0 }
 0x429   :  { %v4758_v60 = vpack.c.bf16 %v4716_v43, %v4716_v43  ;;  %10243 = vmatprep.subr.bf16.mxu0 %v13083_v33 }
 0x42a   :  { %v10754_v58 = vpop.eup %10753 }
 0x42b   :  { %v4718_v44 = vmul.f32 %v10754_v58, %v12303_v16  ;;  %v4654_v45 = vpop.xlane.xlu1 %4653  ;;  %10228 = vmatmul.mubr.msk.bf16.vlgmr.msra.gmra.mrb[232].mxu1 %vm4772_vm5, %v4758_v60  ;;  %v6096_v38 = vpop.permute.xlu0 %6095  ;;  %v116_v58 = vld [vmem:[%s13037_s5 + $0xc] sm:$0xf] }
 0x42c   :  { %10759 = vrcp.f32 %v4654_v45  ;;  %10238 = vmatpush3.bf16.msra.mxu1 %v5905_v62  ;;  %10239 = vmatprep.mubr.msk.bf16.mxu1 %vm10788_vm0, %v13083_v33  ;;  %v6101_v53 = vsel %vm4776_vm3, %v6096_v38, 0 }
 0x42d   :  { %v4759_v20 = vpack.c.bf16 %v4718_v44, %v4718_v44  ;;  %10249 = vmatprep.subr.bf16.mxu1 %v13083_v33 }
 0x42e   :  { %v10756_v55 = vpop.eup %10755 }
 0x42f   :  { %v4720_v25 = vmul.f32 %v10756_v55, %v12309_v42  ;;  %v4657_v22 = vpop.xlane.xlu1 %4656  ;;  %10234 = vmatmul.mubr.msk.bf16.vlgmr.msra.gmra.mrb[236].mxu0 %vm4772_vm5, %v4759_v20  ;;  %v12555_v20 = vsel %vm6374_vm6, %v116_v58, 0 }
 0x430   :  { %10761 = vrcp.f32 %v4657_v22  ;;  %10244 = vmatpush3.bf16.msra.mxu0 %v5954_v29  ;;  %10245 = vmatprep.mubr.msk.bf16.mxu0 %vm10788_vm0, %v13083_v33 }
 0x431   :  { %v4760_v16 = vpack.c.bf16 %v4720_v25, %v4720_v25  ;;  %10255 = vmatprep.subr.bf16.mxu0 %v13083_v33 }
 0x432   :  { %v10758_v17 = vpop.eup %10757 }
 0x433   :  { %v4722_v6 = vmul.f32 %v10758_v17, %v12314_v46  ;;  %v4660_v7 = vpop.xlane.xlu1 %4659  ;;  %10240 = vmatmul.mubr.msk.bf16.vlgmr.msra.gmra.mrb[236].mxu1 %vm4772_vm5, %v4760_v16  ;;  %v6145_v46 = vpop.permute.xlu0 %6144 }
 0x434   :  { %10763 = vrcp.f32 %v4660_v7  ;;  %10250 = vmatpush3.bf16.msra.mxu1 %v6003_v1  ;;  %10251 = vmatprep.mubr.msk.bf16.mxu1 %vm10788_vm0, %v13083_v33  ;;  %v6150_v37 = vsel %vm4776_vm3, %v6145_v46, 0 }
 0x435   :  { %v4761_v42 = vpack.c.bf16 %v4722_v6, %v4722_v6  ;;  %10261 = vmatprep.subr.bf16.mxu1 %v13083_v33 }
 0x436   :  { %v10760_v28 = vpop.eup %10759 }
 0x437   :  { %v4724_v57 = vmul.f32 %v10760_v28, %v12320_v61  ;;  %v4663_v30 = vpop.xlane.xlu1 %4662  ;;  %10246 = vmatmul.mubr.msk.bf16.vlgmr.msra.gmra.mrb[240].mxu0 %vm4772_vm5, %v4761_v42  ;;  %v6194_v49 = vpop.permute.xlu0 %6193 }
 0x438   :  { %10765 = vrcp.f32 %v4663_v30  ;;  %10256 = vmatpush3.bf16.msra.mxu0 %v6052_v36  ;;  %10257 = vmatprep.mubr.msk.bf16.mxu0 %vm10788_vm0, %v13083_v33  ;;  %v6199_v19 = vsel %vm4776_vm3, %v6194_v49, 0 }
 0x439   :  { %v4762_v23 = vpack.c.bf16 %v4724_v57, %v4724_v57  ;;  %10267 = vmatprep.subr.bf16.mxu0 %v13083_v33 }
 0x43a   :  { %v10762_v0 = vpop.eup %10761 }
 0x43b   :  { %v4726_v56 = vmul.f32 %v10762_v0, %v12325_v18  ;;  %v4666_v2 = vpop.xlane.xlu1 %4665  ;;  %10252 = vmatmul.mubr.msk.bf16.vlgmr.msra.gmra.mrb[240].mxu1 %vm4772_vm5, %v4762_v23 }
 0x43c   :  { %10767 = vrcp.f32 %v4666_v2  ;;  %10262 = vmatpush3.bf16.msra.mxu1 %v6101_v53  ;;  %10263 = vmatprep.mubr.msk.bf16.mxu1 %vm10788_vm0, %v13083_v33 }
 0x43d   :  { %v4763_v61 = vpack.c.bf16 %v4726_v56, %v4726_v56  ;;  %10273 = vmatprep.subr.bf16.mxu1 %v13083_v33 }
 0x43e   :  { %v10764_v15 = vpop.eup %10763 }
 0x43f   :  { %v4728_v52 = vmul.f32 %v10764_v15, %v12331_v54  ;;  %v4669_v5 = vpop.xlane.xlu1 %4668  ;;  %10258 = vmatmul.mubr.msk.bf16.vlgmr.msra.gmra.mrb[244].mxu0 %vm4772_vm5, %v4763_v61  ;;  %v6243_v54 = vpop.permute.xlu0 %6242 }
 0x440   :  { %10769 = vrcp.f32 %v4669_v5  ;;  %10268 = vmatpush3.bf16.msra.mxu0 %v6150_v37  ;;  %10269 = vmatprep.mubr.msk.bf16.mxu0 %vm10788_vm0, %v13083_v33  ;;  %v6248_v63 = vsel %vm4776_vm3, %v6243_v54, 0 }
 0x441   :  { %v4764_v18 = vpack.c.bf16 %v4728_v52, %v4728_v52  ;;  %10279 = vmatprep.subr.bf16.mxu0 %v13083_v33 }
 0x442   :  { %v10766_v14 = vpop.eup %10765 }
 0x443   :  { %v4730_v8 = vmul.f32 %v10766_v14, %v12335_v13  ;;  %v4672_v24 = vpop.xlane.xlu1 %4671  ;;  %10264 = vmatmul.mubr.msk.bf16.vlgmr.msra.gmra.mrb[244].mxu1 %vm4772_vm5, %v4764_v18 }
 0x444   :  { %10771 = vrcp.f32 %v4672_v24  ;;  %10274 = vmatpush3.bf16.msra.mxu1 %v6199_v19  ;;  %10275 = vmatprep.mubr.msk.bf16.mxu1 %vm10788_vm0, %v13083_v33 }
 0x445   :  { %v4765_v21 = vpack.c.bf16 %v4730_v8, %v4730_v8  ;;  %10285 = vmatprep.subr.bf16.mxu1 %v13083_v33 }
 0x446   :  { %v10768_v40 = vpop.eup %10767 }
 0x447   :  { %v4732_v26 = vmul.f32 %v10768_v40, %v12339_v10  ;;  %10270 = vmatmul.mubr.msk.bf16.vlgmr.msra.gmra.mrb[248].mxu0 %vm4772_vm5, %v4765_v21  ;;  %v6292_v13 = vpop.permute.xlu1 %6291 }
 0x448   :  { %10280 = vmatpush3.bf16.msra.mxu0 %v6248_v63  ;;  %10281 = vmatprep.mubr.msk.bf16.mxu0 %vm10788_vm0, %v13083_v33  ;;  %v6297_v10 = vsel %vm4776_vm3, %v6292_v13, 0 }
 0x449   :  { %v4766_v59 = vpack.c.bf16 %v4732_v26, %v4732_v26  ;;  %10291 = vmatprep.subr.bf16.mxu0 %v13083_v33 }
 0x44a   :  { %v10770_v4 = vpop.eup %10769 }
 0x44b   :  { %v4734_v32 = vmul.f32 %v10770_v4, %v12343_v50  ;;  %10276 = vmatmul.mubr.msk.bf16.vlgmr.msra.gmra.mrb[248].mxu1 %vm4772_vm5, %v4766_v59 }
 0x44c   :  { %10286 = vmatpush3.bf16.msra.mxu1 %v6297_v10  ;;  %10287 = vmatprep.mubr.msk.bf16.mxu1 %vm10788_vm0, %v13083_v33 }
 0x44d   :  { %v4767_v51 = vpack.c.bf16 %v4734_v32, %v4734_v32  ;;  %10297 = vmatprep.subr.bf16.mxu1 %v13083_v33 }
 0x44e   :  { %v10772_v27 = vpop.eup %10771 }
 0x44f   :  { %v4736_v50 = vmul.f32 %v10772_v27, %v12347_v31  ;;  %10282 = vmatmul.mubr.msk.bf16.vlgmr.msra.gmra.mrb[252].mxu0 %vm4772_vm5, %v4767_v51 }
 0x450   :  { %10292 = vmatpush3.bf16.msra.mxu0 %v12521_v48  ;;  %10293 = vmatprep.mubr.msk.bf16.mxu0 %vm10788_vm0, %v13083_v33 }
 0x451   :  { %v4768_v34 = vpack.c.bf16 %v4736_v50, %v4736_v50  ;;  %10303 = vmatprep.subr.bf16.mxu0 %v13083_v33 }
 0x453   :  { %10288 = vmatmul.mubr.msk.bf16.vlgmr.msra.gmra.mrb[252].mxu1 %vm4772_vm5, %v4768_v34  ;;  %v4814_v31 = vpop.f32.mrb[192].mxu0 }
 0x454   :  { %v6339_v35 = vpack.c.bf16 %v4814_v31, %v4814_v31  ;;  %v10103_v9 = vpop.f32.mrb[193].mxu0  ;;  %10298 = vmatpush3.bf16.msra.mxu1 %v12533_v41  ;;  %10299 = vmatprep.mubr.msk.bf16.mxu1 %vm10788_vm0, %v13083_v33 }
 0x455   :  { %v4817_v43 = vpop.f32.mrb[194].mxu0  ;;  %10309 = vmatprep.subr.bf16.mxu1 %v13083_v33 }
 0x456   :  { %v10104_v60 = vpop.f32.mrb[195].mxu0 }
 0x457   :  { %10294 = vmatmul.mubr.msk.bf16.vlgmr.msra.gmra.mrb[0].mxu0 %vm2911_vm2, %v6339_v35  ;;  %v4863_v62 = vpop.f32.mrb[192].mxu1 }
 0x458   :  { %v6340_v44 = vpack.c.bf16 %v4863_v62, %v4863_v62  ;;  %v10109_v45 = vpop.f32.mrb[193].mxu1  ;;  %10304 = vmatpush3.bf16.msra.mxu0 %v12544_v47  ;;  %10305 = vmatprep.mubr.msk.bf16.mxu0 %vm10788_vm0, %v13083_v33 }
 0x459   :  { %v4866_v39 = vpop.f32.mrb[194].mxu1  ;;  %10315 = vmatprep.subr.bf16.mxu0 %v13083_v33 }
 0x45a   :  { %v10110_v55 = vpop.f32.mrb[195].mxu1 }
 0x45b   :  { %10300 = vmatmul.mubr.msk.bf16.vlgmr.msra.gmra.mrb[0].mxu1 %vm2911_vm2, %v6340_v44  ;;  %v4912_v29 = vpop.f32.mrb[196].mxu0 }
 0x45c   :  { %v6341_v25 = vpack.c.bf16 %v4912_v29, %v4912_v29  ;;  %v10115_v22 = vpop.f32.mrb[197].mxu0  ;;  %10310 = vmatpush3.bf16.msra.mxu1 %v12555_v20  ;;  %10311 = vmatprep.mubr.msk.bf16.mxu1 %vm10788_vm0, %v13083_v33 }
 0x45d   :  { %v4915_v16 = vpop.f32.mrb[198].mxu0  ;;  %10321 = vmatprep.subr.bf16.mxu1 %v13083_v33 }
 0x45e   :  { %v10116_v17 = vpop.f32.mrb[199].mxu0 }
 0x45f   :  { %10306 = vmatmul.mubr.msk.bf16.vlgmr.msra.gmra.mrb[4].mxu0 %vm2911_vm2, %v6341_v25  ;;  %v4961_v38 = vpop.f32.mrb[196].mxu1 }
 0x460   :  { %v6342_v1 = vpack.c.bf16 %v4961_v38, %v4961_v38  ;;  %v10121_v6 = vpop.f32.mrb[197].mxu1  ;;  %10316 = vmatpush3.bf16.msra.mxu0 %v12521_v48  ;;  %10317 = vmatprep.mubr.msk.bf16.mxu0 %vm10788_vm0, %v13083_v33 }
 0x461   :  { %v4964_v7 = vpop.f32.mrb[198].mxu1  ;;  %10327 = vmatprep.subr.bf16.mxu0 %v13083_v33 }
 0x462   :  { %v10122_v42 = vpop.f32.mrb[199].mxu1 }
 0x463   :  { %10312 = vmatmul.mubr.msk.bf16.vlgmr.msra.gmra.mrb[4].mxu1 %vm2911_vm2, %v6342_v1 }
 0x464   :  { %10322 = vmatpush3.bf16.msra.mxu1 %v12533_v41  ;;  %10323 = vmatprep.mubr.msk.bf16.mxu1 %vm10788_vm0, %v13083_v33 }
 0x465   :  { %10333 = vmatprep.subr.bf16.mxu1 %v13083_v33 }
 0x48c   :  { %v5010_v28 = vpop.f32.mrb[200].mxu0 }
 0x48d   :  { %v6343_v36 = vpack.c.bf16 %v5010_v28, %v5010_v28  ;;  %v10127_v57 = vpop.f32.mrb[201].mxu0 }
 0x48e   :  { %v5013_v30 = vpop.f32.mrb[202].mxu0 }
 0x48f   :  { %v10128_v46 = vpop.f32.mrb[203].mxu0  ;;  %10318 = vmatmul.mubr.msk.bf16.vlgmr.msra.gmra.mrb[8].mxu0 %vm2911_vm2, %v6343_v36 }
 0x490   :  { %v5059_v23 = vpop.f32.mrb[200].mxu1  ;;  %10328 = vmatpush3.bf16.msra.mxu0 %v12544_v47  ;;  %10329 = vmatprep.mubr.msk.bf16.mxu0 %vm10788_vm0, %v13083_v33 }
 0x491   :  { %v6344_v0 = vpack.c.bf16 %v5059_v23, %v5059_v23  ;;  %v10133_v53 = vpop.f32.mrb[201].mxu1  ;;  %10339 = vmatprep.subr.bf16.mxu0 %v13083_v33 }
 0x492   :  { %v5062_v56 = vpop.f32.mrb[202].mxu1 }
 0x493   :  { %v10134_v2 = vpop.f32.mrb[203].mxu1  ;;  %10324 = vmatmul.mubr.msk.bf16.vlgmr.msra.gmra.mrb[8].mxu1 %vm2911_vm2, %v6344_v0 }
 0x494   :  { %v5108_v61 = vpop.f32.mrb[204].mxu0  ;;  %10334 = vmatpush3.bf16.msra.mxu1 %v12555_v20  ;;  %10335 = vmatprep.mubr.msk.bf16.mxu1 %vm10788_vm0, %v13083_v33 }
 0x495   :  { %v6345_v15 = vpack.c.bf16 %v5108_v61, %v5108_v61  ;;  %v10139_v49 = vpop.f32.mrb[205].mxu0  ;;  %10345 = vmatprep.subr.bf16.mxu1 %v13083_v33 }
 0x496   :  { %v5111_v37 = vpop.f32.mrb[206].mxu0 }
 0x497   :  { %v10140_v52 = vpop.f32.mrb[207].mxu0  ;;  %10330 = vmatmul.mubr.msk.bf16.vlgmr.msra.gmra.mrb[12].mxu0 %vm2911_vm2, %v6345_v15 }
 0x498   :  { %v5157_v5 = vpop.f32.mrb[204].mxu1  ;;  %10340 = vmatpush3.bf16.msra.mxu0 %v12521_v48  ;;  %10341 = vmatprep.mubr.msk.bf16.mxu0 %vm10788_vm0, %v13083_v33 }
 0x499   :  { %v6346_v18 = vpack.c.bf16 %v5157_v5, %v5157_v5  ;;  %v10145_v14 = vpop.f32.mrb[205].mxu1  ;;  %10351 = vmatprep.subr.bf16.mxu0 %v13083_v33 }
 0x49a   :  { %v5160_v19 = vpop.f32.mrb[206].mxu1 }
 0x49b   :  { %v10146_v8 = vpop.f32.mrb[207].mxu1  ;;  %10336 = vmatmul.mubr.msk.bf16.vlgmr.msra.gmra.mrb[12].mxu1 %vm2911_vm2, %v6346_v18 }
 0x49c   :  { %v5206_v24 = vpop.f32.mrb[208].mxu0  ;;  %10346 = vmatpush3.bf16.msra.mxu1 %v12533_v41  ;;  %10347 = vmatprep.mubr.msk.bf16.mxu1 %vm10788_vm0, %v13083_v33 }
 0x49d   :  { %v6347_v54 = vpack.c.bf16 %v5206_v24, %v5206_v24  ;;  %v10151_v21 = vpop.f32.mrb[209].mxu0  ;;  %10357 = vmatprep.subr.bf16.mxu1 %v13083_v33 }
 0x49e   :  { %v5209_v40 = vpop.f32.mrb[210].mxu0 }
 0x49f   :  { %v10152_v63 = vpop.f32.mrb[211].mxu0  ;;  %10342 = vmatmul.mubr.msk.bf16.vlgmr.msra.gmra.mrb[16].mxu0 %vm2911_vm2, %v6347_v54 }
 0x4a0   :  { %v5255_v26 = vpop.f32.mrb[208].mxu1  ;;  %10352 = vmatpush3.bf16.msra.mxu0 %v12544_v47  ;;  %10353 = vmatprep.mubr.msk.bf16.mxu0 %vm10788_vm0, %v13083_v33 }
 0x4a1   :  { %v6348_v13 = vpack.c.bf16 %v5255_v26, %v5255_v26  ;;  %v10157_v59 = vpop.f32.mrb[209].mxu1  ;;  %10363 = vmatprep.subr.bf16.mxu0 %v13083_v33 }
 0x4a2   :  { %v5258_v4 = vpop.f32.mrb[210].mxu1 }
 0x4a3   :  { %v10158_v3 = vpop.f32.mrb[211].mxu1  ;;  %10348 = vmatmul.mubr.msk.bf16.vlgmr.msra.gmra.mrb[16].mxu1 %vm2911_vm2, %v6348_v13 }
 0x4a4   :  { %v5304_v32 = vpop.f32.mrb[212].mxu0  ;;  %10358 = vmatpush3.bf16.msra.mxu1 %v12555_v20  ;;  %10359 = vmatprep.mubr.msk.bf16.mxu1 %vm10788_vm0, %v13083_v33 }
 0x4a5   :  { %v6349_v10 = vpack.c.bf16 %v5304_v32, %v5304_v32  ;;  %v10163_v51 = vpop.f32.mrb[213].mxu0  ;;  %10369 = vmatprep.subr.bf16.mxu1 %v13083_v33 }
 0x4a6   :  { %v5307_v27 = vpop.f32.mrb[214].mxu0 }
 0x4a7   :  { %v10164_v12 = vpop.f32.mrb[215].mxu0  ;;  %10354 = vmatmul.mubr.msk.bf16.vlgmr.msra.gmra.mrb[20].mxu0 %vm2911_vm2, %v6349_v10 }
 0x4a8   :  { %10364 = vmatpush3.bf16.msra.mxu0 %v12521_v48  ;;  %10365 = vmatprep.mubr.msk.bf16.mxu0 %vm10788_vm0, %v13083_v33 }
 0x4a9   :  { %10375 = vmatprep.subr.bf16.mxu0 %v13083_v33 }
 0x4d5   :  { %v5353_v50 = vpop.f32.mrb[212].mxu1 }
 0x4d6   :  { %v6350_v34 = vpack.c.bf16 %v5353_v50, %v5353_v50  ;;  %v10169_v11 = vpop.f32.mrb[213].mxu1 }
 0x4d7   :  { %v5356_v31 = vpop.f32.mrb[214].mxu1 }
 0x4d8   :  { %v10170_v35 = vpop.f32.mrb[215].mxu1  ;;  %10360 = vmatmul.mubr.msk.bf16.vlgmr.msra.gmra.mrb[20].mxu1 %vm2911_vm2, %v6350_v34 }
 0x4d9   :  { %v5402_v9 = vpop.f32.mrb[216].mxu0  ;;  %10370 = vmatpush3.bf16.msra.mxu1 %v12533_v41  ;;  %10371 = vmatprep.mubr.msk.bf16.mxu1 %vm10788_vm0, %v13083_v33 }
 0x4da   :  { %v6351_v43 = vpack.c.bf16 %v5402_v9, %v5402_v9  ;;  %v10175_v60 = vpop.f32.mrb[217].mxu0  ;;  %10381 = vmatprep.subr.bf16.mxu1 %v13083_v33 }
 0x4db   :  { %v5405_v58 = vpop.f32.mrb[218].mxu0 }
 0x4dc   :  { %v10176_v62 = vpop.f32.mrb[219].mxu0  ;;  %10366 = vmatmul.mubr.msk.bf16.vlgmr.msra.gmra.mrb[24].mxu0 %vm2911_vm2, %v6351_v43 }
 0x4dd   :  { %v5451_v44 = vpop.f32.mrb[216].mxu1  ;;  %10376 = vmatpush3.bf16.msra.mxu0 %v12544_v47  ;;  %10377 = vmatprep.mubr.msk.bf16.mxu0 %vm10788_vm0, %v13083_v33 }
 0x4de   :  { %v6352_v45 = vpack.c.bf16 %v5451_v44, %v5451_v44  ;;  %v10181_v39 = vpop.f32.mrb[217].mxu1  ;;  %10387 = vmatprep.subr.bf16.mxu0 %v13083_v33 }
 0x4df   :  { %v5454_v55 = vpop.f32.mrb[218].mxu1 }
 0x4e0   :  { %v10182_v29 = vpop.f32.mrb[219].mxu1  ;;  %10372 = vmatmul.mubr.msk.bf16.vlgmr.msra.gmra.mrb[24].mxu1 %vm2911_vm2, %v6352_v45 }
 0x4e1   :  { %v5500_v25 = vpop.f32.mrb[220].mxu0  ;;  %10382 = vmatpush3.bf16.msra.mxu1 %v12555_v20  ;;  %10383 = vmatprep.mubr.msk.bf16.mxu1 %vm10788_vm0, %v13083_v33 }
 0x4e2   :  { %v6353_v22 = vpack.c.bf16 %v5500_v25, %v5500_v25  ;;  %v10187_v16 = vpop.f32.mrb[221].mxu0  ;;  %10393 = vmatprep.subr.bf16.mxu1 %v13083_v33 }
 0x4e3   :  { %v5503_v17 = vpop.f32.mrb[222].mxu0 }
 0x4e4   :  { %v10188_v38 = vpop.f32.mrb[223].mxu0  ;;  %10378 = vmatmul.mubr.msk.bf16.vlgmr.msra.gmra.mrb[28].mxu0 %vm2911_vm2, %v6353_v22 }
 0x4e5   :  { %v5549_v1 = vpop.f32.mrb[220].mxu1  ;;  %10388 = vmatpush3.bf16.msra.mxu0 %v12521_v48  ;;  %10389 = vmatprep.mubr.msk.bf16.mxu0 %vm10788_vm0, %v13083_v33 }
 0x4e6   :  { %v6354_v6 = vpack.c.bf16 %v5549_v1, %v5549_v1  ;;  %v10193_v7 = vpop.f32.mrb[221].mxu1  ;;  %10399 = vmatprep.subr.bf16.mxu0 %v13083_v33 }
 0x4e7   :  { %v5552_v42 = vpop.f32.mrb[222].mxu1 }
 0x4e8   :  { %v10194_v28 = vpop.f32.mrb[223].mxu1  ;;  %10384 = vmatmul.mubr.msk.bf16.vlgmr.msra.gmra.mrb[28].mxu1 %vm2911_vm2, %v6354_v6 }
 0x4e9   :  { %v5598_v36 = vpop.f32.mrb[224].mxu0  ;;  %10394 = vmatpush3.bf16.msra.mxu1 %v12533_v41  ;;  %10395 = vmatprep.mubr.msk.bf16.mxu1 %vm10788_vm0, %v13083_v33 }
 0x4ea   :  { %v6355_v57 = vpack.c.bf16 %v5598_v36, %v5598_v36  ;;  %v10199_v30 = vpop.f32.mrb[225].mxu0  ;;  %10405 = vmatprep.subr.bf16.mxu1 %v13083_v33 }
 0x4eb   :  { %v5601_v46 = vpop.f32.mrb[226].mxu0 }
 0x4ec   :  { %v10200_v23 = vpop.f32.mrb[227].mxu0  ;;  %10390 = vmatmul.mubr.msk.bf16.vlgmr.msra.gmra.mrb[32].mxu0 %vm2911_vm2, %v6355_v57 }
 0x4ed   :  { %v5647_v0 = vpop.f32.mrb[224].mxu1  ;;  %10400 = vmatpush3.bf16.msra.mxu0 %v12544_v47  ;;  %10401 = vmatprep.mubr.msk.bf16.mxu0 %vm10788_vm0, %v13083_v33 }
 0x4ee   :  { %v6356_v53 = vpack.c.bf16 %v5647_v0, %v5647_v0  ;;  %v10205_v56 = vpop.f32.mrb[225].mxu1  ;;  %10411 = vmatprep.subr.bf16.mxu0 %v13083_v33 }
 0x4ef   :  { %v5650_v2 = vpop.f32.mrb[226].mxu1 }
 0x4f0   :  { %v10206_v61 = vpop.f32.mrb[227].mxu1  ;;  %10396 = vmatmul.mubr.msk.bf16.vlgmr.msra.gmra.mrb[32].mxu1 %vm2911_vm2, %v6356_v53 }
 0x4f1   :  { %10406 = vmatpush3.bf16.msra.mxu1 %v12555_v20  ;;  %10407 = vmatprep.mubr.msk.bf16.mxu1 %vm10788_vm0, %v13083_v33 }
 0x4f2   :  { %v5696_v15 = vpop.f32.mrb[228].mxu0  ;;  %10417 = vmatprep.subr.bf16.mxu1 %v13083_v33 }
 0x4f3   :  { %v6357_v49 = vpack.c.bf16 %v5696_v15, %v5696_v15  ;;  %v10211_v37 = vpop.f32.mrb[229].mxu0 }
 0x4f4   :  { %v5699_v52 = vpop.f32.mrb[230].mxu0 }
 0x4f5   :  { %v10212_v5 = vpop.f32.mrb[231].mxu0  ;;  %10402 = vmatmul.mubr.msk.bf16.vlgmr.msra.gmra.mrb[36].mxu0 %vm2911_vm2, %v6357_v49 }
 0x4f6   :  { %v5745_v18 = vpop.f32.mrb[228].mxu1  ;;  %10412 = vmatpush3.bf16.msra.mxu0 %v12521_v48  ;;  %10413 = vmatprep.mubr.msk.bf16.mxu0 %vm10788_vm0, %v13083_v33 }
 0x4f7   :  { %v6358_v14 = vpack.c.bf16 %v5745_v18, %v5745_v18  ;;  %v10217_v19 = vpop.f32.mrb[229].mxu1  ;;  %10423 = vmatprep.subr.bf16.mxu0 %v13083_v33 }
 0x4f8   :  { %v5748_v8 = vpop.f32.mrb[230].mxu1 }
 0x4f9   :  { %v10218_v24 = vpop.f32.mrb[231].mxu1  ;;  %10408 = vmatmul.mubr.msk.bf16.vlgmr.msra.gmra.mrb[36].mxu1 %vm2911_vm2, %v6358_v14 }
 0x4fa   :  { %v5794_v54 = vpop.f32.mrb[232].mxu0  ;;  %10418 = vmatpush3.bf16.msra.mxu1 %v12533_v41  ;;  %10419 = vmatprep.mubr.msk.bf16.mxu1 %vm10788_vm0, %v13083_v33 }
 0x4fb   :  { %v6359_v21 = vpack.c.bf16 %v5794_v54, %v5794_v54  ;;  %v10223_v40 = vpop.f32.mrb[233].mxu0  ;;  %10429 = vmatprep.subr.bf16.mxu1 %v13083_v33 }
 0x4fc   :  { %v5797_v63 = vpop.f32.mrb[234].mxu0 }
 0x4fd   :  { %v10224_v26 = vpop.f32.mrb[235].mxu0  ;;  %10414 = vmatmul.mubr.msk.bf16.vlgmr.msra.gmra.mrb[40].mxu0 %vm2911_vm2, %v6359_v21 }
 0x4fe   :  { %v5843_v13 = vpop.f32.mrb[232].mxu1  ;;  %10424 = vmatpush3.bf16.msra.mxu0 %v12544_v47  ;;  %10425 = vmatprep.mubr.msk.bf16.mxu0 %vm10788_vm0, %v13083_v33 }
 0x4ff   :  { %v6360_v59 = vpack.c.bf16 %v5843_v13, %v5843_v13  ;;  %v10229_v4 = vpop.f32.mrb[233].mxu1  ;;  %10435 = vmatprep.subr.bf16.mxu0 %v13083_v33 }
 0x500   :  { %v5846_v3 = vpop.f32.mrb[234].mxu1 }
 0x501   :  { %v10230_v32 = vpop.f32.mrb[235].mxu1  ;;  %10420 = vmatmul.mubr.msk.bf16.vlgmr.msra.gmra.mrb[40].mxu1 %vm2911_vm2, %v6360_v59 }
 0x502   :  { %v5892_v10 = vpop.f32.mrb[236].mxu0  ;;  %10430 = vmatpush3.bf16.msra.mxu1 %v12555_v20  ;;  %10431 = vmatprep.mubr.msk.bf16.mxu1 %vm10788_vm0, %v13083_v33 }
 0x503   :  { %v6361_v51 = vpack.c.bf16 %v5892_v10, %v5892_v10  ;;  %v10235_v27 = vpop.f32.mrb[237].mxu0  ;;  %10441 = vmatprep.subr.bf16.mxu1 %v13083_v33 }
 0x504   :  { %v5895_v12 = vpop.f32.mrb[238].mxu0 }
 0x505   :  { %v10236_v50 = vpop.f32.mrb[239].mxu0  ;;  %10426 = vmatmul.mubr.msk.bf16.vlgmr.msra.gmra.mrb[44].mxu0 %vm2911_vm2, %v6361_v51 }
 0x506   :  { %v5941_v34 = vpop.f32.mrb[236].mxu1  ;;  %10436 = vmatpush3.bf16.msra.mxu0 %v12521_v48  ;;  %10437 = vmatprep.mubr.msk.bf16.mxu0 %vm10788_vm0, %v13083_v33 }
 0x507   :  { %v6362_v11 = vpack.c.bf16 %v5941_v34, %v5941_v34  ;;  %v10241_v31 = vpop.f32.mrb[237].mxu1  ;;  %10447 = vmatprep.subr.bf16.mxu0 %v13083_v33 }
 0x508   :  { %v5944_v35 = vpop.f32.mrb[238].mxu1 }
 0x509   :  { %v10242_v9 = vpop.f32.mrb[239].mxu1  ;;  %10432 = vmatmul.mubr.msk.bf16.vlgmr.msra.gmra.mrb[44].mxu1 %vm2911_vm2, %v6362_v11 }
 0x50a   :  { %v5990_v43 = vpop.f32.mrb[240].mxu0  ;;  %10442 = vmatpush3.bf16.msra.mxu1 %v12533_v41  ;;  %10443 = vmatprep.mubr.msk.bf16.mxu1 %vm10788_vm0, %v13083_v33 }
 0x50b   :  { %v6363_v60 = vpack.c.bf16 %v5990_v43, %v5990_v43  ;;  %v10247_v58 = vpop.f32.mrb[241].mxu0  ;;  %10453 = vmatprep.subr.bf16.mxu1 %v13083_v33 }
 0x50c   :  { %v5993_v62 = vpop.f32.mrb[242].mxu0 }
 0x50d   :  { %v10248_v44 = vpop.f32.mrb[243].mxu0  ;;  %10438 = vmatmul.mubr.msk.bf16.vlgmr.msra.gmra.mrb[48].mxu0 %vm2911_vm2, %v6363_v60 }
 0x50e   :  { %v6039_v45 = vpop.f32.mrb[240].mxu1  ;;  %10448 = vmatpush3.bf16.msra.mxu0 %v12544_v47  ;;  %10449 = vmatprep.mubr.msk.bf16.mxu0 %vm10788_vm0, %v13083_v33 }
 0x50f   :  { %v6364_v39 = vpack.c.bf16 %v6039_v45, %v6039_v45  ;;  %v10253_v55 = vpop.f32.mrb[241].mxu1  ;;  %10459 = vmatprep.subr.bf16.mxu0 %v13083_v33 }
 0x510   :  { %v6042_v29 = vpop.f32.mrb[242].mxu1 }
 0x511   :  { %v10254_v25 = vpop.f32.mrb[243].mxu1  ;;  %10444 = vmatmul.mubr.msk.bf16.vlgmr.msra.gmra.mrb[48].mxu1 %vm2911_vm2, %v6364_v39 }
 0x512   :  { %v6088_v22 = vpop.f32.mrb[244].mxu0  ;;  %10454 = vmatpush3.bf16.msra.mxu1 %v12555_v20  ;;  %10455 = vmatprep.mubr.msk.bf16.mxu1 %vm10788_vm0, %v13083_v33 }
 0x513   :  { %v6365_v16 = vpack.c.bf16 %v6088_v22, %v6088_v22  ;;  %v10259_v17 = vpop.f32.mrb[245].mxu0  ;;  %10465 = vmatprep.subr.bf16.mxu1 %v13083_v33 }
 0x514   :  { %v6091_v38 = vpop.f32.mrb[246].mxu0 }
 0x515   :  { %v10260_v1 = vpop.f32.mrb[247].mxu0  ;;  %10450 = vmatmul.mubr.msk.bf16.vlgmr.msra.gmra.mrb[52].mxu0 %vm2911_vm2, %v6365_v16 }
 0x516   :  { %v6137_v6 = vpop.f32.mrb[244].mxu1  ;;  %10460 = vmatpush3.bf16.msra.mxu0 %v12521_v48  ;;  %10461 = vmatprep.mubr.msk.bf16.mxu0 %vm10788_vm0, %v13083_v33 }
 0x517   :  { %v6366_v7 = vpack.c.bf16 %v6137_v6, %v6137_v6  ;;  %v10265_v42 = vpop.f32.mrb[245].mxu1  ;;  %10471 = vmatprep.subr.bf16.mxu0 %v13083_v33 }
 0x518   :  { %v6140_v28 = vpop.f32.mrb[246].mxu1 }
 0x519   :  { %v10266_v36 = vpop.f32.mrb[247].mxu1  ;;  %10456 = vmatmul.mubr.msk.bf16.vlgmr.msra.gmra.mrb[52].mxu1 %vm2911_vm2, %v6366_v7 }
 0x51a   :  { %v6186_v57 = vpop.f32.mrb[248].mxu0  ;;  %10466 = vmatpush3.bf16.msra.mxu1 %v12533_v41  ;;  %10467 = vmatprep.mubr.msk.bf16.mxu1 %vm10788_vm0, %v13083_v33 }
 0x51b   :  { %v6367_v30 = vpack.c.bf16 %v6186_v57, %v6186_v57  ;;  %v10271_v46 = vpop.f32.mrb[249].mxu0  ;;  %10477 = vmatprep.subr.bf16.mxu1 %v13083_v33 }
 0x51c   :  { %v6189_v48 = vpop.f32.mrb[250].mxu0 }
 0x51d   :  { %v10272_v23 = vpop.f32.mrb[251].mxu0  ;;  %10462 = vmatmul.mubr.msk.bf16.vlgmr.msra.gmra.mrb[56].mxu0 %vm2911_vm2, %v6367_v30 }
 0x51e   :  { %v6235_v0 = vpop.f32.mrb[248].mxu1  ;;  %10472 = vmatpush3.bf16.msra.mxu0 %v12544_v47  ;;  %10473 = vmatprep.mubr.msk.bf16.mxu0 %vm10788_vm0, %v13083_v33 }
 0x51f   :  { %v6368_v53 = vpack.c.bf16 %v6235_v0, %v6235_v0  ;;  %v10277_v56 = vpop.f32.mrb[249].mxu1 }
 0x520   :  { %v6238_v41 = vpop.f32.mrb[250].mxu1 }
 0x521   :  { %v10278_v2 = vpop.f32.mrb[251].mxu1  ;;  %10468 = vmatmul.mubr.msk.bf16.vlgmr.msra.gmra.mrb[56].mxu1 %vm2911_vm2, %v6368_v53 }
 0x522   :  { %v6284_v61 = vpop.f32.mrb[252].mxu0  ;;  %10478 = vmatpush3.bf16.msra.mxu1 %v12555_v20  ;;  %10479 = vmatprep.mubr.msk.bf16.mxu1 %vm10788_vm0, %v13083_v33 }
 0x523   :  { %v6369_v15 = vpack.c.bf16 %v6284_v61, %v6284_v61  ;;  %v10283_v49 = vpop.f32.mrb[253].mxu0 }
 0x524   :  { %v6287_v37 = vpop.f32.mrb[254].mxu0 }
 0x525   :  { %v10284_v52 = vpop.f32.mrb[255].mxu0  ;;  %10474 = vmatmul.mubr.msk.bf16.vlgmr.msra.gmra.mrb[60].mxu0 %vm2911_vm2, %v6369_v15 }
 0x526   :  { %v6333_v47 = vpop.f32.mrb[252].mxu1 }
 0x527   :  { %v6370_v5 = vpack.c.bf16 %v6333_v47, %v6333_v47  ;;  %v10289_v18 = vpop.f32.mrb[253].mxu1 }
 0x528   :  { %v6336_v14 = vpop.f32.mrb[254].mxu1 }
 0x529   :  { %v10290_v19 = vpop.f32.mrb[255].mxu1  ;;  %10480 = vmatmul.mubr.msk.bf16.vlgmr.msra.gmra.mrb[60].mxu1 %vm2911_vm2, %v6370_v5 }
 0x52a   :  { %v6412_v8 = vpop.f32.mrb[0].mxu0 }
 0x52b   :  { %v10295_v24 = vpop.f32.mrb[1].mxu0  ;;  %v7761_v40 = vsel %vm7760_vm7, %v6412_v8, 0.0  ;;  %v10557_v8 = vld [vmem:[%s13038_s7 + $0x4] ss:$8 sps:$4 sm:$0xff]  }
 0x52c   :  { %v6415_v20 = vpop.f32.mrb[2].mxu0  ;;  %v10555_v24 = vld [vmem:[%s13038_s7] ss:$8 sps:$4 sm:$0xff]   ;;  %7886 = vmatprep.subr.bf16.mxu0 %v10557_v8 }
 0x52d   :  { %v10296_v54 = vpop.f32.mrb[3].mxu0  ;;  %7887 = vmatpush1.bf16.msra.mxu0 %v10555_v24  ;;  %v10560_v20 = vld [vmem:[%s13038_s7 + $0x14] ss:$8 sps:$4 sm:$0xff]  }
 0x52e   :  { %v6458_v21 = vpop.f32.mrb[0].mxu1  ;;  %v10558_v54 = vld [vmem:[%s13038_s7 + $0x10] ss:$8 sps:$4 sm:$0xff]   ;;  %7888 = vmatprep.subr.bf16.mxu0 %v10560_v20 }
 0x52f   :  { %v7762_v63 = vsel %vm7760_vm7, %v6458_v21, 0.0  ;;  %v10301_v26 = vpop.f32.mrb[1].mxu1  ;;  %v10790_v21 = vmov 0  }
 0x530   :  { %v7763_v13 = vadd.f32 %v7762_v63, %v7761_v40  ;;  %v6461_v59 = vpop.f32.mrb[2].mxu1  ;;  %7918 = vmatprep.mubr.bf16.mxu0 %v10790_v21  ;;  %v10561_v40 = vld [vmem:[%s13039_s9] ss:$8 sps:$4 sm:$0xff]   ;;  %v10563_v63 = vld [vmem:[%s13039_s9 + $0x4] ss:$8 sps:$4 sm:$0xff]  }
 0x531   :  { %v10302_v4 = vpop.f32.mrb[3].mxu1  ;;  %7889 = vmatpush1.bf16.msra.mxu0 %v10558_v54  ;;  %v10566_v26 = vld [vmem:[%s13039_s9 + $0x14] ss:$8 sps:$4 sm:$0xff]   ;;  %8143 = vmatprep.subr.bf16.mxu1 %v10563_v63  ;;  %v10569_v59 = vld [vmem:[%s13039_s9 + $0x24] ss:$8 sps:$4 sm:$0xff]  }
 0x532   :  { %v6504_v3 = vpop.f32.mrb[4].mxu0  ;;  %8144 = vmatpush1.bf16.msra.mxu1 %v10561_v40  ;;  %v10567_v4 = vld [vmem:[%s13039_s9 + $0x20] ss:$8 sps:$4 sm:$0xff]  }
 0x533   :  { %v7764_v32 = vsel %vm7760_vm7, %v6504_v3, 0.0  ;;  %v10307_v10 = vpop.f32.mrb[5].mxu0  ;;  %8145 = vmatprep.subr.bf16.mxu1 %v10566_v26  ;;  %v10572_v3 = vld [vmem:[%s13039_s9 + $0x34] ss:$8 sps:$4 sm:$0xff]  }
 0x534   :  { %v7765_v51 = vadd.f32 %v7764_v32, %v7763_v13  ;;  %v6507_v27 = vpop.f32.mrb[6].mxu0  ;;  %v10564_v13 = vld [vmem:[%s13039_s9 + $0x10] ss:$8 sps:$4 sm:$0xff]   ;;  %v10575_v10 = vld [vmem:[%s13039_s9 + $0x44] ss:$8 sps:$4 sm:$0xff]  }
 0x535   :  { %v10308_v12 = vpop.f32.mrb[7].mxu0  ;;  %v10570_v32 = vld [vmem:[%s13039_s9 + $0x30] ss:$8 sps:$4 sm:$0xff]   ;;  %v10578_v27 = vld [vmem:[%s13039_s9 + $0x54] ss:$8 sps:$4 sm:$0xff]  }
 0x536   :  { %v6550_v50 = vpop.f32.mrb[4].mxu1  ;;  %8146 = vmatpush1.bf16.msra.mxu1 %v10564_v13  ;;  %v10576_v12 = vld [vmem:[%s13039_s9 + $0x50] ss:$8 sps:$4 sm:$0xff]  }
 0x537   :  { %v7766_v34 = vsel %vm7760_vm7, %v6550_v50, 0.0  ;;  %v10313_v11 = vpop.f32.mrb[5].mxu1  ;;  %8147 = vmatprep.subr.bf16.mxu1 %v10569_v59  ;;  %v10581_v50 = vld [vmem:[%s13039_s9 + $0x64] ss:$8 sps:$4 sm:$0xff]   ;;  %v12805_v59 = vld [vmem:[%s13040_s6] ss:$0 sm:$0xff] }
 0x538   :  { %v12707_v31 = vadd.f32 %v7766_v34, %v7765_v51  ;;  %v6553_v35 = vpop.f32.mrb[6].mxu1  ;;  %v10573_v51 = vld [vmem:[%s13039_s9 + $0x40] ss:$8 sps:$4 sm:$0xff]   ;;  %v10584_v11 = vld [vmem:[%s13039_s9 + $0x74] ss:$8 sps:$4 sm:$0xff]  }
 0x539   :  { %v10314_v9 = vpop.f32.mrb[7].mxu1  ;;  %v10579_v34 = vld [vmem:[%s13039_s9 + $0x60] ss:$8 sps:$4 sm:$0xff]   ;;  %v10582_v35 = vld [vmem:[%s13039_s9 + $0x70] ss:$8 sps:$4 sm:$0xff]  }
 0x53a   :  { %8148 = vmatpush1.bf16.msra.mxu1 %v10567_v4  ;;  %v10587_v9 = vld [vmem:[%s13039_s9 + $0x84] ss:$8 sps:$4 sm:$0xff]  }
 0x53b   :  { %8149 = vmatprep.subr.bf16.mxu1 %v10572_v3 }
 0x53e   :  { %8150 = vmatpush1.bf16.msra.mxu1 %v10570_v32 }
 0x53f   :  { %8151 = vmatprep.subr.bf16.mxu1 %v10575_v10 }
 0x542   :  { %8152 = vmatpush1.bf16.msra.mxu1 %v10573_v51  ;;  %v7823_v51 = vadd.f32 %v12805_v59, %v12707_v31 }
 0x543   :  { %8153 = vmatprep.subr.bf16.mxu1 %v10578_v27 }
 0x546   :  { %8154 = vmatpush1.bf16.msra.mxu1 %v10576_v12 }
 0x547   :  { %8155 = vmatprep.subr.bf16.mxu1 %v10581_v50 }
 0x54a   :  { %8156 = vmatpush1.bf16.msra.mxu1 %v10579_v34 }
 0x54b   :  { %8157 = vmatprep.subr.bf16.mxu1 %v10584_v11 }
 0x54e   :  { %8158 = vmatpush1.bf16.msra.mxu1 %v10582_v35 }
 0x54f   :  { %8159 = vmatprep.subr.bf16.mxu1 %v10587_v9  ;;  %v7831_v9 = vsel %vm7760_vm7, %v7823_v51, -inf }
 0x562   :  { %v6593_v43 = vpop.f32.mrb[8].mxu0 }
 0x563   :  { %v10319_v60 = vpop.f32.mrb[9].mxu0  ;;  %v7768_v45 = vsel %vm7760_vm7, %v6593_v43, 0.0 }
 0x564   :  { %v6596_v58 = vpop.f32.mrb[10].mxu0  ;;  %v10585_v60 = vld [vmem:[%s13039_s9 + $0x80] ss:$8 sps:$4 sm:$0xff]  }
 0x565   :  { %v10320_v62 = vpop.f32.mrb[11].mxu0  ;;  %8160 = vmatpush1.bf16.msra.mxu1 %v10585_v60 }
 0x566   :  { %v6636_v44 = vpop.f32.mrb[8].mxu1 }
 0x567   :  { %v7769_v39 = vsel %vm7760_vm7, %v6636_v44, 0.0  ;;  %v10325_v55 = vpop.f32.mrb[9].mxu1  ;;  %v10590_v44 = vld [vmem:[%s13039_s9 + $0x94] ss:$8 sps:$4 sm:$0xff]  }
 0x568   :  { %v7770_v29 = vadd.f32 %v7769_v39, %v7768_v45  ;;  %v6639_v25 = vpop.f32.mrb[10].mxu1  ;;  %8161 = vmatprep.subr.bf16.mxu1 %v10590_v44 }
 0x569   :  { %v10326_v22 = vpop.f32.mrb[11].mxu1  ;;  %v10588_v25 = vld [vmem:[%s13039_s9 + $0x90] ss:$8 sps:$4 sm:$0xff]  }
 0x56a   :  { %v6679_v16 = vpop.f32.mrb[12].mxu0  ;;  %8162 = vmatpush1.bf16.msra.mxu1 %v10588_v25 }
 0x56b   :  { %v7771_v17 = vsel %vm7760_vm7, %v6679_v16, 0.0  ;;  %v10331_v38 = vpop.f32.mrb[13].mxu0 }
 0x56c   :  { %v7772_v1 = vadd.f32 %v7771_v17, %v7770_v29  ;;  %v6682_v6 = vpop.f32.mrb[14].mxu0 }
 0x56d   :  { %v10332_v7 = vpop.f32.mrb[15].mxu0 }
 0x56e   :  { %v6722_v42 = vpop.f32.mrb[12].mxu1 }
 0x56f   :  { %v7773_v28 = vsel %vm7760_vm7, %v6722_v42, 0.0  ;;  %v10337_v36 = vpop.f32.mrb[13].mxu1 }
 0x570   :  { %v12713_v57 = vadd.f32 %v7773_v28, %v7772_v1  ;;  %v6725_v30 = vpop.f32.mrb[14].mxu1 }
 0x571   :  { %v10338_v46 = vpop.f32.mrb[15].mxu1 }
 0x572   :  { %v6765_v48 = vpop.f32.mrb[16].mxu0 }
 0x573   :  { %v10343_v23 = vpop.f32.mrb[17].mxu0  ;;  %v7775_v41 = vsel %vm7760_vm7, %v6765_v48, 0.0 }
 0x574   :  { %v6768_v0 = vpop.f32.mrb[18].mxu0 }
 0x575   :  { %v10344_v53 = vpop.f32.mrb[19].mxu0 }
 0x576   :  { %v6808_v56 = vpop.f32.mrb[16].mxu1 }
 0x577   :  { %v7776_v2 = vsel %vm7760_vm7, %v6808_v56, 0.0  ;;  %v10349_v61 = vpop.f32.mrb[17].mxu1 }
 0x578   :  { %v7777_v15 = vadd.f32 %v7776_v2, %v7775_v41  ;;  %v6811_v49 = vpop.f32.mrb[18].mxu1 }
 0x579   :  { %v10350_v37 = vpop.f32.mrb[19].mxu1 }
 0x57a   :  { %v6851_v52 = vpop.f32.mrb[20].mxu0 }
 0x57b   :  { %v7778_v47 = vsel %vm7760_vm7, %v6851_v52, 0.0  ;;  %v10355_v5 = vpop.f32.mrb[21].mxu0 }
 0x57c   :  { %v7779_v18 = vadd.f32 %v7778_v47, %v7777_v15  ;;  %v6854_v14 = vpop.f32.mrb[22].mxu0 }
 0x57d   :  { %v10356_v19 = vpop.f32.mrb[23].mxu0 }
 0x5ab   :  { %v6894_v43 = vpop.f32.mrb[20].mxu1 }
 0x5ac   :  { %v7780_v58 = vsel %vm7760_vm7, %v6894_v43, 0.0  ;;  %v10361_v62 = vpop.f32.mrb[21].mxu1 }
 0x5ad   :  { %v12788_v45 = vadd.f32 %v7780_v58, %v7779_v18  ;;  %v6897_v39 = vpop.f32.mrb[22].mxu1 }
 0x5ae   :  { %v10362_v55 = vpop.f32.mrb[23].mxu1 }
 0x5af   :  { %v6937_v29 = vpop.f32.mrb[24].mxu0 }
 0x5b0   :  { %v10367_v22 = vpop.f32.mrb[25].mxu0  ;;  %v7782_v1 = vsel %vm7760_vm7, %v6937_v29, 0.0 }
 0x5b1   :  { %v6940_v16 = vpop.f32.mrb[26].mxu0 }
 0x5b2   :  { %v10368_v17 = vpop.f32.mrb[27].mxu0 }
 0x5b3   :  { %v6980_v38 = vpop.f32.mrb[24].mxu1 }
 0x5b4   :  { %v7783_v6 = vsel %vm7760_vm7, %v6980_v38, 0.0  ;;  %v10373_v7 = vpop.f32.mrb[25].mxu1 }
 0x5b5   :  { %v7784_v42 = vadd.f32 %v7783_v6, %v7782_v1  ;;  %v6983_v28 = vpop.f32.mrb[26].mxu1 }
 0x5b6   :  { %v10374_v36 = vpop.f32.mrb[27].mxu1 }
 0x5b7   :  { %v7023_v30 = vpop.f32.mrb[28].mxu0 }
 0x5b8   :  { %v7785_v46 = vsel %vm7760_vm7, %v7023_v30, 0.0  ;;  %v10379_v48 = vpop.f32.mrb[29].mxu0  ;;  %v7824_v30 = vadd.f32 %v12805_v59, %v12713_v57 }
 0x5b9   :  { %v7786_v23 = vadd.f32 %v7785_v46, %v7784_v42  ;;  %v7026_v0 = vpop.f32.mrb[30].mxu0 }
 0x5ba   :  { %v10380_v53 = vpop.f32.mrb[31].mxu0 }
 0x5bb   :  { %v7066_v56 = vpop.f32.mrb[28].mxu1 }
 0x5bc   :  { %v7787_v41 = vsel %vm7760_vm7, %v7066_v56, 0.0  ;;  %v10385_v2 = vpop.f32.mrb[29].mxu1 }
 0x5bd   :  { %v12797_v61 = vadd.f32 %v7787_v41, %v7786_v23  ;;  %v7069_v15 = vpop.f32.mrb[30].mxu1  ;;  %v7832_v41 = vsel %vm7760_vm7, %v7824_v30, -inf }
 0x5be   :  { %v10386_v49 = vpop.f32.mrb[31].mxu1 }
 0x5bf   :  { %v7109_v37 = vpop.f32.mrb[32].mxu0 }
 0x5c0   :  { %v10391_v52 = vpop.f32.mrb[33].mxu0  ;;  %v7789_v14 = vsel %vm7760_vm7, %v7109_v37, 0.0 }
 0x5c1   :  { %v7112_v47 = vpop.f32.mrb[34].mxu0 }
 0x5c2   :  { %v10392_v5 = vpop.f32.mrb[35].mxu0 }
 0x5c3   :  { %v7152_v18 = vpop.f32.mrb[32].mxu1 }
 0x5c4   :  { %v7790_v19 = vsel %vm7760_vm7, %v7152_v18, 0.0  ;;  %v10397_v8 = vpop.f32.mrb[33].mxu1 }
 0x5c5   :  { %v7791_v24 = vadd.f32 %v7790_v19, %v7789_v14  ;;  %v7155_v20 = vpop.f32.mrb[34].mxu1 }
 0x5c6   :  { %v10398_v54 = vpop.f32.mrb[35].mxu1 }
 0x5c8   :  { %v7195_v21 = vpop.f32.mrb[36].mxu0 }
 0x5c9   :  { %v7792_v40 = vsel %vm7760_vm7, %v7195_v21, 0.0  ;;  %v10403_v63 = vpop.f32.mrb[37].mxu0 }
 0x5ca   :  { %v7793_v26 = vadd.f32 %v7792_v40, %v7791_v24  ;;  %v7198_v13 = vpop.f32.mrb[38].mxu0 }
 0x5cb   :  { %v10404_v4 = vpop.f32.mrb[39].mxu0 }
 0x5cc   :  { %v7238_v3 = vpop.f32.mrb[36].mxu1 }
 0x5cd   :  { %v7794_v32 = vsel %vm7760_vm7, %v7238_v3, 0.0  ;;  %v10409_v10 = vpop.f32.mrb[37].mxu1  ;;  %v7825_v3 = vadd.f32 %v12805_v59, %v12788_v45 }
 0x5ce   :  { %v7795_v27 = vadd.f32 %v7794_v32, %v7793_v26  ;;  %v7241_v12 = vpop.f32.mrb[38].mxu1 }
 0x5cf   :  { %v10410_v50 = vpop.f32.mrb[39].mxu1 }
 0x5d0   :  { %v7827_v34 = vadd.f32 %v12805_v59, %v7795_v27  ;;  %v7281_v11 = vpop.f32.mrb[40].mxu0 }
 0x5d1   :  { %v10415_v35 = vpop.f32.mrb[41].mxu0  ;;  %v7796_v39 = vsel %vm7760_vm7, %v7281_v11, 0.0 }
 0x5d2   :  { %v7835_v43 = vsel %vm7760_vm7, %v7827_v34, -inf  ;;  %v7284_v60 = vpop.f32.mrb[42].mxu0  ;;  %v7833_v34 = vsel %vm7760_vm7, %v7825_v3, -inf }
 0x5d3   :  { %v7836_v58 = vmax.f32 %v7831_v9, %v7835_v43  ;;  %v10416_v62 = vpop.f32.mrb[43].mxu0 }
 0x5d4   :  { %v7324_v44 = vpop.f32.mrb[40].mxu1 }
 0x5d5   :  { %v7797_v55 = vsel %vm7760_vm7, %v7324_v44, 0.0  ;;  %v10421_v31 = vpop.f32.mrb[41].mxu1 }
 0x5d6   :  { %v7798_v29 = vadd.f32 %v7797_v55, %v7796_v39  ;;  %v7327_v25 = vpop.f32.mrb[42].mxu1 }
 0x5d7   :  { %v10422_v22 = vpop.f32.mrb[43].mxu1 }
 0x5d8   :  { %v7367_v16 = vpop.f32.mrb[44].mxu0 }
 0x5d9   :  { %v7799_v17 = vsel %vm7760_vm7, %v7367_v16, 0.0  ;;  %v10427_v38 = vpop.f32.mrb[45].mxu0 }
 0x5da   :  { %v7800_v1 = vadd.f32 %v7799_v17, %v7798_v29  ;;  %v7370_v6 = vpop.f32.mrb[46].mxu0 }
 0x5db   :  { %v10428_v7 = vpop.f32.mrb[47].mxu0 }
 0x5dc   :  { %v7410_v42 = vpop.f32.mrb[44].mxu1  ;;  %v7826_v7 = vadd.f32 %v12805_v59, %v12797_v61  ;;  %v10591_v61 = vld [vmem:[%s13039_s9 + $0xa0] ss:$8 sps:$4 sm:$0xff]  }
 0x5dd   :  { %v7801_v28 = vsel %vm7760_vm7, %v7410_v42, 0.0  ;;  %v10433_v36 = vpop.f32.mrb[45].mxu1 }
 0x5de   :  { %v7802_v46 = vadd.f32 %v7801_v28, %v7800_v1  ;;  %v7413_v48 = vpop.f32.mrb[46].mxu1 }
 0x5df   :  { %v10434_v23 = vpop.f32.mrb[47].mxu1 }
 0x5e0   :  { %v7828_v0 = vadd.f32 %v12805_v59, %v7802_v46  ;;  %v7453_v53 = vpop.f32.mrb[48].mxu0  ;;  %v7834_v46 = vsel %vm7760_vm7, %v7826_v7, -inf  ;;  %v10624_v7 = vld [vmem:[%s13041_s11 + $0x38] sm:$0xff]  }
 0x5e1   :  { %v10439_v56 = vpop.f32.mrb[49].mxu0  ;;  %v7803_v5 = vsel %vm7760_vm7, %v7453_v53, 0.0 }
 0x5e2   :  { %v7837_v2 = vsel %vm7760_vm7, %v7828_v0, -inf  ;;  %v7456_v15 = vpop.f32.mrb[50].mxu0 }
 0x5e3   :  { %v7838_v49 = vmax.f32 %v7832_v41, %v7837_v2  ;;  %v10440_v37 = vpop.f32.mrb[51].mxu0  ;;  %v10593_v41 = vld [vmem:[%s13039_s9 + $0xa4] ss:$8 sps:$4 sm:$0xff]   ;;  %v10594_v2 = vld [vmem:[%s13039_s9 + $0xb0] ss:$8 sps:$4 sm:$0xff]  }
 0x5e4   :  { %v7496_v52 = vpop.f32.mrb[48].mxu1  ;;  %8163 = vmatprep.subr.bf16.mxu1 %v10593_v41  ;;  %v10599_v15 = vld [vmem:[%s13039_s9 + $0xc4] ss:$8 sps:$4 sm:$0xff]   ;;  %v10602_v37 = vld [vmem:[%s13039_s9 + $0xd4] ss:$8 sps:$4 sm:$0xff]  }
 0x5e5   :  { %v7843_v47 = vmax.f32 %v7836_v58, %v7838_v49  ;;  %v7804_v57 = vsel %vm7760_vm7, %v7496_v52, 0.0  ;;  %v10445_v18 = vpop.f32.mrb[49].mxu1  ;;  %8164 = vmatpush1.bf16.msra.mxu1 %v10591_v61  ;;  %v10597_v49 = vld [vmem:[%s13039_s9 + $0xc0] ss:$8 sps:$4 sm:$0xff]   ;;  %v10600_v52 = vld [vmem:[%s13039_s9 + $0xd0] ss:$8 sps:$4 sm:$0xff]  }
 0x5e6   :  { %v7805_v14 = vadd.f32 %v7804_v57, %v7803_v5  ;;  %v7499_v19 = vpop.f32.mrb[50].mxu1  ;;  %v10603_v5 = vld [vmem:[%s13039_s9 + $0xe0] ss:$8 sps:$4 sm:$0xff]   ;;  %v10608_v57 = vld [vmem:[%s13039_s9 + $0xf4] ss:$8 sps:$4 sm:$0xff]  }
 0x5e7   :  { %v10446_v8 = vpop.f32.mrb[51].mxu1  ;;  %v10606_v18 = vld [vmem:[%s13039_s9 + $0xf0] ss:$8 sps:$4 sm:$0xff]   ;;  %v10610_v19 = vld [vmem:[%s13041_s11] sm:$0xff]  }
 0x5e8   :  { %v7539_v24 = vpop.f32.mrb[52].mxu0  ;;  %v10611_v8 = vld [vmem:[%s13041_s11 + $0x48] sm:$0xff]  }
 0x5e9   :  { %v7806_v20 = vsel %vm7760_vm7, %v7539_v24, 0.0  ;;  %v10451_v54 = vpop.f32.mrb[53].mxu0  ;;  %v10612_v24 = vld [vmem:[%s13041_s11 + $0x8] sm:$0xff]  }
 0x5ea   :  { %v7807_v21 = vadd.f32 %v7806_v20, %v7805_v14  ;;  %v7542_v40 = vpop.f32.mrb[54].mxu0  ;;  %v10609_v14 = vld [vmem:[%s13041_s11 + $0x40] sm:$0xff]   ;;  %v7853_v20 = vlaneseq }
 0x5eb   :  { %v10452_v63 = vpop.f32.mrb[55].mxu0  ;;  %9350 = vmatprep.subr.bf16.mxu0 %v10609_v14  ;;  %v7851_v40 = vld [vmem:[%s13042_s8] sm:$0x3] }
 0x5ec   :  { %v7582_v26 = vpop.f32.mrb[52].mxu1  ;;  %v7854_v54 = vshrl.u32 %v7853_v20, 7  ;;  %v10625_v14 = vld [vmem:[%s13043_s13] sm:$0xff]   ;;  %v10628_v20 = vld [vmem:[%s13043_s13 + $0x18] sm:$0xff]  }
 0x5ed   :  { %v7808_v13 = vsel %vm7760_vm7, %v7582_v26, 0.0  ;;  %v10457_v4 = vpop.f32.mrb[53].mxu1 }
 0x5ee   :  { %v7809_v32 = vadd.f32 %v7808_v13, %v7807_v21  ;;  %v7585_v10 = vpop.f32.mrb[54].mxu1  ;;  %v7855_v21 = vsub.s32 0, %v7854_v54  ;;  %v7859_v63 = vsub.s32 1, %v7854_v54  ;;  %v10629_v54 = vld [vmem:[%s13043_s13 + $0x20] sm:$0xff]  }
 0x5ef   :  { %v10458_v51 = vpop.f32.mrb[55].mxu1 }
 0x5f0   :  { %v7829_v27 = vadd.f32 %v12805_v59, %v7809_v32  ;;  %v7625_v12 = vpop.f32.mrb[56].mxu0  ;;  %v7856_v26 = vrot.slane %v7851_v40, %v7855_v21  ;;  %v7860_v13 = vrot.slane %v7851_v40, %v7859_v63  ;;  %v10631_v40 = vld [vmem:[%s13043_s13 + $0x30] sm:$0xff]  }
 0x5f1   :  { %v10463_v50 = vpop.f32.mrb[57].mxu0  ;;  %v7810_v58 = vsel %vm7760_vm7, %v7625_v12, 0.0 }
 0x5f2   :  { %v7839_v11 = vsel %vm7760_vm7, %v7829_v27, -inf  ;;  %v7628_v35 = vpop.f32.mrb[58].mxu0 }
 0x5f3   :  { %v7840_v9 = vmax.f32 %v7833_v34, %v7839_v11  ;;  %v10464_v43 = vpop.f32.mrb[59].mxu0 }
 0x5f4   :  { %v7668_v60 = vpop.f32.mrb[56].mxu1 }
 0x5f5   :  { %v7811_v62 = vsel %vm7760_vm7, %v7668_v60, 0.0  ;;  %v10469_v45 = vpop.f32.mrb[57].mxu1 }
 0x5f6   :  { %v7812_v44 = vadd.f32 %v7811_v62, %v7810_v58  ;;  %v7671_v39 = vpop.f32.mrb[58].mxu1 }
 0x5f7   :  { %v10470_v55 = vpop.f32.mrb[59].mxu1  ;;  %v10613_v39 = vld [vmem:[%s13041_s11 + $0x50] sm:$0xff]  }
 0x5f8   :  { %v7711_v31 = vpop.f32.mrb[60].mxu0  ;;  %v10614_v55 = vld [vmem:[%s13041_s11 + $0x10] sm:$0xff]  }
 0x5f9   :  { %v7813_v29 = vsel %vm7760_vm7, %v7711_v31, 0.0  ;;  %v10475_v25 = vpop.f32.mrb[61].mxu0  ;;  %v10615_v31 = vld [vmem:[%s13041_s11 + $0x58] sm:$0xff]  }
 0x5fa   :  { %v7814_v22 = vadd.f32 %v7813_v29, %v7812_v44  ;;  %v7714_v16 = vpop.f32.mrb[62].mxu0  ;;  %v10616_v29 = vld [vmem:[%s13041_s11 + $0x18] sm:$0xff]   ;;  %v10617_v25 = vld [vmem:[%s13041_s11 + $0x60] sm:$0xff]  }
 0x5fb   :  { %v10476_v17 = vpop.f32.mrb[63].mxu0  ;;  %v10619_v16 = vld [vmem:[%s13041_s11 + $0x68] sm:$0xff]  }
 0x5fc   :  { %v7754_v38 = vpop.f32.mrb[60].mxu1  ;;  %v10620_v17 = vld [vmem:[%s13041_s11 + $0x28] sm:$0xff]  }
 0x5fd   :  { %v7815_v1 = vsel %vm7760_vm7, %v7754_v38, 0.0  ;;  %v10481_v6 = vpop.f32.mrb[61].mxu1  ;;  %v10621_v38 = vld [vmem:[%s13041_s11 + $0x70] sm:$0xff]  }
 0x5fe   :  { %v7816_v42 = vadd.f32 %v7815_v1, %v7814_v22  ;;  %v7757_v28 = vpop.f32.mrb[62].mxu1  ;;  %v10618_v22 = vld [vmem:[%s13041_s11 + $0x20] sm:$0xff]   ;;  %v10622_v1 = vld [vmem:[%s13041_s11 + $0x30] sm:$0xff]   ;;  %v10623_v6 = vld [vmem:[%s13041_s11 + $0x78] sm:$0xff]  }
 0x5ff   :  { %v10482_v36 = vpop.f32.mrb[63].mxu1 }
 0x600   :  { %v7830_v30 = vadd.f32 %v12805_v59, %v7816_v42  ;;  %v10596_v59 = vld [vmem:[%s13039_s9 + $0xb4] ss:$8 sps:$4 sm:$0xff]   ;;  %v7971_v42 = vld [vmem:[%s13044_s10] sm:$0x3] }
 0x601   :  { %8165 = vmatprep.subr.bf16.mxu1 %v10596_v59  ;;  %v7976_v28 = vrot.slane %v7971_v42, %v7855_v21  ;;  %v7980_v36 = vrot.slane %v7971_v42, %v7859_v63  ;;  %v10630_v21 = vld [vmem:[%s13043_s13 + $0x28] sm:$0xff]   ;;  %v10632_v63 = vld [vmem:[%s13043_s13 + $0x38] sm:$0xff]  }
 0x602   :  { %v7841_v48 = vsel %vm7760_vm7, %v7830_v30, -inf  ;;  %8166 = vmatpush1.bf16.msra.mxu1 %v10594_v2 }
 0x603   :  { %v7842_v23 = vmax.f32 %v7834_v46, %v7841_v48  ;;  %8167 = vmatprep.subr.bf16.mxu1 %v10599_v15 }
 0x605   :  { %v7844_v0 = vmax.f32 %v7840_v9, %v7842_v23 }
 0x606   :  { %8168 = vmatpush1.bf16.msra.mxu1 %v10597_v49 }
 0x607   :  { %v7845_v53 = vmax.f32 %v7843_v47, %v7844_v0  ;;  %8169 = vmatprep.subr.bf16.mxu1 %v10602_v37  ;;  %v10605_v47 = vld [vmem:[%s13039_s9 + $0xe4] ss:$8 sps:$4 sm:$0xff]  }
 0x609   :  { %v7846_v56 = vpack.c.bf16 %v7845_v53, %v7845_v53 }
 0x60a   :  { %8170 = vmatpush1.bf16.msra.mxu1 %v10600_v52 }
 0x60b   :  { %8892 = vmatmul.mubr.msk.bf16.vlgmr.msra.gmra.mrb[64].mxu0 %vm154_vm1, %v7846_v56  ;;  %8171 = vmatprep.subr.bf16.mxu1 %v10605_v47 }
 0x60c   :  { %9351 = vmatpush3.bf16.msra.mxu0 %v10610_v19 }
 0x60d   :  { %9352 = vmatprep.subr.bf16.mxu0 %v10611_v8  ;;  %v10626_v8 = vld [vmem:[%s13043_s13 + $0x8] sm:$0xff]  }
 0x60e   :  { %8172 = vmatpush1.bf16.msra.mxu1 %v10603_v5 }
 0x60f   :  { %8173 = vmatprep.subr.bf16.mxu1 %v10608_v57 }
 0x610   :  { %9353 = vmatpush3.bf16.msra.mxu0 %v10612_v24  ;;  %v10627_v24 = vld [vmem:[%s13043_s13 + $0x10] sm:$0xff]  }
 0x611   :  { %9354 = vmatprep.subr.bf16.mxu0 %v10613_v39  ;;  %v10640_v39 = vld [vmem:[%s13045_s15 + $0x38] sm:$0xff]  }
 0x612   :  { %8174 = vmatpush1.bf16.msra.mxu1 %v10606_v18 }
 0x613   :  { %10503 = vmatprep.subr.bf16.mxu1 %v13083_v33 }
 0x614   :  { %9355 = vmatpush3.bf16.msra.mxu0 %v10614_v55  ;;  %v8942_v55 = vld [vmem:[%s13047_s14] ss:$0 sm:$0xff] }
 0x615   :  { %9356 = vmatprep.subr.bf16.mxu0 %v10615_v31 }
 0x618   :  { %9357 = vmatpush3.bf16.msra.mxu0 %v10616_v29 }
 0x619   :  { %9358 = vmatprep.subr.bf16.mxu0 %v10617_v25 }
 0x61c   :  { %9359 = vmatpush3.bf16.msra.mxu0 %v10618_v22 }
 0x61d   :  { %9360 = vmatprep.subr.bf16.mxu0 %v10619_v16 }
 0x620   :  { %9361 = vmatpush3.bf16.msra.mxu0 %v10620_v17 }
 0x621   :  { %9362 = vmatprep.subr.bf16.mxu0 %v10621_v38 }
 0x624   :  { %9363 = vmatpush3.bf16.msra.mxu0 %v10622_v1 }
 0x625   :  { %9364 = vmatprep.subr.bf16.mxu0 %v10623_v6 }
 0x628   :  { %9365 = vmatpush3.bf16.msra.mxu0 %v10624_v7 }
 0x629   :  { %10483 = vmatprep.subr.bf16.mxu0 %v13083_v33 }
 0x6de   :  { %v7920_v4 = vpop.f32.mrb[64].mxu0 }
 0x6df   :  { %v7921_v3 = vadd.f32 %v7920_v4, %v7856_v26  ;;  %v7922_v32 = vpop.f32.mrb[65].mxu0  ;;  %v10633_v26 = vld [vmem:[%s13045_s15] sm:$0xff]  }
 0x6e0   :  { %v7923_v10 = vadd.f32 %v7922_v32, %v7860_v13  ;;  %v7924_v51 = vpop.f32.mrb[66].mxu0  ;;  %v10634_v13 = vld [vmem:[%s13045_s15 + $0x8] sm:$0xff]  }
 0x6e1   :  { %v7929_v27 = vmul.f32 0.70710677, %v7921_v3  ;;  %v7925_v12 = vpop.f32.mrb[67].mxu0  ;;  %v7927_v35 = vmul.f32 0.5, %v7921_v3  ;;  %v8925_v3 = vld [vmem:[%s13046_s12] ss:$0 sm:$0xff] }
 0x6e2   :  { %v7930_v50 = vmul.f32 0.70710677, %v7923_v10  ;;  %v7928_v43 = vmul.f32 0.5, %v7923_v10 }
 0x6e3   :  { %10773 = verf.f32 %v7929_v27 }
 0x6e4   :  { %10775 = verf.f32 %v7930_v50 }
 0x6ed   :  { %v10774_v34 = vpop.eup %10773 }
 0x6ee   :  { %v10776_v11 = vpop.eup %10775  ;;  %v7933_v9 = vadd.f32 1.0, %v10774_v34 }
 0x6ef   :  { %v7934_v60 = vadd.f32 1.0, %v10776_v11 }
 0x6f0   :  { %v7935_v58 = vmul.f32 %v7933_v9, %v7927_v35 }
 0x6f1   :  { %v7936_v62 = vmul.f32 %v7934_v60, %v7928_v43  ;;  %v10635_v60 = vld [vmem:[%s13045_s15 + $0x10] sm:$0xff]  }
 0x6f2   :  { %v7937_v44 = vpack.c.bf16 %v7935_v58, %v7935_v58 }
 0x6f3   :  { %v7938_v45 = vpack.c.bf16 %v7936_v62, %v7936_v62 }
 0x6f5   :  { %8175 = vmatprep.mubr.bf16.mxu1 %v7938_v45  ;;  %v10638_v45 = vld [vmem:[%s13045_s15 + $0x28] sm:$0xff]  }
 0x6f6   :  { %8176 = vmatmul.mubr.bf16.vlgmr.msra.gmra.mrb[64].mxu1 %v7937_v44  ;;  %v10639_v44 = vld [vmem:[%s13045_s15 + $0x30] sm:$0xff]  }
 0x6f7   :  { %10519 = vmatprep.mubr.msk.bf16.mxu1 %vm10788_vm0, %v13083_v33  ;;  %10504 = vmatpush3.bf16.msra.mxu1 %v10633_v26 }
 0x6f8   :  { %10505 = vmatprep.subr.bf16.mxu1 %v13083_v33 }
 0x6fb   :  { %10506 = vmatpush3.bf16.msra.mxu1 %v10634_v13 }
 0x6fc   :  { %10507 = vmatprep.subr.bf16.mxu1 %v13083_v33 }
 0x6ff   :  { %10508 = vmatpush3.bf16.msra.mxu1 %v10635_v60 }
 0x700   :  { %10509 = vmatprep.subr.bf16.mxu1 %v13083_v33 }
 0x7c9   :  { %v8177_v30 = vpop.f32.mrb[64].mxu1 }
 0x7ca   :  { %v8178_v46 = vadd.f32 %v8177_v30, %v7976_v28  ;;  %v8179_v48 = vpop.f32.mrb[65].mxu1  ;;  %v10642_v30 = vld [vmem:[%s13048_s17 + $0x8] sm:$0xff]  }
 0x7cb   :  { %v8180_v23 = vadd.f32 %v8179_v48, %v7980_v36  ;;  %v8181_v0 = vpop.f32.mrb[66].mxu1  ;;  %v10641_v36 = vld [vmem:[%s13048_s17] sm:$0xff]   ;;  %v10644_v48 = vld [vmem:[%s13048_s17 + $0x18] sm:$0xff]  }
 0x7cc   :  { %v8186_v53 = vmul.f32 0.70710677, %v8178_v46  ;;  %v8182_v56 = vpop.f32.mrb[67].mxu1  ;;  %v8184_v2 = vmul.f32 0.5, %v8178_v46  ;;  %v10643_v46 = vld [vmem:[%s13048_s17 + $0x10] sm:$0xff]  }
 0x7cd   :  { %v8187_v41 = vmul.f32 0.70710677, %v8180_v23  ;;  %v8185_v49 = vmul.f32 0.5, %v8180_v23  ;;  %v24_v23 = vstv %s13049_s18  ;;  %v8951_v0 = vld [vmem:[%s13050_s16] ss:$0 sm:$0xff] }
 0x7ce   :  { %10777 = verf.f32 %v8186_v53  ;;  %25 = vst [vmem:[#allocation2] sm:$0x1] %v24_v23 }
 0x7cf   :  { %10779 = verf.f32 %v8187_v41 }
 0x7d8   :  { %v10778_v61 = vpop.eup %10777 }
 0x7d9   :  { %v10780_v59 = vpop.eup %10779  ;;  %v8190_v15 = vadd.f32 1.0, %v10778_v61 }
 0x7da   :  { %v8191_v37 = vadd.f32 1.0, %v10780_v59 }
 0x7db   :  { %v8192_v52 = vmul.f32 %v8190_v15, %v8184_v2 }
 0x7dc   :  { %v8193_v47 = vmul.f32 %v8191_v37, %v8185_v49 }
 0x7dd   :  { %v8194_v5 = vadd.f32 %v8192_v52, %v7935_v58  ;;  %v10636_v58 = vld [vmem:[%s13045_s15 + $0x18] sm:$0xff]  }
 0x7de   :  { %v8195_v57 = vadd.f32 %v8193_v47, %v7936_v62  ;;  %10510 = vmatpush3.bf16.msra.mxu1 %v10636_v58  ;;  %v10637_v62 = vld [vmem:[%s13045_s15 + $0x20] sm:$0xff]  }
 0x7df   :  { %v8196_v19 = vpack.c.bf16 %v8194_v5, %v8194_v5  ;;  %10511 = vmatprep.subr.bf16.mxu1 %v13083_v33  ;;  %v8960_v47 = vld [vmem:[#allocation2] ss:$0 sm:$0xff] }
 0x7e0   :  { %v8197_v18 = vpack.c.bf16 %v8195_v57, %v8195_v57 }
 0x7e2   :  { %8365 = vmatprep.mubr.bf16.mxu0 %v8197_v18  ;;  %10512 = vmatpush3.bf16.msra.mxu1 %v10637_v62 }
 0x7e3   :  { %8366 = vmatmul.mubr.bf16.vlgmr.msra.gmra.mrb[68].mxu0 %v8196_v19  ;;  %10513 = vmatprep.subr.bf16.mxu1 %v13083_v33 }
 0x7e4   :  { %10484 = vmatpush3.bf16.msra.mxu0 %v10625_v14  ;;  %10499 = vmatprep.mubr.msk.bf16.mxu0 %vm10788_vm0, %v13083_v33 }
 0x7e5   :  { %10485 = vmatprep.subr.bf16.mxu0 %v13083_v33 }
 0x7e6   :  { %10514 = vmatpush3.bf16.msra.mxu1 %v10638_v45 }
 0x7e7   :  { %10515 = vmatprep.subr.bf16.mxu1 %v13083_v33 }
 0x7e8   :  { %10486 = vmatpush3.bf16.msra.mxu0 %v10626_v8 }
 0x7e9   :  { %10487 = vmatprep.subr.bf16.mxu0 %v13083_v33 }
 0x7ea   :  { %10516 = vmatpush3.bf16.msra.mxu1 %v10639_v44 }
 0x7eb   :  { %10517 = vmatprep.subr.bf16.mxu1 %v13083_v33 }
 0x7ec   :  { %10488 = vmatpush3.bf16.msra.mxu0 %v10627_v24 }
 0x7ed   :  { %10489 = vmatprep.subr.bf16.mxu0 %v13083_v33 }
 0x7ee   :  { %10518 = vmatpush3.bf16.msra.mxu1 %v10640_v39 }
 0x7f0   :  { %10490 = vmatpush3.bf16.msra.mxu0 %v10628_v20 }
 0x7f1   :  { %10491 = vmatprep.subr.bf16.mxu0 %v13083_v33 }
 0x7f4   :  { %10492 = vmatpush3.bf16.msra.mxu0 %v10629_v54 }
 0x7f5   :  { %10493 = vmatprep.subr.bf16.mxu0 %v13083_v33 }
 0x7f8   :  { %10494 = vmatpush3.bf16.msra.mxu0 %v10630_v21 }
 0x7f9   :  { %10495 = vmatprep.subr.bf16.mxu0 %v13083_v33 }
 0x7fc   :  { %10496 = vmatpush3.bf16.msra.mxu0 %v10631_v40 }
 0x7fd   :  { %10497 = vmatprep.subr.bf16.mxu0 %v13083_v33 }
 0x800   :  { %10498 = vmatpush3.bf16.msra.mxu0 %v10632_v63 }
 0x801   :  { %10523 = vmatprep.subr.bf16.mxu0 %v13083_v33 }
 0x8b6   :  { %v9366_v4 = vpop.f32.mrb[68].mxu0 }
 0x8b7   :  { %v9367_v32 = vpop.f32.mrb[69].mxu0 }
 0x8b8   :  { %v9368_v10 = vadd.f32 %v9367_v32, %v9366_v4  ;;  %v9369_v51 = vpop.f32.mrb[70].mxu0 }
 0x8b9   :  { %v9370_v27 = vpop.f32.mrb[71].mxu0 }
 0x8ba   :  { %v8368_v12 = vadd.f32 %v9368_v10, %v8925_v3 }
 0x8bc   :  { %v8374_v50 = vmul.f32 0.70710677, %v8368_v12  ;;  %v8373_v11 = vmul.f32 0.5, %v8368_v12 }
 0x8be   :  { %10781 = verf.f32 %v8374_v50 }
 0x8c8   :  { %v10782_v34 = vpop.eup %10781 }
 0x8c9   :  { %v8376_v35 = vadd.f32 1.0, %v10782_v34 }
 0x8cb   :  { %v8377_v9 = vmul.f32 %v8376_v35, %v8373_v11 }
 0x8cd   :  { %v8378_v43 = vpack.c.bf16 %v8377_v9, %v8377_v9 }
 0x8cf   :  { %10500 = vmatmul.mubr.bf16.vlgmr.msra.gmra.mrb[72].mxu0 %v8378_v43 }
 0x8d0   :  { %10531 = vmatprep.mubr.msk.bf16.mxu0 %vm10788_vm0, %v13083_v33  ;;  %10524 = vmatpush3.bf16.msra.mxu0 %v10641_v36 }
 0x8d1   :  { %10525 = vmatprep.subr.bf16.mxu0 %v13083_v33 }
 0x8d4   :  { %10526 = vmatpush3.bf16.msra.mxu0 %v10642_v30 }
 0x8d5   :  { %10527 = vmatprep.subr.bf16.mxu0 %v13083_v33 }
 0x8d8   :  { %10528 = vmatpush3.bf16.msra.mxu0 %v10643_v46 }
 0x8d9   :  { %10529 = vmatprep.subr.bf16.mxu0 %v13083_v33 }
 0x8dc   :  { %10530 = vmatpush3.bf16.msra.mxu0 %v10644_v48 }
 0x9a2   :  { %v8484_v31 = vpop.f32.mrb[72].mxu0 }
 0x9a3   :  { %v8485_v29 = vadd.f32 %v8942_v55, %v8484_v31  ;;  %v10501_v25 = vpop.f32.mrb[73].mxu0 }
 0x9a4   :  { %v8487_v22 = vpop.f32.mrb[74].mxu0 }
 0x9a5   :  { %v8491_v16 = vmul.f32 0.70710677, %v8485_v29  ;;  %v10502_v17 = vpop.f32.mrb[75].mxu0  ;;  %v8490_v1 = vmul.f32 0.5, %v8485_v29 }
 0x9a7   :  { %10783 = verf.f32 %v8491_v16 }
 0x9b1   :  { %v10784_v38 = vpop.eup %10783 }
 0x9b2   :  { %v8493_v6 = vadd.f32 1.0, %v10784_v38 }
 0x9b4   :  { %v8494_v7 = vmul.f32 %v8493_v6, %v8490_v1 }
 0x9b6   :  { %v8495_v42 = vadd.f32 %v8494_v7, %v8377_v9 }
 0x9b8   :  { %v8496_v28 = vpack.c.bf16 %v8495_v42, %v8495_v42 }
 0x9ba   :  { %10520 = vmatmul.mubr.bf16.vlgmr.msra.gmra.mrb[68].mxu1 %v8496_v28 }
 0xa8d   :  { %v8602_v53 = vpop.f32.mrb[68].mxu1 }
 0xa8e   :  { %v8603_v56 = vadd.f32 %v8951_v0, %v8602_v53  ;;  %v10521_v41 = vpop.f32.mrb[69].mxu1 }
 0xa8f   :  { %v8605_v61 = vpop.f32.mrb[70].mxu1 }
 0xa90   :  { %v8609_v59 = vmul.f32 0.70710677, %v8603_v56  ;;  %v10522_v33 = vpop.f32.mrb[71].mxu1  ;;  %v8608_v15 = vmul.f32 0.5, %v8603_v56 }
 0xa92   :  { %10785 = verf.f32 %v8609_v59 }
 0xa9c   :  { %v10786_v2 = vpop.eup %10785 }
 0xa9d   :  { %v8611_v49 = vadd.f32 1.0, %v10786_v2 }
 0xa9f   :  { %v8612_v37 = vmul.f32 %v8611_v49, %v8608_v15 }
 0xaa1   :  { %v8613_v52 = vpack.c.bf16 %v8612_v37, %v8612_v37 }
 0xaa3   :  { %10532 = vmatmul.mubr.msk.bf16.vlgmr.msra.gmra.mrb[76].mxu0 %vm8653_vm8, %v8613_v52 }
 0xb76   :  { %v8691_v5 = vpop.f32.mrb[76].mxu0 }
 0xb77   :  { %v8692_v57 = vadd.f32 %v8960_v47, %v8691_v5  ;;  %v10533_v18 = vpop.f32.mrb[77].mxu0 }
 0xb78   :  { %v8694_v14 = vpop.f32.mrb[78].mxu0 }
 0xb79   :  { %8698 = vst.msk [vmem:[%s13051_s19] sm:$0x3] %vm8697_vm9, %v8692_v57  ;;  %v10534_v19 = vpop.f32.mrb[79].mxu0 }

</bundles_post_ra>
